<compile_context>
chip_gen: v7x
topology: tpu7x:2x2x1
jax: 0.10.0
libtpu: 0.0.40
codegen_flags: <defaults>
</compile_context>

<pallas_src>
import jax
import jax.numpy as jnp
from jax import lax
from jax.experimental import pallas as pl
from jax.experimental.pallas import tpu as pltpu


# ---------------- fused 5-layer decoder kernel ----------------

def _make_fused_decoder_kernel(H, W, C, n_layers):
    HW = H * W
    PAD = W                  # zero rows above/below -> SAME padding for ky=+-1
    KW = 6 * C               # widened K: [L | 0 | Ctr | 0 | R | 0], 128-aligned

    def kernel(x_ref, w_ref, b_ref, o_ref, xw_ref):
        # ---- hoisted constants (built once per grid step, reused by all layers) ----
        col = lax.broadcasted_iota(jnp.int32, (HW, 1), 0) % W
        ok_l = jnp.broadcast_to(col >= 1, (HW, C))       # x[p-1] in same image row
        ok_r = jnp.broadcast_to(col <= W - 2, (HW, C))   # x[p+1] in same image row
        zero_c = jnp.zeros((HW, C), jnp.bfloat16)
        zero_row = jnp.zeros((1, C), jnp.bfloat16)

        # Zero the slab once per image: establishes the 2W zero pad rows (top /
        # bottom SAME padding) and the zero K-padding lane blocks.  Layer writes
        # below only touch the data blocks, so the zeros stay valid.
        xw_ref[...] = jnp.zeros((HW + 2 * PAD, KW), jnp.bfloat16)

        def write_act(y_bf):
            """Write activation + its +-1 pixel shifts into the wide slab (once per layer)."""
            left = jnp.concatenate([zero_row, y_bf[:-1, :]], axis=0)    # value at p-1
            right = jnp.concatenate([y_bf[1:, :], zero_row], axis=0)    # value at p+1
            left = jnp.where(ok_l, left, zero_c)
            right = jnp.where(ok_r, right, zero_c)
            xw_ref[PAD:PAD + HW, 0 * C:1 * C] = left     # lane offset   0  (kx = 0)
            xw_ref[PAD:PAD + HW, 2 * C:3 * C] = y_bf     # lane offset 128  (kx = 1)
            xw_ref[PAD:PAD + HW, 4 * C:5 * C] = right    # lane offset 256  (kx = 2)

        write_act(x_ref[0].astype(jnp.bfloat16))

        def conv3x3(layer):
            """3x3 SAME conv: 3 wide-K dots, chained (traced) f32 accumulation."""
            acc = jnp.dot(xw_ref[0:HW, :], w_ref[layer, 0],              # ky = 0 (row above)
                          preferred_element_type=jnp.float32)
            acc = acc + jnp.dot(xw_ref[PAD:PAD + HW, :], w_ref[layer, 1],    # ky = 1
                                preferred_element_type=jnp.float32)
            acc = acc + jnp.dot(xw_ref[2 * PAD:2 * PAD + HW, :], w_ref[layer, 2],  # ky = 2
                                preferred_element_type=jnp.float32)
            return acc + b_ref[layer]                                    # (HW, C) f32

        # Hidden layers: 64 -> 64, ReLU; activations stay VMEM-resident as bf16.
        for layer in range(n_layers - 1):
            write_act(jax.nn.relu(conv3x3(layer)).astype(jnp.bfloat16))

        # Final layer: 64 -> 3 (Cout zero-padded to 64 on the host), Sigmoid.
        y = conv3x3(n_layers - 1)                  # (HW, C) f32, first 3 channels valid
        yt = jnp.transpose(y)                      # (C, HW) lane-dense
        o_ref[0] = jax.nn.sigmoid(yt[:3, :]).astype(o_ref.dtype)

    return kernel


def decoder_pallas(x_nchw, params):
    """x_nchw: (N, 64, H, W) f32; params: list of (w (3,3,Cin,Cout), b (Cout,))."""
    N, C, H, W = x_nchw.shape
    HW = H * W
    PAD = W
    KW = 6 * C
    n_layers = len(params)

    # NCHW -> (N, H*W, C): channels on lanes, flat pixels on sublanes.
    x = jnp.transpose(x_nchw, (0, 2, 3, 1)).reshape(N, HW, C).astype(jnp.float32)

    # Weights (3,3,Cin,Cout) HWIO -> per ky: K-stacked [w(kx=0)|0|w(kx=1)|0|w(kx=2)|0]
    # so every data block of the activation slab starts on a 128-lane boundary.
    ws, bs = [], []
    for w, b in params:
        cin, cout = w.shape[2], w.shape[3]
        wp = jnp.pad(w, ((0, 0), (0, 0), (0, cin), (0, C - cout)))  # (3,3,2*cin,C)
        ws.append(wp.reshape(3, 3 * 2 * cin, C))                    # (3, 6C, C)
        bs.append(jnp.pad(b, (0, C - cout)).reshape(1, C))
    w_stack = jnp.stack(ws).astype(jnp.bfloat16)                    # (L, 3, 6C, C)
    b_stack = jnp.stack(bs).astype(jnp.float32)                     # (L, 1, C)

    kernel = _make_fused_decoder_kernel(H, W, C, n_layers)

    out = pl.pallas_call(
        kernel,
        out_shape=jax.ShapeDtypeStruct((N, 3, HW), jnp.float32),
        grid_spec=pltpu.PrefetchScalarGridSpec(
            num_scalar_prefetch=0,
            grid=(N,),
            in_specs=[
                pl.BlockSpec((1, HW, C), lambda n: (n, 0, 0)),
                # Constant index maps: fetched once, VMEM-resident across the grid.
                pl.BlockSpec(w_stack.shape, lambda n: (0, 0, 0, 0)),
                pl.BlockSpec(b_stack.shape, lambda n: (0, 0, 0)),
            ],
            out_specs=pl.BlockSpec((1, 3, HW), lambda n: (n, 0, 0)),
            scratch_shapes=[
                pltpu.VMEM((HW + 2 * PAD, KW), jnp.bfloat16),   # wide activation slab
            ],
        ),
        compiler_params=pltpu.CompilerParams(
            dimension_semantics=("parallel",),    # batch across TensorCores (v7x)
            vmem_limit_bytes=32 * 1024 * 1024,
        ),
    )(x, w_stack, b_stack)

    # (N, 3, H*W) is already channel-major: reshape to NCHW, no transpose.
    return out.reshape(N, 3, H, W)


# ---------------- parameter construction (deterministic) ----------------

def make_decoder_params(key):
    """Weights in HWIO layout: (3, 3, Cin, Cout)."""
    layer_dims = [(64, 64), (64, 64), (64, 64), (64, 64), (64, 3)]
    params = []
    for i, (cin, cout) in enumerate(layer_dims):
        kw, kb = jax.random.split(jax.random.fold_in(key, i))
        fan_in = cin * 3 * 3
        scale = 1.0 / jnp.sqrt(jnp.float32(fan_in))
        w = jax.random.uniform(kw, (3, 3, cin, cout), jnp.float32,
                               minval=-scale, maxval=scale)
        b = jax.random.uniform(kb, (cout,), jnp.float32,
                               minval=-scale, maxval=scale)
        params.append((w, b))
    return params


# ---------------- pure-JAX reference (same bf16-operand numerics) ----------------

def decoder_reference(x_nchw, params):
    x = jnp.transpose(x_nchw, (0, 2, 3, 1)).astype(jnp.float32)
    acts = [jax.nn.relu] * (len(params) - 1) + [jax.nn.sigmoid]
    for (w, b), act in zip(params, acts):
        y = lax.conv_general_dilated(
            x.astype(jnp.bfloat16), w.astype(jnp.bfloat16),
            window_strides=(1, 1), padding="SAME",
            dimension_numbers=("NHWC", "HWIO", "NHWC"),
            preferred_element_type=jnp.float32)
        x = act(y + b.astype(jnp.float32))
    return jnp.transpose(x, (0, 3, 1, 2))


if __name__ == "__main__":
    key = jax.random.PRNGKey(0)
    k_x, k_p = jax.random.split(key)

    # Decoder expects 64 input channels.
    N, C, H, W = 2, 64, 16, 16
    x = jax.random.normal(k_x, (N, C, H, W), jnp.float32)
    params = make_decoder_params(k_p)

    out = jax.jit(decoder_pallas)(x, params)
    out = jax.block_until_ready(out)

    ref = decoder_reference(x, params)
    ref = jax.block_until_ready(ref)

    assert out.shape == (N, 3, H, W), out.shape
    err = float(jnp.max(jnp.abs(out - ref)))
    assert err < 5e-3, f"max abs err {err}"

    print("KERNEL_OK")
</pallas_src>

<mosaic_0001>
module attributes {stable_mosaic.version = 11 : i64} {
  func.func @kernel(%arg0: i32, %arg1: memref<1x256x64xf32, #tpu.memory_space<vmem>>, %arg2: memref<5x3x384x64xbf16, #tpu.memory_space<vmem>>, %arg3: memref<5x1x64xf32, #tpu.memory_space<vmem>>, %arg4: memref<1x3x256xf32, #tpu.memory_space<vmem>>, %arg5: memref<288x384xbf16, #tpu.memory_space<vmem>>) attributes {dimension_semantics = [#tpu.dimension_semantics<parallel>], iteration_bounds = array<i64: 2>, scalar_prefetch = 0 : i64, scratch_operands = 1 : i64, tpu.core_type = #tpu.core_type<tc>, window_params = [{transform_indices = @transform_0, window_bounds = array<i64: 1, 256, 64>}, {pipeline_mode = #tpu.pipeline_mode<synchronous>, transform_indices = @transform_1, window_bounds = array<i64: 5, 3, 384, 64>}, {pipeline_mode = #tpu.pipeline_mode<synchronous>, transform_indices = @transform_2, window_bounds = array<i64: 5, 1, 64>}, {transform_indices = @transform_3, window_bounds = array<i64: 1, 3, 256>}]} {
    %0 = tpu.iota {dimensions = array<i32: 0>} : vector<256x1xi32>
    %c16_i32 = arith.constant 16 : i32
    %c0_i32 = arith.constant 0 : i32
    %1 = arith.cmpi eq, %c16_i32, %c0_i32 : i32
    %c1_i32 = arith.constant 1 : i32
    %2 = arith.select %1, %c1_i32, %c16_i32 : i32
    %3 = vector.broadcast %2 : i32 to vector<256x1xi32>
    %4 = arith.remsi %0, %3 : vector<256x1xi32>
    %c0_i32_0 = arith.constant 0 : i32
    %5 = vector.broadcast %c0_i32_0 : i32 to vector<256x1xi32>
    %6 = arith.cmpi ne, %4, %5 : vector<256x1xi32>
    %c0_i32_1 = arith.constant 0 : i32
    %7 = vector.broadcast %c0_i32_1 : i32 to vector<256x1xi32>
    %8 = arith.cmpi slt, %4, %7 : vector<256x1xi32>
    %c0_i32_2 = arith.constant 0 : i32
    %9 = arith.cmpi slt, %2, %c0_i32_2 : i32
    %10 = vector.broadcast %9 : i1 to vector<256x1xi1>
    %11 = vector.broadcast %10 : vector<256x1xi1> to vector<256x1xi1>
    %12 = arith.xori %8, %11 : vector<256x1xi1>
    %13 = arith.andi %12, %6 : vector<256x1xi1>
    %14 = vector.broadcast %2 : i32 to vector<256x1xi32>
    %15 = arith.addi %4, %14 : vector<256x1xi32>
    %16 = arith.select %13, %15, %4 : vector<256x1xi1>, vector<256x1xi32>
    %c1_i32_3 = arith.constant 1 : i32
    %17 = vector.broadcast %c1_i32_3 : i32 to vector<256x1xi32>
    %18 = arith.cmpi sge, %16, %17 : vector<256x1xi32>
    %19 = vector.shape_cast %18 : vector<256x1xi1> to vector<256x1xi1>
    %20 = vector.broadcast %19 : vector<256x1xi1> to vector<256x64xi1>
    %c14_i32 = arith.constant 14 : i32
    %21 = vector.broadcast %c14_i32 : i32 to vector<256x1xi32>
    %22 = arith.cmpi sle, %16, %21 : vector<256x1xi32>
    %23 = vector.shape_cast %22 : vector<256x1xi1> to vector<256x1xi1>
    %24 = vector.broadcast %23 : vector<256x1xi1> to vector<256x64xi1>
    %cst = arith.constant 0.000000e+00 : bf16
    %25 = vector.broadcast %cst : bf16 to vector<256x64xbf16>
    %cst_4 = arith.constant 0.000000e+00 : bf16
    %26 = vector.broadcast %cst_4 : bf16 to vector<1x64xbf16>
    %cst_5 = arith.constant 0.000000e+00 : bf16
    %27 = vector.broadcast %cst_5 : bf16 to vector<288x384xbf16>
    %c0 = arith.constant 0 : index
    %c0_6 = arith.constant 0 : index
    %28 = vector.load %arg5[%c0, %c0_6] : memref<288x384xbf16, #tpu.memory_space<vmem>>, vector<288x384xbf16>
    tpu.vector_store %arg5[%c0, %c0_6], %27 {strides = array<i32>} : memref<288x384xbf16, #tpu.memory_space<vmem>>, vector<288x384xbf16>,
    %c0_7 = arith.constant 0 : index
    %c0_8 = arith.constant 0 : index
    %c0_9 = arith.constant 0 : index
    %29 = vector.load %arg1[%c0_7, %c0_8, %c0_9] : memref<1x256x64xf32, #tpu.memory_space<vmem>>, vector<1x256x64xf32>
    %30 = vector.shape_cast %29 : vector<1x256x64xf32> to vector<256x64xf32>
    %31 = arith.truncf %30 : vector<256x64xf32> to vector<256x64xbf16>
    %32 = vector.extract_strided_slice %31 {offsets = [0, 0], sizes = [255, 64], strides = [1, 1]} : vector<256x64xbf16> to vector<255x64xbf16>
    %33 = tpu.concatenate %26, %32 in 0 : vector<1x64xbf16>, vector<255x64xbf16> -> vector<256x64xbf16>
    %34 = vector.extract_strided_slice %31 {offsets = [1, 0], sizes = [255, 64], strides = [1, 1]} : vector<256x64xbf16> to vector<255x64xbf16>
    %35 = tpu.concatenate %34, %26 in 0 : vector<255x64xbf16>, vector<1x64xbf16> -> vector<256x64xbf16>
    %36 = arith.select %20, %33, %25 : vector<256x64xi1>, vector<256x64xbf16>
    %37 = arith.select %24, %35, %25 : vector<256x64xi1>, vector<256x64xbf16>
    %c16 = arith.constant 16 : index
    %c0_10 = arith.constant 0 : index
    %38 = vector.load %arg5[%c16, %c0_10] : memref<288x384xbf16, #tpu.memory_space<vmem>>, vector<256x64xbf16>
    tpu.vector_store %arg5[%c16, %c0_10], %36 {strides = array<i32>} : memref<288x384xbf16, #tpu.memory_space<vmem>>, vector<256x64xbf16>,
    %c16_11 = arith.constant 16 : index
    %c128 = arith.constant 128 : index
    %39 = vector.load %arg5[%c16_11, %c128] : memref<288x384xbf16, #tpu.memory_space<vmem>>, vector<256x64xbf16>
    tpu.vector_store %arg5[%c16_11, %c128], %31 {strides = array<i32>} : memref<288x384xbf16, #tpu.memory_space<vmem>>, vector<256x64xbf16>,
    %c16_12 = arith.constant 16 : index
    %c256 = arith.constant 256 : index
    %40 = vector.load %arg5[%c16_12, %c256] : memref<288x384xbf16, #tpu.memory_space<vmem>>, vector<256x64xbf16>
    tpu.vector_store %arg5[%c16_12, %c256], %37 {strides = array<i32>} : memref<288x384xbf16, #tpu.memory_space<vmem>>, vector<256x64xbf16>,
    %c0_13 = arith.constant 0 : index
    %c0_14 = arith.constant 0 : index
    %41 = vector.load %arg5[%c0_13, %c0_14] : memref<288x384xbf16, #tpu.memory_space<vmem>>, vector<256x384xbf16>
    %c0_15 = arith.constant 0 : index
    %c0_16 = arith.constant 0 : index
    %c0_17 = arith.constant 0 : index
    %c0_18 = arith.constant 0 : index
    %42 = vector.load %arg2[%c0_15, %c0_16, %c0_17, %c0_18] : memref<5x3x384x64xbf16, #tpu.memory_space<vmem>>, vector<1x1x384x64xbf16>
    %43 = vector.shape_cast %42 : vector<1x1x384x64xbf16> to vector<384x64xbf16>
    %cst_19 = arith.constant dense<0.000000e+00> : vector<256x64xf32>
    %44 = tpu.matmul %41, %43, %cst_19 {dimension_numbers = #tpu.dot_dimension_numbers<[1], [0], [0], [1], [0, 0, 1, 1], [], []>} : vector<256x384xbf16>, vector<384x64xbf16>, vector<256x64xf32> -> vector<256x64xf32>
    %c16_20 = arith.constant 16 : index
    %c0_21 = arith.constant 0 : index
    %45 = vector.load %arg5[%c16_20, %c0_21] : memref<288x384xbf16, #tpu.memory_space<vmem>>, vector<256x384xbf16>
    %c0_22 = arith.constant 0 : index
    %c1 = arith.constant 1 : index
    %c0_23 = arith.constant 0 : index
    %c0_24 = arith.constant 0 : index
    %46 = vector.load %arg2[%c0_22, %c1, %c0_23, %c0_24] : memref<5x3x384x64xbf16, #tpu.memory_space<vmem>>, vector<1x1x384x64xbf16>
    %47 = vector.shape_cast %46 : vector<1x1x384x64xbf16> to vector<384x64xbf16>
    %cst_25 = arith.constant dense<0.000000e+00> : vector<256x64xf32>
    %48 = tpu.matmul %45, %47, %cst_25 {dimension_numbers = #tpu.dot_dimension_numbers<[1], [0], [0], [1], [0, 0, 1, 1], [], []>} : vector<256x384xbf16>, vector<384x64xbf16>, vector<256x64xf32> -> vector<256x64xf32>
    %49 = arith.addf %44, %48 : vector<256x64xf32>
    %c32 = arith.constant 32 : index
    %c0_26 = arith.constant 0 : index
    %50 = vector.load %arg5[%c32, %c0_26] : memref<288x384xbf16, #tpu.memory_space<vmem>>, vector<256x384xbf16>
    %c0_27 = arith.constant 0 : index
    %c2 = arith.constant 2 : index
    %c0_28 = arith.constant 0 : index
    %c0_29 = arith.constant 0 : index
    %51 = vector.load %arg2[%c0_27, %c2, %c0_28, %c0_29] : memref<5x3x384x64xbf16, #tpu.memory_space<vmem>>, vector<1x1x384x64xbf16>
    %52 = vector.shape_cast %51 : vector<1x1x384x64xbf16> to vector<384x64xbf16>
    %cst_30 = arith.constant dense<0.000000e+00> : vector<256x64xf32>
    %53 = tpu.matmul %50, %52, %cst_30 {dimension_numbers = #tpu.dot_dimension_numbers<[1], [0], [0], [1], [0, 0, 1, 1], [], []>} : vector<256x384xbf16>, vector<384x64xbf16>, vector<256x64xf32> -> vector<256x64xf32>
    %54 = arith.addf %49, %53 : vector<256x64xf32>
    %c0_31 = arith.constant 0 : index
    %c0_32 = arith.constant 0 : index
    %c0_33 = arith.constant 0 : index
    %55 = vector.load %arg3[%c0_31, %c0_32, %c0_33] : memref<5x1x64xf32, #tpu.memory_space<vmem>>, vector<1x1x64xf32>
    %56 = vector.shape_cast %55 : vector<1x1x64xf32> to vector<1x64xf32>
    %57 = vector.broadcast %56 : vector<1x64xf32> to vector<256x64xf32>
    %58 = arith.addf %54, %57 : vector<256x64xf32>
    %cst_34 = arith.constant 0.000000e+00 : f32
    %59 = vector.broadcast %cst_34 : f32 to vector<256x64xf32>
    %60 = arith.maximumf %58, %59 : vector<256x64xf32>
    %61 = arith.truncf %60 : vector<256x64xf32> to vector<256x64xbf16>
    %62 = vector.extract_strided_slice %61 {offsets = [0, 0], sizes = [255, 64], strides = [1, 1]} : vector<256x64xbf16> to vector<255x64xbf16>
    %63 = tpu.concatenate %26, %62 in 0 : vector<1x64xbf16>, vector<255x64xbf16> -> vector<256x64xbf16>
    %64 = vector.extract_strided_slice %61 {offsets = [1, 0], sizes = [255, 64], strides = [1, 1]} : vector<256x64xbf16> to vector<255x64xbf16>
    %65 = tpu.concatenate %64, %26 in 0 : vector<255x64xbf16>, vector<1x64xbf16> -> vector<256x64xbf16>
    %66 = arith.select %20, %63, %25 : vector<256x64xi1>, vector<256x64xbf16>
    %67 = arith.select %24, %65, %25 : vector<256x64xi1>, vector<256x64xbf16>
    %c16_35 = arith.constant 16 : index
    %c0_36 = arith.constant 0 : index
    %68 = vector.load %arg5[%c16_35, %c0_36] : memref<288x384xbf16, #tpu.memory_space<vmem>>, vector<256x64xbf16>
    tpu.vector_store %arg5[%c16_35, %c0_36], %66 {strides = array<i32>} : memref<288x384xbf16, #tpu.memory_space<vmem>>, vector<256x64xbf16>,
    %c16_37 = arith.constant 16 : index
    %c128_38 = arith.constant 128 : index
    %69 = vector.load %arg5[%c16_37, %c128_38] : memref<288x384xbf16, #tpu.memory_space<vmem>>, vector<256x64xbf16>
    tpu.vector_store %arg5[%c16_37, %c128_38], %61 {strides = array<i32>} : memref<288x384xbf16, #tpu.memory_space<vmem>>, vector<256x64xbf16>,
    %c16_39 = arith.constant 16 : index
    %c256_40 = arith.constant 256 : index
    %70 = vector.load %arg5[%c16_39, %c256_40] : memref<288x384xbf16, #tpu.memory_space<vmem>>, vector<256x64xbf16>
    tpu.vector_store %arg5[%c16_39, %c256_40], %67 {strides = array<i32>} : memref<288x384xbf16, #tpu.memory_space<vmem>>, vector<256x64xbf16>,
    %c0_41 = arith.constant 0 : index
    %c0_42 = arith.constant 0 : index
    %71 = vector.load %arg5[%c0_41, %c0_42] : memref<288x384xbf16, #tpu.memory_space<vmem>>, vector<256x384xbf16>
    %c1_43 = arith.constant 1 : index
    %c0_44 = arith.constant 0 : index
    %c0_45 = arith.constant 0 : index
    %c0_46 = arith.constant 0 : index
    %72 = vector.load %arg2[%c1_43, %c0_44, %c0_45, %c0_46] : memref<5x3x384x64xbf16, #tpu.memory_space<vmem>>, vector<1x1x384x64xbf16>
    %73 = vector.shape_cast %72 : vector<1x1x384x64xbf16> to vector<384x64xbf16>
    %cst_47 = arith.constant dense<0.000000e+00> : vector<256x64xf32>
    %74 = tpu.matmul %71, %73, %cst_47 {dimension_numbers = #tpu.dot_dimension_numbers<[1], [0], [0], [1], [0, 0, 1, 1], [], []>} : vector<256x384xbf16>, vector<384x64xbf16>, vector<256x64xf32> -> vector<256x64xf32>
    %c16_48 = arith.constant 16 : index
    %c0_49 = arith.constant 0 : index
    %75 = vector.load %arg5[%c16_48, %c0_49] : memref<288x384xbf16, #tpu.memory_space<vmem>>, vector<256x384xbf16>
    %c1_50 = arith.constant 1 : index
    %c1_51 = arith.constant 1 : index
    %c0_52 = arith.constant 0 : index
    %c0_53 = arith.constant 0 : index
    %76 = vector.load %arg2[%c1_50, %c1_51, %c0_52, %c0_53] : memref<5x3x384x64xbf16, #tpu.memory_space<vmem>>, vector<1x1x384x64xbf16>
    %77 = vector.shape_cast %76 : vector<1x1x384x64xbf16> to vector<384x64xbf16>
    %cst_54 = arith.constant dense<0.000000e+00> : vector<256x64xf32>
    %78 = tpu.matmul %75, %77, %cst_54 {dimension_numbers = #tpu.dot_dimension_numbers<[1], [0], [0], [1], [0, 0, 1, 1], [], []>} : vector<256x384xbf16>, vector<384x64xbf16>, vector<256x64xf32> -> vector<256x64xf32>
    %79 = arith.addf %74, %78 : vector<256x64xf32>
    %c32_55 = arith.constant 32 : index
    %c0_56 = arith.constant 0 : index
    %80 = vector.load %arg5[%c32_55, %c0_56] : memref<288x384xbf16, #tpu.memory_space<vmem>>, vector<256x384xbf16>
    %c1_57 = arith.constant 1 : index
    %c2_58 = arith.constant 2 : index
    %c0_59 = arith.constant 0 : index
    %c0_60 = arith.constant 0 : index
    %81 = vector.load %arg2[%c1_57, %c2_58, %c0_59, %c0_60] : memref<5x3x384x64xbf16, #tpu.memory_space<vmem>>, vector<1x1x384x64xbf16>
    %82 = vector.shape_cast %81 : vector<1x1x384x64xbf16> to vector<384x64xbf16>
    %cst_61 = arith.constant dense<0.000000e+00> : vector<256x64xf32>
    %83 = tpu.matmul %80, %82, %cst_61 {dimension_numbers = #tpu.dot_dimension_numbers<[1], [0], [0], [1], [0, 0, 1, 1], [], []>} : vector<256x384xbf16>, vector<384x64xbf16>, vector<256x64xf32> -> vector<256x64xf32>
    %84 = arith.addf %79, %83 : vector<256x64xf32>
    %c1_62 = arith.constant 1 : index
    %c0_63 = arith.constant 0 : index
    %c0_64 = arith.constant 0 : index
    %85 = vector.load %arg3[%c1_62, %c0_63, %c0_64] : memref<5x1x64xf32, #tpu.memory_space<vmem>>, vector<1x1x64xf32>
    %86 = vector.shape_cast %85 : vector<1x1x64xf32> to vector<1x64xf32>
    %87 = vector.broadcast %86 : vector<1x64xf32> to vector<256x64xf32>
    %88 = arith.addf %84, %87 : vector<256x64xf32>
    %cst_65 = arith.constant 0.000000e+00 : f32
    %89 = vector.broadcast %cst_65 : f32 to vector<256x64xf32>
    %90 = arith.maximumf %88, %89 : vector<256x64xf32>
    %91 = arith.truncf %90 : vector<256x64xf32> to vector<256x64xbf16>
    %92 = vector.extract_strided_slice %91 {offsets = [0, 0], sizes = [255, 64], strides = [1, 1]} : vector<256x64xbf16> to vector<255x64xbf16>
    %93 = tpu.concatenate %26, %92 in 0 : vector<1x64xbf16>, vector<255x64xbf16> -> vector<256x64xbf16>
    %94 = vector.extract_strided_slice %91 {offsets = [1, 0], sizes = [255, 64], strides = [1, 1]} : vector<256x64xbf16> to vector<255x64xbf16>
    %95 = tpu.concatenate %94, %26 in 0 : vector<255x64xbf16>, vector<1x64xbf16> -> vector<256x64xbf16>
    %96 = arith.select %20, %93, %25 : vector<256x64xi1>, vector<256x64xbf16>
    %97 = arith.select %24, %95, %25 : vector<256x64xi1>, vector<256x64xbf16>
    %c16_66 = arith.constant 16 : index
    %c0_67 = arith.constant 0 : index
    %98 = vector.load %arg5[%c16_66, %c0_67] : memref<288x384xbf16, #tpu.memory_space<vmem>>, vector<256x64xbf16>
    tpu.vector_store %arg5[%c16_66, %c0_67], %96 {strides = array<i32>} : memref<288x384xbf16, #tpu.memory_space<vmem>>, vector<256x64xbf16>,
    %c16_68 = arith.constant 16 : index
    %c128_69 = arith.constant 128 : index
    %99 = vector.load %arg5[%c16_68, %c128_69] : memref<288x384xbf16, #tpu.memory_space<vmem>>, vector<256x64xbf16>
    tpu.vector_store %arg5[%c16_68, %c128_69], %91 {strides = array<i32>} : memref<288x384xbf16, #tpu.memory_space<vmem>>, vector<256x64xbf16>,
    %c16_70 = arith.constant 16 : index
    %c256_71 = arith.constant 256 : index
    %100 = vector.load %arg5[%c16_70, %c256_71] : memref<288x384xbf16, #tpu.memory_space<vmem>>, vector<256x64xbf16>
    tpu.vector_store %arg5[%c16_70, %c256_71], %97 {strides = array<i32>} : memref<288x384xbf16, #tpu.memory_space<vmem>>, vector<256x64xbf16>,
    %c0_72 = arith.constant 0 : index
    %c0_73 = arith.constant 0 : index
    %101 = vector.load %arg5[%c0_72, %c0_73] : memref<288x384xbf16, #tpu.memory_space<vmem>>, vector<256x384xbf16>
    %c2_74 = arith.constant 2 : index
    %c0_75 = arith.constant 0 : index
    %c0_76 = arith.constant 0 : index
    %c0_77 = arith.constant 0 : index
    %102 = vector.load %arg2[%c2_74, %c0_75, %c0_76, %c0_77] : memref<5x3x384x64xbf16, #tpu.memory_space<vmem>>, vector<1x1x384x64xbf16>
    %103 = vector.shape_cast %102 : vector<1x1x384x64xbf16> to vector<384x64xbf16>
    %cst_78 = arith.constant dense<0.000000e+00> : vector<256x64xf32>
    %104 = tpu.matmul %101, %103, %cst_78 {dimension_numbers = #tpu.dot_dimension_numbers<[1], [0], [0], [1], [0, 0, 1, 1], [], []>} : vector<256x384xbf16>, vector<384x64xbf16>, vector<256x64xf32> -> vector<256x64xf32>
    %c16_79 = arith.constant 16 : index
    %c0_80 = arith.constant 0 : index
    %105 = vector.load %arg5[%c16_79, %c0_80] : memref<288x384xbf16, #tpu.memory_space<vmem>>, vector<256x384xbf16>
    %c2_81 = arith.constant 2 : index
    %c1_82 = arith.constant 1 : index
    %c0_83 = arith.constant 0 : index
    %c0_84 = arith.constant 0 : index
    %106 = vector.load %arg2[%c2_81, %c1_82, %c0_83, %c0_84] : memref<5x3x384x64xbf16, #tpu.memory_space<vmem>>, vector<1x1x384x64xbf16>
    %107 = vector.shape_cast %106 : vector<1x1x384x64xbf16> to vector<384x64xbf16>
    %cst_85 = arith.constant dense<0.000000e+00> : vector<256x64xf32>
    %108 = tpu.matmul %105, %107, %cst_85 {dimension_numbers = #tpu.dot_dimension_numbers<[1], [0], [0], [1], [0, 0, 1, 1], [], []>} : vector<256x384xbf16>, vector<384x64xbf16>, vector<256x64xf32> -> vector<256x64xf32>
    %109 = arith.addf %104, %108 : vector<256x64xf32>
    %c32_86 = arith.constant 32 : index
    %c0_87 = arith.constant 0 : index
    %110 = vector.load %arg5[%c32_86, %c0_87] : memref<288x384xbf16, #tpu.memory_space<vmem>>, vector<256x384xbf16>
    %c2_88 = arith.constant 2 : index
    %c2_89 = arith.constant 2 : index
    %c0_90 = arith.constant 0 : index
    %c0_91 = arith.constant 0 : index
    %111 = vector.load %arg2[%c2_88, %c2_89, %c0_90, %c0_91] : memref<5x3x384x64xbf16, #tpu.memory_space<vmem>>, vector<1x1x384x64xbf16>
    %112 = vector.shape_cast %111 : vector<1x1x384x64xbf16> to vector<384x64xbf16>
    %cst_92 = arith.constant dense<0.000000e+00> : vector<256x64xf32>
    %113 = tpu.matmul %110, %112, %cst_92 {dimension_numbers = #tpu.dot_dimension_numbers<[1], [0], [0], [1], [0, 0, 1, 1], [], []>} : vector<256x384xbf16>, vector<384x64xbf16>, vector<256x64xf32> -> vector<256x64xf32>
    %114 = arith.addf %109, %113 : vector<256x64xf32>
    %c2_93 = arith.constant 2 : index
    %c0_94 = arith.constant 0 : index
    %c0_95 = arith.constant 0 : index
    %115 = vector.load %arg3[%c2_93, %c0_94, %c0_95] : memref<5x1x64xf32, #tpu.memory_space<vmem>>, vector<1x1x64xf32>
    %116 = vector.shape_cast %115 : vector<1x1x64xf32> to vector<1x64xf32>
    %117 = vector.broadcast %116 : vector<1x64xf32> to vector<256x64xf32>
    %118 = arith.addf %114, %117 : vector<256x64xf32>
    %cst_96 = arith.constant 0.000000e+00 : f32
    %119 = vector.broadcast %cst_96 : f32 to vector<256x64xf32>
    %120 = arith.maximumf %118, %119 : vector<256x64xf32>
    %121 = arith.truncf %120 : vector<256x64xf32> to vector<256x64xbf16>
    %122 = vector.extract_strided_slice %121 {offsets = [0, 0], sizes = [255, 64], strides = [1, 1]} : vector<256x64xbf16> to vector<255x64xbf16>
    %123 = tpu.concatenate %26, %122 in 0 : vector<1x64xbf16>, vector<255x64xbf16> -> vector<256x64xbf16>
    %124 = vector.extract_strided_slice %121 {offsets = [1, 0], sizes = [255, 64], strides = [1, 1]} : vector<256x64xbf16> to vector<255x64xbf16>
    %125 = tpu.concatenate %124, %26 in 0 : vector<255x64xbf16>, vector<1x64xbf16> -> vector<256x64xbf16>
    %126 = arith.select %20, %123, %25 : vector<256x64xi1>, vector<256x64xbf16>
    %127 = arith.select %24, %125, %25 : vector<256x64xi1>, vector<256x64xbf16>
    %c16_97 = arith.constant 16 : index
    %c0_98 = arith.constant 0 : index
    %128 = vector.load %arg5[%c16_97, %c0_98] : memref<288x384xbf16, #tpu.memory_space<vmem>>, vector<256x64xbf16>
    tpu.vector_store %arg5[%c16_97, %c0_98], %126 {strides = array<i32>} : memref<288x384xbf16, #tpu.memory_space<vmem>>, vector<256x64xbf16>,
    %c16_99 = arith.constant 16 : index
    %c128_100 = arith.constant 128 : index
    %129 = vector.load %arg5[%c16_99, %c128_100] : memref<288x384xbf16, #tpu.memory_space<vmem>>, vector<256x64xbf16>
    tpu.vector_store %arg5[%c16_99, %c128_100], %121 {strides = array<i32>} : memref<288x384xbf16, #tpu.memory_space<vmem>>, vector<256x64xbf16>,
    %c16_101 = arith.constant 16 : index
    %c256_102 = arith.constant 256 : index
    %130 = vector.load %arg5[%c16_101, %c256_102] : memref<288x384xbf16, #tpu.memory_space<vmem>>, vector<256x64xbf16>
    tpu.vector_store %arg5[%c16_101, %c256_102], %127 {strides = array<i32>} : memref<288x384xbf16, #tpu.memory_space<vmem>>, vector<256x64xbf16>,
    %c0_103 = arith.constant 0 : index
    %c0_104 = arith.constant 0 : index
    %131 = vector.load %arg5[%c0_103, %c0_104] : memref<288x384xbf16, #tpu.memory_space<vmem>>, vector<256x384xbf16>
    %c3 = arith.constant 3 : index
    %c0_105 = arith.constant 0 : index
    %c0_106 = arith.constant 0 : index
    %c0_107 = arith.constant 0 : index
    %132 = vector.load %arg2[%c3, %c0_105, %c0_106, %c0_107] : memref<5x3x384x64xbf16, #tpu.memory_space<vmem>>, vector<1x1x384x64xbf16>
    %133 = vector.shape_cast %132 : vector<1x1x384x64xbf16> to vector<384x64xbf16>
    %cst_108 = arith.constant dense<0.000000e+00> : vector<256x64xf32>
    %134 = tpu.matmul %131, %133, %cst_108 {dimension_numbers = #tpu.dot_dimension_numbers<[1], [0], [0], [1], [0, 0, 1, 1], [], []>} : vector<256x384xbf16>, vector<384x64xbf16>, vector<256x64xf32> -> vector<256x64xf32>
    %c16_109 = arith.constant 16 : index
    %c0_110 = arith.constant 0 : index
    %135 = vector.load %arg5[%c16_109, %c0_110] : memref<288x384xbf16, #tpu.memory_space<vmem>>, vector<256x384xbf16>
    %c3_111 = arith.constant 3 : index
    %c1_112 = arith.constant 1 : index
    %c0_113 = arith.constant 0 : index
    %c0_114 = arith.constant 0 : index
    %136 = vector.load %arg2[%c3_111, %c1_112, %c0_113, %c0_114] : memref<5x3x384x64xbf16, #tpu.memory_space<vmem>>, vector<1x1x384x64xbf16>
    %137 = vector.shape_cast %136 : vector<1x1x384x64xbf16> to vector<384x64xbf16>
    %cst_115 = arith.constant dense<0.000000e+00> : vector<256x64xf32>
    %138 = tpu.matmul %135, %137, %cst_115 {dimension_numbers = #tpu.dot_dimension_numbers<[1], [0], [0], [1], [0, 0, 1, 1], [], []>} : vector<256x384xbf16>, vector<384x64xbf16>, vector<256x64xf32> -> vector<256x64xf32>
    %139 = arith.addf %134, %138 : vector<256x64xf32>
    %c32_116 = arith.constant 32 : index
    %c0_117 = arith.constant 0 : index
    %140 = vector.load %arg5[%c32_116, %c0_117] : memref<288x384xbf16, #tpu.memory_space<vmem>>, vector<256x384xbf16>
    %c3_118 = arith.constant 3 : index
    %c2_119 = arith.constant 2 : index
    %c0_120 = arith.constant 0 : index
    %c0_121 = arith.constant 0 : index
    %141 = vector.load %arg2[%c3_118, %c2_119, %c0_120, %c0_121] : memref<5x3x384x64xbf16, #tpu.memory_space<vmem>>, vector<1x1x384x64xbf16>
    %142 = vector.shape_cast %141 : vector<1x1x384x64xbf16> to vector<384x64xbf16>
    %cst_122 = arith.constant dense<0.000000e+00> : vector<256x64xf32>
    %143 = tpu.matmul %140, %142, %cst_122 {dimension_numbers = #tpu.dot_dimension_numbers<[1], [0], [0], [1], [0, 0, 1, 1], [], []>} : vector<256x384xbf16>, vector<384x64xbf16>, vector<256x64xf32> -> vector<256x64xf32>
    %144 = arith.addf %139, %143 : vector<256x64xf32>
    %c3_123 = arith.constant 3 : index
    %c0_124 = arith.constant 0 : index
    %c0_125 = arith.constant 0 : index
    %145 = vector.load %arg3[%c3_123, %c0_124, %c0_125] : memref<5x1x64xf32, #tpu.memory_space<vmem>>, vector<1x1x64xf32>
    %146 = vector.shape_cast %145 : vector<1x1x64xf32> to vector<1x64xf32>
    %147 = vector.broadcast %146 : vector<1x64xf32> to vector<256x64xf32>
    %148 = arith.addf %144, %147 : vector<256x64xf32>
    %cst_126 = arith.constant 0.000000e+00 : f32
    %149 = vector.broadcast %cst_126 : f32 to vector<256x64xf32>
    %150 = arith.maximumf %148, %149 : vector<256x64xf32>
    %151 = arith.truncf %150 : vector<256x64xf32> to vector<256x64xbf16>
    %152 = vector.extract_strided_slice %151 {offsets = [0, 0], sizes = [255, 64], strides = [1, 1]} : vector<256x64xbf16> to vector<255x64xbf16>
    %153 = tpu.concatenate %26, %152 in 0 : vector<1x64xbf16>, vector<255x64xbf16> -> vector<256x64xbf16>
    %154 = vector.extract_strided_slice %151 {offsets = [1, 0], sizes = [255, 64], strides = [1, 1]} : vector<256x64xbf16> to vector<255x64xbf16>
    %155 = tpu.concatenate %154, %26 in 0 : vector<255x64xbf16>, vector<1x64xbf16> -> vector<256x64xbf16>
    %156 = arith.select %20, %153, %25 : vector<256x64xi1>, vector<256x64xbf16>
    %157 = arith.select %24, %155, %25 : vector<256x64xi1>, vector<256x64xbf16>
    %c16_127 = arith.constant 16 : index
    %c0_128 = arith.constant 0 : index
    %158 = vector.load %arg5[%c16_127, %c0_128] : memref<288x384xbf16, #tpu.memory_space<vmem>>, vector<256x64xbf16>
    tpu.vector_store %arg5[%c16_127, %c0_128], %156 {strides = array<i32>} : memref<288x384xbf16, #tpu.memory_space<vmem>>, vector<256x64xbf16>,
    %c16_129 = arith.constant 16 : index
    %c128_130 = arith.constant 128 : index
    %159 = vector.load %arg5[%c16_129, %c128_130] : memref<288x384xbf16, #tpu.memory_space<vmem>>, vector<256x64xbf16>
    tpu.vector_store %arg5[%c16_129, %c128_130], %151 {strides = array<i32>} : memref<288x384xbf16, #tpu.memory_space<vmem>>, vector<256x64xbf16>,
    %c16_131 = arith.constant 16 : index
    %c256_132 = arith.constant 256 : index
    %160 = vector.load %arg5[%c16_131, %c256_132] : memref<288x384xbf16, #tpu.memory_space<vmem>>, vector<256x64xbf16>
    tpu.vector_store %arg5[%c16_131, %c256_132], %157 {strides = array<i32>} : memref<288x384xbf16, #tpu.memory_space<vmem>>, vector<256x64xbf16>,
    %c0_133 = arith.constant 0 : index
    %c0_134 = arith.constant 0 : index
    %161 = vector.load %arg5[%c0_133, %c0_134] : memref<288x384xbf16, #tpu.memory_space<vmem>>, vector<256x384xbf16>
    %c4 = arith.constant 4 : index
    %c0_135 = arith.constant 0 : index
    %c0_136 = arith.constant 0 : index
    %c0_137 = arith.constant 0 : index
    %162 = vector.load %arg2[%c4, %c0_135, %c0_136, %c0_137] : memref<5x3x384x64xbf16, #tpu.memory_space<vmem>>, vector<1x1x384x64xbf16>
    %163 = vector.shape_cast %162 : vector<1x1x384x64xbf16> to vector<384x64xbf16>
    %cst_138 = arith.constant dense<0.000000e+00> : vector<256x64xf32>
    %164 = tpu.matmul %161, %163, %cst_138 {dimension_numbers = #tpu.dot_dimension_numbers<[1], [0], [0], [1], [0, 0, 1, 1], [], []>} : vector<256x384xbf16>, vector<384x64xbf16>, vector<256x64xf32> -> vector<256x64xf32>
    %c16_139 = arith.constant 16 : index
    %c0_140 = arith.constant 0 : index
    %165 = vector.load %arg5[%c16_139, %c0_140] : memref<288x384xbf16, #tpu.memory_space<vmem>>, vector<256x384xbf16>
    %c4_141 = arith.constant 4 : index
    %c1_142 = arith.constant 1 : index
    %c0_143 = arith.constant 0 : index
    %c0_144 = arith.constant 0 : index
    %166 = vector.load %arg2[%c4_141, %c1_142, %c0_143, %c0_144] : memref<5x3x384x64xbf16, #tpu.memory_space<vmem>>, vector<1x1x384x64xbf16>
    %167 = vector.shape_cast %166 : vector<1x1x384x64xbf16> to vector<384x64xbf16>
    %cst_145 = arith.constant dense<0.000000e+00> : vector<256x64xf32>
    %168 = tpu.matmul %165, %167, %cst_145 {dimension_numbers = #tpu.dot_dimension_numbers<[1], [0], [0], [1], [0, 0, 1, 1], [], []>} : vector<256x384xbf16>, vector<384x64xbf16>, vector<256x64xf32> -> vector<256x64xf32>
    %169 = arith.addf %164, %168 : vector<256x64xf32>
    %c32_146 = arith.constant 32 : index
    %c0_147 = arith.constant 0 : index
    %170 = vector.load %arg5[%c32_146, %c0_147] : memref<288x384xbf16, #tpu.memory_space<vmem>>, vector<256x384xbf16>
    %c4_148 = arith.constant 4 : index
    %c2_149 = arith.constant 2 : index
    %c0_150 = arith.constant 0 : index
    %c0_151 = arith.constant 0 : index
    %171 = vector.load %arg2[%c4_148, %c2_149, %c0_150, %c0_151] : memref<5x3x384x64xbf16, #tpu.memory_space<vmem>>, vector<1x1x384x64xbf16>
    %172 = vector.shape_cast %171 : vector<1x1x384x64xbf16> to vector<384x64xbf16>
    %cst_152 = arith.constant dense<0.000000e+00> : vector<256x64xf32>
    %173 = tpu.matmul %170, %172, %cst_152 {dimension_numbers = #tpu.dot_dimension_numbers<[1], [0], [0], [1], [0, 0, 1, 1], [], []>} : vector<256x384xbf16>, vector<384x64xbf16>, vector<256x64xf32> -> vector<256x64xf32>
    %174 = arith.addf %169, %173 : vector<256x64xf32>
    %c4_153 = arith.constant 4 : index
    %c0_154 = arith.constant 0 : index
    %c0_155 = arith.constant 0 : index
    %175 = vector.load %arg3[%c4_153, %c0_154, %c0_155] : memref<5x1x64xf32, #tpu.memory_space<vmem>>, vector<1x1x64xf32>
    %176 = vector.shape_cast %175 : vector<1x1x64xf32> to vector<1x64xf32>
    %177 = vector.broadcast %176 : vector<1x64xf32> to vector<256x64xf32>
    %178 = arith.addf %174, %177 : vector<256x64xf32>
    %179 = tpu.transpose %178, [1, 0] : vector<256x64xf32> -> vector<64x256xf32>
    %180 = vector.extract_strided_slice %179 {offsets = [0, 0], sizes = [3, 256], strides = [1, 1]} : vector<64x256xf32> to vector<3x256xf32>
    %181 = arith.negf %180 : vector<3x256xf32>
    %182 = math.exp %181 : vector<3x256xf32>
    %cst_156 = arith.constant 1.000000e+00 : f32
    %183 = vector.broadcast %cst_156 : f32 to vector<3x256xf32>
    %184 = arith.addf %183, %182 : vector<3x256xf32>
    %185 = arith.divf %183, %184 : vector<3x256xf32>
    %c0_157 = arith.constant 0 : index
    %c0_158 = arith.constant 0 : index
    %c0_159 = arith.constant 0 : index
    %186 = vector.load %arg4[%c0_157, %c0_158, %c0_159] : memref<1x3x256xf32, #tpu.memory_space<vmem>>, vector<1x3x256xf32>
    %187 = vector.shape_cast %186 : vector<1x3x256xf32> to vector<3x256xf32>
    %188 = vector.shape_cast %185 : vector<3x256xf32> to vector<1x3x256xf32>
    tpu.vector_store %arg4[%c0_157, %c0_158, %c0_159], %188 {strides = array<i32>} : memref<1x3x256xf32, #tpu.memory_space<vmem>>, vector<1x3x256xf32>,
    return
  }
  func.func @transform_0(%arg0: i32) -> (i32, i32, i32) {
    %c0_i32 = arith.constant 0 : i32
    %c0_i32_0 = arith.constant 0 : i32
    %c0_i32_1 = arith.constant 0 : i32
    return %arg0, %c0_i32, %c0_i32_0 : i32, i32, i32
  }
  func.func @transform_1(%arg0: i32) -> (i32, i32, i32, i32) {
    %c0_i32 = arith.constant 0 : i32
    %c0_i32_0 = arith.constant 0 : i32
    %c0_i32_1 = arith.constant 0 : i32
    %c0_i32_2 = arith.constant 0 : i32
    %c0_i32_3 = arith.constant 0 : i32
    return %c0_i32, %c0_i32_0, %c0_i32_1, %c0_i32_2 : i32, i32, i32, i32
  }
  func.func @transform_2(%arg0: i32) -> (i32, i32, i32) {
    %c0_i32 = arith.constant 0 : i32
    %c0_i32_0 = arith.constant 0 : i32
    %c0_i32_1 = arith.constant 0 : i32
    %c0_i32_2 = arith.constant 0 : i32
    return %c0_i32, %c0_i32_0, %c0_i32_1 : i32, i32, i32
  }
  func.func @transform_3(%arg0: i32) -> (i32, i32, i32) {
    %c0_i32 = arith.constant 0 : i32
    %c0_i32_0 = arith.constant 0 : i32
    %c0_i32_1 = arith.constant 0 : i32
    return %arg0, %c0_i32, %c0_i32_0 : i32, i32, i32
  }
}

</mosaic_0001>

<bundles_post_ra>
// kernel: decoder_pallas.1
= control target key start
LH: loop header
LB: loop body
LE: loop exit
PB: predicated region body
PF: predicated region fallthrough
CT: control target
= control target key end

     0   :  { %s16612_s12 = smov 0   ;;  %s21622_s0 = inlined_call_operand.vmem [shape: f32[2,256,64], index: 0, kind: input, shape index: {}]   ;;  %s21623_s1 = inlined_call_operand.vmem [shape: bf16[5,3,384,64], index: 1, kind: input, shape index: {}]   ;;  %s21624_s2 = inlined_call_operand.vmem [shape: f32[5,1,64], index: 2, kind: input, shape index: {}]   ;;  %s21625_s3 = inlined_call_operand.vmem [shape: f32[2,3,256], index: 3, kind: output, shape index: {}]  }
   0x1 LB: > { %s11494_s13 = sadd.s32 4294967295, %s16588_s12   ;;  %p11498_p0 = scmp.ge.s32.totalorder %s16588_s12, 1  ;;  %s16588_s12 = sphi %s16612_s12, %s13_s12  }
   0x2   : > { %p137_p1 = scmp.lt.s32.totalorder %s16588_s12, 3 }
   0x4   : > { %p138_p2 = pnand %p11498_p0, %p137_p1 }
   0x6   : > { %141 = sbr.rel (%p138_p2) target bundleno = 3218 (0xc92), region = 32 }
   0xd   : > { %v16168_v0 = vld [vmem:[%s21623_s1 + $0x100] sm:$0xff]   ;;  %v174_v2 = vlaneseq  ;;  %v16170_v3 = vld [vmem:[%s21623_s1 + $0x108] sm:$0xff]   ;;  %p16631_p3 = scmp.lt.s32.totalorder %s11494_s13, 1  ;;  %v16590_v4 = vmov 0   ;;  %v16172_v6 = vld [vmem:[%s21623_s1 + $0x110] sm:$0xff]   ;;  %vm21638_vm0 = vcmask 523264  }
   0xe   : > { %v16169_v1 = vld [vmem:[%s21623_s1 + $0xc0] sm:$0xff]   ;;  %15342 = vmatprep.subr.bf16.mxu1 %v16168_v0  ;;  %799 = vst [vmem:[#allocation2 + $0x80] sm:$0xff] %v16590_v4  ;;  %783 = vst [vmem:[#allocation2] sm:$0xff] %v16590_v4  ;;  %12582 = vmatprep.subr.bf16.mxu0 %v16168_v0  ;;  %v16171_v5 = vld [vmem:[%s21623_s1 + $0xc8] sm:$0xff]   ;;  %vm21641_vm3 = vsmask.f32 256 }
   0xf   : > { %786 = vst [vmem:[#allocation2 + $0x18] sm:$0xff] %v16590_v4  ;;  %787 = vst [vmem:[#allocation2 + $0x20] sm:$0xff] %v16590_v4  ;;  %15350 = vmatpush3.bf16.msra.mxu1 %v16169_v1  ;;  %12583 = vmatpush3.bf16.msra.mxu0 %v16169_v1  ;;  %v16690_v7 = vshrl.u32 %v174_v2, 7  ;;  %s22565_s13 = smov (!%p16631_p3, %s11494_s13), 1  ;;  %v16173_v8 = vld [vmem:[%s21623_s1 + $0xd0] sm:$0xff]   ;;  %v16174_v10 = vld [vmem:[%s21623_s1 + $0x118] sm:$0xff]  }
  0x10   : > { %788 = vst [vmem:[#allocation2 + $0x28] sm:$0xff] %v16590_v4  ;;  %789 = vst [vmem:[#allocation2 + $0x30] sm:$0xff] %v16590_v4  ;;  %15343 = vmatprep.subr.bf16.mxu1 %v16170_v3  ;;  %12584 = vmatprep.subr.bf16.mxu0 %v16170_v3  ;;  %s12580_s29 = sshll.u32 %s22565_s13, 8  ;;  %v16175_v13 = vld [vmem:[%s21623_s1 + $0xd8] sm:$0xff]   ;;  %v16176_v15 = vld [vmem:[%s21623_s1 + $0x120] sm:$0xff]   ;;  %vm16591_vm4 = vmmov 1  }
  0x11   : > { %790 = vst [vmem:[#allocation2 + $0x38] sm:$0xff] %v16590_v4  ;;  %791 = vst [vmem:[#allocation2 + $0x40] sm:$0xff] %v16590_v4  ;;  %v183_v9 = vadd.s32 64, %v16690_v7  ;;  %v185_v11 = vadd.s32 80, %v16690_v7  ;;  %v16177_v16 = vld [vmem:[%s21623_s1 + $0xe0] sm:$0xff]   ;;  %s16719_s11 = scalar_lea.vmem %s21622_s0, %s12580_s29  ;;  %v187_v17 = vadd.s32 96, %v16690_v7 }
  0x12   : > { %792 = vst [vmem:[#allocation2 + $0x48] sm:$0xff] %v16590_v4  ;;  %793 = vst [vmem:[#allocation2 + $0x50] sm:$0xff] %v16590_v4  ;;  %v16178_v18 = vld [vmem:[%s21623_s1 + $0x128] sm:$0xff]   ;;  %v189_v20 = vadd.s32 112, %v16690_v7  ;;  %v845_v23 = vld [vmem:[%s16719_s11 + $0x40] sm:$0xff]  ;;  %v191_v31 = vadd.s32 128, %v16690_v7 }
  0x13   : > { %794 = vst [vmem:[#allocation2 + $0x58] sm:$0xff] %v16590_v4  ;;  %795 = vst [vmem:[#allocation2 + $0x60] sm:$0xff] %v16590_v4  ;;  %15351 = vmatpush3.bf16.msra.mxu1 %v16171_v5  ;;  %12585 = vmatpush3.bf16.msra.mxu0 %v16171_v5  ;;  %v267_v12 = vand.u32 15, %v183_v9  ;;  %v281_v14 = vand.u32 15, %v185_v11  ;;  %v295_v22 = vand.u32 15, %v187_v17  ;;  %v846_v24 = vld [vmem:[%s16719_s11 + $0x48] sm:$0xff] }
  0x14   : > { %796 = vst [vmem:[#allocation2 + $0x68] sm:$0xff] %v16590_v4  ;;  %797 = vst [vmem:[#allocation2 + $0x70] sm:$0xff] %v16590_v4  ;;  %15344 = vmatprep.subr.bf16.mxu1 %v16172_v6  ;;  %12586 = vmatprep.subr.bf16.mxu0 %v16172_v6  ;;  %v843_v25 = vld [vmem:[%s16719_s11 + $0x30] sm:$0xff]  ;;  %v309_v26 = vand.u32 15, %v189_v20  ;;  %v16179_v27 = vld [vmem:[%s21623_s1 + $0xe8] sm:$0xff]   ;;  %v16740_v28 = vpack.c.bf16 %v846_v24, %v845_v23  ;;  %v16749_v32 = vadd.s32 144, %v16690_v7 }
  0x15   : > { %798 = vst [vmem:[#allocation2 + $0x78] sm:$0xff] %v16590_v4  ;;  %800 = vst [vmem:[#allocation2 + $0x88] sm:$0xff] %v16590_v4  ;;  %vm16725_vm1 = vcmp.ge.s32.totalorder %v267_v12, 1  ;;  %vm16730_vm2 = vcmp.ge.s32.totalorder %v281_v14, 1  ;;  %v844_v29 = vld [vmem:[%s16719_s11 + $0x38] sm:$0xff]  ;;  %vm16743_vm6 = vcmp.ge.s32.totalorder %v295_v22, 1 }
  0x16   : > { %801 = vst [vmem:[#allocation2 + $0x90] sm:$0xff] %v16590_v4  ;;  %802 = vst [vmem:[#allocation2 + $0x98] sm:$0xff] %v16590_v4  ;;  %v16180_v33 = vld [vmem:[%s21623_s1 + $0x130] sm:$0xff]   ;;  %v16754_v34 = vpack.c.bf16 %v844_v29, %v843_v25  ;;  %vm16762_vm8 = vcmp.ge.s32.totalorder %v309_v26, 1  ;;  %v16767_v37 = vadd.s32 160, %v16690_v7  ;;  %v918_v38 = vshrl.u32 %v16740_v28, 16 }
  0x17   : > { %803 = vst [vmem:[#allocation2 + $0xa0] sm:$0xff] %v16590_v4  ;;  %804 = vst [vmem:[#allocation2 + $0xa8] sm:$0xff] %v16590_v4  ;;  %15352 = vmatpush3.bf16.msra.mxu1 %v16173_v8  ;;  %12587 = vmatpush3.bf16.msra.mxu0 %v16173_v8  ;;  %v921_v39 = vshll.u32 %v16740_v28, 16  ;;  %v847_v41 = vld [vmem:[%s16719_s11 + $0x50] sm:$0xff]  ;;  %v848_v42 = vld [vmem:[%s16719_s11 + $0x58] sm:$0xff]  ;;  %v323_v43 = vand.u32 15, %v191_v31 }
  0x18   : > { %805 = vst [vmem:[#allocation2 + $0xb0] sm:$0xff] %v16590_v4  ;;  %806 = vst [vmem:[#allocation2 + $0xb8] sm:$0xff] %v16590_v4  ;;  %15345 = vmatprep.subr.bf16.mxu1 %v16174_v10  ;;  %12588 = vmatprep.subr.bf16.mxu0 %v16174_v10  ;;  %v910_v44 = vshrl.u32 %v16754_v34, 16  ;;  %v16783_v46 = vpack.c.bf16 %v848_v42, %v847_v41  ;;  %v16181_v48 = vld [vmem:[%s21623_s1 + $0xf0] sm:$0xff]   ;;  %v920_v49 = vrot.slane %v918_v38, 7  ;;  %v849_v51 = vld [vmem:[%s16719_s11 + $0x60] sm:$0xff] }
  0x19   : > { %807 = vst [vmem:[#allocation2 + $0xc0] sm:$0xff] %v16590_v4  ;;  %808 = vst [vmem:[#allocation2 + $0xc8] sm:$0xff] %v16590_v4  ;;  %v850_v52 = vld [vmem:[%s16719_s11 + $0x68] sm:$0xff]  ;;  %vm16798_vm11 = vcmp.ge.s32.totalorder %v323_v43, 1  ;;  %v21811_v56 = vmov 0  ;;  %v851_v59 = vld [vmem:[%s16719_s11 + $0x70] sm:$0xff] }
  0x1a   : > { %809 = vst [vmem:[#allocation2 + $0xd0] sm:$0xff] %v16590_v4  ;;  %810 = vst [vmem:[#allocation2 + $0xd8] sm:$0xff] %v16590_v4  ;;  %v16804_v55 = vrot.slane %v910_v44, 7  ;;  %v926_v57 = vshrl.u32 %v16783_v46, 16  ;;  %v929_v58 = vshll.u32 %v16783_v46, 16  ;;  %v852_v60 = vld [vmem:[%s16719_s11 + $0x78] sm:$0xff]  ;;  %v923_v62 = vor.u32 %v921_v39, %v920_v49 }
  0x1b   : > { %811 = vst [vmem:[#allocation2 + $0xe0] sm:$0xff] %v16590_v4  ;;  %812 = vst [vmem:[#allocation2 + $0xe8] sm:$0xff] %v16590_v4  ;;  %15353 = vmatpush3.bf16.msra.mxu1 %v16175_v13  ;;  %12589 = vmatpush3.bf16.msra.mxu0 %v16175_v13  ;;  %v16182_v61 = vld [vmem:[%s21623_s1 + $0x138] sm:$0xff]   ;;  %v21814_v63 = vmov 0  ;;  %v16828_v0 = vpack.c.bf16 %v850_v52, %v849_v51  ;;  %v16833_v3 = vpack.c.bf16 %v852_v60, %v851_v59  ;;  %v853_v6 = vld [vmem:[%s16719_s11 + $0x80] sm:$0xff]  ;;  %v337_v9 = vand.u32 15, %v16749_v32 }
  0x1c   : > { %813 = vst [vmem:[#allocation2 + $0xf0] sm:$0xff] %v16590_v4  ;;  %814 = vst [vmem:[#allocation2 + $0xf8] sm:$0xff] %v16590_v4  ;;  %15346 = vmatprep.subr.bf16.mxu1 %v16176_v15  ;;  %12590 = vmatprep.subr.bf16.mxu0 %v16176_v15  ;;  %v928_v2 = vrot.slane %v926_v57, 7  ;;  %v854_v8 = vld [vmem:[%s16719_s11 + $0x88] sm:$0xff]  ;;  %v924_v10 = vsel %vm21641_vm3, %v16804_v55, %v923_v62  ;;  %v21817_v13 = vmov 0  ;;  %v16183_v19 = vld [vmem:[%s21623_s1 + $0xf8] sm:$0xff]  }
  0x1d   : > { %815 = vst [vmem:[#allocation2 + $0x100] sm:$0xff] %v16590_v4  ;;  %816 = vst [vmem:[#allocation2 + $0x108] sm:$0xff] %v16590_v4  ;;  %v934_v11 = vshrl.u32 %v16828_v0, 16  ;;  %v937_v12 = vshll.u32 %v16828_v0, 16  ;;  %v942_v17 = vshrl.u32 %v16833_v3, 16  ;;  %v16867_v22 = vpack.c.bf16 %v854_v8, %v853_v6  ;;  %v855_v24 = vld [vmem:[%s16719_s11 + $0x90] sm:$0xff] }
  0x1e   : > { %817 = vst [vmem:[#allocation2 + $0x110] sm:$0xff] %v16590_v4  ;;  %818 = vst [vmem:[#allocation2 + $0x118] sm:$0xff] %v16590_v4  ;;  %v856_v25 = vld [vmem:[%s16719_s11 + $0x98] sm:$0xff]  ;;  %v16184_v26 = vld [vmem:[%s21623_s1 + $0x140] sm:$0xff]   ;;  %v21820_v36 = vmov 0  ;;  %s12581_s24 = sshll.u32 %s22565_s13, 3 }
  0x1f   : > { %819 = vst [vmem:[#allocation2 + $0x120] sm:$0xff] %v16590_v4  ;;  %820 = vst [vmem:[#allocation2 + $0x128] sm:$0xff] %v16590_v4  ;;  %15354 = vmatpush3.bf16.msra.mxu1 %v16177_v16  ;;  %12591 = vmatpush3.bf16.msra.mxu0 %v16177_v16  ;;  %v931_v16 = vor.u32 %v929_v58, %v928_v2  ;;  %v936_v20 = vrot.slane %v934_v11, 7  ;;  %v944_v29 = vrot.slane %v942_v17, 7  ;;  %v857_v41 = vld [vmem:[%s16719_s11 + $0xa0] sm:$0xff]  ;;  %v858_v42 = vld [vmem:[%s16719_s11 + $0xa8] sm:$0xff]  ;;  %s170_s27 = scalar_lea.vmem %s21625_s3, %s12581_s24 }
  0x20   : > { %821 = vst [vmem:[#allocation2 + $0x130] sm:$0xff] %v16590_v4  ;;  %822 = vst [vmem:[#allocation2 + $0x138] sm:$0xff] %v16590_v4  ;;  %15347 = vmatprep.subr.bf16.mxu1 %v16178_v18  ;;  %12592 = vmatprep.subr.bf16.mxu0 %v16178_v18  ;;  %v945_v18 = vshll.u32 %v16833_v3, 16  ;;  %v16884_v31 = vpack.c.bf16 %v856_v25, %v855_v24  ;;  %v16926_v60 = vpack.c.bf16 %v858_v42, %v857_v41  ;;  %v860_v62 = vld [vmem:[%s16719_s11 + $0xb8] sm:$0xff]  ;;  %v861_v24 = vld [vmem:[%s16719_s11 + $0xc0] sm:$0xff] }
  0x21   : > { %823 = vst [vmem:[#allocation2 + $0x140] sm:$0xff] %v16590_v4  ;;  %824 = vst [vmem:[#allocation2 + $0x148] sm:$0xff] %v16590_v4  ;;  %v862_v25 = vld [vmem:[%s16719_s11 + $0xc8] sm:$0xff]  ;;  %v864_v41 = vld [vmem:[%s16719_s11 + $0xd8] sm:$0xff] }
  0x22   : > { %825 = vst [vmem:[#allocation2 + $0x150] sm:$0xff] %v16590_v4  ;;  %826 = vst [vmem:[#allocation2 + $0x158] sm:$0xff] %v16590_v4  ;;  %v947_v43 = vor.u32 %v945_v18, %v944_v29  ;;  %v961_v51 = vshll.u32 %v16884_v31, 16 }
  0x23   : > { %827 = vst [vmem:[#allocation2 + $0x160] sm:$0xff] %v16590_v4  ;;  %828 = vst [vmem:[#allocation2 + $0x168] sm:$0xff] %v16590_v4  ;;  %15355 = vmatpush3.bf16.msra.mxu1 %v16179_v27  ;;  %12593 = vmatpush3.bf16.msra.mxu0 %v16179_v27  ;;  %v932_v27 = vsel %vm21641_vm3, %v920_v49, %v931_v16  ;;  %v21634_v16 = vshrl.u32 %v16926_v60, 16 }
  0x24   : > { %829 = vst [vmem:[#allocation2 + $0x170] sm:$0xff] %v16590_v4  ;;  %830 = vst [vmem:[#allocation2 + $0x178] sm:$0xff] %v16590_v4  ;;  %15348 = vmatprep.subr.bf16.mxu1 %v16180_v33  ;;  %12594 = vmatprep.subr.bf16.mxu0 %v16180_v33  ;;  %v939_v33 = vor.u32 %v937_v12, %v936_v20  ;;  %v948_v54 = vsel %vm21641_vm3, %v936_v20, %v947_v43 }
  0x25   : > { %831 = vst [vmem:[#allocation2 + $0x180] sm:$0xff] %v16590_v4  ;;  %832 = vst [vmem:[#allocation2 + $0x188] sm:$0xff] %v16590_v4 }
  0x26   : > { %833 = vst [vmem:[#allocation2 + $0x190] sm:$0xff] %v16590_v4  ;;  %vm1100_vm5 = vmpackc.low %vm16591_vm4, %vm16591_vm4  ;;  %v940_v49 = vsel %vm21641_vm3, %v928_v2, %v939_v33  ;;  %v16185_v2 = vld [vmem:[%s21623_s1 + $0x148] sm:$0xff]   ;;  %v863_v33 = vld [vmem:[%s16719_s11 + $0xd0] sm:$0xff] }
  0x27   : > { %vm1107_vm7 = vmpackc.low %vm16725_vm1, %vm16725_vm1  ;;  %v16760_v35 = vsel %vm1100_vm5, 65537, %v16590_v4  ;;  %1408 = vst.msk [vmem:[#allocation2 + $0x80] sm:$0xff] %vm21638_vm0, %v16740_v28  ;;  %15356 = vmatpush3.bf16.msra.mxu1 %v16181_v48  ;;  %12595 = vmatpush3.bf16.msra.mxu0 %v16181_v48  ;;  %v21636_v48 = vshrl.u32 %v16884_v31, 16  ;;  %vm16914_vm5 = vcmp.ge.s32.totalorder %v337_v9, 1  ;;  %v351_v9 = vand.u32 15, %v16767_v37 }
  0x28   : > { %v1139_v40 = vsel %vm1107_vm7, 65537, %v16590_v4  ;;  %vm1109_vm9 = vmpackc.low %vm16730_vm2, %vm16730_vm2  ;;  %1407 = vst.msk [vmem:[#allocation2 + $0x68] sm:$0xff] %vm21638_vm0, %v16754_v34  ;;  %15349 = vmatprep.subr.bf16.mxu1 %v16182_v61  ;;  %12596 = vmatprep.subr.bf16.mxu0 %v16182_v61  ;;  %v859_v61 = vld [vmem:[%s16719_s11 + $0xb0] sm:$0xff] }
  0x29   : > { %v11507_v45 = vcombine.low %v1139_v40, %v16760_v35  ;;  %v1141_v47 = vsel %vm1109_vm9, 65537, %v16590_v4  ;;  %vm1111_vm10 = vmpackc.low %vm16743_vm6, %vm16743_vm6  ;;  %1409 = vst.msk [vmem:[#allocation2 + $0x98] sm:$0xff] %vm21638_vm0, %v16783_v46  ;;  %v21637_v40 = vshrl.u32 %v16867_v22, 16  ;;  %v960_v59 = vrot.slane %v21636_v48, 7 }
  0x2a   : > { %v11508_v50 = vcombine.low %v1141_v47, %v16760_v35  ;;  %v1143_v53 = vsel %vm1111_vm10, 65537, %v16590_v4  ;;  %vm1113_vm13 = vmpackc.low %vm16762_vm8, %vm16762_vm8  ;;  %1410 = vst.msk [vmem:[#allocation2 + $0xb0] sm:$0xff] %vm21638_vm0, %v16828_v0  ;;  %v21823_v47 = vmov 0  ;;  %vm16949_vm7 = vcmp.ge.s32.totalorder %v351_v9, 1 }
  0x2b   : > { %vm16806_vm12 = vcmp.ne.s16.totalorder %v11507_v45, 0  ;;  %v11509_v1 = vcombine.low %v1143_v53, %v16760_v35  ;;  %v1145_v5 = vsel %vm1113_vm13, 65537, %v16590_v4  ;;  %vm1115_vm15 = vmpackc.low %vm16798_vm11, %vm16798_vm11  ;;  %1411 = vst.msk [vmem:[#allocation2 + $0xc8] sm:$0xff] %vm21638_vm0, %v16833_v3  ;;  %v953_v45 = vshll.u32 %v16867_v22, 16  ;;  %15357 = vmatpush3.bf16.msra.mxu1 %v16183_v19  ;;  %12597 = vmatpush3.bf16.msra.mxu0 %v16183_v19 }
  0x2c   : > { %v21812_v56 = vsel %vm16806_vm12, 4294967295, %v21811_v56  ;;  %vm16824_vm14 = vcmp.ne.s16.totalorder %v11508_v50, 0  ;;  %v1231_v15 = vsel %vm16806_vm12, %v924_v10, 0  ;;  %v11510_v21 = vcombine.low %v1145_v5, %v16760_v35  ;;  %1412 = vst.msk [vmem:[#allocation2 + $0xe0] sm:$0xff] %vm21638_vm0, %v16867_v22  ;;  %1413 = vst.msk [vmem:[#allocation2 + $0xf8] sm:$0xff] %vm21638_vm0, %v16884_v31  ;;  %14622 = vmatprep.subr.bf16.mxu1 %v16184_v26 }
  0x2d   : > { %21813 = vst [vmem:[#allocation3_spill] sm:$0xff] %v21812_v56  ;;  %v21815_v63 = vsel %vm16824_vm14, 4294967295, %v21814_v63  ;;  %vm16848_vm1 = vcmp.ne.s16.totalorder %v11509_v1, 0  ;;  %1392 = vst.msk [vmem:[#allocation2 + $0x78] sm:$0xff] %vm21638_vm0, %v1231_v15  ;;  %v1147_v23 = vsel %vm1115_vm15, 65537, %v16590_v4  ;;  %v1232_v32 = vsel %vm16824_vm14, %v932_v27, 0 }
  0x2e   : > { %21816 = vst [vmem:[#allocation4_spill] sm:$0xff] %v21815_v63  ;;  %v21818_v13 = vsel %vm16848_vm1, 4294967295, %v21817_v13  ;;  %v1452_v14 = vld [vmem:[#allocation2 + $0x80] sm:$0xff]  ;;  %v11511_v30 = vcombine.low %v1147_v23, %v16760_v35  ;;  %vm16890_vm2 = vcmp.ne.s16.totalorder %v11510_v21, 0  ;;  %1393 = vst.msk [vmem:[#allocation2 + $0x90] sm:$0xff] %vm21638_vm0, %v1232_v32  ;;  %v952_v50 = vrot.slane %v21637_v40, 7 }
  0x2f   : > { %21819 = vst [vmem:[#allocation5_spill] sm:$0xff] %v21818_v13  ;;  %1792 = vmatprep.mubr.bf16.mxu1 %v1452_v14  ;;  %v21821_v36 = vsel %vm16890_vm2, 4294967295, %v21820_v36  ;;  %v1233_v53 = vsel %vm16848_vm1, %v940_v49, 0  ;;  %vm1117_vm6 = vmpackc.low %vm16914_vm5, %vm16914_vm5  ;;  %v1234_v5 = vsel %vm16890_vm2, %v948_v54, 0  ;;  %v963_v14 = vor.u32 %v961_v51, %v960_v59 }
  0x30   : > { %21822 = vst [vmem:[#allocation6_spill] sm:$0xff] %v21821_v36  ;;  %vm16903_vm4 = vcmp.ne.s16.totalorder %v11511_v30, 0  ;;  %v1455_v1 = vld [vmem:[#allocation2 + $0x98] sm:$0xff]  ;;  %1394 = vst.msk [vmem:[#allocation2 + $0xa8] sm:$0xff] %vm21638_vm0, %v1233_v53  ;;  %v955_v6 = vor.u32 %v953_v45, %v952_v50  ;;  %v1149_v8 = vsel %vm1117_vm6, 65537, %v16590_v4  ;;  %v21651_v19 = vshll.u32 %v16926_v60, 16 }
  0x31   : > { %v21824_v47 = vsel %vm16903_vm4, 4294967295, %v21823_v47  ;;  %1395 = vst.msk [vmem:[#allocation2 + $0xc0] sm:$0xff] %vm21638_vm0, %v1234_v5  ;;  %v11512_v15 = vcombine.low %v1149_v8, %v16760_v35  ;;  %1414 = vst.msk [vmem:[#allocation2 + $0x110] sm:$0xff] %vm21638_vm0, %v16926_v60  ;;  %v16953_v21 = vpack.c.bf16 %v860_v62, %v859_v61  ;;  %v197_v23 = vadd.s32 176, %v16690_v7  ;;  %v1458_v9 = vld [vmem:[#allocation2 + $0xb0] sm:$0xff] }
  0x32   : > { %21825 = vst [vmem:[#allocation7_spill] sm:$0xff] %v21824_v47  ;;  %v956_v37 = vsel %vm21641_vm3, %v944_v29, %v955_v6  ;;  %v964_v30 = vsel %vm21641_vm3, %v952_v50, %v963_v14  ;;  %v21830_v32 = vmov 0  ;;  %v968_v29 = vrot.slane %v21634_v16, 7  ;;  %vm1119_vm9 = vmpackc.low %vm16949_vm7, %vm16949_vm7 }
  0x33   : > { %v1235_v27 = vsel %vm16903_vm4, %v956_v37, 0  ;;  %vm16961_vm8 = vcmp.ne.s16.totalorder %v11512_v15, 0  ;;  %v1151_v43 = vsel %vm1119_vm9, 65537, %v16590_v4  ;;  %v21630_v49 = vshrl.u32 %v16953_v21, 16  ;;  %1415 = vst.msk [vmem:[#allocation2 + $0x128] sm:$0xff] %vm21638_vm0, %v16953_v21 }
  0x34   : > { %v1451_v10 = vld [vmem:[#allocation2 + $0x78] sm:$0xff]  ;;  %v21831_v32 = vsel %vm16961_vm8, 4294967295, %v21830_v32  ;;  %1396 = vst.msk [vmem:[#allocation2 + $0xd8] sm:$0xff] %vm21638_vm0, %v1235_v27  ;;  %v1236_v42 = vsel %vm16961_vm8, %v964_v30, 0  ;;  %v21632_v50 = vshll.u32 %v16953_v21, 16  ;;  %v971_v52 = vor.u32 %v21651_v19, %v968_v29 }
  0x35   : > { %1793 = vmatmul.mubr.bf16.vlgmr.msra.gmra.mrb[0].mxu1 %v1451_v10  ;;  %21832 = vst [vmem:[#allocation8_spill] sm:$0xff] %v21831_v32  ;;  %1397 = vst.msk [vmem:[#allocation2 + $0xf0] sm:$0xff] %vm21638_vm0, %v1236_v42  ;;  %v11513_v53 = vcombine.low %v1151_v43, %v16760_v35  ;;  %v365_v54 = vand.u32 15, %v197_v23  ;;  %v16987_v61 = vpack.c.bf16 %v862_v25, %v861_v24  ;;  %v976_v62 = vrot.slane %v21630_v49, 7  ;;  %v1454_v8 = vld [vmem:[#allocation2 + $0x90] sm:$0xff]  ;;  %v16187_v10 = vld [vmem:[%s21623_s1 + $0x158] sm:$0xff]  }
  0x36   : > { %14623 = vmatpush3.bf16.msra.mxu1 %v16184_v26  ;;  %1800 = vmatprep.mubr.bf16.mxu1 %v1455_v1  ;;  %v16186_v26 = vld [vmem:[%s21623_s1 + $0x150] sm:$0xff]   ;;  %v199_v1 = vadd.s32 192, %v16690_v7  ;;  %v16992_v5 = vpack.c.bf16 %v864_v41, %v863_v33  ;;  %v201_v6 = vadd.s32 208, %v16690_v7  ;;  %v972_v14 = vsel %vm21641_vm3, %v960_v59, %v971_v52  ;;  %v865_v24 = vld [vmem:[%s16719_s11 + $0xe0] sm:$0xff]  ;;  %v866_v25 = vld [vmem:[%s16719_s11 + $0xe8] sm:$0xff] }
  0x37   : > { %14624 = vmatprep.subr.bf16.mxu1 %v16185_v2  ;;  %vm16999_vm10 = vcmp.ne.s16.totalorder %v11513_v53, 0  ;;  %v21833_v15 = vmov 0  ;;  %vm613_vm11 = vcmp.ge.s32.totalorder %v365_v54, 1  ;;  %v21626_v37 = vshrl.u32 %v16987_v61, 16  ;;  %1416 = vst.msk [vmem:[#allocation2 + $0x140] sm:$0xff] %vm21638_vm0, %v16987_v61  ;;  %v867_v42 = vld [vmem:[%s16719_s11 + $0xf0] sm:$0xff] }
  0x38   : > { %v21834_v15 = vsel %vm16999_vm10, 4294967295, %v21833_v15  ;;  %v979_v20 = vor.u32 %v21632_v50, %v976_v62  ;;  %vm1121_vm13 = vmpackc.low %vm613_vm11, %vm613_vm11  ;;  %v21629_v59 = vshll.u32 %v16987_v61, 16  ;;  %v379_v23 = vand.u32 15, %v199_v1  ;;  %1417 = vst.msk [vmem:[#allocation2 + $0x158] sm:$0xff] %vm21638_vm0, %v16992_v5  ;;  %v868_v43 = vld [vmem:[%s16719_s11 + $0xf8] sm:$0xff]  ;;  %v839_v49 = vld [vmem:[%s16719_s11 + $0x10] sm:$0xff] }
  0x39   : > { %21835 = vst [vmem:[#allocation9_spill] sm:$0xff] %v21834_v15  ;;  %v1153_v27 = vsel %vm1121_vm13, 65537, %v16590_v4  ;;  %v984_v30 = vrot.slane %v21626_v37, 7  ;;  %v21627_v33 = vshrl.u32 %v16992_v5, 16  ;;  %v21628_v41 = vshll.u32 %v16992_v5, 16 }
  0x3a   : > { %14625 = vmatpush3.bf16.msra.mxu1 %v16185_v2  ;;  %v1237_v2 = vsel %vm16999_vm10, %v972_v14, 0  ;;  %v980_v52 = vsel %vm21641_vm3, %v968_v29, %v979_v20  ;;  %v11514_v53 = vcombine.low %v1153_v27, %v16760_v35  ;;  %vm615_vm15 = vcmp.ge.s32.totalorder %v379_v23, 1  ;;  %v16188_v29 = vld [vmem:[%s21623_s1 + $0x160] sm:$0xff]   ;;  %v16189_v27 = vld [vmem:[%s21623_s1 + $0x168] sm:$0xff]  }
  0x3b   : > { %14626 = vmatprep.subr.bf16.mxu1 %v16186_v26  ;;  %1398 = vst.msk [vmem:[#allocation2 + $0x108] sm:$0xff] %vm21638_vm0, %v1237_v2  ;;  %v393_v54 = vand.u32 15, %v201_v6  ;;  %v987_v1 = vor.u32 %v21629_v59, %v984_v30  ;;  %vm1123_vm5 = vmpackc.low %vm615_vm15, %vm615_vm15  ;;  %v992_v14 = vrot.slane %v21627_v33, 7  ;;  %v17029_v2 = vpack.c.bf16 %v866_v25, %v865_v24  ;;  %v1461_v25 = vld [vmem:[#allocation2 + $0xc8] sm:$0xff] }
  0x3c   : > { %v203_v37 = vadd.s32 224, %v16690_v7  ;;  %vm17035_vm6 = vcmp.ne.s16.totalorder %v11514_v53, 0  ;;  %v21836_v6 = vmov 0  ;;  %v837_v53 = vld [vmem:[%s16719_s11] sm:$0xff]  ;;  %v21865_v19 = vmov 0 }
  0x3d   : > { %1801 = vmatmul.mubr.bf16.gmra.mrb[4].mxu1 %v1454_v8  ;;  %v21837_v6 = vsel %vm17035_vm6, 4294967295, %v21836_v6  ;;  %vm617_vm7 = vcmp.ge.s32.totalorder %v393_v54, 1  ;;  %v17040_v8 = vpack.c.bf16 %v868_v43, %v867_v42  ;;  %v988_v20 = vsel %vm21641_vm3, %v976_v62, %v987_v1  ;;  %1418 = vst.msk [vmem:[#allocation2 + $0x170] sm:$0xff] %vm21638_vm0, %v17029_v2  ;;  %v1457_v54 = vld [vmem:[#allocation2 + $0xa8] sm:$0xff] }
  0x3e   : > { %1808 = vmatprep.mubr.bf16.mxu1 %v1458_v9  ;;  %14627 = vmatpush3.bf16.msra.mxu1 %v16186_v26  ;;  %21838 = vst [vmem:[#allocation10_spill] sm:$0xff] %v21837_v6  ;;  %v1155_v26 = vsel %vm1123_vm5, 65537, %v16590_v4  ;;  %v1238_v9 = vsel %vm17035_vm6, %v980_v52, 0  ;;  %v995_v24 = vor.u32 %v21628_v41, %v992_v14  ;;  %vm1125_vm9 = vmpackc.low %vm617_vm7, %vm617_vm7  ;;  %v21631_v62 = vshrl.u32 %v17029_v2, 16  ;;  %v838_v41 = vld [vmem:[%s16719_s11 + $0x8] sm:$0xff] }
  0x3f   : > { %14628 = vmatprep.subr.bf16.mxu1 %v16187_v10  ;;  %v11515_v23 = vcombine.low %v1155_v26, %v16760_v35  ;;  %1399 = vst.msk [vmem:[#allocation2 + $0x120] sm:$0xff] %vm21638_vm0, %v1238_v9  ;;  %v1157_v42 = vsel %vm1125_vm9, 65537, %v16590_v4  ;;  %v21635_v43 = vshll.u32 %v17029_v2, 16  ;;  %v407_v52 = vand.u32 15, %v203_v37  ;;  %1419 = vst.msk [vmem:[#allocation2 + $0x188] sm:$0xff] %vm21638_vm0, %v17040_v8 }
  0x40   : > { %v21839_v1 = vmov 0  ;;  %v996_v26 = vsel %vm21641_vm3, %v984_v30, %v995_v24  ;;  %v11516_v9 = vcombine.low %v1157_v42, %v16760_v35  ;;  %v21633_v33 = vshrl.u32 %v17040_v8, 16  ;;  %v840_v30 = vld [vmem:[%s16719_s11 + $0x18] sm:$0xff] }
  0x41   : > { %vm17060_vm11 = vcmp.ne.s16.totalorder %v11515_v23, 0  ;;  %vm17070_vm13 = vcmp.ge.s32.totalorder %v407_v52, 1  ;;  %v21642_v23 = vshll.u32 %v17040_v8, 16  ;;  %v21844_v24 = vmov 0 }
  0x42   : > { %14629 = vmatpush3.bf16.msra.mxu1 %v16187_v10  ;;  %v21840_v1 = vsel %vm17060_vm11, 4294967295, %v21839_v1  ;;  %v1239_v37 = vsel %vm17060_vm11, %v988_v20, 0  ;;  %v1000_v10 = vrot.slane %v21631_v62, 7  ;;  %vm17080_vm15 = vcmp.ne.s16.totalorder %v11516_v9, 0  ;;  %vm1127_vm5 = vmpackc.low %vm17070_vm13, %vm17070_vm13  ;;  %v16190_v9 = vld [vmem:[%s21623_s1 + $0x170] sm:$0xff]  }
  0x43   : > { %21841 = vst [vmem:[#allocation11_spill] sm:$0xff] %v21840_v1  ;;  %14630 = vmatprep.subr.bf16.mxu1 %v16188_v29  ;;  %1400 = vst.msk [vmem:[#allocation2 + $0x138] sm:$0xff] %vm21638_vm0, %v1239_v37  ;;  %v21845_v24 = vsel %vm17080_vm15, 4294967295, %v21844_v24  ;;  %v205_v20 = vadd.s32 240, %v16690_v7  ;;  %v1008_v42 = vrot.slane %v21633_v33, 7  ;;  %v176_v52 = vadd.s32 8, %v16690_v7 }
  0x44   : > { %21846 = vst [vmem:[#allocation12_spill] sm:$0xff] %v21845_v24  ;;  %v1240_v62 = vsel %vm17080_vm15, %v996_v26, 0  ;;  %v1003_v59 = vor.u32 %v21635_v43, %v1000_v10  ;;  %v1159_v37 = vsel %vm1127_vm5, 65537, %v16590_v4  ;;  %v17099_v50 = vpack.c.bf16 %v838_v41, %v837_v53  ;;  %v16235_v24 = vld [vmem:[%s21623_s1 + $0x218] sm:$0xff]  }
  0x45   : > { %1809 = vmatmul.mubr.bf16.gmra.mrb[8].mxu1 %v1457_v54  ;;  %1401 = vst.msk [vmem:[#allocation2 + $0x150] sm:$0xff] %vm21638_vm0, %v1240_v62  ;;  %v11517_v54 = vcombine.low %v1159_v37, %v16760_v35  ;;  %v421_v26 = vand.u32 15, %v205_v20  ;;  %v1011_v33 = vor.u32 %v21642_v23, %v1008_v42  ;;  %v218_v16 = vand.u32 15, %v176_v52  ;;  %v1460_v52 = vld [vmem:[#allocation2 + $0xc0] sm:$0xff] }
  0x46   : > { %1816 = vmatprep.mubr.bf16.mxu1 %v1461_v25  ;;  %14631 = vmatpush3.bf16.msra.mxu1 %v16188_v29  ;;  %v1004_v43 = vsel %vm21641_vm3, %v992_v14, %v1003_v59  ;;  %v17106_v48 = vpack.c.bf16 %v840_v30, %v839_v49  ;;  %v21650_v40 = vshrl.u32 %v17099_v50, 16  ;;  %v21644_v41 = vshll.u32 %v17099_v50, 16  ;;  %1404 = vst.msk [vmem:[#allocation2 + $0x20] sm:$0xff] %vm21638_vm0, %v17099_v50  ;;  %v841_v29 = vld [vmem:[%s16719_s11 + $0x20] sm:$0xff]  ;;  %v842_v25 = vld [vmem:[%s16719_s11 + $0x28] sm:$0xff] }
  0x47   : > { %14632 = vmatprep.subr.bf16.mxu1 %v16189_v27  ;;  %vm17114_vm7 = vcmp.ne.s16.totalorder %v11517_v54, 0  ;;  %v21847_v62 = vmov 0  ;;  %vm621_vm9 = vcmp.ge.s32.totalorder %v421_v26, 1  ;;  %v1012_v53 = vsel %vm21641_vm3, %v1000_v10, %v1011_v33  ;;  %v1464_v49 = vld [vmem:[#allocation2 + $0xe0] sm:$0xff] }
  0x48   : > { %v21848_v62 = vsel %vm17114_vm7, 4294967295, %v21847_v62  ;;  %vm17119_vm13 = vcmp.le.s32.totalorder %v218_v16, 14  ;;  %v1241_v30 = vsel %vm17114_vm7, %v1004_v43, 0  ;;  %vm1129_vm5 = vmpackc.low %vm621_vm9, %vm621_vm9  ;;  %v21649_v20 = vshrl.u32 %v17106_v48, 16 }
  0x49   : > { %21849 = vst [vmem:[#allocation13_spill] sm:$0xff] %v21848_v62  ;;  %v21643_v42 = vshll.u32 %v17106_v48, 16  ;;  %vm21645_vm0 = vsmask.f32 7424  ;;  %vm21852_vm15 = vcmask 523264   ;;  %v1161_v16 = vsel %vm1129_vm5, 65537, %v16590_v4  ;;  %vm1244_vm9 = vmpackc.low %vm17119_vm13, %vm17119_vm13 }
  0x4a   : > { %1405 = vst.msk [vmem:[#allocation2 + $0x38] sm:$0xff] %vm21852_vm15, %v17106_v48  ;;  %14633 = vmatpush3.bf16.msra.mxu1 %v16189_v27  ;;  %vm21853_vm3 = vmmov %vm21852_vm15  ;;  %v1033_v33 = vrot.slane %v21644_v41, 1  ;;  %v178_v43 = vadd.s32 24, %v16690_v7  ;;  %v17137_v10 = vpack.c.bf16 %v842_v25, %v841_v29  ;;  %v16191_v27 = vld [vmem:[%s21623_s1 + $0x178] sm:$0xff]   ;;  %v11518_v59 = vcombine.low %v1161_v16, %v16760_v35 }
  0x4b   : > { %1402 = vst.msk [vmem:[#allocation2 + $0x168] sm:$0xff] %vm21853_vm3, %v1241_v30  ;;  %14634 = vmatprep.subr.bf16.mxu1 %v16190_v9  ;;  %v1035_v37 = vrot.slane %v21643_v42, 1  ;;  %v1276_v54 = vsel %vm1244_vm9, 65537, %v16590_v4  ;;  %v180_v26 = vadd.s32 40, %v16690_v7  ;;  %v21854_v16 = vmov 0  ;;  %vm21860_vm9 = vmmov %vm21853_vm3 }
  0x4c   : > { %v1034_v14 = vor.u32 %v1033_v33, %v21650_v40  ;;  %v11519_v29 = vcombine.low %v16760_v35, %v1276_v54  ;;  %v232_v25 = vand.u32 15, %v178_v43  ;;  %v21648_v30 = vshll.u32 %v17137_v10, 16  ;;  %1406 = vst.msk [vmem:[#allocation2 + $0x50] sm:$0xff] %vm21853_vm3, %v17137_v10  ;;  %vm21863_vm7 = vmmov %vm21860_vm9 }
  0x4d   : > { %1817 = vmatmul.mubr.bf16.gmra.mrb[12].mxu1 %v1460_v52  ;;  %vm17153_vm15 = vcmp.ne.s16.totalorder %v11518_v59, 0  ;;  %v1037_v23 = vor.u32 %v1035_v37, %v21649_v20  ;;  %v246_v42 = vand.u32 15, %v180_v26  ;;  %v902_v41 = vshrl.u32 %v17137_v10, 16  ;;  %v16192_v52 = vld [vmem:[%s21623_s1 + $0x40] sm:$0xff]  }
  0x4e   : > { %v21855_v16 = vsel %vm17153_vm15, 4294967295, %v21854_v16  ;;  %1824 = vmatprep.mubr.bf16.mxu1 %v1464_v49  ;;  %14635 = vmatpush3.bf16.msra.mxu1 %v16190_v9  ;;  %v1242_v33 = vsel %vm17153_vm15, %v1012_v53, 0  ;;  %v1036_v43 = vsel %vm21645_vm0, %v1034_v14, %v1035_v37  ;;  %vm17163_vm13 = vcmp.ne.s16.totalorder %v11519_v29, 0  ;;  %v1440_v29 = vld [vmem:[#allocation2 + $0x20] sm:$0xff] }
  0x4f   : > { %21856 = vst [vmem:[#allocation14_spill] sm:$0xff] %v21855_v16  ;;  %v21857_v54 = vmov 0  ;;  %vm690_vm5 = vcmp.le.s32.totalorder %v232_v25, 14  ;;  %14636 = vmatprep.subr.bf16.mxu1 %v16191_v27  ;;  %1403 = vst.msk [vmem:[#allocation2 + $0x180] sm:$0xff] %vm21860_vm9, %v1242_v33  ;;  %v1371_v9 = vsel %vm17163_vm13, %v1036_v43, 0  ;;  %v1038_v53 = vrot.slane %v21648_v30, 1  ;;  %1760 = vmatprep.mubr.bf16.mxu0 %v1440_v29 }
  0x50   : > { %v21858_v54 = vsel %vm17163_vm13, 4294967295, %v21857_v54  ;;  %vm1246_vm3 = vmpackc.low %vm690_vm5, %vm690_vm5  ;;  %vm17175_vm0 = vcmp.le.s32.totalorder %v246_v42, 14  ;;  %v913_v59 = vshll.u32 %v16754_v34, 16  ;;  %1420 = vst.msk [vmem:[#allocation2 + $0x28] sm:$0xff] %vm21863_vm7, %v1371_v9  ;;  %v182_v26 = vadd.s32 56, %v16690_v7  ;;  %v1463_v25 = vld [vmem:[#allocation2 + $0xd8] sm:$0xff] }
  0x51   : > { %21859 = vst [vmem:[#allocation15_spill] sm:$0xff] %v21858_v54  ;;  %v1278_v37 = vsel %vm1246_vm3, 65537, %v16590_v4  ;;  %vm1248_vm9 = vmpackc.low %vm17175_vm0, %vm17175_vm0  ;;  %v1044_v14 = vrot.slane %v921_v39, 1  ;;  %v184_v42 = vadd.s32 72, %v16690_v7  ;;  %vm21864_vm5 = vsmask.f32 7424 }
  0x52   : > { %v1039_v33 = vsel %vm21864_vm5, %v1037_v23, %v1038_v53  ;;  %v11520_v43 = vcombine.low %v16760_v35, %v1278_v37  ;;  %v1040_v9 = vor.u32 %v1038_v53, %v902_v41  ;;  %v1041_v49 = vrot.slane %v913_v59, 1  ;;  %14637 = vmatpush3.bf16.msra.mxu1 %v16191_v27  ;;  %v16202_v23 = vld [vmem:[%s21623_s1 + $0x1c0] sm:$0xff]   ;;  %v1467_v37 = vld [vmem:[#allocation2 + $0xf8] sm:$0xff]  ;;  %vm21868_vm7 = vmmov %vm21864_vm5 }
  0x53   : > { %v1280_v30 = vsel %vm1248_vm9, 65537, %v16590_v4  ;;  %v260_v20 = vand.u32 15, %v182_v26  ;;  %v274_v39 = vand.u32 15, %v184_v42  ;;  %v1046_v40 = vor.u32 %v1044_v14, %v918_v38  ;;  %12718 = vmatprep.subr.bf16.mxu1 %v16192_v52  ;;  %12854 = vmatprep.subr.bf16.mxu0 %v16202_v23  ;;  %v17228_v42 = vld [vmem:[#allocation2] sm:$0xff]  ;;  %v16211_v34 = vld [vmem:[%s21623_s1 + $0x198] sm:$0xff]  }
  0x54   : > { %vm17201_vm0 = vcmp.ne.s16.totalorder %v11520_v43, 0  ;;  %v1042_v53 = vsel %vm21868_vm7, %v1040_v9, %v1041_v49  ;;  %v11521_v27 = vcombine.low %v16760_v35, %v1280_v30  ;;  %v1043_v4 = vor.u32 %v1041_v49, %v910_v44 }
  0x55   : > { %v21866_v19 = vsel %vm17201_vm0, 4294967295, %v21865_v19  ;;  %v1372_v28 = vsel %vm17201_vm0, %v1039_v33, 0  ;;  %vm694_vm3 = vcmp.le.s32.totalorder %v260_v20, 14  ;;  %vm17211_vm9 = vcmp.le.s32.totalorder %v274_v39, 14  ;;  %1825 = vmatmul.mubr.bf16.gmra.mrb[16].mxu1 %v1463_v25 }
  0x56   : > { %21867 = vst [vmem:[#allocation16_spill] sm:$0xff] %v21866_v19  ;;  %v1047_v26 = vrot.slane %v929_v58, 1  ;;  %vm21871_vm5 = vcmask 523264   ;;  %vm17218_vm7 = vcmp.ne.s16.totalorder %v11521_v27, 0  ;;  %v21872_v30 = vmov 0  ;;  %vm1250_vm11 = vmpackc.low %vm694_vm3, %vm694_vm3  ;;  %1832 = vmatprep.mubr.bf16.mxu1 %v1467_v37  ;;  %v1470_v27 = vld [vmem:[#allocation2 + $0x110] sm:$0xff] }
  0x57   : > { %1421 = vst.msk [vmem:[#allocation2 + $0x40] sm:$0xff] %vm21871_vm5, %v1372_v28  ;;  %v21873_v30 = vsel %vm17218_vm7, 4294967295, %v21872_v30  ;;  %vm21875_vm15 = vsmask.f32 7424  ;;  %v186_v20 = vadd.s32 88, %v16690_v7  ;;  %v1050_v52 = vrot.slane %v937_v12, 1 }
  0x58   : > { %21874 = vst [vmem:[#allocation17_spill] sm:$0xff] %v21873_v30  ;;  %v1045_v44 = vsel %vm21875_vm15, %v1043_v4, %v1044_v14  ;;  %v1373_v58 = vsel %vm17218_vm7, %v1042_v53, 0  ;;  %v1282_v29 = vsel %vm1250_vm11, 65537, %v17228_v42  ;;  %vm21876_vm5 = vmmov %vm21875_vm15  ;;  %v1049_v14 = vor.u32 %v1047_v26, %v926_v57  ;;  %v1466_v53 = vld [vmem:[#allocation2 + $0xf0] sm:$0xff] }
  0x59   : > { %v1048_v25 = vsel %vm21876_vm5, %v1046_v40, %v1047_v26  ;;  %vm1252_vm15 = vmpackc.low %vm17211_vm9, %vm17211_vm9  ;;  %vm21877_vm3 = vcmask 523264   ;;  %v11522_v12 = vcombine.low %v16760_v35, %v1282_v29  ;;  %v288_v43 = vand.u32 15, %v186_v20 }
  0x5a   : > { %1422 = vst.msk [vmem:[#allocation2 + $0x58] sm:$0xff] %vm21877_vm3, %v1373_v58  ;;  %v1284_v33 = vsel %vm1252_vm15, 65537, %v17228_v42  ;;  %v188_v9 = vadd.s32 104, %v16690_v7  ;;  %vm21878_vm11 = vmmov %vm21876_vm5  ;;  %v1052_v39 = vor.u32 %v1050_v52, %v934_v11  ;;  %v1053_v46 = vrot.slane %v945_v18, 1 }
  0x5b   : > { %v11523_v49 = vcombine.low %v16760_v35, %v1284_v33  ;;  %v1051_v40 = vsel %vm21878_vm11, %v1049_v14, %v1050_v52  ;;  %vm17247_vm9 = vcmp.ne.s16.totalorder %v11522_v12, 0  ;;  %v21879_v57 = vmov 0 }
  0x5c   : > { %v21880_v57 = vsel %vm17247_vm9, 4294967295, %v21879_v57  ;;  %vm698_vm5 = vcmp.le.s32.totalorder %v288_v43, 14  ;;  %v302_v23 = vand.u32 15, %v188_v9  ;;  %v190_v37 = vadd.s32 120, %v16690_v7 }
  0x5d   : > { %21881 = vst [vmem:[#allocation18_spill] sm:$0xff] %v21880_v57  ;;  %v1374_v4 = vsel %vm17247_vm9, %v1045_v44, 0  ;;  %vm17254_vm15 = vcmp.ne.s16.totalorder %v11523_v49, 0  ;;  %v21882_v28 = vmov 0  ;;  %vm1254_vm3 = vmpackc.low %vm698_vm5, %vm698_vm5  ;;  %v1054_v0 = vsel %vm21878_vm11, %v1052_v39, %v1053_v46  ;;  %1833 = vmatmul.mubr.bf16.gmra.mrb[20].mxu1 %v1466_v53 }
  0x5e   : > { %v21883_v28 = vsel %vm17254_vm15, 4294967295, %v21882_v28  ;;  %v1055_v11 = vor.u32 %v1053_v46, %v942_v17  ;;  %vm21885_vm10 = vcmask 523264   ;;  %v1375_v18 = vsel %vm17254_vm15, %v1048_v25, 0  ;;  %1840 = vmatprep.mubr.bf16.mxu1 %v1470_v27 }
  0x5f   : > { %21884 = vst [vmem:[#allocation19_spill] sm:$0xff] %v21883_v28  ;;  %1423 = vst.msk [vmem:[#allocation2 + $0x70] sm:$0xff] %vm21885_vm10, %v1374_v4  ;;  %v1286_v38 = vsel %vm1254_vm3, 65537, %v17228_v42  ;;  %vm700_vm6 = vcmp.le.s32.totalorder %v302_v23, 14  ;;  %v316_v26 = vand.u32 15, %v190_v37  ;;  %v1056_v20 = vrot.slane %v953_v45, 1 }
  0x60   : > { %vm21886_vm4 = vmmov %vm21885_vm10  ;;  %v11524_v44 = vcombine.low %v16760_v35, %v1286_v38  ;;  %v192_v3 = vadd.s32 136, %v16690_v7  ;;  %v1059_v17 = vrot.slane %v961_v51, 1  ;;  %v194_v58 = vadd.s32 152, %v16690_v7  ;;  %v1469_v4 = vld [vmem:[#allocation2 + $0x108] sm:$0xff] }
  0x61   : > { %1424 = vst.msk [vmem:[#allocation2 + $0x88] sm:$0xff] %vm21886_vm4, %v1375_v18  ;;  %vm1256_vm8 = vmpackc.low %vm700_vm6, %vm700_vm6  ;;  %vm702_vm10 = vcmp.le.s32.totalorder %v316_v26, 14  ;;  %v21887_v29 = vshll.u32 %v16926_v60, 16  ;;  %v21888_v14 = vmov 0  ;;  %v21892_v9 = vshrl.u32 %v16867_v22, 16  ;;  %v1473_v26 = vld [vmem:[#allocation2 + $0x128] sm:$0xff] }
  0x62   : > { %v1288_v52 = vsel %vm1256_vm8, 65537, %v17228_v42  ;;  %vm17276_vm4 = vcmp.ne.s16.totalorder %v11524_v44, 0  ;;  %vm21891_vm6 = vmmov %vm21878_vm11  ;;  %v330_v51 = vand.u32 15, %v192_v3  ;;  %v344_v39 = vand.u32 15, %v194_v58  ;;  %v2521_v57 = vld [vmem:[#allocation2 + $0x58] sm:$0xff] }
  0x63   : > { %v1062_v25 = vrot.slane %v21887_v29, 1  ;;  %v21889_v14 = vsel %vm17276_vm4, 4294967295, %v21888_v14  ;;  %v11525_v45 = vcombine.low %v16760_v35, %v1288_v52  ;;  %v1057_v12 = vsel %vm21891_vm6, %v1055_v11, %v1056_v20  ;;  %vm1258_vm5 = vmpackc.low %vm702_vm10, %vm702_vm10 }
  0x64   : > { %21890 = vst [vmem:[#allocation20_spill] sm:$0xff] %v21889_v14  ;;  %v1376_v33 = vsel %vm17276_vm4, %v1051_v40, 0  ;;  %v1290_v43 = vsel %vm1258_vm5, 65537, %v17228_v42  ;;  %v1058_v49 = vor.u32 %v1056_v20, %v21892_v9  ;;  %vm21893_vm8 = vcmask 523264   ;;  %vm21898_vm10 = vmmov %vm21891_vm6 }
  0x65   : > { %1425 = vst.msk [vmem:[#allocation2 + $0xa0] sm:$0xff] %vm21893_vm8, %v1376_v33  ;;  %vm17288_vm3 = vcmp.ne.s16.totalorder %v11525_v45, 0  ;;  %v21894_v46 = vmov 0  ;;  %v11526_v23 = vcombine.low %v16760_v35, %v1290_v43  ;;  %vm704_vm11 = vcmp.le.s32.totalorder %v330_v51, 14  ;;  %vm21902_vm2 = vmmov %vm21898_vm10  ;;  %1841 = vmatmul.mubr.bf16.gmra.mrb[24].mxu1 %v1469_v4 }
  0x66   : > { %v21895_v46 = vsel %vm17288_vm3, 4294967295, %v21894_v46  ;;  %v21897_v37 = vshrl.u32 %v16884_v31, 16  ;;  %v1377_v40 = vsel %vm17288_vm3, %v1054_v0, 0  ;;  %v1060_v27 = vsel %vm21898_vm10, %v1058_v49, %v1059_v17  ;;  %vm1260_vm6 = vmpackc.low %vm704_vm11, %vm704_vm11  ;;  %1848 = vmatprep.mubr.bf16.mxu1 %v1473_v26 }
  0x67   : > { %21896 = vst [vmem:[#allocation21_spill] sm:$0xff] %v21895_v46  ;;  %vm706_vm5 = vcmp.le.s32.totalorder %v344_v39, 14  ;;  %v211_v22 = vand.u32 15, %v16690_v7  ;;  %1426 = vst.msk [vmem:[#allocation2 + $0xb8] sm:$0xff] %vm21893_vm8, %v1377_v40  ;;  %vm17300_vm1 = vcmp.ne.s16.totalorder %v11526_v23, 0  ;;  %v21899_v11 = vmov 0 }
  0x68   : > { %v1061_v53 = vor.u32 %v1059_v17, %v21897_v37  ;;  %v21900_v11 = vsel %vm17300_vm1, 4294967295, %v21899_v11  ;;  %v1292_v18 = vsel %vm1260_vm6, 65537, %v17228_v42  ;;  %vm1262_vm4 = vmpackc.low %vm706_vm5, %vm706_vm5  ;;  %v21903_v0 = vshrl.u32 %v17099_v50, 16  ;;  %v2527_v19 = vld [vmem:[#allocation2 + $0x88] sm:$0xff] }
  0x69   : > { %21901 = vst [vmem:[#allocation22_spill] sm:$0xff] %v21900_v11  ;;  %v1378_v44 = vsel %vm17300_vm1, %v1057_v12, 0  ;;  %v11527_v20 = vcombine.low %v16760_v35, %v1292_v18  ;;  %v1294_v3 = vsel %vm1262_vm4, 65537, %v17228_v42  ;;  %vm591_vm11 = vcmp.ge.s32.totalorder %v211_v22, 1  ;;  %vm21904_vm10 = vmmov %vm21893_vm8 }
  0x6a   : > { %v1063_v31 = vsel %vm21902_vm2, %v1061_v53, %v1062_v25  ;;  %v889_v38 = vrot.slane %v21903_v0, 7  ;;  %1427 = vst.msk [vmem:[#allocation2 + $0xd0] sm:$0xff] %vm21904_vm10, %v1378_v44  ;;  %v11528_v17 = vcombine.low %v16760_v35, %v1294_v3  ;;  %v21905_v52 = vshll.u32 %v17099_v50, 16  ;;  %vm1099_vm6 = vmpackc.low %vm591_vm11, %vm591_vm11 }
  0x6b   : > { %vm1029_vm2 = vcmask 1040384   ;;  %v196_v29 = vadd.s32 168, %v16690_v7  ;;  %vm17317_vm5 = vcmp.ne.s16.totalorder %v11527_v20, 0  ;;  %v21906_v45 = vmov 0  ;;  %vm21918_vm11 = vmmov %vm21904_vm10 }
  0x6c   : > { %v892_v58 = vor.u32 %v21905_v52, %v889_v38  ;;  %v21907_v45 = vsel %vm17317_vm5, 4294967295, %v21906_v45  ;;  %vm21909_vm8 = vsmask.f32 256  ;;  %v21910_v12 = vmov 0  ;;  %v2530_v54 = vld [vmem:[#allocation2 + $0xa0] sm:$0xff] }
  0x6d   : > { %21908 = vst [vmem:[#allocation23_spill] sm:$0xff] %v21907_v45  ;;  %vm17322_vm1 = vmand %vm1029_vm2, %vm21909_vm8  ;;  %v1131_v51 = vsel %vm1099_vm6, 65537, %v17228_v42  ;;  %v21913_v33 = vshrl.u32 %v16926_v60, 16  ;;  %v21914_v43 = vshll.u32 %v16953_v21, 16  ;;  %v1379_v49 = vsel %vm17317_vm5, %v1060_v27, 0 }
  0x6e   : > { %v21911_v12 = vsel %vm17322_vm1, 4294967295, %v21910_v12  ;;  %vm17333_vm4 = vcmp.ne.s16.totalorder %v11528_v17, 0  ;;  %v21915_v39 = vmov 0  ;;  %v1031_v23 = vsel %vm17322_vm1, 0, %v892_v58  ;;  %1428 = vst.msk [vmem:[#allocation2 + $0xe8] sm:$0xff] %vm21918_vm11, %v1379_v49  ;;  %vm21920_vm2 = vmmov %vm21918_vm11 }
  0x6f   : > { %21912 = vst [vmem:[#allocation24_spill] sm:$0xff] %v21911_v12  ;;  %v1064_v50 = vor.u32 %v1062_v25, %v21913_v33  ;;  %v1065_v9 = vrot.slane %v21914_v43, 1  ;;  %v21916_v39 = vsel %vm17333_vm4, 4294967295, %v21915_v39  ;;  %v11503_v37 = vcombine.low %v1131_v51, %v16760_v35  ;;  %vm21927_vm11 = vmmov %vm21920_vm2  ;;  %v1476_v33 = vld [vmem:[#allocation2 + $0x140] sm:$0xff] }
  0x70   : > { %21917 = vst [vmem:[#allocation25_spill] sm:$0xff] %v21916_v39  ;;  %v1380_v60 = vsel %vm17333_vm4, %v1063_v31, 0  ;;  %v358_v25 = vand.u32 15, %v196_v29  ;;  %vm21919_vm10 = vsmask.f32 7424  ;;  %v198_v40 = vadd.s32 184, %v16690_v7 }
  0x71   : > { %v1066_v53 = vsel %vm21919_vm10, %v1064_v50, %v1065_v9  ;;  %1429 = vst.msk [vmem:[#allocation2 + $0x100] sm:$0xff] %vm21920_vm2, %v1380_v60  ;;  %vm17346_vm6 = vcmp.ne.s16.totalorder %v11503_v37, 0  ;;  %v21921_v27 = vmov 0  ;;  %v21924_v22 = vshrl.u32 %v16953_v21, 16  ;;  %v1472_v31 = vld [vmem:[#allocation2 + $0x120] sm:$0xff]  ;;  %v16565_v39 = vld [vmem:[#allocation2 + $0x88] sm:$0xff] }
  0x72   : > { %v21922_v27 = vsel %vm17346_vm6, 4294967295, %v21921_v27  ;;  %v21925_v18 = vshll.u32 %v16987_v61, 16  ;;  %v177_v26 = vadd.s32 16, %v16690_v7  ;;  %v1227_v44 = vsel %vm17346_vm6, %v1031_v23, 0  ;;  %1849 = vmatmul.mubr.bf16.gmra.mrb[28].mxu1 %v1472_v31 }
  0x73   : > { %21923 = vst [vmem:[#allocation26_spill] sm:$0xff] %v21922_v27  ;;  %v1067_v4 = vor.u32 %v1065_v9, %v21924_v22  ;;  %vm708_vm8 = vcmp.le.s32.totalorder %v358_v25, 14  ;;  %v372_v20 = vand.u32 15, %v198_v40  ;;  %v21926_v3 = vshrl.u32 %v17106_v48, 16  ;;  %1388 = vst.msk [vmem:[#allocation2 + $0x18] sm:$0xff] %vm21927_vm11, %v1227_v44  ;;  %1856 = vmatprep.mubr.bf16.mxu1 %v1476_v33  ;;  %v17393_v44 = vld [vmem:[#allocation2 + $0x38] sm:$0xff] }
  0x74   : > { %v1068_v0 = vrot.slane %v21925_v18, 1  ;;  %vm1264_vm10 = vmpackc.low %vm708_vm8, %vm708_vm8  ;;  %vm21928_vm2 = vsmask.f32 7424  ;;  %v225_v52 = vand.u32 15, %v177_v26  ;;  %v200_v58 = vadd.s32 200, %v16690_v7  ;;  %v16203_v18 = vld [vmem:[%s21623_s1 + $0x180] sm:$0xff]  }
  0x75   : > { %v17359_v17 = vrot.slane %v21926_v3, 7  ;;  %v21929_v29 = vshrl.u32 %v16987_v61, 16  ;;  %v1296_v50 = vsel %vm1264_vm10, 65537, %v17228_v42  ;;  %vm710_vm4 = vcmp.le.s32.totalorder %v372_v20, 14  ;;  %v16569_v32 = vld [vmem:[#allocation2 + $0xe8] sm:$0xff] }
  0x76   : > { %v1069_v21 = vsel %vm21928_vm2, %v1067_v4, %v1068_v0  ;;  %v21930_v43 = vshll.u32 %v17106_v48, 16  ;;  %v21931_v49 = vshll.u32 %v16992_v5, 16  ;;  %v11529_v37 = vcombine.low %v16760_v35, %v1296_v50  ;;  %vm1266_vm8 = vmpackc.low %vm710_vm4, %vm710_vm4  ;;  %v1479_v50 = vld [vmem:[#allocation2 + $0x158] sm:$0xff] }
  0x77   : > { %v1070_v51 = vor.u32 %v1068_v0, %v21929_v29  ;;  %vm593_vm11 = vcmp.ge.s32.totalorder %v225_v52, 1  ;;  %v386_v60 = vand.u32 15, %v200_v58  ;;  %v202_v25 = vadd.s32 216, %v16690_v7  ;;  %v16204_v0 = vld [vmem:[%s21623_s1 + $0x1c8] sm:$0xff]  }
  0x78   : > { %v899_v9 = vor.u32 %v21930_v43, %v17359_v17  ;;  %v1071_v23 = vrot.slane %v21931_v49, 1  ;;  %v1298_v61 = vsel %vm1266_vm8, 65537, %v17228_v42  ;;  %vm21932_vm2 = vsmask.f32 256  ;;  %vm1101_vm10 = vmpackc.low %vm593_vm11, %vm593_vm11 }
  0x79   : > { %vm21933_vm5 = vsmask.f32 7424  ;;  %v21934_v48 = vshrl.u32 %v16992_v5, 16  ;;  %vm17385_vm4 = vcmp.ne.s16.totalorder %v11529_v37, 0  ;;  %v21935_v26 = vmov 0  ;;  %v1475_v37 = vld [vmem:[#allocation2 + $0x138] sm:$0xff] }
  0x7a   : > { %v900_v40 = vsel %vm21932_vm2, %v889_v38, %v899_v9  ;;  %v1072_v22 = vsel %vm21933_vm5, %v1070_v51, %v1071_v23  ;;  %v21936_v26 = vsel %vm17385_vm4, 4294967295, %v21935_v26  ;;  %v11530_v38 = vcombine.low %v16760_v35, %v1298_v61  ;;  %v17409_v43 = vld [vmem:[#allocation2 + $0x18] sm:$0xff]  ;;  %v16205_v61 = vld [vmem:[%s21623_s1 + $0x188] sm:$0xff]   ;;  %1857 = vmatmul.mubr.bf16.gmra.mrb[32].mxu1 %v1475_v37  ;;  %v1478_v37 = vld [vmem:[#allocation2 + $0x150] sm:$0xff] }
  0x7b   : > { %v1073_v4 = vor.u32 %v1071_v23, %v21934_v48  ;;  %21937 = vst [vmem:[#allocation27_spill] sm:$0xff] %v21936_v26  ;;  %v1133_v31 = vsel %vm1101_vm10, 65537, %v17228_v42  ;;  %vm712_vm5 = vcmp.le.s32.totalorder %v386_v60, 14  ;;  %v1381_v5 = vsel %vm17385_vm4, %v1066_v53, 0  ;;  %1761 = vmatmul.mubr.bf16.vlgmr.msra.gmra.mrb[0].mxu0 %v17409_v43  ;;  %1864 = vmatprep.mubr.bf16.mxu1 %v1479_v50 }
  0x7c   : > { %v11504_v20 = vcombine.low %v1133_v31, %v16760_v35  ;;  %vm1268_vm8 = vmpackc.low %vm712_vm5, %vm712_vm5  ;;  %v400_v3 = vand.u32 15, %v202_v25  ;;  %v21938_v52 = vshll.u32 %v17029_v2, 16  ;;  %vm21939_vm11 = vcmask 523264   ;;  %12855 = vmatpush3.bf16.msra.mxu0 %v16203_v18  ;;  %1768 = vmatprep.mubr.bf16.mxu0 %v17393_v44 }
  0x7d   : > { %1430 = vst.msk [vmem:[#allocation2 + $0x118] sm:$0xff] %vm21939_vm11, %v1381_v5  ;;  %vm17399_vm2 = vcmp.ne.s16.totalorder %v11530_v38, 0  ;;  %v21940_v29 = vmov 0  ;;  %v1300_v51 = vsel %vm1268_vm8, 65537, %v17228_v42  ;;  %v179_v33 = vadd.s32 32, %v16690_v7  ;;  %vm21946_vm8 = vmmov %vm21939_vm11  ;;  %12856 = vmatprep.subr.bf16.mxu0 %v16204_v0 }
  0x7e   : > { %v1074_v58 = vrot.slane %v21938_v52, 1  ;;  %v21941_v29 = vsel %vm17399_vm2, 4294967295, %v21940_v29  ;;  %v17407_v53 = vrot.slane %v902_v41, 7  ;;  %v1382_v9 = vsel %vm17399_vm2, %v1069_v21, 0  ;;  %vm21948_vm2 = vmmov %vm21946_vm8 }
  0x7f   : > { %21942 = vst [vmem:[#allocation28_spill] sm:$0xff] %v21941_v29  ;;  %vm17413_vm10 = vcmp.ne.s16.totalorder %v11504_v20, 0  ;;  %v21943_v49 = vmov 0  ;;  %v11531_v23 = vcombine.low %v16760_v35, %v1300_v51  ;;  %vm714_vm5 = vcmp.le.s32.totalorder %v400_v3, 14  ;;  %1431 = vst.msk [vmem:[#allocation2 + $0x130] sm:$0xff] %vm21946_vm8, %v1382_v9  ;;  %v16563_v29 = vld [vmem:[#allocation2 + $0x58] sm:$0xff] }
  0x80   : > { %v21944_v49 = vsel %vm17413_vm10, 4294967295, %v21943_v49  ;;  %v1228_v41 = vsel %vm17413_vm10, %v900_v40, 0  ;;  %vm1270_vm11 = vmpackc.low %vm714_vm5, %vm714_vm5  ;;  %v239_v60 = vand.u32 15, %v179_v33  ;;  %v21947_v21 = vshll.u32 %v17137_v10, 16  ;;  %v16208_v10 = vld [vmem:[%s21623_s1 + $0x1d0] sm:$0xff]   ;;  %12857 = vmatpush3.bf16.msra.mxu0 %v16205_v61 }
  0x81   : > { %21945 = vst [vmem:[#allocation29_spill] sm:$0xff] %v21944_v49  ;;  %1389 = vst.msk [vmem:[#allocation2 + $0x30] sm:$0xff] %vm21948_vm2, %v1228_v41  ;;  %vm17430_vm4 = vcmp.ne.s16.totalorder %v11531_v23, 0  ;;  %v21949_v48 = vmov 0  ;;  %v1302_v40 = vsel %vm1270_vm11, 65537, %v17228_v42  ;;  %v204_v38 = vadd.s32 232, %v16690_v7  ;;  %12858 = vmatprep.subr.bf16.mxu0 %v16208_v10 }
  0x82   : > { %v907_v25 = vor.u32 %v21947_v21, %v17407_v53  ;;  %v21950_v48 = vsel %vm17430_vm4, 4294967295, %v21949_v48  ;;  %v1383_v18 = vsel %vm17430_vm4, %v1072_v22, 0  ;;  %vm21952_vm5 = vsmask.f32 7424  ;;  %vm21959_vm4 = vmmov %vm21946_vm8  ;;  %v17467_v21 = vld [vmem:[#allocation2 + $0x50] sm:$0xff]  ;;  %1865 = vmatmul.mubr.bf16.gmra.mrb[36].mxu1 %v1478_v37  ;;  %v17532_v37 = vld [vmem:[#allocation2 + $0x68] sm:$0xff] }
  0x83   : > { %21951 = vst [vmem:[#allocation30_spill] sm:$0xff] %v21950_v48  ;;  %v1075_v31 = vsel %vm21952_vm5, %v1073_v4, %v1074_v58  ;;  %v11532_v5 = vcombine.low %v16760_v35, %v1302_v40  ;;  %vm595_vm2 = vcmp.ge.s32.totalorder %v239_v60, 1  ;;  %1432 = vst.msk [vmem:[#allocation2 + $0x148] sm:$0xff] %vm21946_vm8, %v1383_v18  ;;  %v414_v20 = vand.u32 15, %v204_v38  ;;  %v16210_v60 = vld [vmem:[%s21623_s1 + $0x1d8] sm:$0xff]   ;;  %v2536_v49 = vld [vmem:[#allocation2 + $0xd0] sm:$0xff] }
  0x84   : > { %vm1103_vm3 = vmpackc.low %vm595_vm2, %vm595_vm2  ;;  %v21953_v3 = vshrl.u32 %v17029_v2, 16  ;;  %v21954_v52 = vshll.u32 %v17040_v8, 16  ;;  %v206_v33 = vadd.s32 248, %v16690_v7  ;;  %v21955_v22 = vmov 0  ;;  %v16209_v2 = vld [vmem:[%s21623_s1 + $0x190] sm:$0xff]   ;;  %v16571_v13 = vld [vmem:[#allocation2 + $0x118] sm:$0xff] }
  0x85   : > { %vm17449_vm11 = vcmp.ne.s16.totalorder %v11532_v5, 0  ;;  %vm21958_vm5 = vsmask.f32 256  ;;  %v1135_v9 = vsel %vm1103_vm3, 65537, %v17228_v42  ;;  %v181_v23 = vadd.s32 48, %v16690_v7  ;;  %v1482_v7 = vld [vmem:[#allocation2 + $0x170] sm:$0xff]  ;;  %12859 = vmatpush3.bf16.msra.mxu0 %v16209_v2 }
  0x86   : > { %v1076_v0 = vor.u32 %v1074_v58, %v21953_v3  ;;  %v1077_v51 = vrot.slane %v21954_v52, 1  ;;  %v21956_v22 = vsel %vm17449_vm11, 4294967295, %v21955_v22  ;;  %v908_v4 = vsel %vm21958_vm5, %v17359_v17, %v907_v25  ;;  %12860 = vmatprep.subr.bf16.mxu0 %v16210_v60  ;;  %1872 = vmatprep.mubr.bf16.mxu1 %v1482_v7  ;;  %v1481_v2 = vld [vmem:[#allocation2 + $0x168] sm:$0xff]  ;;  %v16220_v60 = vld [vmem:[%s21623_s1 + $0x1f0] sm:$0xff]  }
  0x87   : > { %21957 = vst [vmem:[#allocation31_spill] sm:$0xff] %v21956_v22  ;;  %v1384_v58 = vsel %vm17449_vm11, %v1075_v31, 0  ;;  %v11505_v50 = vcombine.low %v1135_v9, %v16760_v35  ;;  %vm716_vm2 = vcmp.le.s32.totalorder %v414_v20, 14  ;;  %v428_v17 = vand.u32 15, %v206_v33  ;;  %v16217_v7 = vld [vmem:[%s21623_s1 + $0x1a8] sm:$0xff]  }
  0x88   : > { %1433 = vst.msk [vmem:[#allocation2 + $0x160] sm:$0xff] %vm21959_vm4, %v1384_v58  ;;  %vm1272_vm5 = vmpackc.low %vm716_vm2, %vm716_vm2  ;;  %v253_v41 = vand.u32 15, %v181_v23  ;;  %v21960_v25 = vmov 0  ;;  %v21963_v40 = vshrl.u32 %v17040_v8, 16  ;;  %v915_v10 = vor.u32 %v913_v59, %v16804_v55  ;;  %v17479_v18 = vld [vmem:[#allocation2 + $0x30] sm:$0xff]  ;;  %v16214_v59 = vld [vmem:[%s21623_s1 + $0x1e0] sm:$0xff]  }
  0x89   : > { %vm17469_vm3 = vcmp.ne.s16.totalorder %v11505_v50, 0  ;;  %v1304_v61 = vsel %vm1272_vm5, 65537, %v17228_v42  ;;  %vm21964_vm4 = vsmask.f32 7424  ;;  %vm718_vm2 = vcmp.le.s32.totalorder %v428_v17, 14  ;;  %1769 = vmatmul.mubr.bf16.gmra.mrb[4].mxu0 %v17479_v18  ;;  %v16215_v58 = vld [vmem:[%s21623_s1 + $0x1a0] sm:$0xff]  }
  0x8a   : > { %v21961_v25 = vsel %vm17469_vm3, 4294967295, %v21960_v25  ;;  %v1079_v38 = vor.u32 %v1077_v51, %v21963_v40  ;;  %v1229_v31 = vsel %vm17469_vm3, %v908_v4, 0  ;;  %v1078_v5 = vsel %vm21964_vm4, %v1076_v0, %v1077_v51  ;;  %vm21965_vm8 = vmmov %vm21964_vm4  ;;  %1776 = vmatprep.mubr.bf16.mxu0 %v17467_v21  ;;  %12861 = vmatpush3.bf16.msra.mxu0 %v16211_v34  ;;  %v1532_v40 = vld [vmem:[#allocation2 + $0x180] sm:$0xff] }
  0x8b   : > { %21962 = vst [vmem:[#allocation32_spill] sm:$0xff] %v21961_v25  ;;  %v11533_v20 = vcombine.low %v16760_v35, %v1304_v61  ;;  %vm21966_vm11 = vcmask 1047552   ;;  %v21967_v3 = vmov 0  ;;  %vm21970_vm15 = vcmask 523264   ;;  %vm1274_vm14 = vmpackc.low %vm718_vm2, %vm718_vm2  ;;  %12862 = vmatprep.subr.bf16.mxu0 %v16214_v59  ;;  %1873 = vmatmul.mubr.bf16.gmra.mrb[40].mxu1 %v1481_v2  ;;  %v16221_v61 = vld [vmem:[%s21623_s1 + $0x1b0] sm:$0xff]   ;;  %v16193_v34 = vld [vmem:[%s21623_s1] sm:$0xff]  }
  0x8c   : > { %vm17487_vm5 = vmand %vm21966_vm11, %vm21965_vm8  ;;  %1390 = vst.msk [vmem:[#allocation2 + $0x48] sm:$0xff] %vm21970_vm15, %v1229_v31  ;;  %vm597_vm12 = vcmp.ge.s32.totalorder %v253_v41, 1  ;;  %v21971_v55 = vmov 0  ;;  %v1306_v8 = vsel %vm1274_vm14, 65537, %v17228_v42  ;;  %v21975_v23 = vmov 0  ;;  %v16194_v59 = vld [vmem:[%s21623_s1 + $0x48] sm:$0xff]  }
  0x8d   : > { %v21968_v3 = vsel %vm17487_vm5, 4294967295, %v21967_v3  ;;  %vm17497_vm4 = vcmp.ne.s16.totalorder %v11533_v20, 0  ;;  %vm1105_vm11 = vmpackc.low %vm597_vm12, %vm597_vm12  ;;  %v1098_v52 = vsel %vm17487_vm5, %v1079_v38, 0  ;;  %v11534_v51 = vcombine.low %v16760_v35, %v1306_v8  ;;  %v16222_v38 = vld [vmem:[%s21623_s1 + $0x1f8] sm:$0xff]   ;;  %v1444_v20 = vld [vmem:[#allocation2 + $0x40] sm:$0xff] }
  0x8e   : > { %21969 = vst [vmem:[#allocation33_spill] sm:$0xff] %v21968_v3  ;;  %v21972_v55 = vsel %vm17497_vm4, 4294967295, %v21971_v55  ;;  %v1385_v0 = vsel %vm17497_vm4, %v1078_v5, 0  ;;  %v1137_v33 = vsel %vm1105_vm11, 65537, %v17228_v42  ;;  %vm21974_vm12 = vsmask.f32 256  ;;  %vm21981_vm2 = vmmov %vm21970_vm15  ;;  %12863 = vmatpush3.bf16.msra.mxu0 %v16215_v58 }
  0x8f   : > { %21973 = vst [vmem:[#allocation34_spill] sm:$0xff] %v21972_v55  ;;  %1434 = vst.msk [vmem:[#allocation2 + $0x178] sm:$0xff] %vm21970_vm15, %v1385_v0  ;;  %v916_v4 = vsel %vm21974_vm12, %v17407_v53, %v915_v10  ;;  %v11506_v9 = vcombine.low %v1137_v33, %v16760_v35  ;;  %vm17515_vm14 = vcmp.ne.s16.totalorder %v11534_v51, 0  ;;  %v21978_v50 = vmov 0  ;;  %v1533_v53 = vld [vmem:[#allocation2 + $0x188] sm:$0xff]  ;;  %v16223_v5 = vld [vmem:[%s21623_s1 + $0x1b8] sm:$0xff]  }
  0x90   : > { %v21976_v23 = vsel %vm17515_vm14, 4294967295, %v21975_v23  ;;  %v1386_v42 = vsel %vm17515_vm14, %v1098_v52, 0  ;;  %v16216_v35 = vld [vmem:[%s21623_s1 + $0x1e8] sm:$0xff]   ;;  %vm21982_vm11 = vmmov %vm21981_vm2  ;;  %1880 = vmatprep.mubr.bf16.mxu1 %v1533_v53  ;;  %v1447_v8 = vld [vmem:[#allocation2 + $0x58] sm:$0xff] }
  0x91   : > { %21977 = vst [vmem:[#allocation35_spill] sm:$0xff] %v21976_v23  ;;  %vm17524_vm8 = vcmp.ne.s16.totalorder %v11506_v9, 0  ;;  %1435 = vst.msk [vmem:[#allocation2 + $0x190] sm:$0xff] %vm21981_vm2, %v1386_v42  ;;  %12864 = vmatprep.subr.bf16.mxu0 %v16216_v35  ;;  %v1441_v10 = vld [vmem:[#allocation2 + $0x28] sm:$0xff]  ;;  %v16196_v52 = vld [vmem:[%s21623_s1 + $0x50] sm:$0xff]  }
  0x92   : > { %v21979_v50 = vsel %vm17524_vm8, 4294967295, %v21978_v50  ;;  %v1230_v17 = vsel %vm17524_vm8, %v916_v4, 0  ;;  %12865 = vmatpush3.bf16.msra.mxu0 %v16217_v7  ;;  %v16195_v0 = vld [vmem:[%s21623_s1 + $0x8] sm:$0xff]   ;;  %v1450_v51 = vld [vmem:[#allocation2 + $0x70] sm:$0xff]  ;;  %v16198_v9 = vld [vmem:[%s21623_s1 + $0x58] sm:$0xff]  }
  0x93   : > { %21980 = vst [vmem:[#allocation36_spill] sm:$0xff] %v21979_v50  ;;  %v17536_v41 = vld [vmem:[#allocation2 + $0x48] sm:$0xff]  ;;  %1391 = vst.msk [vmem:[#allocation2 + $0x60] sm:$0xff] %vm21982_vm11, %v1230_v17  ;;  %12866 = vmatprep.subr.bf16.mxu0 %v16220_v60  ;;  %1881 = vmatmul.mubr.bf16.gmra.mrb[44].mxu1 %v1532_v40  ;;  %v16197_v33 = vld [vmem:[%s21623_s1 + $0x10] sm:$0xff]   ;;  %vm21997_vm11 = vsmask.f32 7424 }
  0x94   : > { %1777 = vmatmul.mubr.bf16.gmra.mrb[8].mxu0 %v17536_v41  ;;  %14638 = vmatprep.mubr.bf16.mxu1 %v1441_v10  ;;  %v1453_v4 = vld [vmem:[#allocation2 + $0x88] sm:$0xff]  ;;  %v16199_v2 = vld [vmem:[%s21623_s1 + $0x18] sm:$0xff]   ;;  %v16200_v58 = vld [vmem:[%s21623_s1 + $0x60] sm:$0xff]  }
  0x95   : > { %1784 = vmatprep.mubr.bf16.mxu0 %v17532_v37  ;;  %v2526_v42 = vld [vmem:[#allocation2 + $0x80] sm:$0xff]  ;;  %v1459_v17 = vld [vmem:[#allocation2 + $0xb8] sm:$0xff]  ;;  %v16206_v7 = vld [vmem:[%s21623_s1 + $0x68] sm:$0xff]  }
  0x96   : > { %12867 = vmatpush3.bf16.msra.mxu0 %v16221_v61  ;;  %v1456_v53 = vld [vmem:[#allocation2 + $0xa0] sm:$0xff]  ;;  %v16207_v60 = vld [vmem:[%s21623_s1 + $0x28] sm:$0xff]   ;;  %v16212_v61 = vld [vmem:[%s21623_s1 + $0x70] sm:$0xff]  }
  0x97   : > { %12868 = vmatprep.subr.bf16.mxu0 %v16222_v38  ;;  %v16201_v35 = vld [vmem:[%s21623_s1 + $0x20] sm:$0xff]   ;;  %v2525_v40 = vld [vmem:[#allocation2 + $0x78] sm:$0xff]  ;;  %v1462_v10 = vld [vmem:[#allocation2 + $0xd0] sm:$0xff] }
  0x98   : > { %v2529_v38 = vld [vmem:[#allocation2 + $0x98] sm:$0xff]  ;;  %vm21993_vm15 = vmmov %vm21981_vm2 }
  0x99   : > { %v17766_v14 = vld [vmem:[#allocation2 + $0x178] sm:$0xff]  ;;  %vm21994_vm12 = vmmov %vm21981_vm2  ;;  %vm21995_vm2 = vsmask.f32 256 }
  0x9a   : > { %v17553_v31 = vld [vmem:[#allocation2 + $0x60] sm:$0xff]  ;;  %12869 = vmatpush3.bf16.msra.mxu0 %v16223_v5  ;;  %v16213_v5 = vld [vmem:[%s21623_s1 + $0x30] sm:$0xff]  }
  0x9b   : > { %14639 = vmatmul.mubr.bf16.vlgmr.msra.gmra.mrb[48].mxu1 %v1444_v20  ;;  %v1465_v20 = vld [vmem:[#allocation2 + $0xe8] sm:$0xff] }
  0x9c   : > { %1785 = vmatmul.mubr.bf16.gmra.mrb[12].mxu0 %v17553_v31  ;;  %12719 = vmatpush3.bf16.msra.mxu1 %v16193_v34  ;;  %v16218_v34 = vld [vmem:[%s21623_s1 + $0x78] sm:$0xff]  }
  0x9d   : > { %2789 = vmatprep.mubr.bf16.mxu0 %v17393_v44  ;;  %14642 = vmatprep.mubr.bf16.mxu1 %v1447_v8  ;;  %v16219_v8 = vld [vmem:[%s21623_s1 + $0x38] sm:$0xff]  }
  0x9e   : > { %12720 = vmatprep.subr.bf16.mxu1 %v16194_v59  ;;  %v16224_v59 = vld [vmem:[%s21623_s1 + $0x80] sm:$0xff]  }
  0xa0   : > { %12721 = vmatpush3.bf16.msra.mxu1 %v16195_v0  ;;  %v2528_v0 = vld [vmem:[#allocation2 + $0x90] sm:$0xff] }
  0xa1   : > { %12722 = vmatprep.subr.bf16.mxu1 %v16196_v52  ;;  %v2532_v52 = vld [vmem:[#allocation2 + $0xb0] sm:$0xff] }
  0xa3   : > { %14643 = vmatmul.mubr.bf16.gmra.mrb[52].mxu1 %v1450_v51  ;;  %v1468_v51 = vld [vmem:[#allocation2 + $0x100] sm:$0xff] }
  0xa4   : > { %2790 = vmatmul.mubr.bf16.vlgmr.msra.gmra.mrb[16].mxu0 %v17479_v18  ;;  %14646 = vmatprep.mubr.bf16.mxu1 %v1453_v4  ;;  %v2531_v4 = vld [vmem:[#allocation2 + $0xa8] sm:$0xff] }
  0xa5   : > { %2797 = vmatprep.mubr.bf16.mxu0 %v17467_v21  ;;  %12723 = vmatpush3.bf16.msra.mxu1 %v16197_v33  ;;  %v1471_v33 = vld [vmem:[#allocation2 + $0x118] sm:$0xff] }
  0xa6   : > { %12724 = vmatprep.subr.bf16.mxu1 %v16198_v9  ;;  %v2535_v9 = vld [vmem:[#allocation2 + $0xc8] sm:$0xff] }
  0xa9   : > { %12725 = vmatpush3.bf16.msra.mxu1 %v16199_v2  ;;  %v1474_v2 = vld [vmem:[#allocation2 + $0x130] sm:$0xff] }
  0xaa   : > { %12726 = vmatprep.subr.bf16.mxu1 %v16200_v58  ;;  %v1477_v58 = vld [vmem:[#allocation2 + $0x148] sm:$0xff] }
  0xab   : > { %14647 = vmatmul.mubr.bf16.gmra.mrb[56].mxu1 %v1456_v53  ;;  %v2538_v53 = vld [vmem:[#allocation2 + $0xe0] sm:$0xff] }
  0xac   : > { %2798 = vmatmul.mubr.bf16.gmra.mrb[20].mxu0 %v17536_v41  ;;  %14650 = vmatprep.mubr.bf16.mxu1 %v1459_v17  ;;  %v1483_v17 = vld [vmem:[#allocation2 + $0x178] sm:$0xff] }
  0xad   : > { %2805 = vmatprep.mubr.bf16.mxu0 %v17532_v37  ;;  %12727 = vmatpush3.bf16.msra.mxu1 %v16201_v35  ;;  %v1480_v35 = vld [vmem:[#allocation2 + $0x160] sm:$0xff] }
  0xae   : > { %12728 = vmatprep.subr.bf16.mxu1 %v16206_v7  ;;  %v2537_v7 = vld [vmem:[#allocation2 + $0xd8] sm:$0xff] }
  0xb1   : > { %12729 = vmatpush3.bf16.msra.mxu1 %v16207_v60  ;;  %v2541_v60 = vld [vmem:[#allocation2 + $0xf8] sm:$0xff] }
  0xb2   : > { %12730 = vmatprep.subr.bf16.mxu1 %v16212_v61  ;;  %v1534_v61 = vld [vmem:[#allocation2 + $0x190] sm:$0xff] }
  0xb3   : > { %14651 = vmatmul.mubr.bf16.gmra.mrb[60].mxu1 %v1462_v10  ;;  %v2544_v10 = vld [vmem:[#allocation2 + $0x110] sm:$0xff] }
  0xb4   : > { %2806 = vmatmul.mubr.bf16.gmra.mrb[24].mxu0 %v17553_v31  ;;  %14654 = vmatprep.mubr.bf16.mxu1 %v1465_v20  ;;  %v16226_v20 = vld [vmem:[%s21623_s1 + $0x90] sm:$0xff]  }
  0xb5   : > { %2813 = vmatprep.mubr.bf16.mxu0 %v2526_v42  ;;  %12731 = vmatpush3.bf16.msra.mxu1 %v16213_v5  ;;  %v2534_v42 = vld [vmem:[#allocation2 + $0xc0] sm:$0xff]  ;;  %v16225_v5 = vld [vmem:[%s21623_s1 + $0x88] sm:$0xff]  }
  0xb6   : > { %12732 = vmatprep.subr.bf16.mxu1 %v16218_v34  ;;  %v16538_v34 = vld [vmem:[#allocation2 + $0x20] sm:$0xff] }
  0xb9   : > { %12733 = vmatpush3.bf16.msra.mxu1 %v16219_v8  ;;  %v2543_v8 = vld [vmem:[#allocation2 + $0x108] sm:$0xff] }
  0xba   : > { %14670 = vmatprep.subr.bf16.mxu1 %v16224_v59 }
  0xbb   : > { %14655 = vmatmul.mubr.bf16.gmra.mrb[64].mxu1 %v1468_v51  ;;  %v16228_v51 = vld [vmem:[%s21623_s1 + $0xa0] sm:$0xff]  }
  0xbc   : > { %2814 = vmatmul.mubr.bf16.gmra.mrb[28].mxu0 %v2525_v40  ;;  %14658 = vmatprep.mubr.bf16.mxu1 %v1471_v33  ;;  %v17613_v40 = vld [vmem:[#allocation2] sm:$0xff] }
  0xbd   : > { %2821 = vmatprep.mubr.bf16.mxu0 %v2529_v38  ;;  %v2540_v38 = vld [vmem:[#allocation2 + $0xf0] sm:$0xff]  ;;  %v2550_v33 = vld [vmem:[#allocation2 + $0x140] sm:$0xff] }
  0xc3   : > { %14659 = vmatmul.mubr.bf16.gmra.mrb[68].mxu1 %v1474_v2  ;;  %v16231_v2 = vld [vmem:[%s21623_s1 + $0xb8] sm:$0xff]  }
  0xc4   : > { %2822 = vmatmul.mubr.bf16.gmra.mrb[32].mxu0 %v2528_v0  ;;  %14662 = vmatprep.mubr.bf16.mxu1 %v1477_v58  ;;  %v2547_v0 = vld [vmem:[#allocation2 + $0x128] sm:$0xff]  ;;  %v2556_v58 = vld [vmem:[#allocation2 + $0x170] sm:$0xff] }
  0xc5   : > { %2829 = vmatprep.mubr.bf16.mxu0 %v2532_v52  ;;  %v16227_v52 = vld [vmem:[%s21623_s1 + $0x98] sm:$0xff]  }
  0xcb   : > { %14663 = vmatmul.mubr.bf16.gmra.mrb[72].mxu1 %v1480_v35  ;;  %v16540_v35 = vld [vmem:[#allocation2 + $0x78] sm:$0xff] }
  0xcc   : > { %2830 = vmatmul.mubr.bf16.gmra.mrb[36].mxu0 %v2531_v4  ;;  %14666 = vmatprep.mubr.bf16.mxu1 %v1483_v17  ;;  %v16229_v4 = vld [vmem:[%s21623_s1 + $0xa8] sm:$0xff]   ;;  %v2558_v17 = vld [vmem:[#allocation2 + $0x180] sm:$0xff] }
  0xcd   : > { %2837 = vmatprep.mubr.bf16.mxu0 %v2535_v9  ;;  %v2553_v9 = vld [vmem:[#allocation2 + $0x158] sm:$0xff] }
  0xd3   : > { %14667 = vmatmul.mubr.bf16.gmra.mrb[76].mxu1 %v1534_v61 }
  0xd4   : > { %2838 = vmatmul.mubr.bf16.gmra.mrb[40].mxu0 %v2534_v42  ;;  %2226 = vmatprep.mubr.bf16.mxu1 %v17613_v40  ;;  %v16539_v42 = vld [vmem:[#allocation2 + $0x80] sm:$0xff] }
  0xd5   : > { %2845 = vmatprep.mubr.bf16.mxu0 %v2538_v53  ;;  %v2559_v53 = vld [vmem:[#allocation2 + $0x188] sm:$0xff] }
  0xdb   : > { %2227 = vmatmul.mubr.bf16.vlgmr.msra.gmra.mrb[80].mxu1 %v17613_v40 }
  0xdc   : > { %2846 = vmatmul.mubr.bf16.gmra.mrb[44].mxu0 %v2537_v7  ;;  %14671 = vmatpush3.bf16.msra.mxu1 %v16224_v59  ;;  %v2546_v59 = vld [vmem:[#allocation2 + $0x120] sm:$0xff]  ;;  %v16542_v7 = vld [vmem:[#allocation2 + $0x90] sm:$0xff] }
  0xdd   : > { %2853 = vmatprep.mubr.bf16.mxu0 %v2541_v60  ;;  %2234 = vmatprep.mubr.bf16.mxu1 %v16538_v34  ;;  %v16543_v60 = vld [vmem:[#allocation2 + $0xb0] sm:$0xff]  ;;  %v16544_v34 = vld [vmem:[#allocation2 + $0xa8] sm:$0xff] }
  0xde   : > { %14672 = vmatprep.subr.bf16.mxu1 %v16225_v5 }
  0xe0   : > { %14673 = vmatpush3.bf16.msra.mxu1 %v16225_v5 }
  0xe1   : > { %14674 = vmatprep.subr.bf16.mxu1 %v16226_v20 }
  0xe3   : > { %2235 = vmatmul.mubr.bf16.gmra.mrb[84].mxu1 %v17409_v43  ;;  %v16230_v43 = vld [vmem:[%s21623_s1 + $0xb0] sm:$0xff]  }
  0xe4   : > { %2854 = vmatmul.mubr.bf16.gmra.mrb[48].mxu0 %v2540_v38  ;;  %2242 = vmatprep.mubr.bf16.mxu1 %v17393_v44  ;;  %v2549_v44 = vld [vmem:[#allocation2 + $0x138] sm:$0xff] }
  0xe5   : > { %2861 = vmatprep.mubr.bf16.mxu0 %v2544_v10  ;;  %14675 = vmatpush3.bf16.msra.mxu1 %v16226_v20 }
  0xe6   : > { %14676 = vmatprep.subr.bf16.mxu1 %v16227_v52 }
  0xe9   : > { %14677 = vmatpush3.bf16.msra.mxu1 %v16227_v52 }
  0xea   : > { %14678 = vmatprep.subr.bf16.mxu1 %v16228_v51 }
  0xeb   : > { %2243 = vmatmul.mubr.bf16.gmra.mrb[88].mxu1 %v17479_v18  ;;  %v17646_v18 = vld [vmem:[%s21623_s1 + $0x200] sm:$0xff]  }
  0xec   : > { %2862 = vmatmul.mubr.bf16.gmra.mrb[52].mxu0 %v2543_v8  ;;  %2250 = vmatprep.mubr.bf16.mxu1 %v17467_v21  ;;  %v2552_v21 = vld [vmem:[#allocation2 + $0x150] sm:$0xff]  ;;  %v16545_v8 = vld [vmem:[#allocation2 + $0xc8] sm:$0xff] }
  0xed   : > { %2869 = vmatprep.mubr.bf16.mxu0 %v2547_v0  ;;  %14679 = vmatpush3.bf16.msra.mxu1 %v16228_v51 }
  0xee   : > { %14680 = vmatprep.subr.bf16.mxu1 %v16229_v4 }
  0xf1   : > { %14681 = vmatpush3.bf16.msra.mxu1 %v16229_v4 }
  0xf2   : > { %14682 = vmatprep.subr.bf16.mxu1 %v16230_v43 }
  0xf3   : > { %2251 = vmatmul.mubr.bf16.gmra.mrb[92].mxu1 %v17536_v41  ;;  %v2555_v41 = vld [vmem:[#allocation2 + $0x168] sm:$0xff] }
  0xf4   : > { %2870 = vmatmul.mubr.bf16.gmra.mrb[56].mxu0 %v2546_v59  ;;  %2258 = vmatprep.mubr.bf16.mxu1 %v17532_v37  ;;  %v16541_v37 = vld [vmem:[#allocation2 + $0x98] sm:$0xff] }
  0xf5   : > { %2877 = vmatprep.mubr.bf16.mxu0 %v2550_v33  ;;  %14683 = vmatpush3.bf16.msra.mxu1 %v16230_v43  ;;  %v16546_v43 = vld [vmem:[#allocation2 + $0xc0] sm:$0xff] }
  0xf6   : > { %14684 = vmatprep.subr.bf16.mxu1 %v16231_v2 }
  0xf9   : > { %14685 = vmatpush3.bf16.msra.mxu1 %v16231_v2 }
  0xfa   : > { %14718 = vmatprep.subr.bf16.mxu1 %v17646_v18 }
  0xfb   : > { %2259 = vmatmul.mubr.bf16.gmra.mrb[96].mxu1 %v17553_v31 }
  0xfc   : > { %2878 = vmatmul.mubr.bf16.gmra.mrb[60].mxu0 %v2549_v44  ;;  %2266 = vmatprep.mubr.bf16.mxu1 %v16539_v42  ;;  %v16547_v44 = vld [vmem:[#allocation2 + $0xe0] sm:$0xff] }
  0xfd   : > { %2885 = vmatprep.mubr.bf16.mxu0 %v2553_v9 }
 0x103   : > { %2267 = vmatmul.mubr.bf16.gmra.mrb[100].mxu1 %v16540_v35  ;;  %v16549_v35 = vld [vmem:[#allocation2 + $0xf8] sm:$0xff] }
 0x104   : > { %2886 = vmatmul.mubr.bf16.gmra.mrb[64].mxu0 %v2552_v21  ;;  %2274 = vmatprep.mubr.bf16.mxu1 %v16541_v37 }
 0x105   : > { %2893 = vmatprep.mubr.bf16.mxu0 %v2556_v58 }
 0x108   : > { %v12622_v61 = vpop.f32.mrb[0].mxu1 }
 0x109   : > { %v12623_v31 = vpop.f32.mrb[1].mxu1 }
 0x10a   : > { %v17652_v38 = vadd.f32 %v12623_v31, %v12622_v61  ;;  %v12625_v10 = vpop.f32.mrb[2].mxu1 }
 0x10b   : > { %2275 = vmatmul.mubr.bf16.gmra.mrb[104].mxu1 %v16542_v7  ;;  %v12626_v5 = vpop.f32.mrb[3].mxu1 }
 0x10c   : > { %2894 = vmatmul.mubr.bf16.gmra.mrb[68].mxu0 %v2555_v41  ;;  %2282 = vmatprep.mubr.bf16.mxu1 %v16543_v60  ;;  %v17655_v20 = vadd.f32 %v12626_v5, %v12625_v10  ;;  %v16550_v10 = vld [vmem:[#allocation2 + $0xf0] sm:$0xff] }
 0x10d   : > { %2901 = vmatprep.mubr.bf16.mxu0 %v2559_v53  ;;  %v16548_v53 = vld [vmem:[#allocation2 + $0xd8] sm:$0xff]  ;;  %v16551_v5 = vld [vmem:[#allocation2 + $0x110] sm:$0xff] }
 0x110   : > { %v12628_v0 = vpop.f32.mrb[4].mxu1 }
 0x111   : > { %v12629_v52 = vpop.f32.mrb[5].mxu1 }
 0x112   : > { %v17657_v51 = vadd.f32 %v12629_v52, %v12628_v0  ;;  %v12631_v59 = vpop.f32.mrb[6].mxu1 }
 0x113   : > { %2283 = vmatmul.mubr.bf16.gmra.mrb[108].mxu1 %v16544_v34  ;;  %v12632_v33 = vpop.f32.mrb[7].mxu1 }
 0x114   : > { %2902 = vmatmul.mubr.bf16.gmra.mrb[72].mxu0 %v2558_v17  ;;  %2290 = vmatprep.mubr.bf16.mxu1 %v16545_v8  ;;  %v17659_v4 = vadd.f32 %v12632_v33, %v12631_v59 }
 0x115   : > { %2909 = vmatprep.mubr.bf16.mxu0 %v17613_v40 }
 0x118   : > { %v12634_v9 = vpop.f32.mrb[8].mxu1 }
 0x119   : > { %v12635_v2 = vpop.f32.mrb[9].mxu1 }
 0x11a   : > { %v17661_v21 = vadd.f32 %v12635_v2, %v12634_v9  ;;  %v12637_v58 = vpop.f32.mrb[10].mxu1 }
 0x11b   : > { %2291 = vmatmul.mubr.bf16.gmra.mrb[112].mxu1 %v16546_v43  ;;  %v12638_v42 = vpop.f32.mrb[11].mxu1  ;;  %v16552_v43 = vld [vmem:[#allocation2 + $0x108] sm:$0xff] }
 0x11c   : > { %2910 = vmatmul.mubr.bf16.gmra.mrb[76].mxu0 %v17613_v40  ;;  %2298 = vmatprep.mubr.bf16.mxu1 %v16547_v44  ;;  %v17663_v41 = vadd.f32 %v12638_v42, %v12637_v58  ;;  %v16553_v44 = vld [vmem:[#allocation2 + $0x128] sm:$0xff] }
 0x120   : > { %v12640_v37 = vpop.f32.mrb[12].mxu1 }
 0x121   : > { %v12641_v17 = vpop.f32.mrb[13].mxu1 }
 0x122   : > { %v17665_v7 = vadd.f32 %v12641_v17, %v12640_v37  ;;  %v12643_v60 = vpop.f32.mrb[14].mxu1  ;;  %v16554_v37 = vld [vmem:[#allocation2 + $0x120] sm:$0xff] }
 0x123   : > { %2299 = vmatmul.mubr.bf16.gmra.mrb[116].mxu1 %v16548_v53  ;;  %v12644_v61 = vpop.f32.mrb[15].mxu1  ;;  %v16555_v17 = vld [vmem:[#allocation2 + $0x140] sm:$0xff] }
 0x124   : > { %2306 = vmatprep.mubr.bf16.mxu1 %v16549_v35  ;;  %v17667_v31 = vadd.f32 %v12644_v61, %v12643_v60 }
 0x128   : > { %v12646_v34 = vpop.f32.mrb[16].mxu1 }
 0x129   : > { %v12647_v8 = vpop.f32.mrb[17].mxu1 }
 0x12a   : > { %v17669_v0 = vadd.f32 %v12647_v8, %v12646_v34  ;;  %v12649_v52 = vpop.f32.mrb[18].mxu1 }
 0x12b   : > { %2307 = vmatmul.mubr.bf16.gmra.mrb[120].mxu1 %v16550_v10  ;;  %v12650_v59 = vpop.f32.mrb[19].mxu1 }
 0x12c   : > { %2314 = vmatprep.mubr.bf16.mxu1 %v16551_v5  ;;  %v17671_v33 = vadd.f32 %v12650_v59, %v12649_v52  ;;  %v16556_v52 = vld [vmem:[#allocation2 + $0x138] sm:$0xff] }
 0x12d   : > { %v16557_v59 = vld [vmem:[#allocation2 + $0x158] sm:$0xff] }
 0x130   : > { %v12652_v9 = vpop.f32.mrb[20].mxu1 }
 0x131   : > { %v12653_v2 = vpop.f32.mrb[21].mxu1 }
 0x132   : > { %v17673_v58 = vadd.f32 %v12653_v2, %v12652_v9  ;;  %v12655_v42 = vpop.f32.mrb[22].mxu1 }
 0x133   : > { %2315 = vmatmul.mubr.bf16.gmra.mrb[124].mxu1 %v16552_v43  ;;  %v12656_v53 = vpop.f32.mrb[23].mxu1 }
 0x134   : > { %2322 = vmatprep.mubr.bf16.mxu1 %v16553_v44  ;;  %v17675_v35 = vadd.f32 %v12656_v53, %v12655_v42 }
 0x138   : > { %v12658_v60 = vpop.f32.mrb[24].mxu1 }
 0x139   : > { %v12659_v61 = vpop.f32.mrb[25].mxu1 }
 0x13a   : > { %v17677_v10 = vadd.f32 %v12659_v61, %v12658_v60  ;;  %v12661_v5 = vpop.f32.mrb[26].mxu1  ;;  %v16559_v60 = vld [vmem:[#allocation2 + $0x170] sm:$0xff] }
 0x13b   : > { %2323 = vmatmul.mubr.bf16.gmra.mrb[128].mxu1 %v16554_v37  ;;  %v12662_v34 = vpop.f32.mrb[27].mxu1  ;;  %v16558_v37 = vld [vmem:[#allocation2 + $0x150] sm:$0xff] }
 0x13c   : > { %2330 = vmatprep.mubr.bf16.mxu1 %v16555_v17  ;;  %v17679_v8 = vadd.f32 %v12662_v34, %v12661_v5 }
 0x143   : > { %2331 = vmatmul.mubr.bf16.gmra.mrb[132].mxu1 %v16556_v52 }
 0x144   : > { %2338 = vmatprep.mubr.bf16.mxu1 %v16557_v59 }
 0x145   : > { %v12664_v43 = vpop.f32.mrb[28].mxu1 }
 0x146   : > { %v12665_v44 = vpop.f32.mrb[29].mxu1 }
 0x147   : > { %v17681_v9 = vadd.f32 %v12665_v44, %v12664_v43  ;;  %v12667_v2 = vpop.f32.mrb[30].mxu1 }
 0x148   : > { %v12668_v42 = vpop.f32.mrb[31].mxu1 }
 0x149   : > { %v17683_v53 = vadd.f32 %v12668_v42, %v12667_v2  ;;  %v16560_v42 = vld [vmem:[#allocation2 + $0x168] sm:$0xff] }
 0x14b   : > { %2339 = vmatmul.mubr.bf16.gmra.mrb[136].mxu1 %v16558_v37 }
 0x14c   : > { %2346 = vmatprep.mubr.bf16.mxu1 %v16559_v60 }
 0x14d   : > { %v12670_v52 = vpop.f32.mrb[32].mxu1 }
 0x14e   : > { %v12598_v17 = vpop.f32.mrb[0].mxu0  ;;  %v12671_v59 = vpop.f32.mrb[33].mxu1 }
 0x14f   : > { %v12599_v61 = vpop.f32.mrb[1].mxu0  ;;  %v17689_v43 = vadd.f32 %v12671_v59, %v12670_v52  ;;  %v12673_v44 = vpop.f32.mrb[34].mxu1 }
 0x150   : > { %v17685_v5 = vadd.f32 %v12599_v61, %v12598_v17  ;;  %v12601_v34 = vpop.f32.mrb[2].mxu0  ;;  %v12674_v23 = vpop.f32.mrb[35].mxu1 }
 0x151   : > { %v12602_v55 = vpop.f32.mrb[3].mxu0  ;;  %v17691_v2 = vadd.f32 %v12674_v23, %v12673_v44  ;;  %v16233_v23 = vld [vmem:[%s21623_s1 + $0x208] sm:$0xff]  }
 0x152   : > { %v17687_v62 = vadd.f32 %v12602_v55, %v12601_v34 }
 0x153   : > { %2347 = vmatmul.mubr.bf16.gmra.mrb[140].mxu1 %v16560_v42  ;;  %v16562_v42 = vld [vmem:[#allocation2 + $0x40] sm:$0xff] }
 0x154   : > { %14686 = vmatprep.mubr.bf16.mxu1 %v17613_v40  ;;  %v16561_v40 = vld [vmem:[#allocation2 + $0x28] sm:$0xff] }
 0x155   : > { %v12676_v17 = vpop.f32.mrb[36].mxu1 }
 0x156   : > { %v12677_v3 = vpop.f32.mrb[37].mxu1 }
 0x157   : > { %v17696_v55 = vadd.f32 %v12677_v3, %v12676_v17  ;;  %v12679_v34 = vpop.f32.mrb[38].mxu1 }
 0x158   : > { %v12680_v59 = vpop.f32.mrb[39].mxu1 }
 0x159   : > { %v17703_v44 = vadd.f32 %v12680_v59, %v12679_v34 }
 0x15b   : > { %21983 = vst [vmem:[#allocation37_spill] sm:$0xff] %v17703_v44  ;;  %14687 = vmatmul.mubr.bf16.vlgmr.msra.gmra.mrb[48].mxu1 %v16561_v40  ;;  %v16242_v44 = vld [vmem:[%s21623_s1 + $0x390] sm:$0xff]  }
 0x15c   : > { %v12604_v37 = vpop.f32.mrb[4].mxu0  ;;  %14719 = vmatpush3.bf16.msra.mxu1 %v17646_v18  ;;  %14690 = vmatprep.mubr.bf16.mxu1 %v16562_v42 }
 0x15d   : > { %v12605_v60 = vpop.f32.mrb[5].mxu0  ;;  %14720 = vmatprep.subr.bf16.mxu1 %v16233_v23 }
 0x15e   : > { %v17694_v61 = vadd.f32 %v12605_v60, %v12604_v37  ;;  %v12607_v16 = vpop.f32.mrb[6].mxu0  ;;  %v12682_v3 = vpop.f32.mrb[40].mxu1 }
 0x15f   : > { %v12608_v22 = vpop.f32.mrb[7].mxu0  ;;  %v12683_v48 = vpop.f32.mrb[41].mxu1 }
 0x160   : > { %v17698_v52 = vadd.f32 %v12608_v22, %v12607_v16  ;;  %v16234_v16 = vld [vmem:[%s21623_s1 + $0x210] sm:$0xff]   ;;  %v17711_v59 = vadd.f32 %v12683_v48, %v12682_v3  ;;  %v12685_v40 = vpop.f32.mrb[42].mxu1  ;;  %14721 = vmatpush3.bf16.msra.mxu1 %v16233_v23  ;;  %v16236_v48 = vld [vmem:[%s21623_s1 + $0x220] sm:$0xff]  }
 0x161   : > { %v12686_v42 = vpop.f32.mrb[43].mxu1  ;;  %14722 = vmatprep.subr.bf16.mxu1 %v16234_v16 }
 0x162   : > { %21984 = vst [vmem:[#allocation38_spill] sm:$0xff] %v17711_v59  ;;  %v17718_v1 = vadd.f32 %v12686_v42, %v12685_v40 }
 0x163   : > { %14691 = vmatmul.mubr.bf16.gmra.mrb[52].mxu1 %v16563_v29 }
 0x164   : > { %21985 = vst [vmem:[#allocation39_spill] sm:$0xff] %v17718_v1  ;;  %14723 = vmatpush3.bf16.msra.mxu1 %v16234_v16 }
 0x165   : > { %14724 = vmatprep.subr.bf16.mxu1 %v16235_v24 }
 0x166   : > { %v12688_v3 = vpop.f32.mrb[44].mxu1 }
 0x167   : > { %v12610_v37 = vpop.f32.mrb[8].mxu0  ;;  %v12689_v26 = vpop.f32.mrb[45].mxu1 }
 0x168   : > { %v12611_v22 = vpop.f32.mrb[9].mxu0  ;;  %v17725_v40 = vadd.f32 %v12689_v26, %v12688_v3  ;;  %v12691_v42 = vpop.f32.mrb[46].mxu1  ;;  %14725 = vmatpush3.bf16.msra.mxu1 %v16235_v24 }
 0x169   : > { %v17709_v60 = vadd.f32 %v12611_v22, %v12610_v37  ;;  %v12613_v17 = vpop.f32.mrb[10].mxu0  ;;  %v16564_v37 = vld [vmem:[#allocation2 + $0x70] sm:$0xff]  ;;  %v12692_v16 = vpop.f32.mrb[47].mxu1  ;;  %14726 = vmatprep.subr.bf16.mxu1 %v16236_v48 }
 0x16a   : > { %v12614_v34 = vpop.f32.mrb[11].mxu0  ;;  %14694 = vmatprep.mubr.bf16.mxu1 %v16564_v37  ;;  %21986 = vst [vmem:[#allocation40_spill] sm:$0xff] %v17725_v40  ;;  %v16237_v37 = vld [vmem:[%s21623_s1 + $0x228] sm:$0xff]   ;;  %v17732_v6 = vadd.f32 %v12692_v16, %v12691_v42  ;;  %v16568_v16 = vld [vmem:[#allocation2 + $0xd0] sm:$0xff]  ;;  %v2542_v40 = vld [vmem:[#allocation2 + $0x100] sm:$0xff] }
 0x16b   : > { %v17713_v18 = vadd.f32 %v12614_v34, %v12613_v17  ;;  %14695 = vmatmul.mubr.bf16.gmra.mrb[56].mxu1 %v16565_v39 }
 0x16c   : > { %21987 = vst [vmem:[#allocation41_spill] sm:$0xff] %v17732_v6  ;;  %14727 = vmatpush3.bf16.msra.mxu1 %v16236_v48  ;;  %v16567_v48 = vld [vmem:[#allocation2 + $0xb8] sm:$0xff] }
 0x16d   : > { %14728 = vmatprep.subr.bf16.mxu1 %v16237_v37 }
 0x16f   : > { %v12616_v22 = vpop.f32.mrb[12].mxu0 }
 0x170   : > { %v12617_v23 = vpop.f32.mrb[13].mxu0  ;;  %14729 = vmatpush3.bf16.msra.mxu1 %v16237_v37  ;;  %v16570_v37 = vld [vmem:[#allocation2 + $0x100] sm:$0xff] }
 0x171   : > { %v17723_v17 = vadd.f32 %v12617_v23, %v12616_v22  ;;  %v12619_v34 = vpop.f32.mrb[14].mxu0  ;;  %v16566_v22 = vld [vmem:[#allocation2 + $0xa0] sm:$0xff] }
 0x172   : > { %v12620_v15 = vpop.f32.mrb[15].mxu0  ;;  %14698 = vmatprep.mubr.bf16.mxu1 %v16566_v22 }
 0x173   : > { %v17727_v29 = vadd.f32 %v12620_v15, %v12619_v34  ;;  %v16238_v15 = vld [vmem:[%s21623_s1 + $0x230] sm:$0xff]   ;;  %v16239_v34 = vld [vmem:[%s21623_s1 + $0x238] sm:$0xff]   ;;  %14699 = vmatmul.mubr.bf16.gmra.mrb[60].mxu1 %v16567_v48 }
 0x174   : > { %14730 = vmatprep.subr.bf16.mxu1 %v16238_v15  ;;  %14702 = vmatprep.mubr.bf16.mxu1 %v16568_v16 }
 0x175   : > { %14731 = vmatpush3.bf16.msra.mxu1 %v16238_v15 }
 0x176   : > { %14732 = vmatprep.subr.bf16.mxu1 %v16239_v34 }
 0x177   : > { %v12870_v23 = vpop.f32.mrb[16].mxu0 }
 0x178   : > { %v12871_v24 = vpop.f32.mrb[17].mxu0 }
 0x179   : > { %v17737_v26 = vadd.f32 %v12871_v24, %v12870_v23  ;;  %v12873_v3 = vpop.f32.mrb[18].mxu0  ;;  %14733 = vmatpush3.bf16.msra.mxu1 %v16239_v34 }
 0x17a   : > { %v12874_v42 = vpop.f32.mrb[19].mxu0 }
 0x17b   : > { %v17742_v39 = vadd.f32 %v12874_v42, %v12873_v3  ;;  %14703 = vmatmul.mubr.bf16.gmra.mrb[64].mxu1 %v16569_v32 }
 0x17c   : > { %14706 = vmatprep.mubr.bf16.mxu1 %v16570_v37  ;;  %v17756_v37 = vld [vmem:[#allocation2 + $0x148] sm:$0xff] }
 0x17f   : > { %v12876_v22 = vpop.f32.mrb[20].mxu0 }
 0x180   : > { %v12877_v45 = vpop.f32.mrb[21].mxu0 }
 0x181   : > { %v17744_v23 = vadd.f32 %v12877_v45, %v12876_v22  ;;  %v12879_v24 = vpop.f32.mrb[22].mxu0  ;;  %v16572_v45 = vld [vmem:[#allocation2 + $0x130] sm:$0xff] }
 0x182   : > { %v12880_v47 = vpop.f32.mrb[23].mxu0 }
 0x183   : > { %v17746_v11 = vadd.f32 %v12880_v47, %v12879_v24  ;;  %14707 = vmatmul.mubr.bf16.gmra.mrb[68].mxu1 %v16571_v13 }
 0x184   : > { %14710 = vmatprep.mubr.bf16.mxu1 %v16572_v45 }
 0x187   : > { %v12882_v3 = vpop.f32.mrb[24].mxu0 }
 0x188   : > { %v12883_v42 = vpop.f32.mrb[25].mxu0 }
 0x189   : > { %v17748_v48 = vadd.f32 %v12883_v42, %v12882_v3  ;;  %v12885_v16 = vpop.f32.mrb[26].mxu0  ;;  %v17759_v3 = vld [vmem:[#allocation2 + $0x160] sm:$0xff] }
 0x18a   : > { %v12886_v15 = vpop.f32.mrb[27].mxu0 }
 0x18b   : > { %v17750_v46 = vadd.f32 %v12886_v15, %v12885_v16  ;;  %14711 = vmatmul.mubr.bf16.gmra.mrb[72].mxu1 %v17756_v37 }
 0x18c   : > { %14714 = vmatprep.mubr.bf16.mxu1 %v17759_v3 }
 0x18f   : > { %v12888_v22 = vpop.f32.mrb[28].mxu0 }
 0x190   : > { %v12889_v34 = vpop.f32.mrb[29].mxu0 }
 0x191   : > { %v17752_v47 = vadd.f32 %v12889_v34, %v12888_v22  ;;  %v12891_v24 = vpop.f32.mrb[30].mxu0  ;;  %v2518_v34 = vld [vmem:[#allocation2 + $0x40] sm:$0xff] }
 0x192   : > { %v12892_v32 = vpop.f32.mrb[31].mxu0 }
 0x193   : > { %v17754_v36 = vadd.f32 %v12892_v32, %v12891_v24  ;;  %14715 = vmatmul.mubr.bf16.gmra.mrb[76].mxu1 %v17766_v14 }
 0x194   : > { %14734 = vmatprep.mubr.bf16.mxu1 %v2518_v34 }
 0x197   : > { %v12894_v42 = vpop.f32.mrb[32].mxu0 }
 0x198   : > { %v12895_v13 = vpop.f32.mrb[33].mxu0 }
 0x199   : > { %v17762_v16 = vadd.f32 %v12895_v13, %v12894_v42  ;;  %v12897_v15 = vpop.f32.mrb[34].mxu0  ;;  %v2524_v42 = vld [vmem:[#allocation2 + $0x70] sm:$0xff] }
 0x19a   : > { %v12898_v45 = vpop.f32.mrb[35].mxu0 }
 0x19b   : > { %v17764_v22 = vadd.f32 %v12898_v45, %v12897_v15  ;;  %14735 = vmatmul.mubr.bf16.vlgmr.msra.gmra.mrb[48].mxu1 %v2521_v57  ;;  %v2533_v57 = vld [vmem:[#allocation2 + $0xb8] sm:$0xff] }
 0x19c   : > { %14738 = vmatprep.mubr.bf16.mxu1 %v2524_v42 }
 0x19f   : > { %v12900_v24 = vpop.f32.mrb[36].mxu0 }
 0x1a0   : > { %v12901_v32 = vpop.f32.mrb[37].mxu0 }
 0x1a1   : > { %v17769_v28 = vadd.f32 %v12901_v32, %v12900_v24  ;;  %v12903_v63 = vpop.f32.mrb[38].mxu0 }
 0x1a2   : > { %v12904_v56 = vpop.f32.mrb[39].mxu0 }
 0x1a3   : > { %v17771_v30 = vadd.f32 %v12904_v56, %v12903_v63  ;;  %14739 = vmatmul.mubr.bf16.gmra.mrb[52].mxu1 %v2527_v19  ;;  %v16240_v19 = vld [vmem:[%s21623_s1 + $0x380] sm:$0xff]  }
 0x1a4   : > { %14742 = vmatprep.mubr.bf16.mxu1 %v2530_v54  ;;  %v16241_v54 = vld [vmem:[%s21623_s1 + $0x388] sm:$0xff]   ;;  %14766 = vmatprep.subr.bf16.mxu1 %v16240_v19 }
 0x1a5   : > { %14767 = vmatpush3.bf16.msra.mxu1 %v16240_v19 }
 0x1a6   : > { %14768 = vmatprep.subr.bf16.mxu1 %v16241_v54 }
 0x1a7   : > { %v12906_v13 = vpop.f32.mrb[40].mxu0 }
 0x1a8   : > { %v12907_v15 = vpop.f32.mrb[41].mxu0 }
 0x1a9   : > { %v17773_v45 = vadd.f32 %v12907_v15, %v12906_v13  ;;  %v12909_v25 = vpop.f32.mrb[42].mxu0  ;;  %14769 = vmatpush3.bf16.msra.mxu1 %v16241_v54 }
 0x1aa   : > { %v12910_v50 = vpop.f32.mrb[43].mxu0  ;;  %14770 = vmatprep.subr.bf16.mxu1 %v16242_v44 }
 0x1ab   : > { %v17775_v34 = vadd.f32 %v12910_v50, %v12909_v25  ;;  %14743 = vmatmul.mubr.bf16.gmra.mrb[56].mxu1 %v2533_v57 }
 0x1ac   : > { %14746 = vmatprep.mubr.bf16.mxu1 %v2536_v49  ;;  %v16244_v49 = vld [vmem:[%s21623_s1 + $0x340] sm:$0xff]  }
 0x1ad   : > { %12990 = vmatprep.subr.bf16.mxu0 %v16244_v49  ;;  %14771 = vmatpush3.bf16.msra.mxu1 %v16242_v44 }
 0x1ae   : > { %v12734_v12 = vpop.f32.mrb[80].mxu1 }
 0x1af   : > { %v12912_v24 = vpop.f32.mrb[44].mxu0 }
 0x1b0   : > { %v12913_v32 = vpop.f32.mrb[45].mxu0 }
 0x1b1   : > { %v17777_v27 = vadd.f32 %v12913_v32, %v12912_v24  ;;  %v12915_v56 = vpop.f32.mrb[46].mxu0  ;;  %v12735_v24 = vpop.f32.mrb[81].mxu1 }
 0x1b2   : > { %v12916_v63 = vpop.f32.mrb[47].mxu0  ;;  %v12737_v57 = vpop.f32.mrb[82].mxu1 }
 0x1b3   : > { %v17779_v42 = vadd.f32 %v12916_v63, %v12915_v56  ;;  %v16245_v56 = vld [vmem:[%s21623_s1 + $0x300] sm:$0xff]   ;;  %v12736_v63 = vadd.f32 %v12735_v24, %v12734_v12  ;;  %v12738_v6 = vpop.f32.mrb[83].mxu1 }
 0x1b4   : > { %v12739_v59 = vadd.f32 %v12738_v6, %v12737_v57  ;;  %12991 = vmatpush3.bf16.msra.mxu0 %v16245_v56  ;;  %v2548_v57 = vld [vmem:[#allocation2 + $0x130] sm:$0xff] }
 0x1b5   : > { %v15361_v1 = vadd.f32 %v12736_v63, %v17685_v5  ;;  %v16243_v5 = vld [vmem:[%s21623_s1 + $0x398] sm:$0xff]  }
 0x1b6   : > { %v15367_v12 = vadd.f32 %v12739_v59, %v17687_v62  ;;  %v12740_v19 = vpop.f32.mrb[84].mxu1  ;;  %14772 = vmatprep.subr.bf16.mxu1 %v16243_v5 }
 0x1b7   : > { %v12918_v13 = vpop.f32.mrb[48].mxu0  ;;  %v17803_v24 = vadd.f32 %v15361_v1, %v17737_v26  ;;  %v12741_v62 = vpop.f32.mrb[85].mxu1  ;;  %v2545_v1 = vld [vmem:[#allocation2 + $0x118] sm:$0xff]  ;;  %14773 = vmatpush3.bf16.msra.mxu1 %v16243_v5 }
 0x1b8   : > { %v12919_v15 = vpop.f32.mrb[49].mxu0  ;;  %v17811_v56 = vadd.f32 %v15367_v12, %v17742_v39  ;;  %v12743_v63 = vpop.f32.mrb[86].mxu1 }
 0x1b9   : > { %v17781_v25 = vadd.f32 %v12919_v15, %v12918_v13  ;;  %v12921_v50 = vpop.f32.mrb[50].mxu0  ;;  %v2539_v13 = vld [vmem:[#allocation2 + $0xe8] sm:$0xff]  ;;  %v12744_v54 = vpop.f32.mrb[87].mxu1 }
 0x1ba   : > { %v12922_v32 = vpop.f32.mrb[51].mxu0  ;;  %14747 = vmatmul.mubr.bf16.gmra.mrb[60].mxu1 %v2539_v13 }
 0x1bb   : > { %v17795_v15 = vadd.f32 %v12922_v32, %v12921_v50  ;;  %14750 = vmatprep.mubr.bf16.mxu1 %v2542_v40  ;;  %v12742_v40 = vadd.f32 %v12741_v62, %v12740_v19 }
 0x1bd   : > { %v15358_v13 = vadd.f32 %v12742_v40, %v17694_v61 }
 0x1be   : > { %v12746_v62 = vpop.f32.mrb[88].mxu1 }
 0x1bf   : > { %v12924_v50 = vpop.f32.mrb[52].mxu0  ;;  %v17818_v12 = vadd.f32 %v15358_v13, %v17744_v23  ;;  %v12747_v61 = vpop.f32.mrb[89].mxu1 }
 0x1c0   : > { %v12925_v32 = vpop.f32.mrb[53].mxu0 }
 0x1c1   : > { %v17805_v49 = vadd.f32 %v12925_v32, %v12924_v50  ;;  %v12927_v6 = vpop.f32.mrb[54].mxu0  ;;  %v12745_v50 = vadd.f32 %v12744_v54, %v12743_v63  ;;  %v12748_v63 = vadd.f32 %v12747_v61, %v12746_v62 }
 0x1c2   : > { %v12928_v59 = vpop.f32.mrb[55].mxu0  ;;  %14751 = vmatmul.mubr.bf16.gmra.mrb[64].mxu1 %v2545_v1  ;;  %v12749_v1 = vpop.f32.mrb[90].mxu1 }
 0x1c3   : > { %v17813_v26 = vadd.f32 %v12928_v59, %v12927_v6  ;;  %v15364_v32 = vadd.f32 %v12745_v50, %v17698_v52  ;;  %14754 = vmatprep.mubr.bf16.mxu1 %v2548_v57  ;;  %v12750_v52 = vpop.f32.mrb[91].mxu1  ;;  %v15373_v57 = vadd.f32 %v12748_v63, %v17709_v60 }
 0x1c4   : > { %v12751_v23 = vadd.f32 %v12750_v52, %v12749_v1  ;;  %v16576_v1 = vld [vmem:[#allocation2 + $0x190] sm:$0xff] }
 0x1c5   : > { %v17823_v44 = vadd.f32 %v15364_v32, %v17746_v11  ;;  %v17832_v11 = vadd.f32 %v15373_v57, %v17748_v48 }
 0x1c6   : > { %v15379_v5 = vadd.f32 %v12751_v23, %v17713_v18  ;;  %v12752_v32 = vpop.f32.mrb[92].mxu1 }
 0x1c7   : > { %v12930_v39 = vpop.f32.mrb[56].mxu0  ;;  %v12753_v60 = vpop.f32.mrb[93].mxu1 }
 0x1c8   : > { %v12931_v19 = vpop.f32.mrb[57].mxu0  ;;  %v17837_v62 = vadd.f32 %v15379_v5, %v17750_v46  ;;  %v12754_v61 = vadd.f32 %v12753_v60, %v12752_v32 }
 0x1c9   : > { %v17820_v6 = vadd.f32 %v12931_v19, %v12930_v39  ;;  %v12933_v59 = vpop.f32.mrb[58].mxu0 }
 0x1ca   : > { %v12934_v40 = vpop.f32.mrb[59].mxu0  ;;  %14755 = vmatmul.mubr.bf16.gmra.mrb[68].mxu1 %v17756_v37  ;;  %v12755_v37 = vpop.f32.mrb[94].mxu1 }
 0x1cb   : > { %v17825_v54 = vadd.f32 %v12934_v40, %v12933_v59  ;;  %14758 = vmatprep.mubr.bf16.mxu1 %v17759_v3  ;;  %v12756_v18 = vpop.f32.mrb[95].mxu1  ;;  %v15370_v3 = vadd.f32 %v12754_v61, %v17723_v17 }
 0x1cc   : > { %v12757_v63 = vadd.f32 %v12756_v18, %v12755_v37 }
 0x1cd   : > { %v17845_v46 = vadd.f32 %v15370_v3, %v17752_v47  ;;  %v16577_v47 = vld [vmem:[#allocation2] sm:$0xff] }
 0x1ce   : > { %v15376_v48 = vadd.f32 %v12757_v63, %v17727_v29  ;;  %v12758_v23 = vpop.f32.mrb[96].mxu1 }
 0x1cf   : > { %v12936_v13 = vpop.f32.mrb[60].mxu0  ;;  %v12759_v17 = vpop.f32.mrb[97].mxu1 }
 0x1d0   : > { %v12937_v50 = vpop.f32.mrb[61].mxu0 }
 0x1d1   : > { %v17834_v39 = vadd.f32 %v12937_v50, %v12936_v13  ;;  %v12939_v19 = vpop.f32.mrb[62].mxu0  ;;  %v17850_v50 = vadd.f32 %v15376_v48, %v17754_v36 }
 0x1d2   : > { %v12940_v59 = vpop.f32.mrb[63].mxu0  ;;  %14759 = vmatmul.mubr.bf16.gmra.mrb[72].mxu1 %v17766_v14  ;;  %v12761_v14 = vpop.f32.mrb[98].mxu1 }
 0x1d3   : > { %v17839_v40 = vadd.f32 %v12940_v59, %v12939_v19  ;;  %14762 = vmatprep.mubr.bf16.mxu1 %v16576_v1  ;;  %v12760_v19 = vadd.f32 %v12759_v17, %v12758_v23  ;;  %v12762_v29 = vpop.f32.mrb[99].mxu1 }
 0x1d4   : > { %v12763_v61 = vadd.f32 %v12762_v29, %v12761_v14 }
 0x1d5   : > { %v15385_v59 = vadd.f32 %v12760_v19, %v17652_v38 }
 0x1d6   : > { %v15391_v37 = vadd.f32 %v12763_v61, %v17655_v20  ;;  %v12764_v63 = vpop.f32.mrb[100].mxu1 }
 0x1d7   : > { %v12942_v52 = vpop.f32.mrb[64].mxu0  ;;  %v17857_v3 = vadd.f32 %v15385_v59, %v17762_v16 }
 0x1d8   : > { %v12943_v57 = vpop.f32.mrb[65].mxu0 }
 0x1d9   : > { %v17847_v5 = vadd.f32 %v12943_v57, %v12942_v52  ;;  %v12945_v13 = vpop.f32.mrb[66].mxu0  ;;  %v17862_v52 = vadd.f32 %v15391_v37, %v17764_v22  ;;  %v12765_v57 = vpop.f32.mrb[101].mxu1 }
 0x1da   : > { %v12946_v32 = vpop.f32.mrb[67].mxu0  ;;  %14763 = vmatmul.mubr.bf16.gmra.mrb[76].mxu1 %v16577_v47  ;;  %v12766_v38 = vadd.f32 %v12765_v57, %v12764_v63 }
 0x1db   : > { %v17852_v60 = vadd.f32 %v12946_v32, %v12945_v13  ;;  %v12767_v13 = vpop.f32.mrb[102].mxu1 }
 0x1dc   : > { %v12768_v32 = vpop.f32.mrb[103].mxu1  ;;  %v15382_v20 = vadd.f32 %v12766_v38, %v17657_v51 }
 0x1dd   : > { %v12769_v19 = vadd.f32 %v12768_v32, %v12767_v13 }
 0x1de   : > { %v17869_v29 = vadd.f32 %v15382_v20, %v17769_v28  ;;  %v12770_v61 = vpop.f32.mrb[104].mxu1 }
 0x1df   : > { %v12948_v18 = vpop.f32.mrb[68].mxu0  ;;  %v15388_v16 = vadd.f32 %v12769_v19, %v17659_v4 }
 0x1e0   : > { %v12949_v36 = vpop.f32.mrb[69].mxu0 }
 0x1e1   : > { %v17859_v48 = vadd.f32 %v12949_v36, %v12948_v18  ;;  %v12951_v1 = vpop.f32.mrb[70].mxu0  ;;  %v17874_v37 = vadd.f32 %v15388_v16, %v17771_v30  ;;  %v12771_v18 = vpop.f32.mrb[105].mxu1 }
 0x1e2   : > { %v12952_v23 = vpop.f32.mrb[71].mxu0  ;;  %v12772_v63 = vadd.f32 %v12771_v18, %v12770_v61 }
 0x1e3   : > { %v17864_v17 = vadd.f32 %v12952_v23, %v12951_v1  ;;  %v12773_v1 = vpop.f32.mrb[106].mxu1 }
 0x1e4   : > { %v12774_v57 = vpop.f32.mrb[107].mxu1  ;;  %v15397_v4 = vadd.f32 %v12772_v63, %v17661_v21  ;;  %v16246_v63 = vld [vmem:[%s21623_s1 + $0x348] sm:$0xff]  }
 0x1e5   : > { %v12775_v23 = vadd.f32 %v12774_v57, %v12773_v1  ;;  %12992 = vmatprep.subr.bf16.mxu0 %v16246_v63 }
 0x1e6   : > { %v17881_v13 = vadd.f32 %v15397_v4, %v17773_v45  ;;  %v12776_v20 = vpop.f32.mrb[108].mxu1 }
 0x1e7   : > { %v12954_v14 = vpop.f32.mrb[72].mxu0  ;;  %v15403_v28 = vadd.f32 %v12775_v23, %v17663_v41 }
 0x1e8   : > { %v12955_v59 = vpop.f32.mrb[73].mxu0 }
 0x1e9   : > { %v17871_v22 = vadd.f32 %v12955_v59, %v12954_v14  ;;  %v12957_v47 = vpop.f32.mrb[74].mxu0  ;;  %v17886_v16 = vadd.f32 %v15403_v28, %v17775_v34  ;;  %v12777_v14 = vpop.f32.mrb[109].mxu1  ;;  %v16247_v34 = vld [vmem:[%s21623_s1 + $0x308] sm:$0xff]   ;;  %v16249_v28 = vld [vmem:[%s21623_s1 + $0x350] sm:$0xff]  }
 0x1ea   : > { %v12958_v36 = vpop.f32.mrb[75].mxu0  ;;  %v12778_v61 = vadd.f32 %v12777_v14, %v12776_v20  ;;  %12993 = vmatpush3.bf16.msra.mxu0 %v16247_v34  ;;  %v16251_v14 = vld [vmem:[%s21623_s1 + $0x358] sm:$0xff]  }
 0x1eb   : > { %v17876_v51 = vadd.f32 %v12958_v36, %v12957_v47  ;;  %v12779_v47 = vpop.f32.mrb[110].mxu1  ;;  %12994 = vmatprep.subr.bf16.mxu0 %v16249_v28 }
 0x1ec   : > { %v12780_v18 = vpop.f32.mrb[111].mxu1  ;;  %v15394_v41 = vadd.f32 %v12778_v61, %v17665_v7 }
 0x1ed   : > { %v12781_v36 = vadd.f32 %v12780_v18, %v12779_v47 }
 0x1ee   : > { %v17896_v1 = vadd.f32 %v15394_v41, %v17777_v27  ;;  %v12782_v57 = vpop.f32.mrb[112].mxu1  ;;  %v16250_v27 = vld [vmem:[%s21623_s1 + $0x310] sm:$0xff]  }
 0x1ef   : > { %v12960_v38 = vpop.f32.mrb[76].mxu0  ;;  %v15400_v45 = vadd.f32 %v12781_v36, %v17667_v31  ;;  %v12783_v7 = vpop.f32.mrb[113].mxu1  ;;  %12995 = vmatpush3.bf16.msra.mxu0 %v16250_v27  ;;  %v16255_v36 = vld [vmem:[%s21623_s1 + $0x320] sm:$0xff]  }
 0x1f0   : > { %v12961_v32 = vpop.f32.mrb[77].mxu0  ;;  %v12784_v23 = vadd.f32 %v12783_v7, %v12782_v57  ;;  %v12785_v31 = vpop.f32.mrb[114].mxu1  ;;  %12996 = vmatprep.subr.bf16.mxu0 %v16251_v14  ;;  %v16248_v57 = vld [vmem:[%s21623_s1 + $0x3a0] sm:$0xff]   ;;  %v16256_v7 = vld [vmem:[%s21623_s1 + $0x368] sm:$0xff]  }
 0x1f1   : > { %v17883_v30 = vadd.f32 %v12961_v32, %v12960_v38  ;;  %v12963_v19 = vpop.f32.mrb[78].mxu0  ;;  %v17902_v4 = vadd.f32 %v15400_v45, %v17779_v42  ;;  %v12786_v38 = vpop.f32.mrb[115].mxu1  ;;  %14774 = vmatprep.subr.bf16.mxu1 %v16248_v57 }
 0x1f2   : > { %v12964_v59 = vpop.f32.mrb[79].mxu0  ;;  %v15409_v32 = vadd.f32 %v12784_v23, %v17669_v0  ;;  %v12787_v20 = vadd.f32 %v12786_v38, %v12785_v31  ;;  %14775 = vmatpush3.bf16.msra.mxu1 %v16248_v57 }
 0x1f3   : > { %v17888_v21 = vadd.f32 %v12964_v59, %v12963_v19  ;;  %v16252_v59 = vld [vmem:[%s21623_s1 + $0x318] sm:$0xff]  }
 0x1f4   : > { %v15415_v42 = vadd.f32 %v12787_v20, %v17671_v33  ;;  %v17913_v19 = vadd.f32 %v15409_v32, %v17781_v25  ;;  %12997 = vmatpush3.bf16.msra.mxu0 %v16252_v59  ;;  %v16254_v25 = vld [vmem:[%s21623_s1 + $0x360] sm:$0xff]   ;;  %v16259_v20 = vld [vmem:[%s21623_s1 + $0x370] sm:$0xff]  }
 0x1f5   : > { %12998 = vmatprep.subr.bf16.mxu0 %v16254_v25  ;;  %v16258_v25 = vld [vmem:[%s21623_s1 + $0x3b0] sm:$0xff]  }
 0x1f6   : > { %v17922_v61 = vadd.f32 %v15415_v42, %v17795_v15  ;;  %v12788_v0 = vpop.f32.mrb[116].mxu1  ;;  %v16260_v42 = vld [vmem:[%s21623_s1 + $0x330] sm:$0xff]  }
 0x1f7   : > { %v12789_v47 = vpop.f32.mrb[117].mxu1 }
 0x1f8   : > { %v12790_v18 = vadd.f32 %v12789_v47, %v12788_v0  ;;  %v12791_v33 = vpop.f32.mrb[118].mxu1  ;;  %12999 = vmatpush3.bf16.msra.mxu0 %v16255_v36  ;;  %v16261_v47 = vld [vmem:[%s21623_s1 + $0x378] sm:$0xff]  }
 0x1f9   : > { %v12792_v41 = vpop.f32.mrb[119].mxu1  ;;  %13000 = vmatprep.subr.bf16.mxu0 %v16256_v7 }
 0x1fa   : > { %v15406_v45 = vadd.f32 %v12790_v18, %v17673_v58  ;;  %v12793_v63 = vadd.f32 %v12792_v41, %v12791_v33 }
 0x1fc   : > { %v15412_v15 = vadd.f32 %v12793_v63, %v17675_v35  ;;  %v17933_v34 = vadd.f32 %v15406_v45, %v17805_v49  ;;  %v16257_v35 = vld [vmem:[%s21623_s1 + $0x328] sm:$0xff]  }
 0x1fd   : > { %13001 = vmatpush3.bf16.msra.mxu0 %v16257_v35 }
 0x1fe   : > { %v17942_v23 = vadd.f32 %v15412_v15, %v17813_v26  ;;  %v12794_v58 = vpop.f32.mrb[120].mxu1  ;;  %v16253_v26 = vld [vmem:[%s21623_s1 + $0x3a8] sm:$0xff]   ;;  %13002 = vmatprep.subr.bf16.mxu0 %v16259_v20  ;;  %v16263_v15 = vld [vmem:[%s21623_s1 + $0x3b8] sm:$0xff]  }
 0x1ff   : > { %v12795_v31 = vpop.f32.mrb[121].mxu1  ;;  %14776 = vmatprep.subr.bf16.mxu1 %v16253_v26 }
 0x200   : > { %v12796_v49 = vadd.f32 %v12795_v31, %v12794_v58  ;;  %v12797_v28 = vpop.f32.mrb[122].mxu1  ;;  %14777 = vmatpush3.bf16.msra.mxu1 %v16253_v26 }
 0x201   : > { %v12798_v38 = vpop.f32.mrb[123].mxu1  ;;  %13003 = vmatpush3.bf16.msra.mxu0 %v16260_v42  ;;  %14778 = vmatprep.subr.bf16.mxu1 %v16258_v25 }
 0x202   : > { %v15421_v27 = vadd.f32 %v12796_v49, %v17677_v10  ;;  %v12799_v32 = vadd.f32 %v12798_v38, %v12797_v28  ;;  %13004 = vmatprep.subr.bf16.mxu0 %v16261_v47 }
 0x204   : > { %v15427_v14 = vadd.f32 %v12799_v32, %v17679_v8  ;;  %v17959_v59 = vadd.f32 %v15421_v27, %v17820_v6  ;;  %v16262_v8 = vld [vmem:[%s21623_s1 + $0x338] sm:$0xff]   ;;  %14779 = vmatpush3.bf16.msra.mxu1 %v16258_v25 }
 0x205   : > { %13005 = vmatpush3.bf16.msra.mxu0 %v16262_v8  ;;  %14780 = vmatprep.subr.bf16.mxu1 %v16263_v15 }
 0x206   : > { %v17962_v10 = vadd.f32 %v15427_v14, %v17825_v54  ;;  %v12800_v0 = vpop.f32.mrb[124].mxu1 }
 0x207   : > { %v12801_v18 = vpop.f32.mrb[125].mxu1 }
 0x208   : > { %v12802_v33 = vadd.f32 %v12801_v18, %v12800_v0  ;;  %v12803_v6 = vpop.f32.mrb[126].mxu1  ;;  %14781 = vmatpush3.bf16.msra.mxu1 %v16263_v15  ;;  %v21988_v0 = vld [vmem:[#allocation37_spill] sm:$0xff] }
 0x209   : > { %v12804_v41 = vpop.f32.mrb[127].mxu1 }
 0x20a   : > { %v15418_v54 = vadd.f32 %v12802_v33, %v17681_v9  ;;  %v12805_v36 = vadd.f32 %v12804_v41, %v12803_v6  ;;  %v18003_v33 = vld [vmem:[%s21623_s1 + $0x2c0] sm:$0xff]  }
 0x20b   : > { %14814 = vmatprep.subr.bf16.mxu1 %v18003_v33 }
 0x20c   : > { %v15424_v45 = vadd.f32 %v12805_v36, %v17683_v53  ;;  %v17976_v63 = vadd.f32 %v15418_v54, %v17834_v39 }
 0x20e   : > { %v17982_v57 = vadd.f32 %v15424_v45, %v17839_v40  ;;  %v12806_v7 = vpop.f32.mrb[128].mxu1 }
 0x20f   : > { %v12807_v58 = vpop.f32.mrb[129].mxu1 }
 0x210   : > { %v12808_v9 = vadd.f32 %v12807_v58, %v12806_v7  ;;  %v12809_v31 = vpop.f32.mrb[130].mxu1 }
 0x211   : > { %v12810_v35 = vpop.f32.mrb[131].mxu1 }
 0x212   : > { %v15433_v49 = vadd.f32 %v12808_v9, %v17689_v43  ;;  %v12811_v53 = vadd.f32 %v12810_v35, %v12809_v31  ;;  %v21991_v31 = vld [vmem:[#allocation40_spill] sm:$0xff] }
 0x214   : > { %v15439_v39 = vadd.f32 %v12811_v53, %v17691_v2  ;;  %v17987_v28 = vadd.f32 %v15433_v49, %v17847_v5  ;;  %v21992_v53 = vld [vmem:[#allocation41_spill] sm:$0xff] }
 0x216   : > { %v17990_v38 = vadd.f32 %v15439_v39, %v17852_v60  ;;  %v12812_v40 = vpop.f32.mrb[132].mxu1 }
 0x217   : > { %v12813_v27 = vpop.f32.mrb[133].mxu1 }
 0x218   : > { %v12814_v32 = vadd.f32 %v12813_v27, %v12812_v40  ;;  %v12815_v26 = vpop.f32.mrb[134].mxu1 }
 0x219   : > { %v12816_v20 = vpop.f32.mrb[135].mxu1 }
 0x21a   : > { %v15430_v42 = vadd.f32 %v12814_v32, %v17696_v55  ;;  %v12817_v14 = vadd.f32 %v12816_v20, %v12815_v26  ;;  %v21989_v55 = vld [vmem:[#allocation38_spill] sm:$0xff]  ;;  %v16280_v32 = vld [vmem:[%s21623_s1 + $0x280] sm:$0xff]  }
 0x21b   : > { %13126 = vmatprep.subr.bf16.mxu0 %v16280_v32 }
 0x21c   : > { %v15436_v47 = vadd.f32 %v12817_v14, %v21988_v0  ;;  %v17995_v43 = vadd.f32 %v15430_v42, %v17859_v48  ;;  %v21990_v48 = vld [vmem:[#allocation39_spill] sm:$0xff] }
 0x21e   : > { %v17998_v2 = vadd.f32 %v15436_v47, %v17864_v17  ;;  %v12818_v5 = vpop.f32.mrb[136].mxu1 }
 0x21f   : > { %v12819_v18 = vpop.f32.mrb[137].mxu1 }
 0x220   : > { %v12820_v60 = vadd.f32 %v12819_v18, %v12818_v5  ;;  %v12821_v8 = vpop.f32.mrb[138].mxu1 }
 0x221   : > { %v12822_v6 = vpop.f32.mrb[139].mxu1 }
 0x222   : > { %v15445_v25 = vadd.f32 %v12820_v60, %v21989_v55  ;;  %v12823_v41 = vadd.f32 %v12822_v6, %v12821_v8 }
 0x224   : > { %v15451_v54 = vadd.f32 %v12823_v41, %v21990_v48  ;;  %v18009_v17 = vadd.f32 %v15445_v25, %v17871_v22 }
 0x226   : > { %v18012_v36 = vadd.f32 %v15451_v54, %v17876_v51  ;;  %v12824_v45 = vpop.f32.mrb[140].mxu1  ;;  %v18025_v51 = vld [vmem:[%s21624_s2] ss:$0 sm:$0xff] }
 0x227   : > { %v12825_v15 = vpop.f32.mrb[141].mxu1 }
 0x228   : > { %v12826_v7 = vadd.f32 %v12825_v15, %v12824_v45  ;;  %v12827_v58 = vpop.f32.mrb[142].mxu1 }
 0x229   : > { %v12828_v9 = vpop.f32.mrb[143].mxu1 }
 0x22a   : > { %v15442_v35 = vadd.f32 %v12826_v7, %v21991_v31  ;;  %v12829_v49 = vadd.f32 %v12828_v9, %v12827_v58 }
 0x22c   : > { %v15448_v39 = vadd.f32 %v12829_v49, %v21992_v53  ;;  %v18017_v40 = vadd.f32 %v15442_v35, %v17883_v30 }
 0x22e   : > { %v18020_v27 = vadd.f32 %v15448_v39, %v17888_v21 }
 0x26e   : > { %v14736_v22 = vpop.f32.mrb[48].mxu1 }
 0x26f   : > { %v15360_v26 = vadd.f32 %v17818_v12, %v14736_v22  ;;  %v2952_v20 = vpop.f32.mrb[49].mxu1 }
 0x270   : > { %v15363_v42 = vadd.f32 %v17803_v24, %v2952_v20  ;;  %v14737_v30 = vpop.f32.mrb[50].mxu1 }
 0x271   : > { %v3120_v21 = vadd.f32 %v15360_v26, %v18025_v51  ;;  %v15366_v14 = vadd.f32 %v17823_v44, %v14737_v30  ;;  %v2955_v0 = vpop.f32.mrb[51].mxu1 }
 0x272   : > { %v3118_v47 = vadd.f32 %v15363_v42, %v18025_v51  ;;  %v15369_v5 = vadd.f32 %v17811_v56, %v2955_v0 }
 0x273   : > { %v3121_v18 = vadd.f32 %v15366_v14, %v18025_v51  ;;  %v3152_v8 = vmax.f32 %v3120_v21, 0.0 }
 0x274   : > { %v3119_v60 = vadd.f32 %v15369_v5, %v18025_v51  ;;  %v3150_v6 = vmax.f32 %v3118_v47, 0.0 }
 0x275   : > { %v3153_v12 = vmax.f32 %v3121_v18, 0.0 }
 0x276   : > { %v3151_v55 = vmax.f32 %v3119_v60, 0.0  ;;  %v14740_v24 = vpop.f32.mrb[52].mxu1 }
 0x277   : > { %v3183_v25 = vpack.c.bf16 %v3153_v12, %v3152_v8  ;;  %v15372_v41 = vadd.f32 %v17845_v46, %v14740_v24  ;;  %v2968_v48 = vpop.f32.mrb[53].mxu1 }
 0x278   : > { %v3182_v54 = vpack.c.bf16 %v3151_v55, %v3150_v6  ;;  %v15375_v44 = vadd.f32 %v17832_v11, %v2968_v48  ;;  %v14741_v45 = vpop.f32.mrb[54].mxu1  ;;  %v21999_v48 = vld [vmem:[#allocation26_spill] sm:$0xff] }
 0x279   : > { %v3206_v15 = vshrl.u32 %v3183_v25, 16  ;;  %v3209_v7 = vshll.u32 %v3183_v25, 16  ;;  %3455 = vst.msk [vmem:[#allocation2 + $0x38] sm:$0xff] %vm21993_vm15, %v3183_v25  ;;  %v3124_v56 = vadd.f32 %v15372_v41, %v18025_v51  ;;  %v15378_v58 = vadd.f32 %v17850_v50, %v14741_v45  ;;  %v2971_v9 = vpop.f32.mrb[55].mxu1  ;;  %vm22001_vm15 = vmmov %vm21994_vm12 }
 0x27a   : > { %v3199_v31 = vshrl.u32 %v3182_v54, 16  ;;  %v3202_v35 = vshll.u32 %v3182_v54, 16  ;;  %3454 = vst.msk [vmem:[#allocation2 + $0x20] sm:$0xff] %vm21994_vm12, %v3182_v54  ;;  %v3122_v46 = vadd.f32 %v15375_v44, %v18025_v51  ;;  %v15381_v49 = vadd.f32 %v17837_v62, %v2971_v9 }
 0x27b   : > { %v3208_v53 = vrot.slane %v3206_v15, 7  ;;  %v3125_v11 = vadd.f32 %v15378_v58, %v18025_v51  ;;  %v3344_v20 = vrot.slane %v3209_v7, 1  ;;  %v3156_v42 = vmax.f32 %v3124_v56, 0.0 }
 0x27c   : > { %v3201_v39 = vrot.slane %v3199_v31, 7  ;;  %v3342_v22 = vrot.slane %v3202_v35, 1  ;;  %v3123_v32 = vadd.f32 %v15381_v49, %v18025_v51  ;;  %v3154_v14 = vmax.f32 %v3122_v46, 0.0 }
 0x27d   : > { %v3211_v26 = vor.u32 %v3209_v7, %v3208_v53  ;;  %v3157_v50 = vmax.f32 %v3125_v11, 0.0  ;;  %v3346_v49 = vor.u32 %v3344_v20, %v3206_v15 }
 0x27e   : > { %v3204_v30 = vor.u32 %v3202_v35, %v3201_v39  ;;  %v3343_v21 = vor.u32 %v3342_v22, %v3199_v31  ;;  %v3155_v0 = vmax.f32 %v3123_v32, 0.0  ;;  %v14744_v47 = vpop.f32.mrb[56].mxu1 }
 0x27f   : > { %v3212_v5 = vsel %vm21995_vm2, %v3201_v39, %v3211_v26  ;;  %v18049_v18 = vpack.c.bf16 %v3157_v50, %v3156_v42  ;;  %v15384_v62 = vadd.f32 %v17869_v29, %v14744_v47  ;;  %v2984_v60 = vpop.f32.mrb[57].mxu1  ;;  %vm22002_vm2 = vmmov %vm21994_vm12 }
 0x280   : > { %v3341_v12 = vsel %vm17322_vm1, 0, %v3204_v30  ;;  %v3345_v6 = vsel %vm21997_vm11, %v3343_v21, %v3344_v20  ;;  %v3407_v24 = vsel %vm17413_vm10, %v3212_v5, 0  ;;  %v3184_v25 = vpack.c.bf16 %v3155_v0, %v3154_v14  ;;  %v14745_v41 = vpop.f32.mrb[58].mxu1  ;;  %vm22003_vm11 = vmmov %vm22002_vm2 }
 0x281   : > { %v3406_v54 = vsel %vm17346_vm6, %v3341_v12, 0  ;;  %v3422_v45 = vsel %vm17163_vm13, %v3345_v6, 0  ;;  %3439 = vst.msk [vmem:[#allocation2 + $0x30] sm:$0xff] %vm22001_vm15, %v3407_v24  ;;  %v3222_v29 = vshrl.u32 %v18049_v18, 16  ;;  %v3225_v7 = vshll.u32 %v18049_v18, 16  ;;  %v2987_v56 = vpop.f32.mrb[59].mxu1  ;;  %vm22004_vm6 = vmmov %vm22002_vm2 }
 0x282   : > { %3457 = vst.msk [vmem:[#allocation2 + $0x68] sm:$0xff] %vm21994_vm12, %v18049_v18  ;;  %v18066_v58 = vld [vmem:[#allocation2 + $0x20] sm:$0xff]  ;;  %v3214_v9 = vshrl.u32 %v3184_v25, 16  ;;  %v3217_v31 = vshll.u32 %v3184_v25, 16  ;;  %v3128_v35 = vadd.f32 %v15384_v62, %v18025_v51  ;;  %v15387_v46 = vadd.f32 %v17857_v3, %v2984_v60 }
 0x283   : > { %3438 = vst.msk [vmem:[#allocation2 + $0x18] sm:$0xff] %vm22002_vm2, %v3406_v54  ;;  %3811 = vmatprep.mubr.bf16.mxu0 %v18066_v58  ;;  %v18076_v11 = vrot.slane %v3222_v29, 7  ;;  %v15390_v39 = vadd.f32 %v17874_v37, %v14745_v41  ;;  %v15393_v22 = vadd.f32 %v17862_v52, %v2987_v56  ;;  %v3350_v32 = vrot.slane %v3225_v7, 1  ;;  %v16281_v56 = vld [vmem:[%s21623_s1 + $0x240] sm:$0xff]  }
 0x284   : > { %3470 = vst.msk [vmem:[#allocation2 + $0x28] sm:$0xff] %vm22003_vm11, %v3422_v45  ;;  %v3216_v26 = vrot.slane %v3214_v9, 7  ;;  %v3347_v42 = vrot.slane %v3217_v31, 1  ;;  %v3126_v50 = vadd.f32 %v15387_v46, %v18025_v51  ;;  %v3160_v21 = vmax.f32 %v3128_v35, 0.0  ;;  %v22012_v35 = vld [vmem:[#allocation17_spill] sm:$0xff] }
 0x285   : > { %3456 = vst.msk [vmem:[#allocation2 + $0x50] sm:$0xff] %vm22004_vm6, %v3184_v25  ;;  %v3227_v30 = vor.u32 %v3225_v7, %v18076_v11  ;;  %v3129_v3 = vadd.f32 %v15390_v39, %v18025_v51  ;;  %v3127_v15 = vadd.f32 %v15393_v22, %v18025_v51  ;;  %vm22005_vm6 = vsmask.f32 7424 }
 0x286   : > { %v3219_v20 = vor.u32 %v3217_v31, %v3216_v26  ;;  %v3348_v14 = vsel %vm22005_vm6, %v3346_v49, %v3347_v42  ;;  %v3349_v0 = vor.u32 %v3347_v42, %v3214_v9  ;;  %v3158_v47 = vmax.f32 %v3126_v50, 0.0  ;;  %vm22009_vm2 = vmmov %vm22005_vm6 }
 0x287   : > { %vm22006_vm15 = vsmask.f32 256  ;;  %v3423_v62 = vsel %vm17201_vm0, %v3348_v14, 0  ;;  %v3161_v60 = vmax.f32 %v3129_v3, 0.0  ;;  %v3159_v12 = vmax.f32 %v3127_v15, 0.0  ;;  %vm22013_vm6 = vmmov %vm22003_vm11  ;;  %v18118_v3 = vld [vmem:[#allocation2 + $0x38] sm:$0xff] }
 0x288   : > { %v3228_v52 = vsel %vm22006_vm15, %v3216_v26, %v3227_v30  ;;  %vm22008_vm12 = vmmov %vm22006_vm15  ;;  %v3351_v25 = vsel %vm22009_vm2, %v3349_v0, %v3350_v32  ;;  %3471 = vst.msk [vmem:[#allocation2 + $0x40] sm:$0xff] %vm22003_vm11, %v3423_v62  ;;  %v16282_v26 = vld [vmem:[%s21623_s1 + $0x288] sm:$0xff]  }
 0x289   : > { %v3220_v24 = vsel %vm22008_vm12, %v3208_v53, %v3219_v20  ;;  %v3409_v54 = vsel %vm17524_vm8, %v3228_v52, 0  ;;  %v3424_v53 = vsel %vm17218_vm7, %v3351_v25, 0  ;;  %v18102_v46 = vpack.c.bf16 %v3161_v60, %v3160_v21  ;;  %vm22014_vm15 = vmmov %vm22013_vm6 }
 0x28a   : > { %v3408_v31 = vsel %vm17469_vm3, %v3220_v24, 0  ;;  %3441 = vst.msk [vmem:[#allocation2 + $0x60] sm:$0xff] %vm22013_vm6, %v3409_v54  ;;  %v3186_v49 = vpack.c.bf16 %v3159_v12, %v3158_v47  ;;  %v18104_v22 = vld [vmem:[#allocation2 + $0x18] sm:$0xff]  ;;  %vm22015_vm12 = vmmov %vm22013_vm6  ;;  %v16283_v47 = vld [vmem:[%s21623_s1 + $0x248] sm:$0xff]  }
 0x28b   : > { %3440 = vst.msk [vmem:[#allocation2 + $0x48] sm:$0xff] %vm22014_vm15, %v3408_v31  ;;  %3812 = vmatmul.mubr.bf16.vlgmr.msra.gmra.mrb[80].mxu0 %v18104_v22  ;;  %v3238_v15 = vshrl.u32 %v18102_v46, 16  ;;  %v3241_v20 = vshll.u32 %v18102_v46, 16  ;;  %vm22016_vm2 = vmmov %vm22013_vm6  ;;  %vm22018_vm6 = vsmask.f32 7424 }
 0x28c   : > { %3472 = vst.msk [vmem:[#allocation2 + $0x58] sm:$0xff] %vm22015_vm12, %v3424_v53  ;;  %v3230_v14 = vshrl.u32 %v3186_v49, 16  ;;  %v3233_v0 = vshll.u32 %v3186_v49, 16  ;;  %vm22017_vm11 = vmmov %vm22016_vm2  ;;  %3819 = vmatprep.mubr.bf16.mxu0 %v18118_v3  ;;  %13127 = vmatpush3.bf16.msra.mxu0 %v16281_v56  ;;  %vm22020_vm15 = vsmask.f32 256 }
 0x28d   : > { %v14748_v37 = vpop.f32.mrb[60].mxu1  ;;  %3459 = vst.msk [vmem:[#allocation2 + $0x98] sm:$0xff] %vm22016_vm2, %v18102_v46  ;;  %v18137_v52 = vrot.slane %v3238_v15, 7  ;;  %13128 = vmatprep.subr.bf16.mxu0 %v16282_v26  ;;  %vm22021_vm12 = vmmov %vm22020_vm15 }
 0x28e   : > { %v3000_v6 = vpop.f32.mrb[61].mxu1  ;;  %v15396_v45 = vadd.f32 %v17896_v1, %v14748_v37  ;;  %v18106_v1 = vld [vmem:[#allocation2 + $0x28] sm:$0xff]  ;;  %3458 = vst.msk [vmem:[#allocation2 + $0x80] sm:$0xff] %vm22017_vm11, %v3186_v49  ;;  %v3352_v37 = vor.u32 %v3350_v32, %v3222_v29  ;;  %v3232_v62 = vrot.slane %v3230_v14, 7  ;;  %v3353_v60 = vrot.slane %v3233_v0, 1  ;;  %vm22022_vm11 = vmmov %vm22018_vm6 }
 0x28f   : > { %v14749_v7 = vpop.f32.mrb[62].mxu1  ;;  %v15399_v50 = vadd.f32 %v17881_v13, %v3000_v6  ;;  %14782 = vmatprep.mubr.bf16.mxu1 %v18106_v1  ;;  %v18141_v29 = vld [vmem:[#allocation2 + $0x40] sm:$0xff]  ;;  %v16265_v32 = vld [vmem:[%s21623_s1 + $0x2c8] sm:$0xff]  }
 0x290   : > { %v3003_v39 = vpop.f32.mrb[63].mxu1  ;;  %v3132_v42 = vadd.f32 %v15396_v45, %v18025_v51  ;;  %v15402_v30 = vadd.f32 %v17902_v4, %v14749_v7  ;;  %v3243_v45 = vor.u32 %v3241_v20, %v18137_v52  ;;  %v3356_v7 = vrot.slane %v3241_v20, 1  ;;  %v22019_v49 = vld [vmem:[#allocation18_spill] sm:$0xff]  ;;  %14783 = vmatmul.mubr.bf16.vlgmr.msra.gmra.mrb[144].mxu1 %v18141_v29  ;;  %13129 = vmatpush3.bf16.msra.mxu0 %v16283_v47  ;;  %v16287_v47 = vld [vmem:[%s21623_s1 + $0x250] sm:$0xff]  }
 0x291   : > { %v15405_v21 = vadd.f32 %v17886_v16, %v3003_v39  ;;  %v3130_v13 = vadd.f32 %v15399_v50, %v18025_v51  ;;  %v3235_v56 = vor.u32 %v3233_v0, %v3232_v62  ;;  %v3354_v31 = vsel %vm22018_vm6, %v3352_v37, %v3353_v60  ;;  %14815 = vmatpush3.bf16.msra.mxu1 %v18003_v33  ;;  %v22023_v37 = vld [vmem:[#allocation3_spill] sm:$0xff] }
 0x292   : > { %v3133_v16 = vadd.f32 %v15402_v30, %v18025_v51  ;;  %v3164_v12 = vmax.f32 %v3132_v42, 0.0  ;;  %v3355_v53 = vor.u32 %v3353_v60, %v3230_v14  ;;  %v3425_v39 = vsel %vm17247_vm9, %v3354_v31, 0  ;;  %v16286_v30 = vld [vmem:[%s21623_s1 + $0x290] sm:$0xff]   ;;  %v22025_v60 = vld [vmem:[#allocation4_spill] sm:$0xff]  ;;  %14816 = vmatprep.subr.bf16.mxu1 %v16265_v32 }
 0x293   : > { %v3131_v4 = vadd.f32 %v15405_v21, %v18025_v51  ;;  %v3162_v6 = vmax.f32 %v3130_v13, 0.0  ;;  %v3236_v21 = vsel %vm22020_vm15, %v18076_v11, %v3235_v56  ;;  %v3244_v20 = vsel %vm22021_vm12, %v3232_v62, %v3243_v45  ;;  %3473 = vst.msk [vmem:[#allocation2 + $0x70] sm:$0xff] %vm22016_vm2, %v3425_v39  ;;  %vm22027_vm12 = vmmov %vm22016_vm2  ;;  %v18179_v33 = vld [vmem:[#allocation2 + $0x50] sm:$0xff]  ;;  %13130 = vmatprep.subr.bf16.mxu0 %v16286_v30 }
 0x294   : > { %v3165_v24 = vmax.f32 %v3133_v16, 0.0  ;;  %v18161_v16 = vld [vmem:[#allocation2 + $0x30] sm:$0xff]  ;;  %v3357_v11 = vsel %vm22022_vm11, %v3355_v53, %v3356_v7  ;;  %vm22024_vm6 = vnez %v22023_v37  ;;  %vm22026_vm15 = vnez %v22025_v60  ;;  %13131 = vmatpush3.bf16.msra.mxu0 %v16287_v47  ;;  %v22072_v60 = vld [vmem:[#allocation25_spill] sm:$0xff] }
 0x295   : > { %v3163_v25 = vmax.f32 %v3131_v4, 0.0  ;;  %v14752_v54 = vpop.f32.mrb[64].mxu1  ;;  %v18163_v4 = vld [vmem:[#allocation2 + $0x58] sm:$0xff]  ;;  %v3410_v62 = vsel %vm22024_vm6, %v3236_v21, 0  ;;  %3820 = vmatmul.mubr.bf16.gmra.mrb[84].mxu0 %v18161_v16  ;;  %v3358_v21 = vor.u32 %v3356_v7, %v3238_v15  ;;  %14817 = vmatpush3.bf16.msra.mxu1 %v16265_v32  ;;  %vm22040_vm6 = vcmask 523264  }
 0x296   : > { %v3016_v18 = vpop.f32.mrb[65].mxu1  ;;  %v18148_v26 = vpack.c.bf16 %v3165_v24, %v3164_v12  ;;  %v15408_v14 = vadd.f32 %v17933_v34, %v14752_v54  ;;  %v3411_v34 = vsel %vm22026_vm15, %v3244_v20, 0  ;;  %14786 = vmatprep.mubr.bf16.mxu1 %v18163_v4  ;;  %v16266_v12 = vld [vmem:[%s21623_s1 + $0x2d0] sm:$0xff]   ;;  %3827 = vmatprep.mubr.bf16.mxu0 %v18179_v33  ;;  %vm22031_vm15 = vmmov %vm22016_vm2 }
 0x297   : > { %v3188_v42 = vpack.c.bf16 %v3163_v25, %v3162_v6  ;;  %v14753_v50 = vpop.f32.mrb[66].mxu1  ;;  %v15411_v0 = vadd.f32 %v17913_v19, %v3016_v18  ;;  %v16288_v6 = vld [vmem:[%s21623_s1 + $0x298] sm:$0xff]   ;;  %v22028_v24 = vld [vmem:[#allocation19_spill] sm:$0xff]  ;;  %3443 = vst.msk [vmem:[#allocation2 + $0x90] sm:$0xff] %vm22016_vm2, %v3411_v34  ;;  %14818 = vmatprep.subr.bf16.mxu1 %v16266_v12 }
 0x298   : > { %v3019_v13 = vpop.f32.mrb[67].mxu1  ;;  %v21762_v19 = vshrl.u32 %v18148_v26, 16  ;;  %3461 = vst.msk [vmem:[#allocation2 + $0xc8] sm:$0xff] %vm22027_vm12, %v18148_v26  ;;  %vm22029_vm11 = vnez %v22028_v24  ;;  %vm22030_vm12 = vmmov %vm22016_vm2  ;;  %v3257_v54 = vshll.u32 %v18148_v26, 16  ;;  %v3136_v18 = vadd.f32 %v15408_v14, %v18025_v51  ;;  %13132 = vmatprep.subr.bf16.mxu0 %v16288_v6  ;;  %v16267_v6 = vld [vmem:[%s21623_s1 + $0x2d8] sm:$0xff]  }
 0x299   : > { %3460 = vst.msk [vmem:[#allocation2 + $0xb0] sm:$0xff] %vm22016_vm2, %v3188_v42  ;;  %v3426_v25 = vsel %vm22029_vm11, %v3357_v11, 0  ;;  %v3246_v45 = vshrl.u32 %v3188_v42, 16  ;;  %v3249_v56 = vshll.u32 %v3188_v42, 16  ;;  %v3134_v53 = vadd.f32 %v15411_v0, %v18025_v51  ;;  %14819 = vmatpush3.bf16.msra.mxu1 %v16266_v12  ;;  %v18257_v12 = vld [vmem:[%s21623_s1 + $0x2e0] sm:$0xff]  }
 0x29a   : > { %3442 = vst.msk [vmem:[#allocation2 + $0x78] sm:$0xff] %vm22030_vm12, %v3410_v62  ;;  %v18196_v31 = vrot.slane %v21762_v19, 7  ;;  %v15414_v39 = vadd.f32 %v17942_v23, %v14753_v50  ;;  %v15417_v11 = vadd.f32 %v17922_v61, %v3019_v13  ;;  %v16289_v62 = vld [vmem:[%s21623_s1 + $0x258] sm:$0xff]   ;;  %v3362_v34 = vrot.slane %v3257_v54, 1  ;;  %v18214_v19 = vld [vmem:[#allocation2 + $0x70] sm:$0xff]  ;;  %14820 = vmatprep.subr.bf16.mxu1 %v16267_v6 }
 0x29b   : > { %3474 = vst.msk [vmem:[#allocation2 + $0x88] sm:$0xff] %vm22031_vm15, %v3426_v25  ;;  %v3248_v42 = vrot.slane %v3246_v45, 7  ;;  %v3359_v20 = vrot.slane %v3249_v56, 1  ;;  %v3168_v0 = vmax.f32 %v3136_v18, 0.0  ;;  %vm22032_vm15 = vsmask.f32 7424  ;;  %14787 = vmatmul.mubr.bf16.gmra.mrb[148].mxu1 %v18214_v19  ;;  %13133 = vmatpush3.bf16.msra.mxu0 %v16289_v62 }
 0x29c   : > { %v3259_v14 = vor.u32 %v3257_v54, %v18196_v31  ;;  %v3137_v23 = vadd.f32 %v15414_v39, %v18025_v51  ;;  %v3166_v61 = vmax.f32 %v3134_v53, 0.0  ;;  %vm22033_vm12 = vsmask.f32 256  ;;  %v22034_v13 = vld [vmem:[#allocation20_spill] sm:$0xff]  ;;  %v22038_v53 = vld [vmem:[#allocation6_spill] sm:$0xff]  ;;  %v16293_v62 = vld [vmem:[%s21623_s1 + $0x260] sm:$0xff]  }
 0x29d   : > { %v14756_v50 = vpop.f32.mrb[68].mxu1  ;;  %v3251_v46 = vor.u32 %v3249_v56, %v3248_v42  ;;  %v3360_v15 = vsel %vm22032_vm15, %v3358_v21, %v3359_v20  ;;  %v3361_v7 = vor.u32 %v3359_v20, %v3246_v45  ;;  %vm22035_vm2 = vnez %v22034_v13  ;;  %vm22036_vm15 = vmmov %vm22033_vm12  ;;  %v18227_v20 = vld [vmem:[#allocation2 + $0x48] sm:$0xff]  ;;  %14821 = vmatpush3.bf16.msra.mxu1 %v16267_v6  ;;  %v22063_v13 = vld [vmem:[#allocation7_spill] sm:$0xff] }
 0x29e   : > { %v3032_v32 = vpop.f32.mrb[69].mxu1  ;;  %v3260_v30 = vsel %vm22033_vm12, %v3248_v42, %v3259_v14  ;;  %v3427_v47 = vsel %vm22035_vm2, %v3360_v15, 0  ;;  %v3169_v25 = vmax.f32 %v3137_v23, 0.0  ;;  %v3135_v54 = vadd.f32 %v15417_v11, %v18025_v51  ;;  %v16292_v11 = vld [vmem:[%s21623_s1 + $0x2a0] sm:$0xff]   ;;  %3828 = vmatmul.mubr.bf16.gmra.mrb[88].mxu0 %v18227_v20  ;;  %14822 = vmatprep.subr.bf16.mxu1 %v18257_v12  ;;  %v16295_v6 = vld [vmem:[%s21623_s1 + $0x268] sm:$0xff]  }
 0x29f   : > { %v14757_v18 = vpop.f32.mrb[70].mxu1  ;;  %v3252_v45 = vsel %vm22036_vm15, %v18137_v52, %v3251_v46  ;;  %vm22037_vm11 = vsmask.f32 7424  ;;  %vm22039_vm12 = vnez %v22038_v53  ;;  %3475 = vst.msk [vmem:[#allocation2 + $0xa0] sm:$0xff] %vm22040_vm6, %v3427_v47  ;;  %v15420_v21 = vadd.f32 %v17976_v63, %v14756_v50  ;;  %v22041_v52 = vld [vmem:[#allocation5_spill] sm:$0xff]  ;;  %v18240_v50 = vld [vmem:[#allocation2 + $0x68] sm:$0xff]  ;;  %13134 = vmatprep.subr.bf16.mxu0 %v16292_v11 }
 0x2a0   : > { %v3363_v56 = vsel %vm22037_vm11, %v3361_v7, %v3362_v34  ;;  %v3413_v39 = vsel %vm22039_vm12, %v3260_v30, 0  ;;  %v3035_v42 = vpop.f32.mrb[71].mxu1  ;;  %vm22042_vm15 = vnez %v22041_v52  ;;  %v22043_v23 = vld [vmem:[#allocation21_spill] sm:$0xff]  ;;  %vm22045_vm12 = vmmov %vm22040_vm6  ;;  %v18237_v15 = vpack.c.bf16 %v3169_v25, %v3168_v0  ;;  %3835 = vmatprep.mubr.bf16.mxu0 %v18240_v50  ;;  %13135 = vmatpush3.bf16.msra.mxu0 %v16293_v62  ;;  %v22054_v52 = vld [vmem:[#allocation22_spill] sm:$0xff] }
 0x2a1   : > { %v3412_v14 = vsel %vm22042_vm15, %v3252_v45, 0  ;;  %vm22044_vm11 = vnez %v22043_v23  ;;  %3445 = vst.msk [vmem:[#allocation2 + $0xc0] sm:$0xff] %vm22045_vm12, %v3413_v39  ;;  %v3167_v63 = vmax.f32 %v3135_v54, 0.0  ;;  %vm22046_vm15 = vmmov %vm22040_vm6  ;;  %v3140_v7 = vadd.f32 %v15420_v21, %v18025_v51  ;;  %v16294_v54 = vld [vmem:[%s21623_s1 + $0x2a8] sm:$0xff]   ;;  %14823 = vmatpush3.bf16.msra.mxu1 %v18257_v12  ;;  %v16270_v12 = vld [vmem:[%s21623_s1 + $0x2f0] sm:$0xff]  }
 0x2a2   : > { %v3428_v46 = vsel %vm22044_vm11, %v3363_v56, 0  ;;  %3444 = vst.msk [vmem:[#allocation2 + $0xa8] sm:$0xff] %vm22040_vm6, %v3412_v14  ;;  %v15423_v30 = vadd.f32 %v17959_v59, %v3032_v32  ;;  %v15426_v0 = vadd.f32 %v17982_v57, %v14757_v18  ;;  %v15429_v47 = vadd.f32 %v17962_v10, %v3035_v42  ;;  %v18251_v25 = vld [vmem:[#allocation2 + $0x88] sm:$0xff]  ;;  %vm22047_vm12 = vmmov %vm22040_vm6  ;;  %13136 = vmatprep.subr.bf16.mxu0 %v16294_v54 }
 0x2a3   : > { %3476 = vst.msk [vmem:[#allocation2 + $0xb8] sm:$0xff] %vm22046_vm15, %v3428_v46  ;;  %v21763_v45 = vshrl.u32 %v18237_v15, 16  ;;  %v3273_v59 = vshll.u32 %v18237_v15, 16  ;;  %v3190_v10 = vpack.c.bf16 %v3167_v63, %v3166_v61  ;;  %14790 = vmatprep.mubr.bf16.mxu1 %v18251_v25  ;;  %v22048_v57 = vshrl.u32 %v18148_v26, 16  ;;  %vm22049_vm15 = vmmov %vm22040_vm6 }
 0x2a4   : > { %3463 = vst.msk [vmem:[#allocation2 + $0xf8] sm:$0xff] %vm22047_vm12, %v18237_v15  ;;  %v3138_v18 = vadd.f32 %v15423_v30, %v18025_v51  ;;  %v3141_v56 = vadd.f32 %v15426_v0, %v18025_v51  ;;  %v3139_v39 = vadd.f32 %v15429_v47, %v18025_v51  ;;  %v3172_v61 = vmax.f32 %v3140_v7, 0.0  ;;  %13137 = vmatpush3.bf16.msra.mxu0 %v16295_v6 }
 0x2a5   : > { %v3364_v32 = vor.u32 %v3362_v34, %v22048_v57  ;;  %v18274_v21 = vrot.slane %v21763_v45, 7  ;;  %v3262_v42 = vshrl.u32 %v3190_v10, 16  ;;  %v3265_v14 = vshll.u32 %v3190_v10, 16  ;;  %3462 = vst.msk [vmem:[#allocation2 + $0xe0] sm:$0xff] %vm22049_vm15, %v3190_v10  ;;  %v14760_v46 = vpop.f32.mrb[72].mxu1 }
 0x2a6   : > { %v3170_v26 = vmax.f32 %v3138_v18, 0.0  ;;  %v3173_v34 = vmax.f32 %v3141_v56, 0.0  ;;  %v3171_v63 = vmax.f32 %v3139_v39, 0.0  ;;  %v15432_v30 = vadd.f32 %v17995_v43, %v14760_v46  ;;  %v3048_v0 = vpop.f32.mrb[73].mxu1  ;;  %v18280_v10 = vld [vmem:[#allocation2 + $0xa0] sm:$0xff]  ;;  %v16269_v56 = vld [vmem:[%s21623_s1 + $0x2e8] sm:$0xff]  }
 0x2a7   : > { %v3275_v11 = vor.u32 %v3273_v59, %v18274_v21  ;;  %v3368_v47 = vrot.slane %v3273_v59, 1  ;;  %v3264_v57 = vrot.slane %v3262_v42, 7  ;;  %v3365_v45 = vrot.slane %v3265_v14, 1  ;;  %v14761_v23 = vpop.f32.mrb[74].mxu1  ;;  %14791 = vmatmul.mubr.bf16.gmra.mrb[152].mxu1 %v18280_v10  ;;  %v18292_v18 = vld [vmem:[#allocation2 + $0x60] sm:$0xff]  ;;  %v16298_v39 = vld [vmem:[%s21623_s1 + $0x2b0] sm:$0xff]   ;;  %14824 = vmatprep.subr.bf16.mxu1 %v16269_v56 }
 0x2a8   : > { %v18285_v62 = vpack.c.bf16 %v3173_v34, %v3172_v61  ;;  %v3192_v7 = vpack.c.bf16 %v3171_v63, %v3170_v26  ;;  %v18288_v43 = vadd.f32 %v15432_v30, %v18025_v51  ;;  %v15435_v54 = vadd.f32 %v17987_v28, %v3048_v0  ;;  %v3051_v59 = vpop.f32.mrb[75].mxu1  ;;  %3836 = vmatmul.mubr.bf16.gmra.mrb[92].mxu0 %v18292_v18  ;;  %v18305_v63 = vld [vmem:[#allocation2 + $0x80] sm:$0xff]  ;;  %v22052_v30 = vld [vmem:[#allocation8_spill] sm:$0xff] }
 0x2a9   : > { %v3267_v61 = vor.u32 %v3265_v14, %v3264_v57  ;;  %vm22050_vm6 = vsmask.f32 256  ;;  %vm22051_vm12 = vsmask.f32 7424  ;;  %v3367_v34 = vor.u32 %v3365_v45, %v3262_v42  ;;  %3843 = vmatprep.mubr.bf16.mxu0 %v18305_v63  ;;  %13138 = vmatprep.subr.bf16.mxu0 %v16298_v39 }
 0x2aa   : > { %v3276_v46 = vsel %vm22050_vm6, %v3264_v57, %v3275_v11  ;;  %v3366_v26 = vsel %vm22051_vm12, %v3364_v32, %v3365_v45  ;;  %v18303_v28 = vld [vmem:[#allocation2 + $0xb8] sm:$0xff]  ;;  %vm22053_vm15 = vnez %v22052_v30  ;;  %vm22055_vm11 = vnez %v22054_v52  ;;  %v16299_v57 = vld [vmem:[%s21623_s1 + $0x270] sm:$0xff]   ;;  %14825 = vmatpush3.bf16.msra.mxu1 %v16269_v56 }
 0x2ab   : > { %v3415_v0 = vsel %vm22053_vm15, %v3276_v46, 0  ;;  %v3429_v53 = vsel %vm22055_vm11, %v3366_v26, 0  ;;  %v3289_v14 = vshll.u32 %v18285_v62, 16  ;;  %vm22056_vm6 = vcmask 523264   ;;  %14794 = vmatprep.mubr.bf16.mxu1 %v18303_v28  ;;  %13139 = vmatpush3.bf16.msra.mxu0 %v16299_v57 }
 0x2ac   : > { %3465 = vst.msk [vmem:[#allocation2 + $0x128] sm:$0xff] %vm22056_vm6, %v18285_v62  ;;  %vm22057_vm12 = vmmov %vm22056_vm6  ;;  %vm22058_vm2 = vsmask.f32 256  ;;  %vm22059_vm15 = vsmask.f32 7424  ;;  %v3278_v42 = vshrl.u32 %v3192_v7, 16  ;;  %v15438_v39 = vadd.f32 %v17998_v2, %v14761_v23  ;;  %14826 = vmatprep.subr.bf16.mxu1 %v16270_v12 }
 0x2ad   : > { %3464 = vst.msk [vmem:[#allocation2 + $0x110] sm:$0xff] %vm22057_vm12, %v3192_v7  ;;  %v3268_v45 = vsel %vm22058_vm2, %v18196_v31, %v3267_v61  ;;  %v3369_v32 = vsel %vm22059_vm15, %v3367_v34, %v3368_v47  ;;  %vm22060_vm9 = vmmov %vm22056_vm6  ;;  %v3281_v11 = vshll.u32 %v3192_v7, 16  ;;  %v22062_v46 = vshrl.u32 %v18237_v15, 16  ;;  %v22065_v61 = vld [vmem:[#allocation23_spill] sm:$0xff]  ;;  %v16300_v15 = vld [vmem:[%s21623_s1 + $0x2b8] sm:$0xff]  }
 0x2ae   : > { %3447 = vst.msk [vmem:[#allocation2 + $0xf0] sm:$0xff] %vm22060_vm9, %v3415_v0  ;;  %vm22061_vm11 = vmmov %vm22056_vm6  ;;  %vm22064_vm2 = vnez %v22063_v13  ;;  %vm22066_vm15 = vnez %v22065_v61  ;;  %v3280_v6 = vrot.slane %v3278_v42, 7  ;;  %v15441_v61 = vadd.f32 %v17990_v38, %v3051_v59  ;;  %v18356_v38 = vld [vmem:[#allocation2 + $0x78] sm:$0xff]  ;;  %13140 = vmatprep.subr.bf16.mxu0 %v16300_v15  ;;  %14827 = vmatpush3.bf16.msra.mxu1 %v16270_v12 }
 0x2af   : > { %3477 = vst.msk [vmem:[#allocation2 + $0xd0] sm:$0xff] %vm22061_vm11, %v3429_v53  ;;  %v3370_v26 = vor.u32 %v3368_v47, %v22062_v46  ;;  %v3414_v31 = vsel %vm22064_vm2, %v3268_v45, 0  ;;  %v3430_v34 = vsel %vm22066_vm15, %v3369_v32, 0  ;;  %v22067_v53 = vshrl.u32 %v18285_v62, 16  ;;  %vm22068_vm9 = vmmov %vm22056_vm6  ;;  %v14764_v32 = vpop.f32.mrb[76].mxu1  ;;  %v16301_v59 = vld [vmem:[%s21623_s1 + $0x278] sm:$0xff]  }
 0x2b0   : > { %3446 = vst.msk [vmem:[#allocation2 + $0xd8] sm:$0xff] %vm22068_vm9, %v3414_v31  ;;  %vm22069_vm11 = vmmov %vm22056_vm6  ;;  %v3374_v47 = vrot.slane %v3289_v14, 1  ;;  %v3371_v7 = vrot.slane %v3281_v11, 1  ;;  %v3142_v45 = vadd.f32 %v15435_v54, %v18025_v51  ;;  %v3064_v13 = vpop.f32.mrb[77].mxu1  ;;  %v3283_v52 = vor.u32 %v3281_v11, %v3280_v6  ;;  %v22075_v11 = vld [vmem:[#allocation10_spill] sm:$0xff]  ;;  %3844 = vmatmul.mubr.bf16.gmra.mrb[96].mxu0 %v18356_v38  ;;  %v16271_v15 = vld [vmem:[%s21623_s1 + $0x2f8] sm:$0xff]  }
 0x2b1   : > { %v18335_v0 = vrot.slane %v22067_v53, 7  ;;  %3478 = vst.msk [vmem:[#allocation2 + $0xe8] sm:$0xff] %vm22069_vm11, %v3430_v34  ;;  %v3176_v53 = vmax.f32 %v18288_v43, 0.0  ;;  %vm22070_vm6 = vsmask.f32 7424  ;;  %v14765_v24 = vpop.f32.mrb[78].mxu1  ;;  %vm22073_vm9 = vnez %v22072_v60  ;;  %13141 = vmatpush3.bf16.msra.mxu0 %v16301_v59  ;;  %14828 = vmatprep.subr.bf16.mxu1 %v16271_v15 }
 0x2b2   : > { %v3372_v31 = vsel %vm22070_vm6, %v3370_v26, %v3371_v7  ;;  %v3373_v30 = vor.u32 %v3371_v7, %v3278_v42  ;;  %v3174_v34 = vmax.f32 %v3142_v45, 0.0  ;;  %vm22071_vm12 = vsmask.f32 256  ;;  %v3067_v23 = vpop.f32.mrb[79].mxu1  ;;  %14829 = vmatpush3.bf16.msra.mxu1 %v16271_v15 }
 0x2b3   : > { %v3291_v46 = vor.u32 %v3289_v14, %v18335_v0  ;;  %v3431_v14 = vsel %vm22073_vm9, %v3372_v31, 0  ;;  %v3145_v43 = vadd.f32 %v15438_v39, %v18025_v51  ;;  %v3143_v2 = vadd.f32 %v15441_v61, %v18025_v51  ;;  %vm22074_vm11 = vmmov %vm22071_vm12  ;;  %v18369_v61 = vld [vmem:[#allocation2 + $0x98] sm:$0xff] }
 0x2b4   : > { %v3284_v56 = vsel %vm22074_vm11, %v18274_v21, %v3283_v52  ;;  %v3375_v42 = vsel %vm22070_vm6, %v3373_v30, %v3374_v47  ;;  %vm22077_vm9 = vcmask 523264   ;;  %v15444_v26 = vadd.f32 %v18017_v40, %v14764_v32  ;;  %v22080_v21 = vld [vmem:[#allocation27_spill] sm:$0xff]  ;;  %3851 = vmatprep.mubr.bf16.mxu0 %v18369_v61 }
 0x2b5   : > { %v3292_v54 = vsel %vm22071_vm12, %v3280_v6, %v3291_v46  ;;  %vm22076_vm12 = vnez %v22075_v11  ;;  %3479 = vst.msk [vmem:[#allocation2 + $0x100] sm:$0xff] %vm22077_vm9, %v3431_v14  ;;  %v22078_v6 = vld [vmem:[#allocation9_spill] sm:$0xff]  ;;  %vm22081_vm11 = vnez %v22080_v21  ;;  %vm22082_vm6 = vmmov %vm22077_vm9  ;;  %v3177_v7 = vmax.f32 %v3145_v43, 0.0 }
 0x2b6   : > { %v3417_v57 = vsel %vm22076_vm12, %v3292_v54, 0  ;;  %vm22079_vm15 = vnez %v22078_v6  ;;  %v3432_v30 = vsel %vm22081_vm11, %v3375_v42, 0  ;;  %v3175_v45 = vmax.f32 %v3143_v2, 0.0  ;;  %v18379_v46 = vld [vmem:[#allocation2 + $0xd0] sm:$0xff]  ;;  %vm22083_vm9 = vmmov %vm22082_vm6 }
 0x2b7   : > { %v3416_v52 = vsel %vm22079_vm15, %v3284_v56, 0  ;;  %3449 = vst.msk [vmem:[#allocation2 + $0x120] sm:$0xff] %vm22082_vm6, %v3417_v57  ;;  %vm22084_vm12 = vmmov %vm22082_vm6  ;;  %v3148_v40 = vadd.f32 %v15444_v26, %v18025_v51  ;;  %v15447_v32 = vadd.f32 %v18009_v17, %v3064_v13  ;;  %v15450_v39 = vadd.f32 %v18020_v27, %v14765_v24  ;;  %14795 = vmatmul.mubr.bf16.gmra.mrb[156].mxu1 %v18379_v46 }
 0x2b8   : > { %3448 = vst.msk [vmem:[#allocation2 + $0x108] sm:$0xff] %vm22083_vm9, %v3416_v52  ;;  %v15453_v31 = vadd.f32 %v18012_v36, %v3067_v23  ;;  %v22085_v54 = vshrl.u32 %v18285_v62, 16  ;;  %v3195_v43 = vpack.c.bf16 %v3177_v7, %v3176_v53  ;;  %v3194_v2 = vpack.c.bf16 %v3175_v45, %v3174_v34  ;;  %v18391_v56 = vld [vmem:[#allocation2 + $0xe8] sm:$0xff]  ;;  %v16272_v36 = vld [vmem:[%s21623_s1 + $0x400] sm:$0xff]   ;;  %vm22090_vm11 = vmmov %vm22082_vm6 }
 0x2b9   : > { %3480 = vst.msk [vmem:[#allocation2 + $0x118] sm:$0xff] %vm22084_vm12, %v3432_v30  ;;  %v3146_v42 = vadd.f32 %v15447_v32, %v18025_v51  ;;  %v3149_v57 = vadd.f32 %v15450_v39, %v18025_v51  ;;  %14798 = vmatprep.mubr.bf16.mxu1 %v18391_v56  ;;  %vm22086_vm12 = vmmov %vm22082_vm6  ;;  %v3180_v12 = vmax.f32 %v3148_v40, 0.0  ;;  %v18404_v30 = vld [vmem:[#allocation2 + $0x90] sm:$0xff]  ;;  %13262 = vmatprep.subr.bf16.mxu1 %v16272_v36  ;;  %vm22087_vm9 = vsmask.f32 7424 }
 0x2ba   : > { %v3376_v14 = vor.u32 %v3374_v47, %v22085_v54  ;;  %v3147_v17 = vadd.f32 %v15453_v31, %v18025_v51  ;;  %v3302_v27 = vshrl.u32 %v3195_v43, 16  ;;  %v3305_v24 = vshll.u32 %v3195_v43, 16  ;;  %3467 = vst.msk [vmem:[#allocation2 + $0x158] sm:$0xff] %vm22086_vm12, %v3195_v43  ;;  %3852 = vmatmul.mubr.bf16.gmra.mrb[100].mxu0 %v18404_v30  ;;  %v18407_v32 = vld [vmem:[#allocation2 + $0xb0] sm:$0xff]  ;;  %vm22093_vm2 = vmmov %vm22082_vm6 }
 0x2bb   : > { %v3294_v13 = vshrl.u32 %v3194_v2, 16  ;;  %v3297_v62 = vshll.u32 %v3194_v2, 16  ;;  %3466 = vst.msk [vmem:[#allocation2 + $0x140] sm:$0xff] %vm22082_vm6, %v3194_v2  ;;  %v3178_v47 = vmax.f32 %v3146_v42, 0.0  ;;  %v3181_v53 = vmax.f32 %v3149_v57, 0.0  ;;  %3859 = vmatprep.mubr.bf16.mxu0 %v18407_v32  ;;  %v22088_v42 = vld [vmem:[#allocation28_spill] sm:$0xff] }
 0x2bc   : > { %v3179_v34 = vmax.f32 %v3147_v17, 0.0  ;;  %v3304_v51 = vrot.slane %v3302_v27, 7  ;;  %v3380_v23 = vrot.slane %v3305_v24, 1  ;;  %v18402_v52 = vld [vmem:[#allocation2 + $0x100] sm:$0xff]  ;;  %vm22089_vm12 = vnez %v22088_v42 }
 0x2bd   : > { %v3296_v59 = vrot.slane %v3294_v13, 7  ;;  %v3377_v26 = vrot.slane %v3297_v62, 1  ;;  %v3197_v7 = vpack.c.bf16 %v3181_v53, %v3180_v12  ;;  %vm22091_vm15 = vsmask.f32 256 }
 0x2be   : > { %v3196_v45 = vpack.c.bf16 %v3179_v34, %v3178_v47  ;;  %v3307_v40 = vor.u32 %v3305_v24, %v3304_v51  ;;  %v3382_v39 = vor.u32 %v3380_v23, %v3302_v27  ;;  %v22097_v47 = vld [vmem:[#allocation12_spill] sm:$0xff] }
 0x2bf   : > { %v3299_v31 = vor.u32 %v3297_v62, %v3296_v59  ;;  %v3378_v54 = vsel %vm22087_vm9, %v3376_v14, %v3377_v26  ;;  %v3379_v2 = vor.u32 %v3377_v26, %v3294_v13  ;;  %v3318_v57 = vshrl.u32 %v3197_v7, 16  ;;  %3469 = vst.msk [vmem:[#allocation2 + $0x188] sm:$0xff] %vm22082_vm6, %v3197_v7  ;;  %14799 = vmatmul.mubr.bf16.gmra.mrb[160].mxu1 %v18402_v52  ;;  %vm22092_vm9 = vmmov %vm22091_vm15  ;;  %v22095_v62 = vld [vmem:[#allocation11_spill] sm:$0xff]  ;;  %v22099_v26 = vld [vmem:[#allocation30_spill] sm:$0xff] }
 0x2c0   : > { %v18410_v43 = vld [vmem:[#allocation2 + $0x118] sm:$0xff]  ;;  %v3433_v15 = vsel %vm22089_vm12, %v3378_v54, 0  ;;  %v3321_v17 = vshll.u32 %v3197_v7, 16  ;;  %3468 = vst.msk [vmem:[#allocation2 + $0x170] sm:$0xff] %vm22090_vm11, %v3196_v45  ;;  %v3308_v14 = vsel %vm22092_vm9, %v3296_v59, %v3307_v40  ;;  %v3310_v27 = vshrl.u32 %v3196_v45, 16  ;;  %vm22102_vm9 = vmmov %vm22093_vm2 }
 0x2c1   : > { %v3300_v36 = vsel %vm22091_vm15, %v18335_v0, %v3299_v31  ;;  %3481 = vst.msk [vmem:[#allocation2 + $0x130] sm:$0xff] %vm22093_vm2, %v3433_v15  ;;  %v3313_v24 = vshll.u32 %v3196_v45, 16  ;;  %14802 = vmatprep.mubr.bf16.mxu1 %v18410_v43  ;;  %vm22094_vm12 = vsmask.f32 7424  ;;  %vm22096_vm7 = vnez %v22095_v62  ;;  %vm22101_vm15 = vmmov %vm22093_vm2  ;;  %v18434_v15 = vld [vmem:[#allocation2 + $0xa8] sm:$0xff] }
 0x2c2   : > { %v3381_v13 = vsel %vm22094_vm12, %v3379_v2, %v3380_v23  ;;  %v3418_v12 = vsel %vm22096_vm7, %v3300_v36, 0  ;;  %vm22098_vm11 = vnez %v22097_v47  ;;  %v3320_v34 = vrot.slane %v3318_v57, 7  ;;  %3860 = vmatmul.mubr.bf16.gmra.mrb[104].mxu0 %v18434_v15 }
 0x2c3   : > { %v3419_v53 = vsel %vm22098_vm11, %v3308_v14, 0  ;;  %vm22100_vm6 = vnez %v22099_v26  ;;  %3450 = vst.msk [vmem:[#allocation2 + $0x138] sm:$0xff] %vm22101_vm15, %v3418_v12  ;;  %v3386_v59 = vrot.slane %v3321_v17, 1  ;;  %v3312_v7 = vrot.slane %v3310_v27, 7  ;;  %v22104_v14 = vld [vmem:[#allocation31_spill] sm:$0xff]  ;;  %v18440_v12 = vld [vmem:[#allocation2 + $0xc8] sm:$0xff] }
 0x2c4   : > { %v3434_v0 = vsel %vm22100_vm6, %v3381_v13, 0  ;;  %3451 = vst.msk [vmem:[#allocation2 + $0x150] sm:$0xff] %vm22102_vm9, %v3419_v53  ;;  %v3383_v45 = vrot.slane %v3313_v24, 1  ;;  %v3323_v23 = vor.u32 %v3321_v17, %v3320_v34  ;;  %vm22103_vm11 = vsmask.f32 256  ;;  %vm22108_vm9 = vmmov %vm22094_vm12  ;;  %3867 = vmatprep.mubr.bf16.mxu0 %v18440_v12 }
 0x2c5   : > { %3482 = vst.msk [vmem:[#allocation2 + $0x148] sm:$0xff] %vm22093_vm2, %v3434_v0  ;;  %v3388_v40 = vor.u32 %v3386_v59, %v3318_v57  ;;  %v3315_v31 = vor.u32 %v3313_v24, %v3312_v7  ;;  %vm22105_vm6 = vnez %v22104_v14  ;;  %vm22107_vm15 = vmmov %vm22103_vm11  ;;  %v18510_v24 = vld [vmem:[#allocation2 + $0x108] sm:$0xff] }
 0x2c6   : > { %v3384_v54 = vsel %vm22094_vm12, %v3382_v39, %v3383_v45  ;;  %v3385_v2 = vor.u32 %v3383_v45, %v3310_v27  ;;  %v3324_v36 = vsel %vm22103_vm11, %v3312_v7, %v3323_v23  ;;  %v22109_v39 = vld [vmem:[#allocation14_spill] sm:$0xff]  ;;  %vm22111_vm12 = vcmask 523264   ;;  %v22113_v7 = vld [vmem:[#allocation13_spill] sm:$0xff] }
 0x2c7   : > { %v3435_v13 = vsel %vm22105_vm6, %v3384_v54, 0  ;;  %v3405_v0 = vsel %vm17487_vm5, %v3388_v40, 0  ;;  %v3316_v57 = vsel %vm22107_vm15, %v3304_v51, %v3315_v31  ;;  %vm22110_vm2 = vnez %v22109_v39  ;;  %vm22116_vm5 = vmmov %vm22111_vm12  ;;  %v18466_v31 = vld [vmem:[#allocation2 + $0xc0] sm:$0xff]  ;;  %v16275_v23 = vld [vmem:[%s21623_s1 + $0x3c8] sm:$0xff]  }
 0x2c8   : > { %v3387_v17 = vsel %vm22108_vm9, %v3385_v2, %v3386_v59  ;;  %v3421_v27 = vsel %vm22110_vm2, %v3324_v36, 0  ;;  %3483 = vst.msk [vmem:[#allocation2 + $0x160] sm:$0xff] %vm22111_vm12, %v3435_v13  ;;  %v3437_v34 = vsel %vm17515_vm14, %v3405_v0, 0  ;;  %vm22114_vm11 = vnez %v22113_v7  ;;  %v18457_v51 = vld [vmem:[#allocation2 + $0x130] sm:$0xff]  ;;  %vm22117_vm15 = vmmov %vm22116_vm5  ;;  %v18471_v2 = vld [vmem:[#allocation2 + $0xe0] sm:$0xff] }
 0x2c9   : > { %v3420_v45 = vsel %vm22114_vm11, %v3316_v57, 0  ;;  %v3436_v40 = vsel %vm17497_vm4, %v3387_v17, 0  ;;  %3453 = vst.msk [vmem:[#allocation2 + $0x180] sm:$0xff] %vm22116_vm5, %v3421_v27  ;;  %vm22118_vm9 = vmmov %vm22116_vm5  ;;  %14803 = vmatmul.mubr.bf16.gmra.mrb[164].mxu1 %v18457_v51  ;;  %v18478_v13 = vld [vmem:[#allocation2 + $0xd8] sm:$0xff]  ;;  %v18487_v17 = vld [vmem:[#allocation2] sm:$0xff] }
 0x2ca   : > { %3485 = vst.msk [vmem:[#allocation2 + $0x190] sm:$0xff] %vm22117_vm15, %v3437_v34  ;;  %vm22119_vm12 = vmmov %vm22116_vm5  ;;  %3868 = vmatmul.mubr.bf16.gmra.mrb[108].mxu0 %v18466_v31  ;;  %v18481_v0 = vld [vmem:[#allocation2 + $0xf8] sm:$0xff]  ;;  %v18490_v27 = vld [vmem:[#allocation2 + $0xf0] sm:$0xff] }
 0x2cb   : > { %3452 = vst.msk [vmem:[#allocation2 + $0x168] sm:$0xff] %vm22118_vm9, %v3420_v45  ;;  %3875 = vmatprep.mubr.bf16.mxu0 %v18471_v2  ;;  %v16273_v34 = vld [vmem:[%s21623_s1 + $0x3c0] sm:$0xff]   ;;  %v18496_v45 = vld [vmem:[#allocation2 + $0x110] sm:$0xff]  ;;  %v18513_v39 = vld [vmem:[#allocation2 + $0x128] sm:$0xff]  ;;  %vm22121_vm9 = vsmask.f32 256 }
 0x2cc   : > { %3484 = vst.msk [vmem:[#allocation2 + $0x178] sm:$0xff] %vm22119_vm12, %v3436_v40  ;;  %v18463_v59 = vld [vmem:[#allocation2 + $0x148] sm:$0xff]  ;;  %v16276_v7 = vld [vmem:[%s21623_s1 + $0x410] sm:$0xff]   ;;  %vm22120_vm15 = vmmov %vm22116_vm5  ;;  %vm22122_vm12 = vsmask.f32 7424 }
 0x2cd   : > { %14806 = vmatprep.mubr.bf16.mxu1 %v18463_v59  ;;  %v16274_v40 = vld [vmem:[%s21623_s1 + $0x408] sm:$0xff]   ;;  %v18570_v53 = vld [vmem:[#allocation2 + $0x150] sm:$0xff] }
 0x2ce   : > { %v16305_v14 = vld [vmem:[%s21623_s1 + $0x448] sm:$0xff]  }
 0x2cf   : > { %v18468_v54 = vld [vmem:[#allocation2 + $0x160] sm:$0xff] }
 0x2d1   : > { %14807 = vmatmul.mubr.bf16.gmra.mrb[168].mxu1 %v18468_v54  ;;  %v18484_v57 = vld [vmem:[#allocation2 + $0x190] sm:$0xff] }
 0x2d2   : > { %3876 = vmatmul.mubr.bf16.gmra.mrb[112].mxu0 %v18478_v13 }
 0x2d3   : > { %v18474_v36 = vld [vmem:[#allocation2 + $0x178] sm:$0xff]  ;;  %3883 = vmatprep.mubr.bf16.mxu0 %v18481_v0 }
 0x2d4   : > { %14810 = vmatprep.mubr.bf16.mxu1 %v18474_v36 }
 0x2d9   : > { %14811 = vmatmul.mubr.bf16.gmra.mrb[172].mxu1 %v18484_v57 }
 0x2da   : > { %14830 = vmatprep.mubr.bf16.mxu1 %v18487_v17  ;;  %3884 = vmatmul.mubr.bf16.gmra.mrb[116].mxu0 %v18490_v27 }
 0x2db   : > { %3891 = vmatprep.mubr.bf16.mxu0 %v18496_v45 }
 0x2e1   : > { %14831 = vmatmul.mubr.bf16.vlgmr.msra.gmra.mrb[144].mxu1 %v18106_v1  ;;  %v16277_v1 = vld [vmem:[%s21623_s1 + $0x3d0] sm:$0xff]  }
 0x2e2   : > { %14834 = vmatprep.mubr.bf16.mxu1 %v18141_v29  ;;  %13263 = vmatpush3.bf16.msra.mxu1 %v16273_v34  ;;  %v16278_v29 = vld [vmem:[%s21623_s1 + $0x418] sm:$0xff]   ;;  %v16284_v34 = vld [vmem:[%s21623_s1 + $0x420] sm:$0xff]  }
 0x2e3   : > { %13264 = vmatprep.subr.bf16.mxu1 %v16274_v40  ;;  %3892 = vmatmul.mubr.bf16.gmra.mrb[120].mxu0 %v18510_v24  ;;  %v18530_v40 = vld [vmem:[#allocation2 + $0x120] sm:$0xff] }
 0x2e4   : > { %3899 = vmatprep.mubr.bf16.mxu0 %v18513_v39 }
 0x2e6   : > { %13265 = vmatpush3.bf16.msra.mxu1 %v16275_v23  ;;  %v16279_v23 = vld [vmem:[%s21623_s1 + $0x3d8] sm:$0xff]  }
 0x2e7   : > { %13266 = vmatprep.subr.bf16.mxu1 %v16276_v7  ;;  %v18533_v7 = vld [vmem:[#allocation2 + $0x140] sm:$0xff] }
 0x2e9   : > { %14835 = vmatmul.mubr.bf16.gmra.mrb[148].mxu1 %v18163_v4  ;;  %v16285_v4 = vld [vmem:[%s21623_s1 + $0x3e0] sm:$0xff]  }
 0x2ea   : > { %14838 = vmatprep.mubr.bf16.mxu1 %v18214_v19  ;;  %13267 = vmatpush3.bf16.msra.mxu1 %v16277_v1  ;;  %v16290_v19 = vld [vmem:[%s21623_s1 + $0x428] sm:$0xff]  }
 0x2eb   : > { %13268 = vmatprep.subr.bf16.mxu1 %v16278_v29  ;;  %3900 = vmatmul.mubr.bf16.gmra.mrb[124].mxu0 %v18530_v40  ;;  %v16291_v1 = vld [vmem:[%s21623_s1 + $0x3e8] sm:$0xff]   ;;  %v16296_v29 = vld [vmem:[%s21623_s1 + $0x430] sm:$0xff]  }
 0x2ec   : > { %3907 = vmatprep.mubr.bf16.mxu0 %v18533_v7 }
 0x2ee   : > { %13269 = vmatpush3.bf16.msra.mxu1 %v16279_v23  ;;  %v18550_v23 = vld [vmem:[#allocation2 + $0x138] sm:$0xff] }
 0x2ef   : > { %13270 = vmatprep.subr.bf16.mxu1 %v16284_v34  ;;  %v18553_v34 = vld [vmem:[#allocation2 + $0x158] sm:$0xff] }
 0x2f1   : > { %14839 = vmatmul.mubr.bf16.gmra.mrb[152].mxu1 %v18251_v25  ;;  %v16297_v25 = vld [vmem:[%s21623_s1 + $0x3f0] sm:$0xff]  }
 0x2f2   : > { %14842 = vmatprep.mubr.bf16.mxu1 %v18280_v10  ;;  %13271 = vmatpush3.bf16.msra.mxu1 %v16285_v4  ;;  %v16302_v4 = vld [vmem:[%s21623_s1 + $0x438] sm:$0xff]  }
 0x2f3   : > { %13272 = vmatprep.subr.bf16.mxu1 %v16290_v19  ;;  %3908 = vmatmul.mubr.bf16.gmra.mrb[128].mxu0 %v18550_v23  ;;  %v16303_v19 = vld [vmem:[%s21623_s1 + $0x3f8] sm:$0xff]  }
 0x2f4   : > { %3915 = vmatprep.mubr.bf16.mxu0 %v18553_v34 }
 0x2f6   : > { %13273 = vmatpush3.bf16.msra.mxu1 %v16291_v1  ;;  %v16304_v1 = vld [vmem:[%s21623_s1 + $0x440] sm:$0xff]  }
 0x2f7   : > { %13274 = vmatprep.subr.bf16.mxu1 %v16296_v29  ;;  %v18573_v29 = vld [vmem:[#allocation2 + $0x170] sm:$0xff] }
 0x2f9   : > { %14843 = vmatmul.mubr.bf16.gmra.mrb[156].mxu1 %v18303_v28 }
 0x2fa   : > { %14846 = vmatprep.mubr.bf16.mxu1 %v18379_v46  ;;  %13275 = vmatpush3.bf16.msra.mxu1 %v16297_v25  ;;  %v18578_v25 = vld [vmem:[#allocation2 + $0x168] sm:$0xff] }
 0x2fb   : > { %13276 = vmatprep.subr.bf16.mxu1 %v16302_v4  ;;  %3916 = vmatmul.mubr.bf16.gmra.mrb[132].mxu0 %v18570_v53  ;;  %v18581_v4 = vld [vmem:[#allocation2 + $0x188] sm:$0xff] }
 0x2fc   : > { %3923 = vmatprep.mubr.bf16.mxu0 %v18573_v29 }
 0x2fe   : > { %13277 = vmatpush3.bf16.msra.mxu1 %v16303_v19  ;;  %v18586_v19 = vld [vmem:[#allocation2 + $0x180] sm:$0xff] }
 0x2ff   : > { %14862 = vmatprep.subr.bf16.mxu1 %v16304_v1 }
 0x301   : > { %14847 = vmatmul.mubr.bf16.gmra.mrb[160].mxu1 %v18391_v56 }
 0x302   : > { %14850 = vmatprep.mubr.bf16.mxu1 %v18402_v52 }
 0x303   : > { %3924 = vmatmul.mubr.bf16.gmra.mrb[136].mxu0 %v18578_v25 }
 0x304   : > { %3931 = vmatprep.mubr.bf16.mxu0 %v18581_v4 }
 0x309   : > { %14851 = vmatmul.mubr.bf16.gmra.mrb[164].mxu1 %v18410_v43 }
 0x30a   : > { %14854 = vmatprep.mubr.bf16.mxu1 %v18457_v51 }
 0x30b   : > { %3932 = vmatmul.mubr.bf16.gmra.mrb[140].mxu0 %v18586_v19 }
 0x30c   : > { %4277 = vmatprep.mubr.bf16.mxu0 %v18487_v17 }
 0x311   : > { %14855 = vmatmul.mubr.bf16.gmra.mrb[168].mxu1 %v18463_v59 }
 0x312   : > { %14858 = vmatprep.mubr.bf16.mxu1 %v18468_v54 }
 0x313   : > { %4278 = vmatmul.mubr.bf16.vlgmr.msra.gmra.mrb[144].mxu0 %v18487_v17 }
 0x314   : > { %4285 = vmatprep.mubr.bf16.mxu0 %v18066_v58  ;;  %v16306_v58 = vld [vmem:[%s21623_s1 + $0x450] sm:$0xff]  }
 0x319   : > { %14859 = vmatmul.mubr.bf16.gmra.mrb[172].mxu1 %v18474_v36 }
 0x31a   : > { %4840 = vmatprep.mubr.bf16.mxu1 %v18118_v3 }
 0x31b   : > { %4286 = vmatmul.mubr.bf16.gmra.mrb[148].mxu0 %v18104_v22  ;;  %v16307_v22 = vld [vmem:[%s21623_s1 + $0x458] sm:$0xff]  }
 0x31c   : > { %4293 = vmatprep.mubr.bf16.mxu0 %v18118_v3  ;;  %v16308_v3 = vld [vmem:[%s21623_s1 + $0x460] sm:$0xff]  }
 0x321   : > { %4841 = vmatmul.mubr.bf16.vlgmr.msra.gmra.mrb[176].mxu1 %v18161_v16 }
 0x322   : > { %4848 = vmatprep.mubr.bf16.mxu1 %v18179_v33  ;;  %14863 = vmatpush3.bf16.msra.mxu1 %v16304_v1 }
 0x323   : > { %14864 = vmatprep.subr.bf16.mxu1 %v16305_v14  ;;  %4294 = vmatmul.mubr.bf16.gmra.mrb[152].mxu0 %v18161_v16  ;;  %v16309_v16 = vld [vmem:[%s21623_s1 + $0x468] sm:$0xff]  }
 0x324   : > { %4301 = vmatprep.mubr.bf16.mxu0 %v18179_v33  ;;  %v16310_v33 = vld [vmem:[%s21623_s1 + $0x470] sm:$0xff]  }
 0x326   : > { %14865 = vmatpush3.bf16.msra.mxu1 %v16305_v14 }
 0x327   : > { %14866 = vmatprep.subr.bf16.mxu1 %v16306_v58 }
 0x329   : > { %4849 = vmatmul.mubr.bf16.gmra.mrb[180].mxu1 %v18227_v20 }
 0x32a   : > { %4856 = vmatprep.mubr.bf16.mxu1 %v18240_v50  ;;  %14867 = vmatpush3.bf16.msra.mxu1 %v16306_v58 }
 0x32b   : > { %14868 = vmatprep.subr.bf16.mxu1 %v16307_v22  ;;  %4302 = vmatmul.mubr.bf16.gmra.mrb[156].mxu0 %v18227_v20  ;;  %v16311_v20 = vld [vmem:[%s21623_s1 + $0x478] sm:$0xff]  }
 0x32c   : > { %4309 = vmatprep.mubr.bf16.mxu0 %v18240_v50 }
 0x32e   : > { %14869 = vmatpush3.bf16.msra.mxu1 %v16307_v22 }
 0x32f   : > { %14870 = vmatprep.subr.bf16.mxu1 %v16308_v3 }
 0x331   : > { %4857 = vmatmul.mubr.bf16.gmra.mrb[184].mxu1 %v18292_v18 }
 0x332   : > { %4864 = vmatprep.mubr.bf16.mxu1 %v18305_v63  ;;  %14871 = vmatpush3.bf16.msra.mxu1 %v16308_v3 }
 0x333   : > { %14872 = vmatprep.subr.bf16.mxu1 %v16309_v16  ;;  %4310 = vmatmul.mubr.bf16.gmra.mrb[160].mxu0 %v18292_v18 }
 0x334   : > { %4317 = vmatprep.mubr.bf16.mxu0 %v18305_v63 }
 0x336   : > { %14873 = vmatpush3.bf16.msra.mxu1 %v16309_v16 }
 0x337   : > { %14874 = vmatprep.subr.bf16.mxu1 %v16310_v33 }
 0x339   : > { %4865 = vmatmul.mubr.bf16.gmra.mrb[188].mxu1 %v18356_v38 }
 0x33a   : > { %4872 = vmatprep.mubr.bf16.mxu1 %v18369_v61  ;;  %14875 = vmatpush3.bf16.msra.mxu1 %v16310_v33 }
 0x33b   : > { %14876 = vmatprep.subr.bf16.mxu1 %v16311_v20  ;;  %4318 = vmatmul.mubr.bf16.gmra.mrb[164].mxu0 %v18356_v38 }
 0x33c   : > { %4325 = vmatprep.mubr.bf16.mxu0 %v18369_v61 }
 0x33e   : > { %14877 = vmatpush3.bf16.msra.mxu1 %v16311_v20 }
 0x341   : > { %4873 = vmatmul.mubr.bf16.gmra.mrb[192].mxu1 %v18404_v30 }
 0x342   : > { %4880 = vmatprep.mubr.bf16.mxu1 %v18407_v32 }
 0x343   : > { %4326 = vmatmul.mubr.bf16.gmra.mrb[168].mxu0 %v18404_v30 }
 0x344   : > { %4333 = vmatprep.mubr.bf16.mxu0 %v18407_v32 }
 0x349   : > { %4881 = vmatmul.mubr.bf16.gmra.mrb[196].mxu1 %v18434_v15 }
 0x34a   : > { %4888 = vmatprep.mubr.bf16.mxu1 %v18440_v12 }
 0x34b   : > { %4334 = vmatmul.mubr.bf16.gmra.mrb[172].mxu0 %v18434_v15 }
 0x34c   : > { %4341 = vmatprep.mubr.bf16.mxu0 %v18440_v12 }
 0x351   : > { %4889 = vmatmul.mubr.bf16.gmra.mrb[200].mxu1 %v18466_v31 }
 0x352   : > { %4896 = vmatprep.mubr.bf16.mxu1 %v18471_v2 }
 0x353   : > { %4342 = vmatmul.mubr.bf16.gmra.mrb[176].mxu0 %v18466_v31 }
 0x354   : > { %4349 = vmatprep.mubr.bf16.mxu0 %v18471_v2 }
 0x359   : > { %4897 = vmatmul.mubr.bf16.gmra.mrb[204].mxu1 %v18478_v13 }
 0x35a   : > { %4904 = vmatprep.mubr.bf16.mxu1 %v18481_v0 }
 0x35b   : > { %4350 = vmatmul.mubr.bf16.gmra.mrb[180].mxu0 %v18478_v13 }
 0x35c   : > { %4357 = vmatprep.mubr.bf16.mxu0 %v18481_v0 }
 0x35e   : > { %v13006_v50 = vpop.f32.mrb[80].mxu0 }
 0x35f   : > { %v13007_v18 = vpop.f32.mrb[81].mxu0 }
 0x360   : > { %v18657_v63 = vadd.f32 %v13007_v18, %v13006_v50  ;;  %v13009_v38 = vpop.f32.mrb[82].mxu0 }
 0x361   : > { %4905 = vmatmul.mubr.bf16.gmra.mrb[208].mxu1 %v18490_v27  ;;  %v13010_v61 = vpop.f32.mrb[83].mxu0 }
 0x362   : > { %4912 = vmatprep.mubr.bf16.mxu1 %v18496_v45  ;;  %v18659_v30 = vadd.f32 %v13010_v61, %v13009_v38 }
 0x363   : > { %4358 = vmatmul.mubr.bf16.gmra.mrb[184].mxu0 %v18490_v27 }
 0x364   : > { %4365 = vmatprep.mubr.bf16.mxu0 %v18496_v45 }
 0x368   : > { %v13012_v32 = vpop.f32.mrb[84].mxu0 }
 0x369   : > { %4913 = vmatmul.mubr.bf16.gmra.mrb[212].mxu1 %v18510_v24  ;;  %v13013_v15 = vpop.f32.mrb[85].mxu0 }
 0x36a   : > { %4920 = vmatprep.mubr.bf16.mxu1 %v18513_v39  ;;  %v18665_v14 = vadd.f32 %v13013_v15, %v13012_v32  ;;  %v13015_v12 = vpop.f32.mrb[86].mxu0  ;;  %v4569_v15 = vld [vmem:[#allocation2 + $0x40] sm:$0xff] }
 0x36b   : > { %4366 = vmatmul.mubr.bf16.gmra.mrb[188].mxu0 %v18510_v24  ;;  %v13016_v31 = vpop.f32.mrb[87].mxu0 }
 0x36c   : > { %4373 = vmatprep.mubr.bf16.mxu0 %v18513_v39  ;;  %v18667_v2 = vadd.f32 %v13016_v31, %v13015_v12 }
 0x371   : > { %4921 = vmatmul.mubr.bf16.gmra.mrb[216].mxu1 %v18530_v40  ;;  %v13018_v24 = vpop.f32.mrb[88].mxu0 }
 0x372   : > { %4928 = vmatprep.mubr.bf16.mxu1 %v18533_v7  ;;  %v13019_v39 = vpop.f32.mrb[89].mxu0 }
 0x373   : > { %4374 = vmatmul.mubr.bf16.gmra.mrb[192].mxu0 %v18530_v40  ;;  %v18673_v13 = vadd.f32 %v13019_v39, %v13018_v24  ;;  %v13021_v0 = vpop.f32.mrb[90].mxu0 }
 0x374   : > { %4381 = vmatprep.mubr.bf16.mxu0 %v18533_v7  ;;  %v13022_v27 = vpop.f32.mrb[91].mxu0 }
 0x375   : > { %v18675_v45 = vadd.f32 %v13022_v27, %v13021_v0  ;;  %v4572_v27 = vld [vmem:[#allocation2 + $0x58] sm:$0xff] }
 0x379   : > { %4929 = vmatmul.mubr.bf16.gmra.mrb[220].mxu1 %v18550_v23 }
 0x37a   : > { %4936 = vmatprep.mubr.bf16.mxu1 %v18553_v34 }
 0x37b   : > { %4382 = vmatmul.mubr.bf16.gmra.mrb[196].mxu0 %v18550_v23  ;;  %v13024_v40 = vpop.f32.mrb[92].mxu0 }
 0x37c   : > { %4389 = vmatprep.mubr.bf16.mxu0 %v18553_v34  ;;  %v13025_v7 = vpop.f32.mrb[93].mxu0 }
 0x37d   : > { %v18681_v1 = vadd.f32 %v13025_v7, %v13024_v40  ;;  %v13027_v58 = vpop.f32.mrb[94].mxu0  ;;  %v16314_v40 = vld [vmem:[%s21623_s1 + $0x588] sm:$0xff]  }
 0x37e   : > { %v13028_v22 = vpop.f32.mrb[95].mxu0  ;;  %v16315_v7 = vld [vmem:[%s21623_s1 + $0x548] sm:$0xff]  }
 0x37f   : > { %v18683_v3 = vadd.f32 %v13028_v22, %v13027_v58  ;;  %v4575_v58 = vld [vmem:[#allocation2 + $0x70] sm:$0xff] }
 0x381   : > { %4937 = vmatmul.mubr.bf16.gmra.mrb[224].mxu1 %v18570_v53 }
 0x382   : > { %4944 = vmatprep.mubr.bf16.mxu1 %v18573_v29 }
 0x383   : > { %4390 = vmatmul.mubr.bf16.gmra.mrb[200].mxu0 %v18570_v53  ;;  %v13030_v23 = vpop.f32.mrb[96].mxu0  ;;  %v16312_v53 = vld [vmem:[%s21623_s1 + $0x580] sm:$0xff]  }
 0x384   : > { %4397 = vmatprep.mubr.bf16.mxu0 %v18573_v29  ;;  %v13031_v34 = vpop.f32.mrb[97].mxu0  ;;  %v16313_v29 = vld [vmem:[%s21623_s1 + $0x540] sm:$0xff]   ;;  %13398 = vmatprep.subr.bf16.mxu0 %v16312_v53 }
 0x385   : > { %v18689_v16 = vadd.f32 %v13031_v34, %v13030_v23  ;;  %v13033_v33 = vpop.f32.mrb[98].mxu0  ;;  %13399 = vmatpush3.bf16.msra.mxu0 %v16313_v29  ;;  %v4578_v29 = vld [vmem:[#allocation2 + $0x88] sm:$0xff] }
 0x386   : > { %v13034_v20 = vpop.f32.mrb[99].mxu0  ;;  %13400 = vmatprep.subr.bf16.mxu0 %v16314_v40 }
 0x387   : > { %v18691_v50 = vadd.f32 %v13034_v20, %v13033_v33 }
 0x389   : > { %4945 = vmatmul.mubr.bf16.gmra.mrb[228].mxu1 %v18578_v25  ;;  %13401 = vmatpush3.bf16.msra.mxu0 %v16315_v7 }
 0x38a   : > { %4952 = vmatprep.mubr.bf16.mxu1 %v18581_v4 }
 0x38b   : > { %4398 = vmatmul.mubr.bf16.gmra.mrb[204].mxu0 %v18578_v25 }
 0x38d   : > { %v13036_v4 = vpop.f32.mrb[100].mxu0 }
 0x38e   : > { %v13037_v18 = vpop.f32.mrb[101].mxu0 }
 0x38f   : > { %v18702_v38 = vadd.f32 %v13037_v18, %v13036_v4  ;;  %v13039_v61 = vpop.f32.mrb[102].mxu0 }
 0x390   : > { %v13040_v25 = vpop.f32.mrb[103].mxu0 }
 0x391   : > { %4953 = vmatmul.mubr.bf16.gmra.mrb[232].mxu1 %v18586_v19  ;;  %v18704_v32 = vadd.f32 %v13040_v25, %v13039_v61 }
 0x392   : > { %4960 = vmatprep.mubr.bf16.mxu1 %v18487_v17 }
 0x395   : > { %v13042_v12 = vpop.f32.mrb[104].mxu0 }
 0x396   : > { %v13043_v31 = vpop.f32.mrb[105].mxu0 }
 0x397   : > { %v18707_v24 = vadd.f32 %v13043_v31, %v13042_v12  ;;  %v13045_v19 = vpop.f32.mrb[106].mxu0  ;;  %v16316_v31 = vld [vmem:[%s21623_s1 + $0x590] sm:$0xff]  }
 0x398   : > { %v13046_v39 = vpop.f32.mrb[107].mxu0  ;;  %13402 = vmatprep.subr.bf16.mxu0 %v16316_v31 }
 0x399   : > { %4961 = vmatmul.mubr.bf16.gmra.mrb[236].mxu1 %v18487_v17  ;;  %v18709_v0 = vadd.f32 %v13046_v39, %v13045_v19  ;;  %v16317_v19 = vld [vmem:[%s21623_s1 + $0x550] sm:$0xff]  }
 0x39a   : > { %14878 = vmatprep.mubr.bf16.mxu1 %v4569_v15  ;;  %13403 = vmatpush3.bf16.msra.mxu0 %v16317_v19 }
 0x39d   : > { %v13048_v22 = vpop.f32.mrb[108].mxu0 }
 0x39e   : > { %v13049_v23 = vpop.f32.mrb[109].mxu0 }
 0x39f   : > { %v18717_v34 = vadd.f32 %v13049_v23, %v13048_v22  ;;  %v13051_v33 = vpop.f32.mrb[110].mxu0 }
 0x3a0   : > { %v13052_v20 = vpop.f32.mrb[111].mxu0 }
 0x3a1   : > { %14879 = vmatmul.mubr.bf16.vlgmr.msra.gmra.mrb[144].mxu1 %v4572_v27  ;;  %v18719_v53 = vadd.f32 %v13052_v20, %v13051_v33 }
 0x3a2   : > { %14882 = vmatprep.mubr.bf16.mxu1 %v4575_v58 }
 0x3a5   : > { %v13054_v4 = vpop.f32.mrb[112].mxu0 }
 0x3a6   : > { %v13055_v18 = vpop.f32.mrb[113].mxu0 }
 0x3a7   : > { %v18722_v61 = vadd.f32 %v13055_v18, %v13054_v4  ;;  %v13057_v25 = vpop.f32.mrb[114].mxu0  ;;  %v16319_v4 = vld [vmem:[%s21623_s1 + $0x558] sm:$0xff]  }
 0x3a8   : > { %v13058_v15 = vpop.f32.mrb[115].mxu0 }
 0x3a9   : > { %14883 = vmatmul.mubr.bf16.gmra.mrb[148].mxu1 %v4578_v29  ;;  %v18724_v12 = vadd.f32 %v13058_v15, %v13057_v25  ;;  %v16318_v29 = vld [vmem:[%s21623_s1 + $0x598] sm:$0xff]  }
 0x3aa   : > { %14886 = vmatprep.mubr.bf16.mxu1 %v18280_v10  ;;  %13404 = vmatprep.subr.bf16.mxu0 %v16318_v29 }
 0x3ab   : > { %13405 = vmatpush3.bf16.msra.mxu0 %v16319_v4 }
 0x3ad   : > { %v13060_v39 = vpop.f32.mrb[116].mxu0 }
 0x3ae   : > { %v13061_v10 = vpop.f32.mrb[117].mxu0 }
 0x3af   : > { %v18734_v27 = vadd.f32 %v13061_v10, %v13060_v39  ;;  %v13063_v40 = vpop.f32.mrb[118].mxu0 }
 0x3b0   : > { %v13064_v7 = vpop.f32.mrb[119].mxu0 }
 0x3b1   : > { %14887 = vmatmul.mubr.bf16.gmra.mrb[152].mxu1 %v18303_v28  ;;  %v18736_v58 = vadd.f32 %v13064_v7, %v13063_v40  ;;  %v16320_v7 = vld [vmem:[%s21623_s1 + $0x5a0] sm:$0xff]  }
 0x3b2   : > { %14890 = vmatprep.mubr.bf16.mxu1 %v18379_v46  ;;  %13406 = vmatprep.subr.bf16.mxu0 %v16320_v7 }
 0x3b6   : > { %v13066_v22 = vpop.f32.mrb[120].mxu0 }
 0x3b7   : > { %v13067_v23 = vpop.f32.mrb[121].mxu0 }
 0x3b8   : > { %v18740_v33 = vadd.f32 %v13067_v23, %v13066_v22  ;;  %v13069_v28 = vpop.f32.mrb[122].mxu0  ;;  %v16321_v22 = vld [vmem:[%s21623_s1 + $0x560] sm:$0xff]  }
 0x3b9   : > { %14891 = vmatmul.mubr.bf16.gmra.mrb[156].mxu1 %v18391_v56  ;;  %v13070_v20 = vpop.f32.mrb[123].mxu0  ;;  %13407 = vmatpush3.bf16.msra.mxu0 %v16321_v22 }
 0x3ba   : > { %14894 = vmatprep.mubr.bf16.mxu1 %v18402_v52  ;;  %v18742_v46 = vadd.f32 %v13070_v20, %v13069_v28 }
 0x3be   : > { %v13072_v56 = vpop.f32.mrb[124].mxu0 }
 0x3bf   : > { %v13073_v52 = vpop.f32.mrb[125].mxu0 }
 0x3c0   : > { %v18752_v18 = vadd.f32 %v13073_v52, %v13072_v56  ;;  %v13075_v25 = vpop.f32.mrb[126].mxu0 }
 0x3c1   : > { %14895 = vmatmul.mubr.bf16.gmra.mrb[160].mxu1 %v18410_v43  ;;  %v13076_v15 = vpop.f32.mrb[127].mxu0 }
 0x3c2   : > { %14898 = vmatprep.mubr.bf16.mxu1 %v18457_v51  ;;  %v18754_v31 = vadd.f32 %v13076_v15, %v13075_v25  ;;  %v16322_v15 = vld [vmem:[%s21623_s1 + $0x5a8] sm:$0xff]  }
 0x3c3   : > { %13408 = vmatprep.subr.bf16.mxu0 %v16322_v15  ;;  %v16327_v15 = vld [vmem:[%s21623_s1 + $0x488] sm:$0xff]  }
 0x3c6   : > { %v13078_v19 = vpop.f32.mrb[128].mxu0 }
 0x3c7   : > { %v13079_v39 = vpop.f32.mrb[129].mxu0 }
 0x3c8   : > { %v18758_v10 = vadd.f32 %v13079_v39, %v13078_v19  ;;  %v13081_v43 = vpop.f32.mrb[130].mxu0  ;;  %v16323_v19 = vld [vmem:[%s21623_s1 + $0x568] sm:$0xff]  }
 0x3c9   : > { %14899 = vmatmul.mubr.bf16.gmra.mrb[164].mxu1 %v18463_v59  ;;  %v13082_v40 = vpop.f32.mrb[131].mxu0  ;;  %13409 = vmatpush3.bf16.msra.mxu0 %v16323_v19 }
 0x3ca   : > { %14902 = vmatprep.mubr.bf16.mxu1 %v18468_v54  ;;  %v18760_v51 = vadd.f32 %v13082_v40, %v13081_v43 }
 0x3ce   : > { %v13084_v59 = vpop.f32.mrb[132].mxu0 }
 0x3cf   : > { %v13085_v54 = vpop.f32.mrb[133].mxu0 }
 0x3d0   : > { %v18770_v23 = vadd.f32 %v13085_v54, %v13084_v59  ;;  %v13087_v28 = vpop.f32.mrb[134].mxu0  ;;  %v16324_v54 = vld [vmem:[%s21623_s1 + $0x4c0] sm:$0xff]  }
 0x3d1   : > { %14903 = vmatmul.mubr.bf16.gmra.mrb[168].mxu1 %v18474_v36  ;;  %v13088_v20 = vpop.f32.mrb[135].mxu0  ;;  %13534 = vmatprep.subr.bf16.mxu1 %v16324_v54  ;;  %v16330_v54 = vld [vmem:[%s21623_s1 + $0x490] sm:$0xff]  }
 0x3d2   : > { %14906 = vmatprep.mubr.bf16.mxu1 %v18484_v57  ;;  %v18772_v29 = vadd.f32 %v13088_v20, %v13087_v28  ;;  %v16325_v28 = vld [vmem:[%s21623_s1 + $0x480] sm:$0xff]   ;;  %v16326_v20 = vld [vmem:[%s21623_s1 + $0x4c8] sm:$0xff]  }
 0x3d3   : > { %13535 = vmatpush3.bf16.msra.mxu1 %v16325_v28  ;;  %v16329_v28 = vld [vmem:[%s21623_s1 + $0x5b0] sm:$0xff]  }
 0x3d4   : > { %13536 = vmatprep.subr.bf16.mxu1 %v16326_v20  ;;  %v16332_v20 = vld [vmem:[%s21623_s1 + $0x4d8] sm:$0xff]   ;;  %13410 = vmatprep.subr.bf16.mxu0 %v16329_v28 }
 0x3d6   : > { %v13090_v4 = vpop.f32.mrb[136].mxu0 }
 0x3d7   : > { %v13091_v56 = vpop.f32.mrb[137].mxu0  ;;  %13537 = vmatpush3.bf16.msra.mxu1 %v16327_v15 }
 0x3d8   : > { %v18776_v52 = vadd.f32 %v13091_v56, %v13090_v4  ;;  %v13093_v36 = vpop.f32.mrb[138].mxu0 }
 0x3d9   : > { %14907 = vmatmul.mubr.bf16.gmra.mrb[172].mxu1 %v18487_v17  ;;  %v13094_v25 = vpop.f32.mrb[139].mxu0 }
 0x3da   : > { %6329 = vmatprep.mubr.bf16.mxu1 %v18487_v17  ;;  %v18778_v57 = vadd.f32 %v13094_v25, %v13093_v36 }
 0x3de   : > { %v13096_v39 = vpop.f32.mrb[140].mxu0 }
 0x3df   : > { %v13097_v43 = vpop.f32.mrb[141].mxu0 }
 0x3e0   : > { %v18786_v40 = vadd.f32 %v13097_v43, %v13096_v39  ;;  %v13099_v7 = vpop.f32.mrb[142].mxu0 }
 0x3e1   : > { %v13100_v22 = vpop.f32.mrb[143].mxu0 }
 0x3e2   : > { %v18788_v59 = vadd.f32 %v13100_v22, %v13099_v7  ;;  %v16328_v7 = vld [vmem:[%s21623_s1 + $0x4d0] sm:$0xff]  }
 0x3e3   : > { %13538 = vmatprep.subr.bf16.mxu1 %v16328_v7 }
 0x3e4   : > { %13539 = vmatpush3.bf16.msra.mxu1 %v16330_v54  ;;  %v16334_v54 = vld [vmem:[%s21623_s1 + $0x4e0] sm:$0xff]  }
 0x3e5   : > { %13540 = vmatprep.subr.bf16.mxu1 %v16332_v20  ;;  %v16335_v20 = vld [vmem:[%s21623_s1 + $0x4a0] sm:$0xff]  }
 0x3e6   : > { %v13142_v4 = vpop.f32.mrb[144].mxu0 }
 0x3e7   : > { %v13143_v56 = vpop.f32.mrb[145].mxu0 }
 0x3e8   : > { %v13144_v36 = vadd.f32 %v13143_v56, %v13142_v4  ;;  %v13145_v25 = vpop.f32.mrb[146].mxu0 }
 0x3e9   : > { %v13146_v19 = vpop.f32.mrb[147].mxu0 }
 0x3ea   : > { %v15457_v39 = vadd.f32 %v13144_v36, %v18657_v63  ;;  %v13147_v43 = vadd.f32 %v13146_v19, %v13145_v25  ;;  %v16331_v63 = vld [vmem:[%s21623_s1 + $0x570] sm:$0xff]   ;;  %v16333_v25 = vld [vmem:[%s21623_s1 + $0x498] sm:$0xff]  }
 0x3eb   : > { %13411 = vmatpush3.bf16.msra.mxu0 %v16331_v63  ;;  %13541 = vmatpush3.bf16.msra.mxu1 %v16333_v25  ;;  %v16336_v25 = vld [vmem:[%s21623_s1 + $0x4e8] sm:$0xff]  }
 0x3ec   : > { %v15463_v22 = vadd.f32 %v13147_v43, %v18659_v30  ;;  %13542 = vmatprep.subr.bf16.mxu1 %v16334_v54 }
 0x3ee   : > { %v13148_v4 = vpop.f32.mrb[148].mxu0 }
 0x3ef   : > { %v13149_v30 = vpop.f32.mrb[149].mxu0  ;;  %13543 = vmatpush3.bf16.msra.mxu1 %v16335_v20 }
 0x3f0   : > { %v13150_v56 = vadd.f32 %v13149_v30, %v13148_v4  ;;  %v13151_v36 = vpop.f32.mrb[150].mxu0  ;;  %13544 = vmatprep.subr.bf16.mxu1 %v16336_v25 }
 0x3f1   : > { %v13152_v19 = vpop.f32.mrb[151].mxu0 }
 0x3f2   : > { %v15454_v7 = vadd.f32 %v13150_v56, %v18665_v14  ;;  %v13153_v26 = vadd.f32 %v13152_v19, %v13151_v36 }
 0x3f4   : > { %v13278_v15 = vpop.f32.mrb[176].mxu1  ;;  %v15460_v63 = vadd.f32 %v13153_v26, %v18667_v2  ;;  %v16337_v26 = vld [vmem:[%s21623_s1 + $0x4a8] sm:$0xff]  }
 0x3f5   : > { %v13279_v43 = vpop.f32.mrb[177].mxu1  ;;  %13545 = vmatpush3.bf16.msra.mxu1 %v16337_v26  ;;  %v16342_v26 = vld [vmem:[%s21623_s1 + $0x4f8] sm:$0xff]  }
 0x3f6   : > { %v13280_v47 = vadd.f32 %v13279_v43, %v13278_v15  ;;  %v13281_v62 = vpop.f32.mrb[178].mxu1  ;;  %v13154_v14 = vpop.f32.mrb[152].mxu0 }
 0x3f7   : > { %v13282_v28 = vpop.f32.mrb[179].mxu1  ;;  %v13155_v56 = vpop.f32.mrb[153].mxu0 }
 0x3f8   : > { %v13283_v4 = vadd.f32 %v13282_v28, %v13281_v62  ;;  %v18830_v30 = vadd.f32 %v15457_v39, %v13280_v47  ;;  %v13156_v15 = vadd.f32 %v13155_v56, %v13154_v14  ;;  %v13157_v19 = vpop.f32.mrb[154].mxu0  ;;  %v16338_v28 = vld [vmem:[%s21623_s1 + $0x4f0] sm:$0xff]  }
 0x3f9   : > { %v13158_v62 = vpop.f32.mrb[155].mxu0  ;;  %v16340_v14 = vld [vmem:[%s21623_s1 + $0x4b0] sm:$0xff]   ;;  %13546 = vmatprep.subr.bf16.mxu1 %v16338_v28 }
 0x3fa   : > { %v18832_v36 = vadd.f32 %v15463_v22, %v13283_v4  ;;  %v15469_v39 = vadd.f32 %v13156_v15, %v18673_v13  ;;  %v13159_v43 = vadd.f32 %v13158_v62, %v13157_v19  ;;  %13547 = vmatpush3.bf16.msra.mxu1 %v16340_v14 }
 0x3fb   : > { %13548 = vmatprep.subr.bf16.mxu1 %v16342_v26 }
 0x3fc   : > { %v13284_v2 = vpop.f32.mrb[180].mxu1  ;;  %v15475_v4 = vadd.f32 %v13159_v43, %v18675_v45  ;;  %v16343_v45 = vld [vmem:[%s21623_s1 + $0x4b8] sm:$0xff]  }
 0x3fd   : > { %v13285_v47 = vpop.f32.mrb[181].mxu1 }
 0x3fe   : > { %v13286_v22 = vadd.f32 %v13285_v47, %v13284_v2  ;;  %v13287_v54 = vpop.f32.mrb[182].mxu1  ;;  %v13160_v13 = vpop.f32.mrb[156].mxu0  ;;  %13549 = vmatpush3.bf16.msra.mxu1 %v16343_v45 }
 0x3ff   : > { %v13288_v20 = vpop.f32.mrb[183].mxu1  ;;  %v13161_v15 = vpop.f32.mrb[157].mxu0 }
 0x400   : > { %v13289_v56 = vadd.f32 %v13288_v20, %v13287_v54  ;;  %v18848_v25 = vadd.f32 %v15454_v7, %v13286_v22  ;;  %v13162_v2 = vadd.f32 %v13161_v15, %v13160_v13  ;;  %v13163_v62 = vpop.f32.mrb[158].mxu0 }
 0x401   : > { %v13164_v43 = vpop.f32.mrb[159].mxu0  ;;  %6330 = vmatmul.mubr.bf16.vlgmr.msra.gmra.mrb[240].mxu1 %v18487_v17 }
 0x402   : > { %v18850_v19 = vadd.f32 %v15460_v63, %v13289_v56  ;;  %v15466_v22 = vadd.f32 %v13162_v2, %v18681_v1  ;;  %v13165_v54 = vadd.f32 %v13164_v43, %v13163_v62  ;;  %v16339_v1 = vld [vmem:[%s21623_s1 + $0x5b8] sm:$0xff]  }
 0x403   : > { %13412 = vmatprep.subr.bf16.mxu0 %v16339_v1 }
 0x404   : > { %v13290_v47 = vpop.f32.mrb[184].mxu1  ;;  %v15472_v14 = vadd.f32 %v13165_v54, %v18683_v3  ;;  %v16341_v3 = vld [vmem:[%s21623_s1 + $0x578] sm:$0xff]  }
 0x405   : > { %v13291_v7 = vpop.f32.mrb[185].mxu1  ;;  %13413 = vmatpush3.bf16.msra.mxu0 %v16341_v3 }
 0x406   : > { %v13292_v63 = vadd.f32 %v13291_v7, %v13290_v47  ;;  %v13293_v28 = vpop.f32.mrb[186].mxu1  ;;  %v13166_v15 = vpop.f32.mrb[160].mxu0 }
 0x407   : > { %v13294_v20 = vpop.f32.mrb[187].mxu1  ;;  %v13167_v42 = vpop.f32.mrb[161].mxu0 }
 0x408   : > { %v13295_v56 = vadd.f32 %v13294_v20, %v13293_v28  ;;  %v18860_v13 = vadd.f32 %v15469_v39, %v13292_v63  ;;  %v13168_v26 = vadd.f32 %v13167_v42, %v13166_v15  ;;  %v13169_v6 = vpop.f32.mrb[162].mxu0 }
 0x409   : > { %v13170_v62 = vpop.f32.mrb[163].mxu0 }
 0x40a   : > { %v18863_v21 = vadd.f32 %v15475_v4, %v13295_v56  ;;  %v15481_v45 = vadd.f32 %v13168_v26, %v18689_v16  ;;  %v13171_v17 = vadd.f32 %v13170_v62, %v13169_v6 }
 0x40c   : > { %v13296_v2 = vpop.f32.mrb[188].mxu1  ;;  %v15487_v43 = vadd.f32 %v13171_v17, %v18691_v50 }
 0x40d   : > { %v13297_v39 = vpop.f32.mrb[189].mxu1 }
 0x40e   : > { %v13298_v47 = vadd.f32 %v13297_v39, %v13296_v2  ;;  %v13299_v4 = vpop.f32.mrb[190].mxu1  ;;  %v13172_v63 = vpop.f32.mrb[164].mxu0 }
 0x40f   : > { %v13300_v42 = vpop.f32.mrb[191].mxu1  ;;  %v13173_v28 = vpop.f32.mrb[165].mxu0 }
 0x410   : > { %v13301_v7 = vadd.f32 %v13300_v42, %v13299_v4  ;;  %v18873_v54 = vadd.f32 %v15466_v22, %v13298_v47  ;;  %v13174_v56 = vadd.f32 %v13173_v28, %v13172_v63  ;;  %v13175_v15 = vpop.f32.mrb[166].mxu0 }
 0x411   : > { %v13176_v60 = vpop.f32.mrb[167].mxu0 }
 0x412   : > { %v18875_v20 = vadd.f32 %v15472_v14, %v13301_v7  ;;  %v15478_v6 = vadd.f32 %v13174_v56, %v18702_v38  ;;  %v13177_v26 = vadd.f32 %v13176_v60, %v13175_v15 }
 0x414   : > { %v13302_v11 = vpop.f32.mrb[192].mxu1  ;;  %v15484_v50 = vadd.f32 %v13177_v26, %v18704_v32 }
 0x415   : > { %v13303_v16 = vpop.f32.mrb[193].mxu1 }
 0x416   : > { %v13304_v1 = vadd.f32 %v13303_v16, %v13302_v11  ;;  %v13305_v2 = vpop.f32.mrb[194].mxu1  ;;  %v13178_v39 = vpop.f32.mrb[168].mxu0 }
 0x417   : > { %v13306_v62 = vpop.f32.mrb[195].mxu1  ;;  %v13179_v17 = vpop.f32.mrb[169].mxu0 }
 0x418   : > { %v13307_v3 = vadd.f32 %v13306_v62, %v13305_v2  ;;  %v18879_v22 = vadd.f32 %v15481_v45, %v13304_v1  ;;  %v13180_v47 = vadd.f32 %v13179_v17, %v13178_v39  ;;  %v13181_v4 = vpop.f32.mrb[170].mxu0 }
 0x419   : > { %v13182_v7 = vpop.f32.mrb[171].mxu0 }
 0x41a   : > { %v18881_v14 = vadd.f32 %v15487_v43, %v13307_v3  ;;  %v15493_v38 = vadd.f32 %v13180_v47, %v18707_v24  ;;  %v13183_v60 = vadd.f32 %v13182_v7, %v13181_v4  ;;  %v18890_v43 = vld [vmem:[%s21623_s1 + $0x5c0] sm:$0xff]  }
 0x41b   : > { %14910 = vmatprep.subr.bf16.mxu0 %v18890_v43 }
 0x41c   : > { %v13308_v42 = vpop.f32.mrb[196].mxu1  ;;  %v15499_v32 = vadd.f32 %v13183_v60, %v18709_v0 }
 0x41d   : > { %v13309_v63 = vpop.f32.mrb[197].mxu1 }
 0x41e   : > { %v13310_v11 = vadd.f32 %v13309_v63, %v13308_v42  ;;  %v13311_v28 = vpop.f32.mrb[198].mxu1  ;;  %v13184_v16 = vpop.f32.mrb[172].mxu0 }
 0x41f   : > { %v13312_v56 = vpop.f32.mrb[199].mxu1  ;;  %v13185_v26 = vpop.f32.mrb[173].mxu0 }
 0x420   : > { %v13313_v15 = vadd.f32 %v13312_v56, %v13311_v28  ;;  %v18885_v45 = vadd.f32 %v15478_v6, %v13310_v11  ;;  %v13186_v2 = vadd.f32 %v13185_v26, %v13184_v16  ;;  %v13187_v24 = vpop.f32.mrb[174].mxu0 }
 0x421   : > { %v13188_v3 = vpop.f32.mrb[175].mxu0 }
 0x422   : > { %v18892_v1 = vadd.f32 %v15484_v50, %v13313_v15  ;;  %v15490_v0 = vadd.f32 %v13186_v2, %v18717_v34  ;;  %v13189_v6 = vadd.f32 %v13188_v3, %v13187_v24 }
 0x424   : > { %v13314_v62 = vpop.f32.mrb[200].mxu1  ;;  %v15496_v42 = vadd.f32 %v13189_v6, %v18719_v53 }
 0x425   : > { %v13315_v39 = vpop.f32.mrb[201].mxu1 }
 0x426   : > { %v13316_v17 = vadd.f32 %v13315_v39, %v13314_v62  ;;  %v13317_v47 = vpop.f32.mrb[202].mxu1  ;;  %v13190_v50 = vpop.f32.mrb[176].mxu0 }
 0x427   : > { %v13318_v4 = vpop.f32.mrb[203].mxu1  ;;  %v13191_v60 = vpop.f32.mrb[177].mxu0 }
 0x428   : > { %v13319_v7 = vadd.f32 %v13318_v4, %v13317_v47  ;;  %v18897_v63 = vadd.f32 %v15493_v38, %v13316_v17  ;;  %v13192_v28 = vadd.f32 %v13191_v60, %v13190_v50  ;;  %v13193_v56 = vpop.f32.mrb[178].mxu0 }
 0x429   : > { %v13194_v16 = vpop.f32.mrb[179].mxu0 }
 0x42a   : > { %v18899_v11 = vadd.f32 %v15499_v32, %v13319_v7  ;;  %v15505_v34 = vadd.f32 %v13192_v28, %v18722_v61  ;;  %v13195_v2 = vadd.f32 %v13194_v16, %v13193_v56 }
 0x42c   : > { %v13320_v15 = vpop.f32.mrb[204].mxu1  ;;  %v15511_v53 = vadd.f32 %v13195_v2, %v18724_v12 }
 0x42d   : > { %v13321_v26 = vpop.f32.mrb[205].mxu1 }
 0x42e   : > { %v13322_v24 = vadd.f32 %v13321_v26, %v13320_v15  ;;  %v13323_v62 = vpop.f32.mrb[206].mxu1  ;;  %v13196_v6 = vpop.f32.mrb[180].mxu0 }
 0x42f   : > { %v13324_v3 = vpop.f32.mrb[207].mxu1  ;;  %v13197_v17 = vpop.f32.mrb[181].mxu0 }
 0x430   : > { %v13325_v39 = vadd.f32 %v13324_v3, %v13323_v62  ;;  %v18903_v38 = vadd.f32 %v15490_v0, %v13322_v24  ;;  %v13198_v47 = vadd.f32 %v13197_v17, %v13196_v6  ;;  %v13199_v4 = vpop.f32.mrb[182].mxu0 }
 0x431   : > { %v13200_v50 = vpop.f32.mrb[183].mxu0 }
 0x432   : > { %v18905_v32 = vadd.f32 %v15496_v42, %v13325_v39  ;;  %v15502_v61 = vadd.f32 %v13198_v47, %v18734_v27  ;;  %v13201_v28 = vadd.f32 %v13200_v50, %v13199_v4 }
 0x434   : > { %v13326_v7 = vpop.f32.mrb[208].mxu1  ;;  %v15508_v12 = vadd.f32 %v13201_v28, %v18736_v58 }
 0x435   : > { %v13327_v60 = vpop.f32.mrb[209].mxu1 }
 0x436   : > { %v13328_v56 = vadd.f32 %v13327_v60, %v13326_v7  ;;  %v13329_v15 = vpop.f32.mrb[210].mxu1  ;;  %v13202_v2 = vpop.f32.mrb[184].mxu0 }
 0x437   : > { %v13330_v16 = vpop.f32.mrb[211].mxu1  ;;  %v13203_v24 = vpop.f32.mrb[185].mxu0 }
 0x438   : > { %v13331_v26 = vadd.f32 %v13330_v16, %v13329_v15  ;;  %v18909_v0 = vadd.f32 %v15505_v34, %v13328_v56  ;;  %v13204_v62 = vadd.f32 %v13203_v24, %v13202_v2  ;;  %v13205_v3 = vpop.f32.mrb[186].mxu0 }
 0x439   : > { %v13206_v6 = vpop.f32.mrb[187].mxu0 }
 0x43a   : > { %v18911_v42 = vadd.f32 %v15511_v53, %v13331_v26  ;;  %v15517_v27 = vadd.f32 %v13204_v62, %v18740_v33  ;;  %v13207_v47 = vadd.f32 %v13206_v6, %v13205_v3 }
 0x43c   : > { %v13332_v39 = vpop.f32.mrb[212].mxu1  ;;  %v15523_v58 = vadd.f32 %v13207_v47, %v18742_v46 }
 0x43d   : > { %v13333_v17 = vpop.f32.mrb[213].mxu1 }
 0x43e   : > { %v13334_v4 = vadd.f32 %v13333_v17, %v13332_v39  ;;  %v13335_v7 = vpop.f32.mrb[214].mxu1  ;;  %v13208_v28 = vpop.f32.mrb[188].mxu0 }
 0x43f   : > { %v13336_v50 = vpop.f32.mrb[215].mxu1  ;;  %v13209_v56 = vpop.f32.mrb[189].mxu0 }
 0x440   : > { %v13337_v60 = vadd.f32 %v13336_v50, %v13335_v7  ;;  %v18915_v34 = vadd.f32 %v15502_v61, %v13334_v4  ;;  %v13210_v15 = vadd.f32 %v13209_v56, %v13208_v28  ;;  %v13211_v16 = vpop.f32.mrb[190].mxu0 }
 0x441   : > { %v13212_v2 = vpop.f32.mrb[191].mxu0 }
 0x442   : > { %v18917_v53 = vadd.f32 %v15508_v12, %v13337_v60  ;;  %v15514_v33 = vadd.f32 %v13210_v15, %v18752_v18  ;;  %v13213_v62 = vadd.f32 %v13212_v2, %v13211_v16 }
 0x444   : > { %v13338_v26 = vpop.f32.mrb[216].mxu1  ;;  %v15520_v46 = vadd.f32 %v13213_v62, %v18754_v31 }
 0x445   : > { %v13339_v24 = vpop.f32.mrb[217].mxu1 }
 0x446   : > { %v13340_v3 = vadd.f32 %v13339_v24, %v13338_v26  ;;  %v13341_v39 = vpop.f32.mrb[218].mxu1  ;;  %v13214_v47 = vpop.f32.mrb[192].mxu0 }
 0x447   : > { %v13342_v6 = vpop.f32.mrb[219].mxu1  ;;  %v13215_v4 = vpop.f32.mrb[193].mxu0 }
 0x448   : > { %v13343_v17 = vadd.f32 %v13342_v6, %v13341_v39  ;;  %v18921_v61 = vadd.f32 %v15517_v27, %v13340_v3  ;;  %v13216_v7 = vadd.f32 %v13215_v4, %v13214_v47  ;;  %v13217_v50 = vpop.f32.mrb[194].mxu0 }
 0x449   : > { %v13218_v28 = vpop.f32.mrb[195].mxu0 }
 0x44a   : > { %v18923_v12 = vadd.f32 %v15523_v58, %v13343_v17  ;;  %v15529_v18 = vadd.f32 %v13216_v7, %v18758_v10  ;;  %v13219_v15 = vadd.f32 %v13218_v28, %v13217_v50 }
 0x44c   : > { %v13344_v60 = vpop.f32.mrb[220].mxu1  ;;  %v15535_v31 = vadd.f32 %v13219_v15, %v18760_v51 }
 0x44d   : > { %v13345_v56 = vpop.f32.mrb[221].mxu1 }
 0x44e   : > { %v13346_v16 = vadd.f32 %v13345_v56, %v13344_v60  ;;  %v13347_v26 = vpop.f32.mrb[222].mxu1  ;;  %v13220_v62 = vpop.f32.mrb[196].mxu0 }
 0x44f   : > { %v13348_v2 = vpop.f32.mrb[223].mxu1  ;;  %v13221_v3 = vpop.f32.mrb[197].mxu0 }
 0x450   : > { %v13349_v24 = vadd.f32 %v13348_v2, %v13347_v26  ;;  %v18927_v27 = vadd.f32 %v15514_v33, %v13346_v16  ;;  %v13222_v39 = vadd.f32 %v13221_v3, %v13220_v62  ;;  %v13223_v6 = vpop.f32.mrb[198].mxu0 }
 0x451   : > { %v13224_v47 = vpop.f32.mrb[199].mxu0 }
 0x452   : > { %v18929_v58 = vadd.f32 %v15520_v46, %v13349_v24  ;;  %v15526_v10 = vadd.f32 %v13222_v39, %v18770_v23  ;;  %v13225_v7 = vadd.f32 %v13224_v47, %v13223_v6 }
 0x454   : > { %v13350_v17 = vpop.f32.mrb[224].mxu1  ;;  %v15532_v51 = vadd.f32 %v13225_v7, %v18772_v29 }
 0x455   : > { %v13351_v4 = vpop.f32.mrb[225].mxu1 }
 0x456   : > { %v13352_v50 = vadd.f32 %v13351_v4, %v13350_v17  ;;  %v13353_v60 = vpop.f32.mrb[226].mxu1  ;;  %v13226_v15 = vpop.f32.mrb[200].mxu0 }
 0x457   : > { %v13354_v28 = vpop.f32.mrb[227].mxu1  ;;  %v13227_v16 = vpop.f32.mrb[201].mxu0 }
 0x458   : > { %v13355_v56 = vadd.f32 %v13354_v28, %v13353_v60  ;;  %v18933_v33 = vadd.f32 %v15529_v18, %v13352_v50  ;;  %v13228_v26 = vadd.f32 %v13227_v16, %v13226_v15  ;;  %v13229_v2 = vpop.f32.mrb[202].mxu0 }
 0x459   : > { %v13230_v62 = vpop.f32.mrb[203].mxu0 }
 0x45a   : > { %v18935_v46 = vadd.f32 %v15535_v31, %v13355_v56  ;;  %v15541_v23 = vadd.f32 %v13228_v26, %v18776_v52  ;;  %v13231_v39 = vadd.f32 %v13230_v62, %v13229_v2 }
 0x45c   : > { %v13356_v24 = vpop.f32.mrb[228].mxu1  ;;  %v15547_v29 = vadd.f32 %v13231_v39, %v18778_v57 }
 0x45d   : > { %v13357_v3 = vpop.f32.mrb[229].mxu1 }
 0x45e   : > { %v13358_v6 = vadd.f32 %v13357_v3, %v13356_v24  ;;  %v13359_v17 = vpop.f32.mrb[230].mxu1  ;;  %v13232_v7 = vpop.f32.mrb[204].mxu0 }
 0x45f   : > { %v13360_v47 = vpop.f32.mrb[231].mxu1  ;;  %v13233_v50 = vpop.f32.mrb[205].mxu0 }
 0x460   : > { %v13361_v4 = vadd.f32 %v13360_v47, %v13359_v17  ;;  %v18939_v18 = vadd.f32 %v15526_v10, %v13358_v6  ;;  %v13234_v60 = vadd.f32 %v13233_v50, %v13232_v7  ;;  %v13235_v28 = vpop.f32.mrb[206].mxu0 }
 0x461   : > { %v13236_v15 = vpop.f32.mrb[207].mxu0 }
 0x462   : > { %v18941_v31 = vadd.f32 %v15532_v51, %v13361_v4  ;;  %v15538_v52 = vadd.f32 %v13234_v60, %v18786_v40  ;;  %v13237_v26 = vadd.f32 %v13236_v15, %v13235_v28 }
 0x464   : > { %v13362_v56 = vpop.f32.mrb[232].mxu1  ;;  %v15544_v57 = vadd.f32 %v13237_v26, %v18788_v59  ;;  %v18956_v59 = vld [vmem:[%s21624_s2 + $0x1] ss:$0 sm:$0xff] }
 0x465   : > { %v13363_v16 = vpop.f32.mrb[233].mxu1 }
 0x466   : > { %v13364_v2 = vadd.f32 %v13363_v16, %v13362_v56  ;;  %v13365_v24 = vpop.f32.mrb[234].mxu1 }
 0x467   : > { %v13366_v62 = vpop.f32.mrb[235].mxu1 }
 0x468   : > { %v13367_v3 = vadd.f32 %v13366_v62, %v13365_v24  ;;  %v18945_v10 = vadd.f32 %v15541_v23, %v13364_v2 }
 0x46a   : > { %v18947_v39 = vadd.f32 %v15547_v29, %v13367_v3 }
 0x46c   : > { %v13368_v51 = vpop.f32.mrb[236].mxu1 }
 0x46d   : > { %v13369_v6 = vpop.f32.mrb[237].mxu1 }
 0x46e   : > { %v13370_v17 = vadd.f32 %v13369_v6, %v13368_v51  ;;  %v13371_v47 = vpop.f32.mrb[238].mxu1 }
 0x46f   : > { %v13372_v4 = vpop.f32.mrb[239].mxu1 }
 0x470   : > { %v13373_v7 = vadd.f32 %v13372_v4, %v13371_v47  ;;  %v18949_v50 = vadd.f32 %v15538_v52, %v13370_v17 }
 0x472   : > { %v18951_v40 = vadd.f32 %v15544_v57, %v13373_v7 }
 0x474   : > { %v14880_v60 = vpop.f32.mrb[144].mxu1 }
 0x475   : > { %v15456_v23 = vadd.f32 %v18848_v25, %v14880_v60  ;;  %v5003_v29 = vpop.f32.mrb[145].mxu1 }
 0x476   : > { %v15459_v28 = vadd.f32 %v18830_v30, %v5003_v29  ;;  %v14881_v56 = vpop.f32.mrb[146].mxu1 }
 0x477   : > { %v5172_v15 = vadd.f32 %v15456_v23, %v18956_v59  ;;  %v15462_v16 = vadd.f32 %v18850_v19, %v14881_v56  ;;  %v5006_v52 = vpop.f32.mrb[147].mxu1 }
 0x478   : > { %v5170_v26 = vadd.f32 %v15459_v28, %v18956_v59  ;;  %v15465_v2 = vadd.f32 %v18832_v36, %v5006_v52 }
 0x479   : > { %v5173_v24 = vadd.f32 %v15462_v16, %v18956_v59  ;;  %v5204_v57 = vmax.f32 %v5172_v15, 0.0 }
 0x47a   : > { %v5171_v62 = vadd.f32 %v15465_v2, %v18956_v59  ;;  %v5202_v25 = vmax.f32 %v5170_v26, 0.0 }
 0x47b   : > { %v5205_v3 = vmax.f32 %v5173_v24, 0.0 }
 0x47c   : > { %v5203_v51 = vmax.f32 %v5171_v62, 0.0  ;;  %v14884_v6 = vpop.f32.mrb[148].mxu1 }
 0x47d   : > { %v5235_v30 = vpack.c.bf16 %v5205_v3, %v5204_v57  ;;  %v15468_v17 = vadd.f32 %v18873_v54, %v14884_v6  ;;  %v5019_v47 = vpop.f32.mrb[149].mxu1 }
 0x47e   : > { %v5234_v4 = vpack.c.bf16 %v5203_v51, %v5202_v25  ;;  %v15471_v19 = vadd.f32 %v18860_v13, %v5019_v47  ;;  %v14885_v7 = vpop.f32.mrb[150].mxu1 }
 0x47f   : > { %v5258_v60 = vshrl.u32 %v5235_v30, 16  ;;  %v5261_v23 = vshll.u32 %v5235_v30, 16  ;;  %5507 = vst.msk [vmem:[#allocation2 + $0x38] sm:$0xff] %vm22116_vm5, %v5235_v30  ;;  %v5176_v36 = vadd.f32 %v15468_v17, %v18956_v59  ;;  %v15474_v29 = vadd.f32 %v18875_v20, %v14885_v7  ;;  %v5022_v28 = vpop.f32.mrb[151].mxu1 }
 0x480   : > { %v5251_v56 = vshrl.u32 %v5234_v4, 16  ;;  %v5254_v15 = vshll.u32 %v5234_v4, 16  ;;  %5506 = vst.msk [vmem:[#allocation2 + $0x20] sm:$0xff] %vm22120_vm15, %v5234_v4  ;;  %v5174_v54 = vadd.f32 %v15471_v19, %v18956_v59  ;;  %v15477_v16 = vadd.f32 %v18863_v21, %v5022_v28 }
 0x481   : > { %v18974_v52 = vrot.slane %v5258_v60, 7  ;;  %v5177_v13 = vadd.f32 %v15474_v29, %v18956_v59  ;;  %v5396_v20 = vrot.slane %v5261_v23, 1  ;;  %v5208_v57 = vmax.f32 %v5176_v36, 0.0 }
 0x482   : > { %v5253_v26 = vrot.slane %v5251_v56, 7  ;;  %v5394_v2 = vrot.slane %v5254_v15, 1  ;;  %v5175_v24 = vadd.f32 %v15477_v16, %v18956_v59  ;;  %v5206_v6 = vmax.f32 %v5174_v54, 0.0 }
 0x483   : > { %v5263_v62 = vor.u32 %v5261_v23, %v18974_v52  ;;  %v5209_v3 = vmax.f32 %v5177_v13, 0.0  ;;  %vm22123_vm5 = vnez %v21999_v48 }
 0x484   : > { %v5256_v25 = vor.u32 %v5254_v15, %v5253_v26  ;;  %v5395_v51 = vor.u32 %v5394_v2, %v5251_v56  ;;  %v5207_v30 = vmax.f32 %v5175_v24, 0.0  ;;  %v14888_v17 = vpop.f32.mrb[152].mxu1 }
 0x485   : > { %v5264_v21 = vsel %vm22121_vm9, %v5253_v26, %v5263_v62  ;;  %v18980_v47 = vpack.c.bf16 %v5209_v3, %v5208_v57  ;;  %v15480_v4 = vadd.f32 %v18885_v45, %v14888_v17  ;;  %v5035_v19 = vpop.f32.mrb[153].mxu1  ;;  %vm22124_vm9 = vmmov %vm22120_vm15  ;;  %v5398_v57 = vor.u32 %v5396_v20, %v5258_v60 }
 0x486   : > { %v5393_v7 = vsel %vm17322_vm1, 0, %v5256_v25  ;;  %v5397_v29 = vsel %vm22122_vm12, %v5395_v51, %v5396_v20  ;;  %v5459_v23 = vsel %vm17413_vm10, %v5264_v21, 0  ;;  %v5236_v36 = vpack.c.bf16 %v5207_v30, %v5206_v6  ;;  %v14889_v28 = vpop.f32.mrb[154].mxu1  ;;  %vm22125_vm12 = vmmov %vm22124_vm9 }
 0x487   : > { %v5458_v56 = vsel %vm22123_vm5, %v5393_v7, 0  ;;  %v5474_v15 = vsel %vm17163_vm13, %v5397_v29, 0  ;;  %5491 = vst.msk [vmem:[#allocation2 + $0x30] sm:$0xff] %vm22120_vm15, %v5459_v23  ;;  %v5274_v45 = vshrl.u32 %v18980_v47, 16  ;;  %v5277_v54 = vshll.u32 %v18980_v47, 16  ;;  %v5038_v16 = vpop.f32.mrb[155].mxu1  ;;  %vm22126_vm10 = vmmov %vm22124_vm9 }
 0x488   : > { %5509 = vst.msk [vmem:[#allocation2 + $0x68] sm:$0xff] %vm22124_vm9, %v18980_v47  ;;  %v5542_v13 = vld [vmem:[#allocation2 + $0x20] sm:$0xff]  ;;  %v5266_v26 = vshrl.u32 %v5236_v36, 16  ;;  %v5269_v2 = vshll.u32 %v5236_v36, 16  ;;  %vm22127_vm5 = vmmov %vm22124_vm9  ;;  %v5180_v24 = vadd.f32 %v15480_v4, %v18956_v59  ;;  %v15483_v62 = vadd.f32 %v18879_v22, %v5035_v19 }
 0x489   : > { %5490 = vst.msk [vmem:[#allocation2 + $0x18] sm:$0xff] %vm22125_vm12, %v5458_v56  ;;  %5863 = vmatprep.mubr.bf16.mxu0 %v5542_v13  ;;  %6337 = vmatprep.mubr.bf16.mxu1 %v5542_v13  ;;  %v19004_v3 = vrot.slane %v5274_v45, 7  ;;  %v15486_v25 = vadd.f32 %v18892_v1, %v14889_v28  ;;  %v15489_v51 = vadd.f32 %v18881_v14, %v5038_v16  ;;  %v5402_v6 = vrot.slane %v5277_v54, 1 }
 0x48a   : > { %5522 = vst.msk [vmem:[#allocation2 + $0x28] sm:$0xff] %vm22126_vm10, %v5474_v15  ;;  %v5268_v30 = vrot.slane %v5266_v26, 7  ;;  %v5399_v17 = vrot.slane %v5269_v2, 1  ;;  %v5178_v21 = vadd.f32 %v15483_v62, %v18956_v59  ;;  %v5212_v7 = vmax.f32 %v5180_v24, 0.0 }
 0x48b   : > { %5508 = vst.msk [vmem:[#allocation2 + $0x50] sm:$0xff] %vm22127_vm5, %v5236_v36  ;;  %v5279_v4 = vor.u32 %v5277_v54, %v19004_v3  ;;  %v5181_v22 = vadd.f32 %v15486_v25, %v18956_v59  ;;  %v5179_v60 = vadd.f32 %v15489_v51, %v18956_v59  ;;  %vm22128_vm10 = vsmask.f32 7424 }
 0x48c   : > { %v5271_v20 = vor.u32 %v5269_v2, %v5268_v30  ;;  %v5400_v19 = vsel %vm22128_vm10, %v5398_v57, %v5399_v17  ;;  %v5401_v29 = vor.u32 %v5399_v17, %v5266_v26  ;;  %v5210_v23 = vmax.f32 %v5178_v21, 0.0  ;;  %v14892_v1 = vpop.f32.mrb[156].mxu1  ;;  %vm22131_vm9 = vmmov %vm22128_vm10 }
 0x48d   : > { %vm22129_vm5 = vsmask.f32 256  ;;  %v5475_v36 = vsel %vm17201_vm0, %v5400_v19, 0  ;;  %v5213_v28 = vmax.f32 %v5181_v22, 0.0  ;;  %v5211_v56 = vmax.f32 %v5179_v60, 0.0  ;;  %v5051_v15 = vpop.f32.mrb[157].mxu1 }
 0x48e   : > { %v5280_v14 = vsel %vm22129_vm5, %v5268_v30, %v5279_v4  ;;  %vm22130_vm15 = vmmov %vm22129_vm5  ;;  %v5403_v16 = vsel %vm22131_vm9, %v5401_v29, %v5402_v6  ;;  %5523 = vst.msk [vmem:[#allocation2 + $0x40] sm:$0xff] %vm22125_vm12, %v5475_v36  ;;  %v15492_v26 = vadd.f32 %v18903_v38, %v14892_v1  ;;  %v14893_v2 = vpop.f32.mrb[158].mxu1  ;;  %vm22132_vm10 = vnez %v22012_v35  ;;  %v16345_v30 = vld [vmem:[%s21623_s1 + $0x5c8] sm:$0xff]   ;;  %v16346_v36 = vld [vmem:[%s21623_s1 + $0x5d0] sm:$0xff]  }
 0x48f   : > { %v5272_v54 = vsel %vm22130_vm15, %v18974_v52, %v5271_v20  ;;  %v5461_v13 = vsel %vm17524_vm8, %v5280_v14, 0  ;;  %v5476_v62 = vsel %vm22132_vm10, %v5403_v16, 0  ;;  %vm22133_vm5 = vmmov %vm22125_vm12  ;;  %v19028_v57 = vpack.c.bf16 %v5213_v28, %v5212_v7  ;;  %v5054_v25 = vpop.f32.mrb[159].mxu1  ;;  %v5545_v7 = vld [vmem:[#allocation2 + $0x38] sm:$0xff] }
 0x490   : > { %v5460_v24 = vsel %vm17469_vm3, %v5272_v54, 0  ;;  %5493 = vst.msk [vmem:[#allocation2 + $0x60] sm:$0xff] %vm22133_vm5, %v5461_v13  ;;  %v5238_v52 = vpack.c.bf16 %v5211_v56, %v5210_v23  ;;  %v5541_v51 = vld [vmem:[#allocation2 + $0x18] sm:$0xff]  ;;  %vm22134_vm15 = vmmov %vm22133_vm5  ;;  %v5184_v38 = vadd.f32 %v15492_v26, %v18956_v59  ;;  %v15495_v17 = vadd.f32 %v18897_v63, %v5051_v15 }
 0x491   : > { %5492 = vst.msk [vmem:[#allocation2 + $0x48] sm:$0xff] %vm22134_vm15, %v5460_v24  ;;  %vm22135_vm9 = vmmov %vm22133_vm5  ;;  %v15498_v21 = vadd.f32 %v18905_v32, %v14893_v2  ;;  %v15501_v4 = vadd.f32 %v18899_v11, %v5054_v25  ;;  %5864 = vmatmul.mubr.bf16.vlgmr.msra.gmra.mrb[208].mxu0 %v5541_v51  ;;  %v5290_v22 = vshrl.u32 %v19028_v57, 16  ;;  %v5293_v60 = vshll.u32 %v19028_v57, 16  ;;  %6338 = vmatmul.mubr.bf16.gmra.mrb[244].mxu1 %v5541_v51 }
 0x492   : > { %5524 = vst.msk [vmem:[#allocation2 + $0x58] sm:$0xff] %vm22135_vm9, %v5476_v62  ;;  %vm22136_vm12 = vmmov %vm22133_vm5  ;;  %v5282_v20 = vshrl.u32 %v5238_v52, 16  ;;  %v5285_v19 = vshll.u32 %v5238_v52, 16  ;;  %5871 = vmatprep.mubr.bf16.mxu0 %v5545_v7  ;;  %v5182_v63 = vadd.f32 %v15495_v17, %v18956_v59  ;;  %14911 = vmatpush3.bf16.msra.mxu0 %v18890_v43  ;;  %v5404_v29 = vor.u32 %v5402_v6, %v5274_v45 }
 0x493   : > { %5511 = vst.msk [vmem:[#allocation2 + $0x98] sm:$0xff] %vm22136_vm12, %v19028_v57  ;;  %v5185_v32 = vadd.f32 %v15498_v21, %v18956_v59  ;;  %v5183_v11 = vadd.f32 %v15501_v4, %v18956_v59  ;;  %6345 = vmatprep.mubr.bf16.mxu1 %v5545_v7  ;;  %v19052_v23 = vrot.slane %v5290_v22, 7  ;;  %14912 = vmatprep.subr.bf16.mxu0 %v16345_v30  ;;  %v5216_v28 = vmax.f32 %v5184_v38, 0.0  ;;  %v19069_v4 = vld [vmem:[#allocation2 + $0x30] sm:$0xff]  ;;  %v16347_v7 = vld [vmem:[%s21623_s1 + $0x5d8] sm:$0xff]  }
 0x494   : > { %5510 = vst.msk [vmem:[#allocation2 + $0x80] sm:$0xff] %vm22133_vm5, %v5238_v52  ;;  %v5284_v1 = vrot.slane %v5282_v20, 7  ;;  %v5405_v14 = vrot.slane %v5285_v19, 1  ;;  %v5214_v56 = vmax.f32 %v5182_v63, 0.0  ;;  %v14896_v43 = vpop.f32.mrb[160].mxu1  ;;  %v5408_v47 = vrot.slane %v5293_v60, 1 }
 0x495   : > { %v5217_v15 = vmax.f32 %v5185_v32, 0.0  ;;  %v5215_v54 = vmax.f32 %v5183_v11, 0.0  ;;  %v5295_v16 = vor.u32 %v5293_v60, %v19052_v23  ;;  %vm22137_vm15 = vsmask.f32 7424  ;;  %v5067_v13 = vpop.f32.mrb[161].mxu1  ;;  %v22143_v60 = vld [vmem:[#allocation4_spill] sm:$0xff] }
 0x496   : > { %v5287_v45 = vor.u32 %v5285_v19, %v5284_v1  ;;  %v5406_v6 = vsel %vm22137_vm15, %v5404_v29, %v5405_v14  ;;  %v5407_v26 = vor.u32 %v5405_v14, %v5282_v20  ;;  %vm22138_vm9 = vnez %v22019_v49  ;;  %v14897_v52 = vpop.f32.mrb[162].mxu1  ;;  %14913 = vmatpush3.bf16.msra.mxu0 %v16345_v30  ;;  %v22146_v19 = vld [vmem:[#allocation19_spill] sm:$0xff] }
 0x497   : > { %v5477_v2 = vsel %vm22138_vm9, %v5406_v6, 0  ;;  %v19061_v24 = vpack.c.bf16 %v5217_v15, %v5216_v28  ;;  %v5240_v62 = vpack.c.bf16 %v5215_v54, %v5214_v56  ;;  %vm22139_vm12 = vsmask.f32 256  ;;  %v5070_v21 = vpop.f32.mrb[163].mxu1  ;;  %14914 = vmatprep.subr.bf16.mxu0 %v16346_v36 }
 0x498   : > { %v5288_v25 = vsel %vm22139_vm12, %v19004_v3, %v5287_v45  ;;  %vm22140_vm5 = vmmov %vm22139_vm12  ;;  %vm22141_vm10 = vcmask 523264   ;;  %v15504_v38 = vadd.f32 %v18915_v34, %v14896_v43  ;;  %v15507_v17 = vadd.f32 %v18909_v0, %v5067_v13  ;;  %v19084_v0 = vld [vmem:[#allocation2 + $0x50] sm:$0xff]  ;;  %v16348_v45 = vld [vmem:[%s21623_s1 + $0x5e0] sm:$0xff]  }
 0x499   : > { %v5296_v51 = vsel %vm22140_vm5, %v5284_v1, %v5295_v16  ;;  %5525 = vst.msk [vmem:[#allocation2 + $0x70] sm:$0xff] %vm22141_vm10, %v5477_v2  ;;  %v5409_v30 = vsel %vm22137_vm15, %v5407_v26, %v5408_v47  ;;  %vm22142_vm12 = vnez %v22023_v37  ;;  %vm22144_vm5 = vnez %v22143_v60  ;;  %5513 = vst.msk [vmem:[#allocation2 + $0xc8] sm:$0xff] %vm22141_vm10, %v19061_v24  ;;  %5872 = vmatmul.mubr.bf16.gmra.mrb[212].mxu0 %v19069_v4 }
 0x49a   : > { %v5462_v3 = vsel %vm22142_vm12, %v5288_v25, 0  ;;  %v5463_v20 = vsel %vm22144_vm5, %v5296_v51, 0  ;;  %v5306_v34 = vshrl.u32 %v19061_v24, 16  ;;  %vm22145_vm9 = vmmov %vm22141_vm10  ;;  %vm22147_vm3 = vnez %v22146_v19  ;;  %6346 = vmatmul.mubr.bf16.gmra.mrb[248].mxu1 %v19069_v4  ;;  %5879 = vmatprep.mubr.bf16.mxu0 %v19084_v0  ;;  %v16365_v19 = vld [vmem:[%s21623_s1 + $0x610] sm:$0xff]  }
 0x49b   : > { %5512 = vst.msk [vmem:[#allocation2 + $0xb0] sm:$0xff] %vm22145_vm9, %v5240_v62  ;;  %v5478_v63 = vsel %vm22147_vm3, %v5409_v30, 0  ;;  %vm22148_vm15 = vmmov %vm22145_vm9  ;;  %v5309_v32 = vshll.u32 %v19061_v24, 16  ;;  %v5298_v11 = vshrl.u32 %v5240_v62, 16  ;;  %v5301_v29 = vshll.u32 %v5240_v62, 16  ;;  %6353 = vmatprep.mubr.bf16.mxu1 %v19084_v0  ;;  %14915 = vmatpush3.bf16.msra.mxu0 %v16346_v36 }
 0x49c   : > { %5494 = vst.msk [vmem:[#allocation2 + $0x78] sm:$0xff] %vm22148_vm15, %v5462_v3  ;;  %vm22149_vm12 = vmmov %vm22145_vm9  ;;  %v19096_v1 = vrot.slane %v5306_v34, 7  ;;  %v5188_v14 = vadd.f32 %v15504_v38, %v18956_v59  ;;  %v5186_v28 = vadd.f32 %v15507_v17, %v18956_v59  ;;  %v15510_v56 = vadd.f32 %v18917_v53, %v14897_v52  ;;  %14916 = vmatprep.subr.bf16.mxu0 %v16347_v7  ;;  %v14900_v2 = vpop.f32.mrb[164].mxu1  ;;  %v22152_v52 = vld [vmem:[#allocation20_spill] sm:$0xff]  ;;  %v22156_v3 = vld [vmem:[#allocation6_spill] sm:$0xff] }
 0x49d   : > { %5495 = vst.msk [vmem:[#allocation2 + $0x90] sm:$0xff] %vm22149_vm12, %v5463_v20  ;;  %v5410_v15 = vor.u32 %v5408_v47, %v5290_v22  ;;  %v5300_v54 = vrot.slane %v5298_v11, 7  ;;  %v5411_v43 = vrot.slane %v5301_v29, 1  ;;  %v15513_v16 = vadd.f32 %v18911_v42, %v5070_v21  ;;  %v5083_v62 = vpop.f32.mrb[165].mxu1 }
 0x49e   : > { %5526 = vst.msk [vmem:[#allocation2 + $0x88] sm:$0xff] %vm22145_vm9, %v5478_v63  ;;  %v5311_v6 = vor.u32 %v5309_v32, %v19096_v1  ;;  %v5414_v13 = vrot.slane %v5309_v32, 1  ;;  %v5220_v26 = vmax.f32 %v5188_v14, 0.0  ;;  %v5189_v53 = vadd.f32 %v15510_v56, %v18956_v59  ;;  %v14901_v17 = vpop.f32.mrb[166].mxu1 }
 0x49f   : > { %v5303_v36 = vor.u32 %v5301_v29, %v5300_v54  ;;  %vm22150_vm12 = vsmask.f32 7424  ;;  %v5413_v22 = vor.u32 %v5411_v43, %v5298_v11  ;;  %v5218_v47 = vmax.f32 %v5186_v28, 0.0  ;;  %14917 = vmatpush3.bf16.msra.mxu0 %v16347_v7  ;;  %v5086_v32 = vpop.f32.mrb[167].mxu1  ;;  %v19122_v11 = vld [vmem:[#allocation2 + $0x48] sm:$0xff]  ;;  %v22159_v29 = vld [vmem:[#allocation5_spill] sm:$0xff] }
 0x4a0   : > { %v5412_v57 = vsel %vm22150_vm12, %v5410_v15, %v5411_v43  ;;  %vm22151_vm10 = vsmask.f32 256  ;;  %vm22153_vm15 = vnez %v22152_v52  ;;  %v5221_v51 = vmax.f32 %v5189_v53, 0.0  ;;  %vm22155_vm3 = vmmov %vm22150_vm12  ;;  %14918 = vmatprep.subr.bf16.mxu0 %v16348_v45  ;;  %v22161_v7 = vld [vmem:[#allocation21_spill] sm:$0xff]  ;;  %v16364_v52 = vld [vmem:[%s21623_s1 + $0x650] sm:$0xff]  }
 0x4a1   : > { %v5312_v42 = vsel %vm22151_vm10, %v5300_v54, %v5311_v6  ;;  %v5479_v25 = vsel %vm22153_vm15, %v5412_v57, 0  ;;  %v5187_v38 = vadd.f32 %v15513_v16, %v18956_v59  ;;  %vm22154_vm9 = vmmov %vm22151_vm10  ;;  %v5415_v30 = vsel %vm22155_vm3, %v5413_v22, %v5414_v13  ;;  %5880 = vmatmul.mubr.bf16.gmra.mrb[216].mxu0 %v19122_v11  ;;  %v19142_v6 = vld [vmem:[#allocation2 + $0x68] sm:$0xff] }
 0x4a2   : > { %v5304_v21 = vsel %vm22154_vm9, %v19052_v23, %v5303_v36  ;;  %vm22157_vm12 = vnez %v22156_v3  ;;  %vm22158_vm5 = vcmask 523264   ;;  %v15516_v63 = vadd.f32 %v18927_v27, %v14900_v2  ;;  %v16349_v27 = vld [vmem:[%s21623_s1 + $0x5e8] sm:$0xff]   ;;  %6354 = vmatmul.mubr.bf16.gmra.mrb[252].mxu1 %v19122_v11  ;;  %5887 = vmatprep.mubr.bf16.mxu0 %v19142_v6 }
 0x4a3   : > { %v5465_v20 = vsel %vm22157_vm12, %v5312_v42, 0  ;;  %5527 = vst.msk [vmem:[#allocation2 + $0xa0] sm:$0xff] %vm22158_vm5, %v5479_v25  ;;  %vm22160_vm10 = vnez %v22159_v29  ;;  %vm22162_vm15 = vnez %v22161_v7  ;;  %vm22163_vm9 = vmmov %vm22158_vm5  ;;  %v19129_v23 = vpack.c.bf16 %v5221_v51, %v5220_v26  ;;  %6361 = vmatprep.mubr.bf16.mxu1 %v19142_v6  ;;  %14919 = vmatpush3.bf16.msra.mxu0 %v16348_v45  ;;  %v16361_v7 = vld [vmem:[%s21623_s1 + $0x600] sm:$0xff]   ;;  %v16362_v29 = vld [vmem:[%s21623_s1 + $0x648] sm:$0xff]  }
 0x4a4   : > { %v5464_v14 = vsel %vm22160_vm10, %v5304_v21, 0  ;;  %v5480_v28 = vsel %vm22162_vm15, %v5415_v30, 0  ;;  %5497 = vst.msk [vmem:[#allocation2 + $0xc0] sm:$0xff] %vm22163_vm9, %v5465_v20  ;;  %v5219_v56 = vmax.f32 %v5187_v38, 0.0  ;;  %vm22164_vm3 = vmmov %vm22158_vm5  ;;  %v5192_v15 = vadd.f32 %v15516_v63, %v18956_v59  ;;  %v14904_v42 = vpop.f32.mrb[168].mxu1  ;;  %14920 = vmatprep.subr.bf16.mxu0 %v16349_v27  ;;  %v16350_v20 = vld [vmem:[%s21623_s1 + $0x5f0] sm:$0xff]  }
 0x4a5   : > { %5496 = vst.msk [vmem:[#allocation2 + $0xa8] sm:$0xff] %vm22164_vm3, %v5464_v14  ;;  %vm22165_vm5 = vmmov %vm22164_vm3  ;;  %v15519_v54 = vadd.f32 %v18921_v61, %v5083_v62  ;;  %v15522_v43 = vadd.f32 %v18929_v58, %v14901_v17  ;;  %v15525_v16 = vadd.f32 %v18923_v12, %v5086_v32  ;;  %v5322_v26 = vshrl.u32 %v19129_v23, 16  ;;  %v16363_v3 = vld [vmem:[%s21623_s1 + $0x608] sm:$0xff]  }
 0x4a6   : > { %5528 = vst.msk [vmem:[#allocation2 + $0xb8] sm:$0xff] %vm22165_vm5, %v5480_v28  ;;  %v5325_v53 = vshll.u32 %v19129_v23, 16  ;;  %vm22166_vm9 = vmmov %vm22164_vm3  ;;  %v5242_v2 = vpack.c.bf16 %v5219_v56, %v5218_v47  ;;  %v5416_v61 = vor.u32 %v5414_v13, %v5306_v34  ;;  %v5224_v47 = vmax.f32 %v5192_v15, 0.0  ;;  %v5099_v13 = vpop.f32.mrb[169].mxu1 }
 0x4a7   : > { %5515 = vst.msk [vmem:[#allocation2 + $0xf8] sm:$0xff] %vm22166_vm9, %v19129_v23  ;;  %v5190_v12 = vadd.f32 %v15519_v54, %v18956_v59  ;;  %v5193_v58 = vadd.f32 %v15522_v43, %v18956_v59  ;;  %v5191_v36 = vadd.f32 %v15525_v16, %v18956_v59  ;;  %v19155_v57 = vrot.slane %v5322_v26, 7  ;;  %v14905_v30 = vpop.f32.mrb[170].mxu1  ;;  %v19169_v23 = vld [vmem:[#allocation2 + $0x60] sm:$0xff]  ;;  %14921 = vmatpush3.bf16.msra.mxu0 %v16349_v27 }
 0x4a8   : > { %v5314_v22 = vshrl.u32 %v5242_v2, 16  ;;  %v5317_v62 = vshll.u32 %v5242_v2, 16  ;;  %5514 = vst.msk [vmem:[#allocation2 + $0xe0] sm:$0xff] %vm22164_vm3, %v5242_v2  ;;  %v15528_v34 = vadd.f32 %v18939_v18, %v14904_v42  ;;  %v5420_v17 = vrot.slane %v5325_v53, 1  ;;  %v5102_v18 = vpop.f32.mrb[171].mxu1  ;;  %v19174_v16 = vld [vmem:[#allocation2 + $0x80] sm:$0xff]  ;;  %14922 = vmatprep.subr.bf16.mxu0 %v16350_v20 }
 0x4a9   : > { %v5222_v25 = vmax.f32 %v5190_v12, 0.0  ;;  %v5225_v51 = vmax.f32 %v5193_v58, 0.0  ;;  %v5223_v24 = vmax.f32 %v5191_v36, 0.0  ;;  %v5327_v38 = vor.u32 %v5325_v53, %v19155_v57  ;;  %5888 = vmatmul.mubr.bf16.gmra.mrb[220].mxu0 %v19169_v23  ;;  %v16351_v53 = vld [vmem:[%s21623_s1 + $0x5f8] sm:$0xff]   ;;  %v22171_v12 = vld [vmem:[#allocation22_spill] sm:$0xff] }
 0x4aa   : > { %v5316_v21 = vrot.slane %v5314_v22, 7  ;;  %v5417_v45 = vrot.slane %v5317_v62, 1  ;;  %v19166_v14 = vadd.f32 %v15528_v34, %v18956_v59  ;;  %v15531_v28 = vadd.f32 %v18933_v33, %v5099_v13  ;;  %v22169_v2 = vld [vmem:[#allocation8_spill] sm:$0xff]  ;;  %6362 = vmatmul.mubr.bf16.gmra.mrb[0].mxu1 %v19169_v23  ;;  %5895 = vmatprep.mubr.bf16.mxu0 %v19174_v16 }
 0x4ab   : > { %v19163_v63 = vpack.c.bf16 %v5225_v51, %v5224_v47  ;;  %v5244_v32 = vpack.c.bf16 %v5223_v24, %v5222_v25  ;;  %vm22167_vm5 = vsmask.f32 256  ;;  %vm22168_vm9 = vsmask.f32 7424  ;;  %6369 = vmatprep.mubr.bf16.mxu1 %v19174_v16  ;;  %v22179_v25 = vld [vmem:[#allocation7_spill] sm:$0xff]  ;;  %14923 = vmatpush3.bf16.msra.mxu0 %v16350_v20 }
 0x4ac   : > { %v5319_v56 = vor.u32 %v5317_v62, %v5316_v21  ;;  %v5328_v15 = vsel %vm22167_vm5, %v5316_v21, %v5327_v38  ;;  %v5418_v54 = vsel %vm22168_vm9, %v5416_v61, %v5417_v45  ;;  %v5419_v43 = vor.u32 %v5417_v45, %v5314_v22  ;;  %v22181_v24 = vld [vmem:[#allocation23_spill] sm:$0xff]  ;;  %14924 = vmatprep.subr.bf16.mxu0 %v16351_v53  ;;  %v19210_v45 = vld [vmem:[%s21623_s1 + $0x500] sm:$0xff]  }
 0x4ad   : > { %vm22170_vm3 = vnez %v22169_v2  ;;  %vm22172_vm15 = vnez %v22171_v12  ;;  %v21774_v58 = vshrl.u32 %v19163_v63, 16  ;;  %v5341_v36 = vshll.u32 %v19163_v63, 16  ;;  %v19452_v2 = vld [vmem:[#allocation2] sm:$0xff] }
 0x4ae   : > { %v5467_v33 = vsel %vm22170_vm3, %v5328_v15, 0  ;;  %v5481_v27 = vsel %vm22172_vm15, %v5418_v54, 0  ;;  %vm22173_vm5 = vcmask 523264   ;;  %vm22175_vm10 = vsmask.f32 256 }
 0x4af   : > { %5517 = vst.msk [vmem:[#allocation2 + $0x128] sm:$0xff] %vm22173_vm5, %v19163_v63  ;;  %vm22174_vm9 = vmmov %vm22173_vm5  ;;  %v5320_v61 = vsel %vm22175_vm10, %v19096_v1, %v5319_v56  ;;  %vm22176_vm3 = vsmask.f32 7424  ;;  %v5330_v62 = vshrl.u32 %v5244_v32, 16  ;;  %v5333_v47 = vshll.u32 %v5244_v32, 16  ;;  %14925 = vmatpush3.bf16.msra.mxu0 %v16351_v53 }
 0x4b0   : > { %5516 = vst.msk [vmem:[#allocation2 + $0x110] sm:$0xff] %vm22174_vm9, %v5244_v32  ;;  %v5421_v22 = vsel %vm22176_vm3, %v5419_v43, %v5420_v17  ;;  %vm22177_vm12 = vmmov %vm22173_vm5  ;;  %v5422_v42 = vor.u32 %v5420_v17, %v5322_v26  ;;  %vm22182_vm9 = vnez %v22181_v24  ;;  %v19202_v1 = vrot.slane %v21774_v58, 7  ;;  %v14908_v17 = vpop.f32.mrb[172].mxu1  ;;  %14958 = vmatprep.subr.bf16.mxu0 %v19210_v45 }
 0x4b1   : > { %5499 = vst.msk [vmem:[#allocation2 + $0xf0] sm:$0xff] %vm22177_vm12, %v5467_v33  ;;  %vm22178_vm15 = vmmov %vm22173_vm5  ;;  %vm22180_vm5 = vnez %v22179_v25  ;;  %v5482_v34 = vsel %vm22182_vm9, %v5421_v22, 0  ;;  %v5426_v13 = vrot.slane %v5341_v36, 1  ;;  %v5332_v38 = vrot.slane %v5330_v62, 7  ;;  %v5115_v54 = vpop.f32.mrb[173].mxu1 }
 0x4b2   : > { %5529 = vst.msk [vmem:[#allocation2 + $0xd0] sm:$0xff] %vm22178_vm15, %v5481_v27  ;;  %v5466_v51 = vsel %vm22180_vm5, %v5320_v61, 0  ;;  %vm22183_vm15 = vmmov %vm22177_vm12  ;;  %v5423_v21 = vrot.slane %v5333_v47, 1  ;;  %v5194_v26 = vadd.f32 %v15531_v28, %v18956_v59  ;;  %v5343_v32 = vor.u32 %v5341_v36, %v19202_v1  ;;  %v14909_v61 = vpop.f32.mrb[174].mxu1 }
 0x4b3   : > { %5498 = vst.msk [vmem:[#allocation2 + $0xd8] sm:$0xff] %vm22177_vm12, %v5466_v51  ;;  %v5228_v20 = vmax.f32 %v19166_v14, 0.0  ;;  %v15534_v56 = vadd.f32 %v18941_v31, %v14905_v30  ;;  %v15537_v15 = vadd.f32 %v18935_v46, %v5102_v18  ;;  %v5335_v43 = vor.u32 %v5333_v47, %v5332_v38  ;;  %vm22184_vm10 = vmmov %vm22176_vm3  ;;  %v22186_v51 = vld [vmem:[#allocation25_spill] sm:$0xff]  ;;  %v5118_v58 = vpop.f32.mrb[175].mxu1  ;;  %v19222_v31 = vld [vmem:[#allocation2 + $0x78] sm:$0xff] }
 0x4b4   : > { %5530 = vst.msk [vmem:[#allocation2 + $0xe8] sm:$0xff] %vm22183_vm15, %v5482_v34  ;;  %v5424_v33 = vsel %vm22184_vm10, %v5422_v42, %v5423_v21  ;;  %v5425_v28 = vor.u32 %v5423_v21, %v5330_v62  ;;  %v5226_v27 = vmax.f32 %v5194_v26, 0.0  ;;  %vm22185_vm3 = vsmask.f32 256  ;;  %v22189_v18 = vld [vmem:[#allocation10_spill] sm:$0xff]  ;;  %5896 = vmatmul.mubr.bf16.gmra.mrb[224].mxu0 %v19222_v31  ;;  %v19232_v42 = vld [vmem:[#allocation2 + $0x98] sm:$0xff]  ;;  %6370 = vmatmul.mubr.bf16.gmra.mrb[4].mxu1 %v19222_v31 }
 0x4b5   : > { %v5344_v22 = vsel %vm22185_vm3, %v5332_v38, %v5343_v32  ;;  %vm22187_vm12 = vnez %v22186_v51  ;;  %v5197_v36 = vadd.f32 %v15534_v56, %v18956_v59  ;;  %v5195_v14 = vadd.f32 %v15537_v15, %v18956_v59  ;;  %vm22188_vm15 = vmmov %vm22185_vm3  ;;  %v22192_v38 = vld [vmem:[#allocation9_spill] sm:$0xff]  ;;  %v22194_v21 = vld [vmem:[#allocation27_spill] sm:$0xff]  ;;  %5903 = vmatprep.mubr.bf16.mxu0 %v19232_v42  ;;  %6377 = vmatprep.mubr.bf16.mxu1 %v19232_v42 }
 0x4b6   : > { %v5483_v34 = vsel %vm22187_vm12, %v5424_v33, 0  ;;  %v5336_v46 = vsel %vm22188_vm15, %v19155_v57, %v5335_v43  ;;  %v5427_v30 = vsel %vm22184_vm10, %v5425_v28, %v5426_v13  ;;  %vm22190_vm9 = vnez %v22189_v18 }
 0x4b7   : > { %v5469_v62 = vsel %vm22190_vm9, %v5344_v22, 0  ;;  %vm22191_vm3 = vcmask 523264   ;;  %v15540_v47 = vadd.f32 %v18949_v50, %v14908_v17  ;;  %vm22193_vm12 = vnez %v22192_v38  ;;  %v19413_v38 = vld [vmem:[#allocation2 + $0xb8] sm:$0xff] }
 0x4b8   : > { %5531 = vst.msk [vmem:[#allocation2 + $0x100] sm:$0xff] %vm22191_vm3, %v5483_v34  ;;  %v5468_v53 = vsel %vm22193_vm12, %v5336_v46, 0  ;;  %vm22195_vm15 = vnez %v22194_v21  ;;  %vm22196_vm10 = vmmov %vm22191_vm3  ;;  %v5229_v26 = vmax.f32 %v5197_v36, 0.0  ;;  %v5227_v32 = vmax.f32 %v5195_v14, 0.0  ;;  %v19410_v21 = vld [vmem:[#allocation2 + $0xa0] sm:$0xff] }
 0x4b9   : > { %v5484_v57 = vsel %vm22195_vm15, %v5427_v30, 0  ;;  %5501 = vst.msk [vmem:[#allocation2 + $0x120] sm:$0xff] %vm22196_vm10, %v5469_v62  ;;  %vm22197_vm9 = vmmov %vm22191_vm3  ;;  %v5200_v50 = vadd.f32 %v15540_v47, %v18956_v59  ;;  %v15543_v17 = vadd.f32 %v18945_v10, %v5115_v54  ;;  %v15546_v56 = vadd.f32 %v18951_v40, %v14909_v61  ;;  %v19256_v62 = vld [vmem:[#allocation2 + $0x90] sm:$0xff] }
 0x4ba   : > { %5500 = vst.msk [vmem:[#allocation2 + $0x108] sm:$0xff] %vm22191_vm3, %v5468_v53  ;;  %v15549_v15 = vadd.f32 %v18947_v39, %v5118_v58  ;;  %v5247_v43 = vpack.c.bf16 %v5229_v26, %v5228_v20  ;;  %v5246_v33 = vpack.c.bf16 %v5227_v32, %v5226_v27  ;;  %v22198_v28 = vshrl.u32 %v19163_v63, 16  ;;  %vm22200_vm10 = vmmov %vm22191_vm3  ;;  %v19422_v18 = vld [vmem:[#allocation2 + $0xd0] sm:$0xff] }
 0x4bb   : > { %5532 = vst.msk [vmem:[#allocation2 + $0x118] sm:$0xff] %vm22197_vm9, %v5484_v57  ;;  %v5198_v34 = vadd.f32 %v15543_v17, %v18956_v59  ;;  %v5201_v36 = vadd.f32 %v15546_v56, %v18956_v59  ;;  %vm22199_vm9 = vmmov %vm22191_vm3  ;;  %v5232_v39 = vmax.f32 %v5200_v50, 0.0  ;;  %vm22201_vm3 = vsmask.f32 7424  ;;  %v19261_v50 = vld [vmem:[#allocation2 + $0xb0] sm:$0xff]  ;;  %v22202_v56 = vld [vmem:[#allocation28_spill] sm:$0xff] }
 0x4bc   : > { %v5428_v22 = vor.u32 %v5426_v13, %v22198_v28  ;;  %v5199_v14 = vadd.f32 %v15549_v15, %v18956_v59  ;;  %v5354_v46 = vshrl.u32 %v5247_v43, 16  ;;  %v5357_v30 = vshll.u32 %v5247_v43, 16  ;;  %5519 = vst.msk [vmem:[#allocation2 + $0x158] sm:$0xff] %vm22199_vm9, %v5247_v43  ;;  %5904 = vmatmul.mubr.bf16.gmra.mrb[228].mxu0 %v19256_v62  ;;  %6378 = vmatmul.mubr.bf16.gmra.mrb[8].mxu1 %v19256_v62  ;;  %vm22204_vm15 = vmmov %vm22200_vm10  ;;  %v19425_v51 = vld [vmem:[#allocation2 + $0xe8] sm:$0xff] }
 0x4bd   : > { %v5346_v10 = vshrl.u32 %v5246_v33, 16  ;;  %v5349_v40 = vshll.u32 %v5246_v33, 16  ;;  %5518 = vst.msk [vmem:[#allocation2 + $0x140] sm:$0xff] %vm22200_vm10, %v5246_v33  ;;  %v5230_v58 = vmax.f32 %v5198_v34, 0.0  ;;  %v5233_v20 = vmax.f32 %v5201_v36, 0.0  ;;  %5911 = vmatprep.mubr.bf16.mxu0 %v19261_v50  ;;  %6385 = vmatprep.mubr.bf16.mxu1 %v19261_v50  ;;  %vm22207_vm5 = vmmov %vm22200_vm10 }
 0x4be   : > { %v5231_v54 = vmax.f32 %v5199_v14, 0.0  ;;  %v5356_v63 = vrot.slane %v5354_v46, 7  ;;  %v5432_v13 = vrot.slane %v5357_v30, 1  ;;  %vm22203_vm9 = vnez %v22202_v56  ;;  %vm22214_vm8 = vmmov %vm22207_vm5  ;;  %v19401_v56 = vld [vmem:[#allocation2 + $0x88] sm:$0xff]  ;;  %22233 = vst [vmem:[#allocation37_spill] sm:$0xff] %v19413_v38 }
 0x4bf   : > { %v5348_v27 = vrot.slane %v5346_v10, 7  ;;  %v5429_v61 = vrot.slane %v5349_v40, 1  ;;  %v5249_v47 = vpack.c.bf16 %v5233_v20, %v5232_v39  ;;  %22234 = vst [vmem:[#allocation38_spill] sm:$0xff] %v19422_v18 }
 0x4c0   : > { %v5248_v59 = vpack.c.bf16 %v5231_v54, %v5230_v58  ;;  %v5359_v53 = vor.u32 %v5357_v30, %v5356_v63  ;;  %v5434_v57 = vor.u32 %v5432_v13, %v5354_v46  ;;  %v22212_v58 = vld [vmem:[#allocation30_spill] sm:$0xff]  ;;  %v19398_v46 = vld [vmem:[#allocation2 + $0x70] sm:$0xff] }
 0x4c1   : > { %v5351_v26 = vor.u32 %v5349_v40, %v5348_v27  ;;  %v5430_v32 = vsel %vm22201_vm3, %v5428_v22, %v5429_v61  ;;  %v5431_v17 = vor.u32 %v5429_v61, %v5346_v10  ;;  %v5370_v43 = vshrl.u32 %v5249_v47, 16  ;;  %5521 = vst.msk [vmem:[#allocation2 + $0x188] sm:$0xff] %vm22200_vm10, %v5249_v47  ;;  %v22210_v10 = vld [vmem:[#allocation12_spill] sm:$0xff] }
 0x4c2   : > { %v5485_v15 = vsel %vm22203_vm9, %v5430_v32, 0  ;;  %v5373_v33 = vshll.u32 %v5249_v47, 16  ;;  %5520 = vst.msk [vmem:[#allocation2 + $0x170] sm:$0xff] %vm22204_vm15, %v5248_v59  ;;  %vm22205_vm3 = vsmask.f32 256  ;;  %v5362_v34 = vshrl.u32 %v5248_v59, 16 }
 0x4c3   : > { %v5352_v28 = vsel %vm22205_vm3, %v19202_v1, %v5351_v26  ;;  %vm22206_vm12 = vmmov %vm22205_vm3  ;;  %5533 = vst.msk [vmem:[#allocation2 + $0x130] sm:$0xff] %vm22207_vm5, %v5485_v15  ;;  %v5365_v36 = vshll.u32 %v5248_v59, 16  ;;  %vm22208_vm9 = vsmask.f32 7424  ;;  %vm22211_vm15 = vnez %v22210_v10  ;;  %v19284_v26 = vld [vmem:[#allocation2 + $0xa8] sm:$0xff]  ;;  %v16355_v10 = vld [vmem:[%s21623_s1 + $0x518] sm:$0xff]  }
 0x4c4   : > { %v5360_v22 = vsel %vm22206_vm12, %v5348_v27, %v5359_v53  ;;  %v5433_v14 = vsel %vm22208_vm9, %v5431_v17, %v5432_v13  ;;  %v5470_v30 = vsel %vm22096_vm7, %v5352_v28, 0  ;;  %v5372_v39 = vrot.slane %v5370_v43, 7  ;;  %vm22215_vm3 = vmmov %vm22207_vm5  ;;  %5912 = vmatmul.mubr.bf16.gmra.mrb[232].mxu0 %v19284_v26  ;;  %v19290_v28 = vld [vmem:[#allocation2 + $0xc8] sm:$0xff]  ;;  %6386 = vmatmul.mubr.bf16.gmra.mrb[12].mxu1 %v19284_v26  ;;  %v19388_v17 = vld [vmem:[#allocation2 + $0x58] sm:$0xff] }
 0x4c5   : > { %v5471_v40 = vsel %vm22211_vm15, %v5360_v22, 0  ;;  %vm22213_vm10 = vnez %v22212_v58  ;;  %5502 = vst.msk [vmem:[#allocation2 + $0x138] sm:$0xff] %vm22214_vm8, %v5470_v30  ;;  %v5438_v1 = vrot.slane %v5373_v33, 1  ;;  %v5364_v54 = vrot.slane %v5362_v34, 7  ;;  %vm22216_vm5 = vmmov %vm22215_vm3  ;;  %v22220_v22 = vld [vmem:[#allocation33_spill] sm:$0xff]  ;;  %5919 = vmatprep.mubr.bf16.mxu0 %v19290_v28  ;;  %6393 = vmatprep.mubr.bf16.mxu1 %v19290_v28  ;;  %v16354_v58 = vld [vmem:[%s21623_s1 + $0x510] sm:$0xff]  }
 0x4c6   : > { %v5486_v20 = vsel %vm22213_vm10, %v5433_v14, 0  ;;  %5503 = vst.msk [vmem:[#allocation2 + $0x150] sm:$0xff] %vm22215_vm3, %v5471_v40  ;;  %v5435_v27 = vrot.slane %v5365_v36, 1  ;;  %v5375_v13 = vor.u32 %v5373_v33, %v5372_v39  ;;  %vm22217_vm12 = vmmov %vm22208_vm9  ;;  %vm22218_vm9 = vsmask.f32 256  ;;  %v19434_v24 = vld [vmem:[#allocation2 + $0x118] sm:$0xff] }
 0x4c7   : > { %5534 = vst.msk [vmem:[#allocation2 + $0x148] sm:$0xff] %vm22216_vm5, %v5486_v20  ;;  %v5440_v61 = vor.u32 %v5438_v1, %v5370_v43  ;;  %v5367_v47 = vor.u32 %v5365_v36, %v5364_v54  ;;  %vm22221_vm8 = vnez %v22220_v22  ;;  %vm22222_vm3 = vmmov %vm22218_vm9  ;;  %v5543_v36 = vld [vmem:[#allocation2 + $0x28] sm:$0xff]  ;;  %v19385_v22 = vld [vmem:[#allocation2 + $0x40] sm:$0xff] }
 0x4c8   : > { %v5436_v59 = vsel %vm22217_vm12, %v5434_v57, %v5435_v27  ;;  %v5437_v53 = vor.u32 %v5435_v27, %v5362_v34  ;;  %v5376_v32 = vsel %vm22218_vm9, %v5364_v54, %v5375_v13  ;;  %vm22223_vm5 = vmmov %vm22217_vm12  ;;  %vm22225_vm12 = vcmask 523264   ;;  %v19315_v54 = vld [vmem:[#allocation2 + $0xe0] sm:$0xff]  ;;  %v19320_v27 = vld [vmem:[#allocation2 + $0xd8] sm:$0xff] }
 0x4c9   : > { %v5487_v15 = vsel %vm22105_vm6, %v5436_v59, 0  ;;  %v5457_v14 = vsel %vm22221_vm8, %v5440_v61, 0  ;;  %v5368_v43 = vsel %vm22222_vm3, %v5356_v63, %v5367_v47  ;;  %v5473_v34 = vsel %vm22110_vm2, %v5376_v32, 0  ;;  %vm22229_vm9 = vmmov %vm22225_vm12  ;;  %v19323_v13 = vld [vmem:[#allocation2 + $0xf8] sm:$0xff]  ;;  %v19328_v61 = vld [vmem:[#allocation2 + $0xf0] sm:$0xff] }
 0x4ca   : > { %v5439_v33 = vsel %vm22223_vm5, %v5437_v53, %v5438_v1  ;;  %5535 = vst.msk [vmem:[#allocation2 + $0x160] sm:$0xff] %vm22225_vm12, %v5487_v15  ;;  %v5489_v30 = vsel %vm17515_vm14, %v5457_v14, 0  ;;  %v5472_v39 = vsel %vm22114_vm11, %v5368_v43, 0  ;;  %vm22230_vm3 = vmmov %vm22229_vm9  ;;  %v19312_v1 = vld [vmem:[#allocation2 + $0xc0] sm:$0xff]  ;;  %v19331_v47 = vld [vmem:[#allocation2 + $0x110] sm:$0xff] }
 0x4cb   : > { %v5488_v63 = vsel %vm17497_vm4, %v5439_v33, 0  ;;  %5505 = vst.msk [vmem:[#allocation2 + $0x180] sm:$0xff] %vm22229_vm9, %v5473_v34  ;;  %vm22231_vm5 = vmmov %vm22230_vm3  ;;  %v19338_v15 = vld [vmem:[#allocation2 + $0x108] sm:$0xff]  ;;  %v19437_v25 = vld [vmem:[#allocation2 + $0x130] sm:$0xff] }
 0x4cc   : > { %5537 = vst.msk [vmem:[#allocation2 + $0x190] sm:$0xff] %vm22230_vm3, %v5489_v30  ;;  %vm22232_vm12 = vmmov %vm22230_vm3  ;;  %5920 = vmatmul.mubr.bf16.gmra.mrb[236].mxu0 %v19312_v1  ;;  %6394 = vmatmul.mubr.bf16.gmra.mrb[16].mxu1 %v19312_v1  ;;  %v19341_v14 = vld [vmem:[#allocation2 + $0x128] sm:$0xff]  ;;  %v19348_v30 = vld [vmem:[#allocation2 + $0x120] sm:$0xff] }
 0x4cd   : > { %5504 = vst.msk [vmem:[#allocation2 + $0x168] sm:$0xff] %vm22231_vm5, %v5472_v39  ;;  %5927 = vmatprep.mubr.bf16.mxu0 %v19315_v54  ;;  %6401 = vmatprep.mubr.bf16.mxu1 %v19315_v54  ;;  %v19351_v39 = vld [vmem:[#allocation2 + $0x140] sm:$0xff]  ;;  %v19375_v20 = vld [vmem:[#allocation2 + $0x188] sm:$0xff]  ;;  %vm22259_vm9 = vmmov %vm22230_vm3  ;;  %vm22260_vm5 = vsmask.f32 256 }
 0x4ce   : > { %5536 = vst.msk [vmem:[#allocation2 + $0x178] sm:$0xff] %vm22232_vm12, %v5488_v63  ;;  %v19356_v63 = vld [vmem:[#allocation2 + $0x138] sm:$0xff]  ;;  %v16353_v57 = vld [vmem:[%s21623_s1 + $0x508] sm:$0xff]   ;;  %vm22262_vm12 = vsmask.f32 7424 }
 0x4d1   : > { %v19443_v12 = vld [vmem:[#allocation2 + $0x160] sm:$0xff] }
 0x4d2   : > { %v19379_v40 = vld [vmem:[#allocation2 + $0x180] sm:$0xff]  ;;  %22235 = vst [vmem:[#allocation39_spill] sm:$0xff] %v19443_v12 }
 0x4d4   : > { %5928 = vmatmul.mubr.bf16.gmra.mrb[240].mxu0 %v19320_v27  ;;  %6402 = vmatmul.mubr.bf16.gmra.mrb[20].mxu1 %v19320_v27  ;;  %v13550_v59 = vpop.f32.mrb[240].mxu1 }
 0x4d5   : > { %5935 = vmatprep.mubr.bf16.mxu0 %v19323_v13  ;;  %6409 = vmatprep.mubr.bf16.mxu1 %v19323_v13  ;;  %v13551_v53 = vpop.f32.mrb[241].mxu1 }
 0x4d6   : > { %v19336_v32 = vadd.f32 %v13551_v53, %v13550_v59  ;;  %v13553_v43 = vpop.f32.mrb[242].mxu1  ;;  %v19359_v59 = vld [vmem:[#allocation2 + $0x158] sm:$0xff]  ;;  %v19364_v53 = vld [vmem:[#allocation2 + $0x150] sm:$0xff] }
 0x4d7   : > { %v13554_v33 = vpop.f32.mrb[243].mxu1 }
 0x4d8   : > { %v19346_v34 = vadd.f32 %v13554_v33, %v13553_v43  ;;  %v19367_v43 = vld [vmem:[#allocation2 + $0x170] sm:$0xff]  ;;  %v19372_v33 = vld [vmem:[#allocation2 + $0x168] sm:$0xff] }
 0x4dc   : > { %5936 = vmatmul.mubr.bf16.gmra.mrb[244].mxu0 %v19328_v61  ;;  %6410 = vmatmul.mubr.bf16.gmra.mrb[24].mxu1 %v19328_v61 }
 0x4dd   : > { %5943 = vmatprep.mubr.bf16.mxu0 %v19331_v47  ;;  %6417 = vmatprep.mubr.bf16.mxu1 %v19331_v47 }
 0x4e4   : > { %5944 = vmatmul.mubr.bf16.gmra.mrb[248].mxu0 %v19338_v15  ;;  %6418 = vmatmul.mubr.bf16.gmra.mrb[28].mxu1 %v19338_v15 }
 0x4e5   : > { %5951 = vmatprep.mubr.bf16.mxu0 %v19341_v14  ;;  %6425 = vmatprep.mubr.bf16.mxu1 %v19341_v14 }
 0x4ec   : > { %5952 = vmatmul.mubr.bf16.gmra.mrb[252].mxu0 %v19348_v30  ;;  %6426 = vmatmul.mubr.bf16.gmra.mrb[32].mxu1 %v19348_v30 }
 0x4ed   : > { %5959 = vmatprep.mubr.bf16.mxu0 %v19351_v39  ;;  %6433 = vmatprep.mubr.bf16.mxu1 %v19351_v39 }
 0x4f4   : > { %5960 = vmatmul.mubr.bf16.gmra.mrb[0].mxu0 %v19356_v63  ;;  %6434 = vmatmul.mubr.bf16.gmra.mrb[36].mxu1 %v19356_v63 }
 0x4f5   : > { %5967 = vmatprep.mubr.bf16.mxu0 %v19359_v59  ;;  %6441 = vmatprep.mubr.bf16.mxu1 %v19359_v59 }
 0x4fc   : > { %5968 = vmatmul.mubr.bf16.gmra.mrb[4].mxu0 %v19364_v53  ;;  %6442 = vmatmul.mubr.bf16.gmra.mrb[40].mxu1 %v19364_v53 }
 0x4fd   : > { %5975 = vmatprep.mubr.bf16.mxu0 %v19367_v43  ;;  %6449 = vmatprep.mubr.bf16.mxu1 %v19367_v43 }
 0x504   : > { %5976 = vmatmul.mubr.bf16.gmra.mrb[8].mxu0 %v19372_v33  ;;  %6450 = vmatmul.mubr.bf16.gmra.mrb[44].mxu1 %v19372_v33 }
 0x505   : > { %5983 = vmatprep.mubr.bf16.mxu0 %v19375_v20 }
 0x50c   : > { %5984 = vmatmul.mubr.bf16.gmra.mrb[12].mxu0 %v19379_v40 }
 0x50d   : > { %14926 = vmatprep.mubr.bf16.mxu0 %v5543_v36 }
 0x514   : > { %14927 = vmatmul.mubr.bf16.vlgmr.msra.gmra.mrb[16].mxu0 %v19385_v22 }
 0x515   : > { %14930 = vmatprep.mubr.bf16.mxu0 %v19388_v17  ;;  %14959 = vmatpush3.bf16.msra.mxu0 %v19210_v45  ;;  %v16356_v45 = vld [vmem:[%s21623_s1 + $0x520] sm:$0xff]  }
 0x516   : > { %14960 = vmatprep.subr.bf16.mxu0 %v16353_v57 }
 0x519   : > { %14961 = vmatpush3.bf16.msra.mxu0 %v16353_v57  ;;  %v16357_v57 = vld [vmem:[%s21623_s1 + $0x528] sm:$0xff]  }
 0x51a   : > { %14962 = vmatprep.subr.bf16.mxu0 %v16354_v58 }
 0x51c   : > { %14931 = vmatmul.mubr.bf16.gmra.mrb[20].mxu0 %v19398_v46 }
 0x51d   : > { %14934 = vmatprep.mubr.bf16.mxu0 %v19401_v56  ;;  %14963 = vmatpush3.bf16.msra.mxu0 %v16354_v58  ;;  %v16358_v58 = vld [vmem:[%s21623_s1 + $0x530] sm:$0xff]  }
 0x51e   : > { %14964 = vmatprep.subr.bf16.mxu0 %v16355_v10 }
 0x521   : > { %14965 = vmatpush3.bf16.msra.mxu0 %v16355_v10  ;;  %v16359_v10 = vld [vmem:[%s21623_s1 + $0x538] sm:$0xff]  }
 0x522   : > { %14966 = vmatprep.subr.bf16.mxu0 %v16356_v45 }
 0x524   : > { %14935 = vmatmul.mubr.bf16.gmra.mrb[24].mxu0 %v19410_v21 }
 0x525   : > { %14938 = vmatprep.mubr.bf16.mxu0 %v19413_v38  ;;  %14967 = vmatpush3.bf16.msra.mxu0 %v16356_v45  ;;  %v16360_v45 = vld [vmem:[%s21623_s1 + $0x640] sm:$0xff]  }
 0x526   : > { %14968 = vmatprep.subr.bf16.mxu0 %v16357_v57 }
 0x529   : > { %14969 = vmatpush3.bf16.msra.mxu0 %v16357_v57  ;;  %v19431_v57 = vld [vmem:[#allocation2 + $0x100] sm:$0xff] }
 0x52a   : > { %14970 = vmatprep.subr.bf16.mxu0 %v16358_v58 }
 0x52c   : > { %14939 = vmatmul.mubr.bf16.gmra.mrb[28].mxu0 %v19422_v18 }
 0x52d   : > { %14942 = vmatprep.mubr.bf16.mxu0 %v19425_v51  ;;  %14971 = vmatpush3.bf16.msra.mxu0 %v16358_v58  ;;  %v19440_v58 = vld [vmem:[#allocation2 + $0x148] sm:$0xff] }
 0x52e   : > { %14972 = vmatprep.subr.bf16.mxu0 %v16359_v10 }
 0x531   : > { %14973 = vmatpush3.bf16.msra.mxu0 %v16359_v10  ;;  %v19446_v10 = vld [vmem:[#allocation2 + $0x178] sm:$0xff] }
 0x532   : > { %13670 = vmatprep.subr.bf16.mxu0 %v16360_v45  ;;  %v19449_v45 = vld [vmem:[#allocation2 + $0x190] sm:$0xff] }
 0x533   : > { %22236 = vst [vmem:[#allocation40_spill] sm:$0xff] %v19449_v45 }
 0x534   : > { %14943 = vmatmul.mubr.bf16.gmra.mrb[32].mxu0 %v19431_v57 }
 0x535   : > { %14946 = vmatprep.mubr.bf16.mxu0 %v19434_v24 }
 0x53c   : > { %14947 = vmatmul.mubr.bf16.gmra.mrb[36].mxu0 %v19437_v25 }
 0x53d   : > { %14950 = vmatprep.mubr.bf16.mxu0 %v19440_v58 }
 0x544   : > { %14951 = vmatmul.mubr.bf16.gmra.mrb[40].mxu0 %v19443_v12 }
 0x545   : > { %14954 = vmatprep.mubr.bf16.mxu0 %v19446_v10 }
 0x54c   : > { %14955 = vmatmul.mubr.bf16.gmra.mrb[44].mxu0 %v19449_v45 }
 0x54d   : > { %14974 = vmatprep.mubr.bf16.mxu0 %v19452_v2 }
 0x554   : > { %14975 = vmatmul.mubr.bf16.vlgmr.msra.gmra.mrb[16].mxu0 %v5543_v36  ;;  %v16366_v36 = vld [vmem:[%s21623_s1 + $0x658] sm:$0xff]  }
 0x555   : > { %14978 = vmatprep.mubr.bf16.mxu0 %v19385_v22  ;;  %13671 = vmatpush3.bf16.msra.mxu0 %v16361_v7  ;;  %v16370_v7 = vld [vmem:[%s21623_s1 + $0x668] sm:$0xff]  }
 0x556   : > { %13672 = vmatprep.subr.bf16.mxu0 %v16362_v29  ;;  %v16367_v29 = vld [vmem:[%s21623_s1 + $0x618] sm:$0xff]  }
 0x559   : > { %13673 = vmatpush3.bf16.msra.mxu0 %v16363_v3  ;;  %v16368_v3 = vld [vmem:[%s21623_s1 + $0x660] sm:$0xff]  }
 0x55a   : > { %13674 = vmatprep.subr.bf16.mxu0 %v16364_v52  ;;  %v16369_v52 = vld [vmem:[%s21623_s1 + $0x620] sm:$0xff]  }
 0x55c   : > { %14979 = vmatmul.mubr.bf16.gmra.mrb[20].mxu0 %v19388_v17 }
 0x55d   : > { %14982 = vmatprep.mubr.bf16.mxu0 %v19398_v46  ;;  %13675 = vmatpush3.bf16.msra.mxu0 %v16365_v19  ;;  %v16371_v19 = vld [vmem:[%s21623_s1 + $0x628] sm:$0xff]  }
 0x55e   : > { %13676 = vmatprep.subr.bf16.mxu0 %v16366_v36  ;;  %v16372_v36 = vld [vmem:[%s21623_s1 + $0x670] sm:$0xff]  }
 0x561   : > { %13677 = vmatpush3.bf16.msra.mxu0 %v16367_v29 }
 0x562   : > { %13678 = vmatprep.subr.bf16.mxu0 %v16368_v3 }
 0x564   : > { %14983 = vmatmul.mubr.bf16.gmra.mrb[24].mxu0 %v19401_v56  ;;  %v13414_v29 = vpop.f32.mrb[208].mxu0  ;;  %v13556_v3 = vpop.f32.mrb[244].mxu1 }
 0x565   : > { %14986 = vmatprep.mubr.bf16.mxu0 %v19410_v21  ;;  %13679 = vmatpush3.bf16.msra.mxu0 %v16369_v52  ;;  %v13415_v60 = vpop.f32.mrb[209].mxu0  ;;  %v13557_v49 = vpop.f32.mrb[245].mxu1  ;;  %v16373_v52 = vld [vmem:[%s21623_s1 + $0x630] sm:$0xff]  }
 0x566   : > { %13680 = vmatprep.subr.bf16.mxu0 %v16370_v7  ;;  %v13416_v37 = vadd.f32 %v13415_v60, %v13414_v29  ;;  %v13417_v35 = vpop.f32.mrb[210].mxu0  ;;  %v13558_v9 = vadd.f32 %v13557_v49, %v13556_v3  ;;  %v13559_v41 = vpop.f32.mrb[246].mxu1  ;;  %v16374_v7 = vld [vmem:[%s21623_s1 + $0x678] sm:$0xff]  }
 0x567   : > { %v13418_v5 = vpop.f32.mrb[211].mxu0  ;;  %v13560_v48 = vpop.f32.mrb[247].mxu1  ;;  %v16375_v49 = vld [vmem:[%s21623_s1 + $0x638] sm:$0xff]  }
 0x568   : > { %v13419_v44 = vadd.f32 %v13418_v5, %v13417_v35  ;;  %v19503_v55 = vadd.f32 %v19336_v32, %v13416_v37  ;;  %v13561_v60 = vadd.f32 %v13560_v48, %v13559_v41  ;;  %v19516_v5 = vld [vmem:[%s21623_s1 + $0x680] sm:$0xff]  }
 0x569   : > { %13681 = vmatpush3.bf16.msra.mxu0 %v16371_v19 }
 0x56a   : > { %13682 = vmatprep.subr.bf16.mxu0 %v16372_v36  ;;  %22237 = vst [vmem:[#allocation41_spill] sm:$0xff] %v19503_v55  ;;  %v19511_v19 = vadd.f32 %v19346_v34, %v13419_v44 }
 0x56c   : > { %14987 = vmatmul.mubr.bf16.gmra.mrb[28].mxu0 %v19413_v38  ;;  %22238 = vst [vmem:[#allocation42_spill] sm:$0xff] %v19511_v19  ;;  %v13420_v35 = vpop.f32.mrb[212].mxu0 }
 0x56d   : > { %14990 = vmatprep.mubr.bf16.mxu0 %v19422_v18  ;;  %13683 = vmatpush3.bf16.msra.mxu0 %v16373_v52  ;;  %v13562_v48 = vpop.f32.mrb[248].mxu1  ;;  %v13421_v41 = vpop.f32.mrb[213].mxu0 }
 0x56e   : > { %13684 = vmatprep.subr.bf16.mxu0 %v16374_v7  ;;  %v13422_v37 = vadd.f32 %v13421_v41, %v13420_v35  ;;  %v13563_v32 = vpop.f32.mrb[249].mxu1  ;;  %v13423_v36 = vpop.f32.mrb[214].mxu0 }
 0x56f   : > { %v13564_v29 = vadd.f32 %v13563_v32, %v13562_v48  ;;  %v13565_v3 = vpop.f32.mrb[250].mxu1  ;;  %v13424_v52 = vpop.f32.mrb[215].mxu0 }
 0x570   : > { %v13425_v44 = vadd.f32 %v13424_v52, %v13423_v36  ;;  %v13566_v34 = vpop.f32.mrb[251].mxu1  ;;  %v19519_v7 = vadd.f32 %v13558_v9, %v13422_v37 }
 0x571   : > { %13685 = vmatpush3.bf16.msra.mxu0 %v16375_v49  ;;  %v13567_v8 = vadd.f32 %v13566_v34, %v13565_v3 }
 0x572   : > { %15006 = vmatprep.subr.bf16.mxu0 %v19516_v5  ;;  %22239 = vst [vmem:[#allocation43_spill] sm:$0xff] %v19519_v7  ;;  %v19523_v19 = vadd.f32 %v13561_v60, %v13425_v44 }
 0x574   : > { %14991 = vmatmul.mubr.bf16.gmra.mrb[32].mxu0 %v19425_v51  ;;  %22240 = vst [vmem:[#allocation44_spill] sm:$0xff] %v19523_v19  ;;  %v13426_v35 = vpop.f32.mrb[216].mxu0 }
 0x575   : > { %14994 = vmatprep.mubr.bf16.mxu0 %v19431_v57  ;;  %v13568_v41 = vpop.f32.mrb[252].mxu1  ;;  %v13427_v55 = vpop.f32.mrb[217].mxu0 }
 0x576   : > { %v13428_v49 = vadd.f32 %v13427_v55, %v13426_v35  ;;  %v13569_v48 = vpop.f32.mrb[253].mxu1  ;;  %v13429_v32 = vpop.f32.mrb[218].mxu0 }
 0x577   : > { %v13570_v45 = vadd.f32 %v13569_v48, %v13568_v41  ;;  %v13571_v18 = vpop.f32.mrb[254].mxu1  ;;  %v13430_v38 = vpop.f32.mrb[219].mxu0 }
 0x578   : > { %v13431_v36 = vadd.f32 %v13430_v38, %v13429_v32  ;;  %v13572_v52 = vpop.f32.mrb[255].mxu1  ;;  %v19525_v9 = vadd.f32 %v13564_v29, %v13428_v49 }
 0x579   : > { %v13573_v37 = vadd.f32 %v13572_v52, %v13571_v18 }
 0x57a   : > { %22241 = vst [vmem:[#allocation45_spill] sm:$0xff] %v19525_v9  ;;  %v19529_v60 = vadd.f32 %v13567_v8, %v13431_v36 }
 0x57c   : > { %14995 = vmatmul.mubr.bf16.gmra.mrb[36].mxu0 %v19434_v24  ;;  %22242 = vst [vmem:[#allocation46_spill] sm:$0xff] %v19529_v60  ;;  %v13432_v3 = vpop.f32.mrb[220].mxu0 }
 0x57d   : > { %14998 = vmatprep.mubr.bf16.mxu0 %v19437_v25  ;;  %v13574_v44 = vpop.f32.mrb[0].mxu1  ;;  %v13433_v34 = vpop.f32.mrb[221].mxu0 }
 0x57e   : > { %v13434_v55 = vadd.f32 %v13433_v34, %v13432_v3  ;;  %v13575_v35 = vpop.f32.mrb[1].mxu1  ;;  %v13435_v19 = vpop.f32.mrb[222].mxu0 }
 0x57f   : > { %v13576_v41 = vadd.f32 %v13575_v35, %v13574_v44  ;;  %v13577_v48 = vpop.f32.mrb[2].mxu1  ;;  %v13436_v7 = vpop.f32.mrb[223].mxu0 }
 0x580   : > { %v13437_v38 = vadd.f32 %v13436_v7, %v13435_v19  ;;  %v13578_v32 = vpop.f32.mrb[3].mxu1  ;;  %v19531_v29 = vadd.f32 %v13570_v45, %v13434_v55 }
 0x581   : > { %v13579_v18 = vadd.f32 %v13578_v32, %v13577_v48  ;;  %v6620_v48 = vld [vmem:[#allocation2 + $0x38] sm:$0xff] }
 0x582   : > { %22243 = vst [vmem:[#allocation47_spill] sm:$0xff] %v19531_v29  ;;  %v19535_v8 = vadd.f32 %v13573_v37, %v13437_v38 }
 0x584   : > { %14999 = vmatmul.mubr.bf16.gmra.mrb[40].mxu0 %v19440_v58  ;;  %22244 = vst [vmem:[#allocation48_spill] sm:$0xff] %v19535_v8 }
 0x585   : > { %15002 = vmatprep.mubr.bf16.mxu0 %v19443_v12 }
 0x587   : > { %v13438_v49 = vpop.f32.mrb[224].mxu0  ;;  %v13580_v36 = vpop.f32.mrb[4].mxu1 }
 0x588   : > { %v13439_v52 = vpop.f32.mrb[225].mxu0  ;;  %v13581_v34 = vpop.f32.mrb[5].mxu1 }
 0x589   : > { %v13440_v3 = vadd.f32 %v13439_v52, %v13438_v49  ;;  %v13441_v60 = vpop.f32.mrb[226].mxu0  ;;  %v13582_v44 = vadd.f32 %v13581_v34, %v13580_v36  ;;  %v13583_v35 = vpop.f32.mrb[6].mxu1 }
 0x58a   : > { %v13442_v9 = vpop.f32.mrb[227].mxu0  ;;  %v13584_v7 = vpop.f32.mrb[7].mxu1 }
 0x58b   : > { %v13443_v19 = vadd.f32 %v13442_v9, %v13441_v60  ;;  %v19537_v45 = vadd.f32 %v13576_v41, %v13440_v3  ;;  %v13585_v55 = vadd.f32 %v13584_v7, %v13583_v35  ;;  %v16377_v9 = vld [vmem:[%s21623_s1 + $0x688] sm:$0xff]  }
 0x58c   : > { %15003 = vmatmul.mubr.bf16.gmra.mrb[44].mxu0 %v19446_v10 }
 0x58d   : > { %6892 = vmatprep.mubr.bf16.mxu0 %v6620_v48  ;;  %v19540_v37 = vadd.f32 %v13579_v18, %v13443_v19 }
 0x58f   : > { %v13444_v38 = vpop.f32.mrb[228].mxu0  ;;  %v13586_v32 = vpop.f32.mrb[8].mxu1 }
 0x590   : > { %v13445_v8 = vpop.f32.mrb[229].mxu0  ;;  %v13587_v52 = vpop.f32.mrb[9].mxu1 }
 0x591   : > { %v13446_v49 = vadd.f32 %v13445_v8, %v13444_v38  ;;  %v13447_v29 = vpop.f32.mrb[230].mxu0  ;;  %v13588_v36 = vadd.f32 %v13587_v52, %v13586_v32  ;;  %v13589_v34 = vpop.f32.mrb[10].mxu1  ;;  %v16378_v8 = vld [vmem:[%s21623_s1 + $0x690] sm:$0xff]  }
 0x592   : > { %v13448_v12 = vpop.f32.mrb[231].mxu0  ;;  %v13590_v41 = vpop.f32.mrb[11].mxu1 }
 0x593   : > { %v13449_v60 = vadd.f32 %v13448_v12, %v13447_v29  ;;  %v19545_v3 = vadd.f32 %v13582_v44, %v13446_v49  ;;  %v13591_v35 = vadd.f32 %v13590_v41, %v13589_v34 }
 0x594   : > { %6893 = vmatmul.mubr.bf16.vlgmr.msra.gmra.mrb[48].mxu0 %v19069_v4 }
 0x595   : > { %6900 = vmatprep.mubr.bf16.mxu0 %v19084_v0  ;;  %15007 = vmatpush3.bf16.msra.mxu0 %v19516_v5  ;;  %v19550_v18 = vadd.f32 %v13585_v55, %v13449_v60  ;;  %v16379_v0 = vld [vmem:[%s21623_s1 + $0x698] sm:$0xff]  }
 0x596   : > { %15008 = vmatprep.subr.bf16.mxu0 %v16377_v9 }
 0x597   : > { %v13450_v19 = vpop.f32.mrb[232].mxu0  ;;  %v13592_v7 = vpop.f32.mrb[12].mxu1 }
 0x598   : > { %v13451_v12 = vpop.f32.mrb[233].mxu0  ;;  %v13593_v44 = vpop.f32.mrb[13].mxu1 }
 0x599   : > { %v13452_v29 = vadd.f32 %v13451_v12, %v13450_v19  ;;  %v13453_v48 = vpop.f32.mrb[234].mxu0  ;;  %15009 = vmatpush3.bf16.msra.mxu0 %v16377_v9  ;;  %v13594_v38 = vadd.f32 %v13593_v44, %v13592_v7  ;;  %v13595_v4 = vpop.f32.mrb[14].mxu1  ;;  %v16380_v9 = vld [vmem:[%s21623_s1 + $0x6a0] sm:$0xff]  }
 0x59a   : > { %v13454_v32 = vpop.f32.mrb[235].mxu0  ;;  %15010 = vmatprep.subr.bf16.mxu0 %v16378_v8  ;;  %v13596_v55 = vpop.f32.mrb[15].mxu1 }
 0x59b   : > { %v13455_v5 = vadd.f32 %v13454_v32, %v13453_v48  ;;  %v19558_v49 = vadd.f32 %v13588_v36, %v13452_v29  ;;  %v13597_v52 = vadd.f32 %v13596_v55, %v13595_v4 }
 0x59c   : > { %6901 = vmatmul.mubr.bf16.gmra.mrb[52].mxu0 %v19122_v11 }
 0x59d   : > { %6908 = vmatprep.mubr.bf16.mxu0 %v19142_v6  ;;  %15011 = vmatpush3.bf16.msra.mxu0 %v16378_v8  ;;  %v19562_v34 = vadd.f32 %v13591_v35, %v13455_v5  ;;  %v16381_v6 = vld [vmem:[%s21623_s1 + $0x6a8] sm:$0xff]  }
 0x59e   : > { %15012 = vmatprep.subr.bf16.mxu0 %v16379_v0 }
 0x59f   : > { %v13456_v60 = vpop.f32.mrb[236].mxu0  ;;  %v13598_v41 = vpop.f32.mrb[16].mxu1 }
 0x5a0   : > { %v13457_v19 = vpop.f32.mrb[237].mxu0  ;;  %v13599_v12 = vpop.f32.mrb[17].mxu1 }
 0x5a1   : > { %v13458_v7 = vadd.f32 %v13457_v19, %v13456_v60  ;;  %v13459_v36 = vpop.f32.mrb[238].mxu0  ;;  %15013 = vmatpush3.bf16.msra.mxu0 %v16379_v0  ;;  %v13600_v29 = vadd.f32 %v13599_v12, %v13598_v41  ;;  %v13601_v44 = vpop.f32.mrb[18].mxu1  ;;  %v16382_v0 = vld [vmem:[%s21623_s1 + $0x6b0] sm:$0xff]  }
 0x5a2   : > { %v13460_v11 = vpop.f32.mrb[239].mxu0  ;;  %15014 = vmatprep.subr.bf16.mxu0 %v16380_v9  ;;  %v13602_v8 = vpop.f32.mrb[19].mxu1 }
 0x5a3   : > { %v13461_v35 = vadd.f32 %v13460_v11, %v13459_v36  ;;  %v19570_v48 = vadd.f32 %v13594_v38, %v13458_v7  ;;  %v13603_v4 = vadd.f32 %v13602_v8, %v13601_v44 }
 0x5a4   : > { %6909 = vmatmul.mubr.bf16.gmra.mrb[56].mxu0 %v19169_v23 }
 0x5a5   : > { %6916 = vmatprep.mubr.bf16.mxu0 %v19174_v16  ;;  %15015 = vmatpush3.bf16.msra.mxu0 %v16380_v9  ;;  %v19574_v32 = vadd.f32 %v13597_v52, %v13461_v35  ;;  %v16383_v16 = vld [vmem:[%s21623_s1 + $0x6b8] sm:$0xff]  }
 0x5a6   : > { %15016 = vmatprep.subr.bf16.mxu0 %v16381_v6 }
 0x5a7   : > { %v13462_v5 = vpop.f32.mrb[240].mxu0  ;;  %v13604_v55 = vpop.f32.mrb[20].mxu1 }
 0x5a8   : > { %v13463_v60 = vpop.f32.mrb[241].mxu0  ;;  %v13605_v41 = vpop.f32.mrb[21].mxu1 }
 0x5a9   : > { %v13465_v19 = vpop.f32.mrb[242].mxu0  ;;  %15017 = vmatpush3.bf16.msra.mxu0 %v16381_v6  ;;  %v13464_v38 = vadd.f32 %v13463_v60, %v13462_v5  ;;  %v13606_v7 = vadd.f32 %v13605_v41, %v13604_v55  ;;  %v13607_v12 = vpop.f32.mrb[22].mxu1 }
 0x5aa   : > { %v13466_v23 = vpop.f32.mrb[243].mxu0  ;;  %15018 = vmatprep.subr.bf16.mxu0 %v16382_v0  ;;  %v13608_v52 = vpop.f32.mrb[23].mxu1 }
 0x5ab   : > { %v19582_v9 = vadd.f32 %v13600_v29, %v13464_v38  ;;  %v13467_v36 = vadd.f32 %v13466_v23, %v13465_v19  ;;  %v13609_v44 = vadd.f32 %v13608_v52, %v13607_v12 }
 0x5ac   : > { %6917 = vmatmul.mubr.bf16.gmra.mrb[60].mxu0 %v19222_v31 }
 0x5ad   : > { %6924 = vmatprep.mubr.bf16.mxu0 %v19232_v42  ;;  %15019 = vmatpush3.bf16.msra.mxu0 %v16382_v0  ;;  %v19586_v11 = vadd.f32 %v13603_v4, %v13467_v36 }
 0x5ae   : > { %15020 = vmatprep.subr.bf16.mxu0 %v16383_v16 }
 0x5af   : > { %22245 = vst [vmem:[#allocation49_spill] sm:$0xff] %v19586_v11  ;;  %v13468_v6 = vpop.f32.mrb[244].mxu0  ;;  %v13610_v35 = vpop.f32.mrb[24].mxu1 }
 0x5b0   : > { %v13469_v8 = vpop.f32.mrb[245].mxu0  ;;  %v13611_v5 = vpop.f32.mrb[25].mxu1 }
 0x5b1   : > { %v13471_v55 = vpop.f32.mrb[246].mxu0  ;;  %15021 = vmatpush3.bf16.msra.mxu0 %v16383_v16  ;;  %v13470_v60 = vadd.f32 %v13469_v8, %v13468_v6  ;;  %v13612_v41 = vadd.f32 %v13611_v5, %v13610_v35  ;;  %v13613_v29 = vpop.f32.mrb[26].mxu1 }
 0x5b2   : > { %v13472_v38 = vpop.f32.mrb[247].mxu0  ;;  %v13614_v19 = vpop.f32.mrb[27].mxu1 }
 0x5b3   : > { %v19588_v12 = vadd.f32 %v13606_v7, %v13470_v60  ;;  %v13473_v31 = vadd.f32 %v13472_v38, %v13471_v55  ;;  %v13615_v23 = vadd.f32 %v13614_v19, %v13613_v29 }
 0x5b4   : > { %6925 = vmatmul.mubr.bf16.gmra.mrb[64].mxu0 %v19256_v62 }
 0x5b5   : > { %6932 = vmatprep.mubr.bf16.mxu0 %v19261_v50  ;;  %v19592_v42 = vadd.f32 %v13609_v44, %v13473_v31 }
 0x5b7   : > { %v13474_v4 = vpop.f32.mrb[248].mxu0  ;;  %v13616_v0 = vpop.f32.mrb[28].mxu1 }
 0x5b8   : > { %v13475_v52 = vpop.f32.mrb[249].mxu0  ;;  %v13617_v36 = vpop.f32.mrb[29].mxu1 }
 0x5b9   : > { %v13477_v16 = vpop.f32.mrb[250].mxu0  ;;  %v13476_v6 = vadd.f32 %v13475_v52, %v13474_v4  ;;  %v13618_v35 = vadd.f32 %v13617_v36, %v13616_v0  ;;  %v13619_v8 = vpop.f32.mrb[30].mxu1 }
 0x5ba   : > { %v13478_v5 = vpop.f32.mrb[251].mxu0  ;;  %v13620_v11 = vpop.f32.mrb[31].mxu1 }
 0x5bb   : > { %v19594_v7 = vadd.f32 %v13612_v41, %v13476_v6  ;;  %v13479_v55 = vadd.f32 %v13478_v5, %v13477_v16  ;;  %v13621_v60 = vadd.f32 %v13620_v11, %v13619_v8 }
 0x5bc   : > { %6933 = vmatmul.mubr.bf16.gmra.mrb[68].mxu0 %v19284_v26 }
 0x5bd   : > { %6940 = vmatprep.mubr.bf16.mxu0 %v19290_v28  ;;  %v19598_v62 = vadd.f32 %v13615_v23, %v13479_v55 }
 0x5bf   : > { %v13480_v50 = vpop.f32.mrb[252].mxu0  ;;  %v13622_v44 = vpop.f32.mrb[32].mxu1 }
 0x5c0   : > { %v13481_v29 = vpop.f32.mrb[253].mxu0  ;;  %v13623_v38 = vpop.f32.mrb[33].mxu1 }
 0x5c1   : > { %v13483_v19 = vpop.f32.mrb[254].mxu0  ;;  %v13482_v31 = vadd.f32 %v13481_v29, %v13480_v50  ;;  %v13624_v4 = vadd.f32 %v13623_v38, %v13622_v44  ;;  %v13625_v0 = vpop.f32.mrb[34].mxu1 }
 0x5c2   : > { %v13484_v52 = vpop.f32.mrb[255].mxu0  ;;  %v13626_v36 = vpop.f32.mrb[35].mxu1 }
 0x5c3   : > { %v19600_v41 = vadd.f32 %v13618_v35, %v13482_v31  ;;  %v13485_v16 = vadd.f32 %v13484_v52, %v13483_v19  ;;  %v13627_v11 = vadd.f32 %v13626_v36, %v13625_v0 }
 0x5c4   : > { %6941 = vmatmul.mubr.bf16.gmra.mrb[72].mxu0 %v19312_v1 }
 0x5c5   : > { %6948 = vmatprep.mubr.bf16.mxu0 %v19315_v54  ;;  %v19604_v26 = vadd.f32 %v13621_v60, %v13485_v16 }
 0x5c7   : > { %v13486_v28 = vpop.f32.mrb[0].mxu0  ;;  %v13628_v23 = vpop.f32.mrb[36].mxu1 }
 0x5c8   : > { %v13487_v6 = vpop.f32.mrb[1].mxu0  ;;  %v13629_v8 = vpop.f32.mrb[37].mxu1 }
 0x5c9   : > { %v13489_v5 = vpop.f32.mrb[2].mxu0  ;;  %v13488_v55 = vadd.f32 %v13487_v6, %v13486_v28  ;;  %v13630_v50 = vadd.f32 %v13629_v8, %v13628_v23  ;;  %v13631_v44 = vpop.f32.mrb[38].mxu1 }
 0x5ca   : > { %v13490_v29 = vpop.f32.mrb[3].mxu0  ;;  %v13632_v38 = vpop.f32.mrb[39].mxu1 }
 0x5cb   : > { %v19606_v35 = vadd.f32 %v13624_v4, %v13488_v55  ;;  %v13491_v19 = vadd.f32 %v13490_v29, %v13489_v5  ;;  %v13633_v31 = vadd.f32 %v13632_v38, %v13631_v44 }
 0x5cc   : > { %6949 = vmatmul.mubr.bf16.gmra.mrb[76].mxu0 %v19320_v27 }
 0x5cd   : > { %6956 = vmatprep.mubr.bf16.mxu0 %v19323_v13  ;;  %v19610_v1 = vadd.f32 %v13627_v11, %v13491_v19 }
 0x5cf   : > { %v13492_v54 = vpop.f32.mrb[4].mxu0  ;;  %v13634_v60 = vpop.f32.mrb[40].mxu1 }
 0x5d0   : > { %v13493_v0 = vpop.f32.mrb[5].mxu0  ;;  %v13635_v52 = vpop.f32.mrb[41].mxu1 }
 0x5d1   : > { %v13495_v36 = vpop.f32.mrb[6].mxu0  ;;  %v13494_v16 = vadd.f32 %v13493_v0, %v13492_v54  ;;  %v13636_v28 = vadd.f32 %v13635_v52, %v13634_v60  ;;  %v13637_v23 = vpop.f32.mrb[42].mxu1 }
 0x5d2   : > { %v13496_v6 = vpop.f32.mrb[7].mxu0  ;;  %v13638_v8 = vpop.f32.mrb[43].mxu1 }
 0x5d3   : > { %v19612_v4 = vadd.f32 %v13630_v50, %v13494_v16  ;;  %v13497_v5 = vadd.f32 %v13496_v6, %v13495_v36  ;;  %v13639_v55 = vadd.f32 %v13638_v8, %v13637_v23 }
 0x5d4   : > { %6957 = vmatmul.mubr.bf16.gmra.mrb[80].mxu0 %v19328_v61 }
 0x5d5   : > { %6964 = vmatprep.mubr.bf16.mxu0 %v19331_v47  ;;  %v19616_v27 = vadd.f32 %v13633_v31, %v13497_v5 }
 0x5d7   : > { %v13498_v13 = vpop.f32.mrb[8].mxu0  ;;  %v13640_v11 = vpop.f32.mrb[44].mxu1 }
 0x5d8   : > { %v13499_v44 = vpop.f32.mrb[9].mxu0  ;;  %v13641_v29 = vpop.f32.mrb[45].mxu1 }
 0x5d9   : > { %v13501_v38 = vpop.f32.mrb[10].mxu0  ;;  %v13500_v19 = vadd.f32 %v13499_v44, %v13498_v13  ;;  %v13642_v54 = vadd.f32 %v13641_v29, %v13640_v11  ;;  %v13643_v60 = vpop.f32.mrb[46].mxu1  ;;  %v16403_v11 = vld [vmem:[%s21623_s1 + $0x7b0] sm:$0xff]   ;;  %v16404_v44 = vld [vmem:[%s21623_s1 + $0x718] sm:$0xff]  }
 0x5da   : > { %v13502_v0 = vpop.f32.mrb[11].mxu0  ;;  %v13644_v52 = vpop.f32.mrb[47].mxu1 }
 0x5db   : > { %v19618_v50 = vadd.f32 %v13636_v28, %v13500_v19  ;;  %v13503_v36 = vadd.f32 %v13502_v0, %v13501_v38  ;;  %v13645_v16 = vadd.f32 %v13644_v52, %v13643_v60  ;;  %v16405_v52 = vld [vmem:[%s21623_s1 + $0x6d8] sm:$0xff]  }
 0x5dc   : > { %6965 = vmatmul.mubr.bf16.gmra.mrb[84].mxu0 %v19338_v15  ;;  %v16384_v15 = vld [vmem:[%s21623_s1 + $0x7c0] sm:$0xff]  }
 0x5dd   : > { %6972 = vmatprep.mubr.bf16.mxu0 %v19341_v14  ;;  %v19622_v61 = vadd.f32 %v13639_v55, %v13503_v36  ;;  %v16385_v14 = vld [vmem:[%s21623_s1 + $0x780] sm:$0xff]   ;;  %13806 = vmatprep.subr.bf16.mxu1 %v16384_v15  ;;  %v16402_v55 = vld [vmem:[%s21623_s1 + $0x6d0] sm:$0xff]  }
 0x5de   : > { %13807 = vmatpush3.bf16.msra.mxu1 %v16385_v14  ;;  %v22250_v36 = vld [vmem:[#allocation41_spill] sm:$0xff] }
 0x5df   : > { %v13504_v47 = vpop.f32.mrb[12].mxu0 }
 0x5e0   : > { %v13505_v31 = vpop.f32.mrb[13].mxu0 }
 0x5e1   : > { %v13507_v23 = vpop.f32.mrb[14].mxu0  ;;  %v13506_v6 = vadd.f32 %v13505_v31, %v13504_v47  ;;  %v22251_v47 = vld [vmem:[#allocation42_spill] sm:$0xff] }
 0x5e2   : > { %v13508_v8 = vpop.f32.mrb[15].mxu0 }
 0x5e3   : > { %v19624_v5 = vadd.f32 %v13642_v54, %v13506_v6  ;;  %v13509_v13 = vadd.f32 %v13508_v8, %v13507_v23  ;;  %v16406_v23 = vld [vmem:[%s21623_s1 + $0x720] sm:$0xff]  }
 0x5e4   : > { %6973 = vmatmul.mubr.bf16.gmra.mrb[88].mxu0 %v19348_v30  ;;  %v16387_v30 = vld [vmem:[%s21623_s1 + $0x788] sm:$0xff]   ;;  %v16407_v8 = vld [vmem:[%s21623_s1 + $0x6e0] sm:$0xff]  }
 0x5e5   : > { %6980 = vmatprep.mubr.bf16.mxu0 %v19351_v39  ;;  %v19628_v28 = vadd.f32 %v13645_v16, %v13509_v13  ;;  %v22246_v39 = vld [vmem:[#allocation37_spill] sm:$0xff] }
 0x5ec   : > { %6981 = vmatmul.mubr.bf16.gmra.mrb[92].mxu0 %v19356_v63  ;;  %v22247_v63 = vld [vmem:[#allocation38_spill] sm:$0xff] }
 0x5ed   : > { %6988 = vmatprep.mubr.bf16.mxu0 %v19359_v59  ;;  %v22249_v59 = vld [vmem:[#allocation40_spill] sm:$0xff] }
 0x5f4   : > { %6989 = vmatmul.mubr.bf16.gmra.mrb[96].mxu0 %v19364_v53  ;;  %v16396_v53 = vld [vmem:[%s21623_s1 + $0x700] sm:$0xff]  }
 0x5f5   : > { %6996 = vmatprep.mubr.bf16.mxu0 %v19367_v43  ;;  %v16397_v43 = vld [vmem:[%s21623_s1 + $0x6c0] sm:$0xff]   ;;  %13942 = vmatprep.subr.bf16.mxu0 %v16396_v53 }
 0x5fc   : > { %6997 = vmatmul.mubr.bf16.gmra.mrb[100].mxu0 %v19372_v33  ;;  %v16398_v33 = vld [vmem:[%s21623_s1 + $0x708] sm:$0xff]  }
 0x5fd   : > { %7004 = vmatprep.mubr.bf16.mxu0 %v19375_v20  ;;  %v16386_v20 = vld [vmem:[%s21623_s1 + $0x7c8] sm:$0xff]  }
 0x5fe   : > { %13808 = vmatprep.subr.bf16.mxu1 %v16386_v20 }
 0x5ff   : > { %13809 = vmatpush3.bf16.msra.mxu1 %v16387_v30  ;;  %v16408_v30 = vld [vmem:[%s21623_s1 + $0x728] sm:$0xff]  }
 0x604   : > { %7005 = vmatmul.mubr.bf16.gmra.mrb[104].mxu0 %v19379_v40  ;;  %v16389_v40 = vld [vmem:[%s21623_s1 + $0x790] sm:$0xff]  }
 0x605   : > { %7012 = vmatprep.mubr.bf16.mxu0 %v19452_v2 }
 0x60c   : > { %7013 = vmatmul.mubr.bf16.gmra.mrb[108].mxu0 %v19452_v2 }
 0x60d   : > { %15022 = vmatprep.mubr.bf16.mxu0 %v19385_v22  ;;  %v16388_v22 = vld [vmem:[%s21623_s1 + $0x7d0] sm:$0xff]  }
 0x60e   : > { %13810 = vmatprep.subr.bf16.mxu1 %v16388_v22 }
 0x60f   : > { %13811 = vmatpush3.bf16.msra.mxu1 %v16389_v40  ;;  %v22252_v40 = vld [vmem:[#allocation43_spill] sm:$0xff] }
 0x614   : > { %15023 = vmatmul.mubr.bf16.vlgmr.msra.gmra.mrb[16].mxu0 %v19388_v17  ;;  %v16393_v17 = vld [vmem:[%s21623_s1 + $0x7a0] sm:$0xff]  }
 0x615   : > { %15026 = vmatprep.mubr.bf16.mxu0 %v19398_v46  ;;  %v22248_v46 = vld [vmem:[#allocation39_spill] sm:$0xff]  ;;  %13943 = vmatpush3.bf16.msra.mxu0 %v16397_v43  ;;  %v16414_v43 = vld [vmem:[%s21623_s1 + $0x738] sm:$0xff]  }
 0x616   : > { %13944 = vmatprep.subr.bf16.mxu0 %v16398_v33 }
 0x61c   : > { %15027 = vmatmul.mubr.bf16.gmra.mrb[20].mxu0 %v19401_v56  ;;  %v16391_v56 = vld [vmem:[%s21623_s1 + $0x798] sm:$0xff]  }
 0x61d   : > { %15030 = vmatprep.mubr.bf16.mxu0 %v19410_v21  ;;  %v16390_v21 = vld [vmem:[%s21623_s1 + $0x7d8] sm:$0xff]  }
 0x61e   : > { %13812 = vmatprep.subr.bf16.mxu1 %v16390_v21  ;;  %v22253_v21 = vld [vmem:[#allocation44_spill] sm:$0xff] }
 0x61f   : > { %13813 = vmatpush3.bf16.msra.mxu1 %v16391_v56 }
 0x624   : > { %15031 = vmatmul.mubr.bf16.gmra.mrb[24].mxu0 %v22246_v39 }
 0x625   : > { %15034 = vmatprep.mubr.bf16.mxu0 %v22247_v63  ;;  %v16409_v63 = vld [vmem:[%s21623_s1 + $0x6e8] sm:$0xff]  }
 0x62c   : > { %15035 = vmatmul.mubr.bf16.gmra.mrb[28].mxu0 %v19425_v51  ;;  %v16392_v51 = vld [vmem:[%s21623_s1 + $0x7e0] sm:$0xff]  }
 0x62d   : > { %15038 = vmatprep.mubr.bf16.mxu0 %v19431_v57  ;;  %13814 = vmatprep.subr.bf16.mxu1 %v16392_v51  ;;  %v16399_v57 = vld [vmem:[%s21623_s1 + $0x6c8] sm:$0xff]  }
 0x62e   : > { %13815 = vmatpush3.bf16.msra.mxu1 %v16393_v17  ;;  %13945 = vmatpush3.bf16.msra.mxu0 %v16399_v57  ;;  %v16412_v17 = vld [vmem:[%s21623_s1 + $0x6f0] sm:$0xff]   ;;  %v22254_v57 = vld [vmem:[#allocation45_spill] sm:$0xff] }
 0x634   : > { %15039 = vmatmul.mubr.bf16.gmra.mrb[32].mxu0 %v19434_v24  ;;  %v16395_v24 = vld [vmem:[%s21623_s1 + $0x7a8] sm:$0xff]  }
 0x635   : > { %15042 = vmatprep.mubr.bf16.mxu0 %v19437_v25  ;;  %v16394_v25 = vld [vmem:[%s21623_s1 + $0x7e8] sm:$0xff]  }
 0x636   : > { %13816 = vmatprep.subr.bf16.mxu1 %v16394_v25 }
 0x637   : > { %13817 = vmatpush3.bf16.msra.mxu1 %v16395_v24 }
 0x63c   : > { %15043 = vmatmul.mubr.bf16.gmra.mrb[36].mxu0 %v19440_v58  ;;  %v16400_v58 = vld [vmem:[%s21623_s1 + $0x710] sm:$0xff]  }
 0x63d   : > { %15046 = vmatprep.mubr.bf16.mxu0 %v22248_v46  ;;  %13946 = vmatprep.subr.bf16.mxu0 %v16400_v58  ;;  %v16410_v46 = vld [vmem:[%s21623_s1 + $0x730] sm:$0xff]  }
 0x63e   : > { %13947 = vmatpush3.bf16.msra.mxu0 %v16402_v55  ;;  %v22255_v55 = vld [vmem:[#allocation46_spill] sm:$0xff] }
 0x63f   : > { %13948 = vmatprep.subr.bf16.mxu0 %v16404_v44 }
 0x642   : > { %13949 = vmatpush3.bf16.msra.mxu0 %v16405_v52 }
 0x643   : > { %13950 = vmatprep.subr.bf16.mxu0 %v16406_v23  ;;  %v22257_v23 = vld [vmem:[#allocation48_spill] sm:$0xff] }
 0x644   : > { %15047 = vmatmul.mubr.bf16.gmra.mrb[40].mxu0 %v19446_v10  ;;  %v16401_v10 = vld [vmem:[%s21623_s1 + $0x7f0] sm:$0xff]  }
 0x645   : > { %15050 = vmatprep.mubr.bf16.mxu0 %v22249_v59  ;;  %13818 = vmatprep.subr.bf16.mxu1 %v16401_v10  ;;  %v16415_v10 = vld [vmem:[%s21623_s1 + $0x6f8] sm:$0xff]  }
 0x646   : > { %13819 = vmatpush3.bf16.msra.mxu1 %v16403_v11  ;;  %13951 = vmatpush3.bf16.msra.mxu0 %v16407_v8 }
 0x647   : > { %13952 = vmatprep.subr.bf16.mxu0 %v16408_v30 }
 0x64a   : > { %13953 = vmatpush3.bf16.msra.mxu0 %v16409_v63 }
 0x64b   : > { %13954 = vmatprep.subr.bf16.mxu0 %v16410_v46 }
 0x64c   : > { %15051 = vmatmul.mubr.bf16.gmra.mrb[44].mxu0 %v19452_v2 }
 0x64d   : > { %8381 = vmatprep.mubr.bf16.mxu0 %v19452_v2 }
 0x64e   : > { %13955 = vmatpush3.bf16.msra.mxu0 %v16412_v17 }
 0x64f   : > { %13956 = vmatprep.subr.bf16.mxu0 %v16414_v43 }
 0x652   : > { %13957 = vmatpush3.bf16.msra.mxu0 %v16415_v10 }
 0x655   : > { %8382 = vmatmul.mubr.bf16.vlgmr.msra.gmra.mrb[112].mxu0 %v19452_v2 }
 0x667   : > { %v13686_v29 = vpop.f32.mrb[48].mxu0 }
 0x668   : > { %v13687_v38 = vpop.f32.mrb[49].mxu0 }
 0x669   : > { %v13688_v19 = vadd.f32 %v13687_v38, %v13686_v29  ;;  %v13689_v54 = vpop.f32.mrb[50].mxu0 }
 0x66a   : > { %v13690_v60 = vpop.f32.mrb[51].mxu0 }
 0x66b   : > { %v13691_v0 = vadd.f32 %v13690_v60, %v13689_v54  ;;  %v19723_v16 = vadd.f32 %v22250_v36, %v13688_v19  ;;  %v16411_v36 = vld [vmem:[%s21623_s1 + $0x7f8] sm:$0xff]  }
 0x66c   : > { %13820 = vmatprep.subr.bf16.mxu1 %v16411_v36 }
 0x66d   : > { %v19726_v31 = vadd.f32 %v22251_v47, %v13691_v0  ;;  %v22256_v0 = vld [vmem:[#allocation47_spill] sm:$0xff]  ;;  %v16413_v47 = vld [vmem:[%s21623_s1 + $0x7b8] sm:$0xff]  }
 0x66e   : > { %13821 = vmatpush3.bf16.msra.mxu1 %v16413_v47 }
 0x66f   : > { %v13692_v6 = vpop.f32.mrb[52].mxu0 }
 0x670   : > { %v13693_v13 = vpop.f32.mrb[53].mxu0 }
 0x671   : > { %v13694_v15 = vadd.f32 %v13693_v13, %v13692_v6  ;;  %v13695_v14 = vpop.f32.mrb[54].mxu0 }
 0x672   : > { %v13696_v20 = vpop.f32.mrb[55].mxu0 }
 0x673   : > { %v13697_v22 = vadd.f32 %v13696_v20, %v13695_v14  ;;  %v19738_v39 = vadd.f32 %v22252_v40, %v13694_v15 }
 0x675   : > { %v19744_v56 = vadd.f32 %v22253_v21, %v13697_v22 }
 0x677   : > { %v13698_v51 = vpop.f32.mrb[56].mxu0 }
 0x678   : > { %v13699_v59 = vpop.f32.mrb[57].mxu0 }
 0x679   : > { %v13700_v25 = vadd.f32 %v13699_v59, %v13698_v51  ;;  %v13701_v24 = vpop.f32.mrb[58].mxu0 }
 0x67a   : > { %v13702_v53 = vpop.f32.mrb[59].mxu0 }
 0x67b   : > { %v13703_v33 = vadd.f32 %v13702_v53, %v13701_v24  ;;  %v19756_v58 = vadd.f32 %v22254_v57, %v13700_v25  ;;  %v19789_v25 = vld [vmem:[%s21623_s1 + $0x800] sm:$0xff]  }
 0x67c   : > { %15054 = vmatprep.subr.bf16.mxu1 %v19789_v25 }
 0x67d   : > { %v19762_v11 = vadd.f32 %v22255_v55, %v13703_v33 }
 0x67f   : > { %v13704_v44 = vpop.f32.mrb[60].mxu0 }
 0x680   : > { %v13705_v29 = vpop.f32.mrb[61].mxu0 }
 0x681   : > { %v13706_v38 = vadd.f32 %v13705_v29, %v13704_v44  ;;  %v13707_v19 = vpop.f32.mrb[62].mxu0 }
 0x682   : > { %v13708_v54 = vpop.f32.mrb[63].mxu0 }
 0x683   : > { %v13709_v60 = vadd.f32 %v13708_v54, %v13707_v19  ;;  %v19766_v52 = vadd.f32 %v22256_v0, %v13706_v38 }
 0x685   : > { %v19775_v6 = vadd.f32 %v22257_v23, %v13709_v60 }
 0x687   : > { %v13710_v2 = vpop.f32.mrb[64].mxu0 }
 0x688   : > { %v13711_v8 = vpop.f32.mrb[65].mxu0 }
 0x689   : > { %v13712_v13 = vadd.f32 %v13711_v8, %v13710_v2  ;;  %v13713_v15 = vpop.f32.mrb[66].mxu0  ;;  %v22258_v8 = vld [vmem:[#allocation49_spill] sm:$0xff] }
 0x68a   : > { %v13714_v14 = vpop.f32.mrb[67].mxu0 }
 0x68b   : > { %v13715_v20 = vadd.f32 %v13714_v14, %v13713_v15  ;;  %v19778_v30 = vadd.f32 %v19537_v45, %v13712_v13 }
 0x68d   : > { %v19781_v22 = vadd.f32 %v19540_v37, %v13715_v20 }
 0x68f   : > { %v13716_v40 = vpop.f32.mrb[68].mxu0 }
 0x690   : > { %v13717_v63 = vpop.f32.mrb[69].mxu0 }
 0x691   : > { %v13718_v21 = vadd.f32 %v13717_v63, %v13716_v40  ;;  %v13719_v46 = vpop.f32.mrb[70].mxu0 }
 0x692   : > { %v13720_v51 = vpop.f32.mrb[71].mxu0 }
 0x693   : > { %v13721_v17 = vadd.f32 %v13720_v51, %v13719_v46  ;;  %v19784_v59 = vadd.f32 %v19545_v3, %v13718_v21 }
 0x695   : > { %v19792_v45 = vadd.f32 %v19550_v18, %v13721_v17 }
 0x697   : > { %v13722_v37 = vpop.f32.mrb[72].mxu0 }
 0x698   : > { %v13723_v24 = vpop.f32.mrb[73].mxu0 }
 0x699   : > { %v13724_v53 = vadd.f32 %v13723_v24, %v13722_v37  ;;  %v13725_v43 = vpop.f32.mrb[74].mxu0 }
 0x69a   : > { %v13726_v33 = vpop.f32.mrb[75].mxu0 }
 0x69b   : > { %v13727_v57 = vadd.f32 %v13726_v33, %v13725_v43  ;;  %v19796_v10 = vadd.f32 %v19558_v49, %v13724_v53 }
 0x69d   : > { %v19799_v3 = vadd.f32 %v19562_v34, %v13727_v57 }
 0x69f   : > { %v13728_v55 = vpop.f32.mrb[76].mxu0 }
 0x6a0   : > { %v13729_v44 = vpop.f32.mrb[77].mxu0 }
 0x6a1   : > { %v13730_v29 = vadd.f32 %v13729_v44, %v13728_v55  ;;  %v13731_v38 = vpop.f32.mrb[78].mxu0 }
 0x6a2   : > { %v13732_v18 = vpop.f32.mrb[79].mxu0 }
 0x6a3   : > { %v13733_v19 = vadd.f32 %v13732_v18, %v13731_v38  ;;  %v19802_v54 = vadd.f32 %v19570_v48, %v13730_v29 }
 0x6a5   : > { %v19805_v60 = vadd.f32 %v19574_v32, %v13733_v19 }
 0x6a7   : > { %v13734_v0 = vpop.f32.mrb[80].mxu0 }
 0x6a8   : > { %v13735_v36 = vpop.f32.mrb[81].mxu0 }
 0x6a9   : > { %v13736_v47 = vadd.f32 %v13735_v36, %v13734_v0  ;;  %v13737_v49 = vpop.f32.mrb[82].mxu0 }
 0x6aa   : > { %v13738_v23 = vpop.f32.mrb[83].mxu0 }
 0x6ab   : > { %v13739_v2 = vadd.f32 %v13738_v23, %v13737_v49  ;;  %v19808_v34 = vadd.f32 %v19582_v9, %v13736_v47 }
 0x6ad   : > { %v19811_v13 = vadd.f32 %v22258_v8, %v13739_v2 }
 0x6af   : > { %v13740_v15 = vpop.f32.mrb[84].mxu0 }
 0x6b0   : > { %v13741_v14 = vpop.f32.mrb[85].mxu0 }
 0x6b1   : > { %v13742_v20 = vadd.f32 %v13741_v14, %v13740_v15  ;;  %v13743_v48 = vpop.f32.mrb[86].mxu0 }
 0x6b2   : > { %v13744_v40 = vpop.f32.mrb[87].mxu0 }
 0x6b3   : > { %v13745_v63 = vadd.f32 %v13744_v40, %v13743_v48  ;;  %v19814_v32 = vadd.f32 %v19588_v12, %v13742_v20 }
 0x6b5   : > { %v19817_v21 = vadd.f32 %v19592_v42, %v13745_v63 }
 0x6b7   : > { %v13746_v46 = vpop.f32.mrb[88].mxu0 }
 0x6b8   : > { %v13747_v51 = vpop.f32.mrb[89].mxu0 }
 0x6b9   : > { %v13748_v17 = vadd.f32 %v13747_v51, %v13746_v46  ;;  %v13749_v9 = vpop.f32.mrb[90].mxu0 }
 0x6ba   : > { %v13750_v37 = vpop.f32.mrb[91].mxu0 }
 0x6bb   : > { %v13751_v24 = vadd.f32 %v13750_v37, %v13749_v9  ;;  %v19820_v53 = vadd.f32 %v19594_v7, %v13748_v17 }
 0x6bd   : > { %v19823_v43 = vadd.f32 %v19598_v62, %v13751_v24 }
 0x6bf   : > { %v13752_v33 = vpop.f32.mrb[92].mxu0 }
 0x6c0   : > { %v13753_v57 = vpop.f32.mrb[93].mxu0 }
 0x6c1   : > { %v13754_v55 = vadd.f32 %v13753_v57, %v13752_v33  ;;  %v13755_v12 = vpop.f32.mrb[94].mxu0 }
 0x6c2   : > { %v13756_v44 = vpop.f32.mrb[95].mxu0 }
 0x6c3   : > { %v13757_v29 = vadd.f32 %v13756_v44, %v13755_v12  ;;  %v19826_v42 = vadd.f32 %v19600_v41, %v13754_v55 }
 0x6c5   : > { %v19829_v38 = vadd.f32 %v19604_v26, %v13757_v29 }
 0x6c7   : > { %v13758_v18 = vpop.f32.mrb[96].mxu0 }
 0x6c8   : > { %v13759_v19 = vpop.f32.mrb[97].mxu0 }
 0x6c9   : > { %v13760_v0 = vadd.f32 %v13759_v19, %v13758_v18  ;;  %v13761_v7 = vpop.f32.mrb[98].mxu0 }
 0x6ca   : > { %v13762_v36 = vpop.f32.mrb[99].mxu0 }
 0x6cb   : > { %v13763_v47 = vadd.f32 %v13762_v36, %v13761_v7  ;;  %v19832_v62 = vadd.f32 %v19606_v35, %v13760_v0 }
 0x6cd   : > { %v19835_v49 = vadd.f32 %v19610_v1, %v13763_v47 }
 0x6cf   : > { %v13764_v23 = vpop.f32.mrb[100].mxu0 }
 0x6d0   : > { %v13765_v2 = vpop.f32.mrb[101].mxu0 }
 0x6d1   : > { %v13766_v8 = vadd.f32 %v13765_v2, %v13764_v23  ;;  %v13767_v41 = vpop.f32.mrb[102].mxu0 }
 0x6d2   : > { %v13768_v15 = vpop.f32.mrb[103].mxu0 }
 0x6d3   : > { %v13769_v14 = vadd.f32 %v13768_v15, %v13767_v41  ;;  %v19838_v26 = vadd.f32 %v19612_v4, %v13766_v8 }
 0x6d5   : > { %v19841_v20 = vadd.f32 %v19616_v27, %v13769_v14 }
 0x6d7   : > { %v13770_v48 = vpop.f32.mrb[104].mxu0 }
 0x6d8   : > { %v13771_v40 = vpop.f32.mrb[105].mxu0 }
 0x6d9   : > { %v13772_v63 = vadd.f32 %v13771_v40, %v13770_v48  ;;  %v13773_v35 = vpop.f32.mrb[106].mxu0 }
 0x6da   : > { %v13774_v46 = vpop.f32.mrb[107].mxu0 }
 0x6db   : > { %v13775_v51 = vadd.f32 %v13774_v46, %v13773_v35  ;;  %v19844_v1 = vadd.f32 %v19618_v50, %v13772_v63  ;;  %v19858_v50 = vld [vmem:[%s21624_s2 + $0x2] ss:$0 sm:$0xff] }
 0x6dd   : > { %v19847_v17 = vadd.f32 %v19622_v61, %v13775_v51 }
 0x6df   : > { %v13776_v9 = vpop.f32.mrb[108].mxu0 }
 0x6e0   : > { %v13777_v37 = vpop.f32.mrb[109].mxu0 }
 0x6e1   : > { %v13778_v24 = vadd.f32 %v13777_v37, %v13776_v9  ;;  %v13779_v4 = vpop.f32.mrb[110].mxu0 }
 0x6e2   : > { %v13780_v33 = vpop.f32.mrb[111].mxu0 }
 0x6e3   : > { %v13781_v57 = vadd.f32 %v13780_v33, %v13779_v4  ;;  %v19850_v27 = vadd.f32 %v19624_v5, %v13778_v24 }
 0x6e5   : > { %v19853_v55 = vadd.f32 %v19628_v28, %v13781_v57 }
 0x6e7   : > { %v15024_v12 = vpop.f32.mrb[16].mxu0 }
 0x6e8   : > { %v15552_v61 = vadd.f32 %v19738_v39, %v15024_v12  ;;  %v7055_v44 = vpop.f32.mrb[17].mxu0 }
 0x6e9   : > { %v15555_v29 = vadd.f32 %v19723_v16, %v7055_v44  ;;  %v15025_v18 = vpop.f32.mrb[18].mxu0 }
 0x6ea   : > { %v7224_v19 = vadd.f32 %v15552_v61, %v19858_v50  ;;  %v15558_v5 = vadd.f32 %v19744_v56, %v15025_v18  ;;  %v7058_v0 = vpop.f32.mrb[19].mxu0 }
 0x6eb   : > { %v7222_v28 = vadd.f32 %v15555_v29, %v19858_v50  ;;  %v15561_v7 = vadd.f32 %v19726_v31, %v7058_v0 }
 0x6ec   : > { %v7225_v36 = vadd.f32 %v15558_v5, %v19858_v50  ;;  %v7256_v23 = vmax.f32 %v7224_v19, 0.0 }
 0x6ed   : > { %v7223_v47 = vadd.f32 %v15561_v7, %v19858_v50  ;;  %v7254_v39 = vmax.f32 %v7222_v28, 0.0 }
 0x6ee   : > { %v7257_v2 = vmax.f32 %v7225_v36, 0.0 }
 0x6ef   : > { %v7255_v8 = vmax.f32 %v7223_v47, 0.0  ;;  %v15028_v41 = vpop.f32.mrb[20].mxu0 }
 0x6f0   : > { %v7287_v16 = vpack.c.bf16 %v7257_v2, %v7256_v23  ;;  %v15564_v15 = vadd.f32 %v19766_v52, %v15028_v41  ;;  %v7071_v14 = vpop.f32.mrb[21].mxu0 }
 0x6f1   : > { %v7286_v48 = vpack.c.bf16 %v7255_v8, %v7254_v39  ;;  %v15567_v56 = vadd.f32 %v19756_v58, %v7071_v14  ;;  %v15029_v40 = vpop.f32.mrb[22].mxu0  ;;  %v22263_v8 = vld [vmem:[#allocation29_spill] sm:$0xff]  ;;  %v22265_v14 = vld [vmem:[#allocation26_spill] sm:$0xff] }
 0x6f2   : > { %v7310_v63 = vshrl.u32 %v7287_v16, 16  ;;  %v7313_v35 = vshll.u32 %v7287_v16, 16  ;;  %7559 = vst.msk [vmem:[#allocation2 + $0x38] sm:$0xff] %vm22259_vm9, %v7287_v16  ;;  %v7228_v31 = vadd.f32 %v15564_v15, %v19858_v50  ;;  %v15570_v46 = vadd.f32 %v19775_v6, %v15029_v40  ;;  %v7074_v51 = vpop.f32.mrb[23].mxu0 }
 0x6f3   : > { %v7303_v9 = vshrl.u32 %v7286_v48, 16  ;;  %v7306_v37 = vshll.u32 %v7286_v48, 16  ;;  %7558 = vst.msk [vmem:[#allocation2 + $0x20] sm:$0xff] %vm22230_vm3, %v7286_v48  ;;  %v7226_v52 = vadd.f32 %v15567_v56, %v19858_v50  ;;  %v15573_v24 = vadd.f32 %v19762_v11, %v7074_v51 }
 0x6f4   : > { %v19876_v4 = vrot.slane %v7310_v63, 7  ;;  %v7229_v58 = vadd.f32 %v15570_v46, %v19858_v50  ;;  %v7448_v6 = vrot.slane %v7313_v35, 1  ;;  %v7260_v44 = vmax.f32 %v7228_v31, 0.0 }
 0x6f5   : > { %v7305_v33 = vrot.slane %v7303_v9, 7  ;;  %v7446_v57 = vrot.slane %v7306_v37, 1  ;;  %v7227_v12 = vadd.f32 %v15573_v24, %v19858_v50  ;;  %v7258_v5 = vmax.f32 %v7226_v52, 0.0 }
 0x6f6   : > { %v7315_v61 = vor.u32 %v7313_v35, %v19876_v4  ;;  %v7261_v29 = vmax.f32 %v7229_v58, 0.0  ;;  %vm22264_vm9 = vnez %v22263_v8  ;;  %vm22266_vm3 = vnez %v22265_v14 }
 0x6f7   : > { %v7308_v18 = vor.u32 %v7306_v37, %v7305_v33  ;;  %v7447_v19 = vor.u32 %v7446_v57, %v7303_v9  ;;  %v7259_v0 = vmax.f32 %v7227_v12, 0.0  ;;  %v15032_v28 = vpop.f32.mrb[24].mxu0  ;;  %v7450_v24 = vor.u32 %v7448_v6, %v7310_v63 }
 0x6f8   : > { %v7316_v11 = vsel %vm22260_vm5, %v7305_v33, %v7315_v61  ;;  %v19882_v7 = vpack.c.bf16 %v7261_v29, %v7260_v44  ;;  %v15576_v36 = vadd.f32 %v19784_v59, %v15032_v28  ;;  %v7087_v47 = vpop.f32.mrb[25].mxu0  ;;  %vm22268_vm5 = vcmask 523264  }
 0x6f9   : > { %v7445_v2 = vsel %vm17322_vm1, 0, %v7308_v18  ;;  %v7449_v39 = vsel %vm22262_vm12, %v7447_v19, %v7448_v6  ;;  %v7511_v41 = vsel %vm22264_vm9, %v7316_v11, 0  ;;  %v7288_v16 = vpack.c.bf16 %v7259_v0, %v7258_v5  ;;  %v15033_v15 = vpop.f32.mrb[26].mxu0  ;;  %vm22269_vm1 = vmmov %vm22268_vm5 }
 0x6fa   : > { %v7510_v48 = vsel %vm22266_vm3, %v7445_v2, 0  ;;  %v7526_v40 = vsel %vm17163_vm13, %v7449_v39, 0  ;;  %7543 = vst.msk [vmem:[#allocation2 + $0x30] sm:$0xff] %vm22268_vm5, %v7511_v41  ;;  %v7326_v59 = vshrl.u32 %v19882_v7, 16  ;;  %v7329_v35 = vshll.u32 %v19882_v7, 16  ;;  %v7090_v31 = vpop.f32.mrb[27].mxu0  ;;  %vm22270_vm12 = vmmov %vm22269_vm1 }
 0x6fb   : > { %7561 = vst.msk [vmem:[#allocation2 + $0x68] sm:$0xff] %vm22269_vm1, %v19882_v7  ;;  %v7594_v46 = vld [vmem:[#allocation2 + $0x20] sm:$0xff]  ;;  %vm22271_vm9 = vmmov %vm22269_vm1  ;;  %v7318_v51 = vshrl.u32 %v7288_v16, 16  ;;  %v7321_v9 = vshll.u32 %v7288_v16, 16  ;;  %v7232_v37 = vadd.f32 %v15576_v36, %v19858_v50  ;;  %v15579_v52 = vadd.f32 %v19778_v30, %v7087_v47 }
 0x6fc   : > { %7542 = vst.msk [vmem:[#allocation2 + $0x18] sm:$0xff] %vm22270_vm12, %v7510_v48  ;;  %vm22272_vm3 = vmmov %vm22269_vm1  ;;  %7915 = vmatprep.mubr.bf16.mxu1 %v7594_v46  ;;  %8389 = vmatprep.mubr.bf16.mxu0 %v7594_v46  ;;  %v19906_v58 = vrot.slane %v7326_v59, 7  ;;  %v15582_v33 = vadd.f32 %v19792_v45, %v15033_v15  ;;  %v15585_v57 = vadd.f32 %v19781_v22, %v7090_v31  ;;  %v7454_v12 = vrot.slane %v7329_v35, 1  ;;  %v22278_v15 = vld [vmem:[#allocation36_spill] sm:$0xff] }
 0x6fd   : > { %7574 = vst.msk [vmem:[#allocation2 + $0x28] sm:$0xff] %vm22271_vm9, %v7526_v40  ;;  %v7320_v61 = vrot.slane %v7318_v51, 7  ;;  %v7451_v44 = vrot.slane %v7321_v9, 1  ;;  %v7230_v29 = vadd.f32 %v15579_v52, %v19858_v50  ;;  %v7264_v19 = vmax.f32 %v7232_v37, 0.0  ;;  %v22281_v31 = vld [vmem:[#allocation32_spill] sm:$0xff] }
 0x6fe   : > { %7560 = vst.msk [vmem:[#allocation2 + $0x50] sm:$0xff] %vm22272_vm3, %v7288_v16  ;;  %v7331_v18 = vor.u32 %v7329_v35, %v19906_v58  ;;  %v7233_v30 = vadd.f32 %v15582_v33, %v19858_v50  ;;  %v7231_v63 = vadd.f32 %v15585_v57, %v19858_v50  ;;  %vm22273_vm1 = vsmask.f32 7424  ;;  %v16417_v33 = vld [vmem:[%s21623_s1 + $0x808] sm:$0xff]  }
 0x6ff   : > { %v7323_v6 = vor.u32 %v7321_v9, %v7320_v61  ;;  %v7452_v5 = vsel %vm22273_vm1, %v7450_v24, %v7451_v44  ;;  %v7453_v0 = vor.u32 %v7451_v44, %v7318_v51  ;;  %v7262_v28 = vmax.f32 %v7230_v29, 0.0  ;;  %v15036_v45 = vpop.f32.mrb[28].mxu0  ;;  %vm22277_vm5 = vmmov %vm22273_vm1  ;;  %v22283_v51 = vld [vmem:[#allocation17_spill] sm:$0xff]  ;;  %v7597_v29 = vld [vmem:[#allocation2 + $0x38] sm:$0xff] }
 0x700   : > { %vm22274_vm9 = vsmask.f32 256  ;;  %v7527_v36 = vsel %vm17201_vm0, %v7452_v5, 0  ;;  %v7265_v47 = vmax.f32 %v7233_v30, 0.0  ;;  %v7263_v2 = vmax.f32 %v7231_v63, 0.0  ;;  %v7103_v39 = vpop.f32.mrb[29].mxu0 }
 0x701   : > { %v7332_v22 = vsel %vm22274_vm9, %v7320_v61, %v7331_v18  ;;  %vm22276_vm3 = vmmov %vm22274_vm9  ;;  %v7455_v16 = vsel %vm22277_vm5, %v7453_v0, %v7454_v12  ;;  %vm22279_vm12 = vnez %v22278_v15  ;;  %vm22280_vm1 = vcmask 523264   ;;  %v15037_v35 = vpop.f32.mrb[30].mxu0 }
 0x702   : > { %v7324_v41 = vsel %vm22276_vm3, %v19876_v4, %v7323_v6  ;;  %v7513_v48 = vsel %vm22279_vm12, %v7332_v22, 0  ;;  %7575 = vst.msk [vmem:[#allocation2 + $0x40] sm:$0xff] %vm22280_vm1, %v7527_v36  ;;  %v15588_v40 = vadd.f32 %v19802_v54, %v15036_v45  ;;  %vm22282_vm9 = vnez %v22281_v31  ;;  %vm22285_vm13 = vmmov %vm22280_vm1  ;;  %v7106_v52 = vpop.f32.mrb[31].mxu0  ;;  %v16418_v45 = vld [vmem:[%s21623_s1 + $0x810] sm:$0xff]  }
 0x703   : > { %v7512_v46 = vsel %vm22282_vm9, %v7324_v41, 0  ;;  %vm22284_vm0 = vnez %v22283_v51  ;;  %7545 = vst.msk [vmem:[#allocation2 + $0x60] sm:$0xff] %vm22285_vm13, %v7513_v48  ;;  %v19930_v37 = vpack.c.bf16 %v7265_v47, %v7264_v19  ;;  %v7290_v4 = vpack.c.bf16 %v7263_v2, %v7262_v28  ;;  %v7593_v24 = vld [vmem:[#allocation2 + $0x18] sm:$0xff]  ;;  %vm22286_vm3 = vmmov %vm22280_vm1  ;;  %v22290_v48 = vld [vmem:[#allocation18_spill] sm:$0xff] }
 0x704   : > { %v7528_v9 = vsel %vm22284_vm0, %v7455_v16, 0  ;;  %7544 = vst.msk [vmem:[#allocation2 + $0x48] sm:$0xff] %vm22286_vm3, %v7512_v46  ;;  %vm22287_vm5 = vmmov %vm22280_vm1  ;;  %v7236_v54 = vadd.f32 %v15588_v40, %v19858_v50  ;;  %v15591_v57 = vadd.f32 %v19796_v10, %v7103_v39  ;;  %v15594_v61 = vadd.f32 %v19805_v60, %v15037_v35  ;;  %7916 = vmatmul.mubr.bf16.vlgmr.msra.gmra.mrb[80].mxu1 %v7593_v24 }
 0x705   : > { %7576 = vst.msk [vmem:[#allocation2 + $0x58] sm:$0xff] %vm22287_vm5, %v7528_v9  ;;  %v15597_v44 = vadd.f32 %v19799_v3, %v7106_v52  ;;  %v7342_v18 = vshrl.u32 %v19930_v37, 16  ;;  %v7345_v19 = vshll.u32 %v19930_v37, 16  ;;  %vm22288_vm13 = vmmov %vm22280_vm1  ;;  %v7334_v30 = vshrl.u32 %v7290_v4, 16  ;;  %8390 = vmatmul.mubr.bf16.gmra.mrb[116].mxu0 %v7593_v24  ;;  %7923 = vmatprep.mubr.bf16.mxu1 %v7597_v29 }
 0x706   : > { %7563 = vst.msk [vmem:[#allocation2 + $0x98] sm:$0xff] %vm22288_vm13, %v19930_v37  ;;  %v7337_v63 = vshll.u32 %v7290_v4, 16  ;;  %v7234_v10 = vadd.f32 %v15591_v57, %v19858_v50  ;;  %v7237_v60 = vadd.f32 %v15594_v61, %v19858_v50  ;;  %15055 = vmatpush3.bf16.msra.mxu1 %v19789_v25  ;;  %8397 = vmatprep.mubr.bf16.mxu0 %v7597_v29  ;;  %v7268_v22 = vmax.f32 %v7236_v54, 0.0  ;;  %v7596_v61 = vld [vmem:[#allocation2 + $0x30] sm:$0xff] }
 0x707   : > { %7562 = vst.msk [vmem:[#allocation2 + $0x80] sm:$0xff] %vm22280_vm1, %v7290_v4  ;;  %v7235_v3 = vadd.f32 %v15597_v44, %v19858_v50  ;;  %v7456_v6 = vor.u32 %v7454_v12, %v7326_v59  ;;  %v19954_v5 = vrot.slane %v7342_v18, 7  ;;  %v7336_v0 = vrot.slane %v7334_v30, 7  ;;  %15056 = vmatprep.subr.bf16.mxu1 %v16417_v33  ;;  %v15040_v25 = vpop.f32.mrb[32].mxu0  ;;  %v16419_v44 = vld [vmem:[%s21623_s1 + $0x818] sm:$0xff]   ;;  %v22295_v29 = vld [vmem:[#allocation3_spill] sm:$0xff] }
 0x708   : > { %v7457_v28 = vrot.slane %v7337_v63, 1  ;;  %v7266_v36 = vmax.f32 %v7234_v10, 0.0  ;;  %v7269_v47 = vmax.f32 %v7237_v60, 0.0  ;;  %v7460_v7 = vrot.slane %v7345_v19, 1  ;;  %v7119_v41 = vpop.f32.mrb[33].mxu0 }
 0x709   : > { %v7267_v2 = vmax.f32 %v7235_v3, 0.0  ;;  %v7347_v39 = vor.u32 %v7345_v19, %v19954_v5  ;;  %v7339_v59 = vor.u32 %v7337_v63, %v7336_v0  ;;  %vm22289_vm3 = vsmask.f32 7424  ;;  %v15041_v9 = vpop.f32.mrb[34].mxu0  ;;  %v22297_v19 = vld [vmem:[#allocation4_spill] sm:$0xff] }
 0x70a   : > { %v7458_v12 = vsel %vm22289_vm3, %v7456_v6, %v7457_v28  ;;  %v7459_v16 = vor.u32 %v7457_v28, %v7334_v30  ;;  %vm22291_vm5 = vnez %v22290_v48  ;;  %v19963_v35 = vpack.c.bf16 %v7269_v47, %v7268_v22  ;;  %15057 = vmatpush3.bf16.msra.mxu1 %v16417_v33  ;;  %v7122_v57 = vpop.f32.mrb[35].mxu0 }
 0x70b   : > { %v7529_v40 = vsel %vm22291_vm5, %v7458_v12, 0  ;;  %v7292_v46 = vpack.c.bf16 %v7267_v2, %v7266_v36  ;;  %vm22292_vm13 = vsmask.f32 256  ;;  %vm22294_vm0 = vcmask 523264   ;;  %15058 = vmatprep.subr.bf16.mxu1 %v16418_v45 }
 0x70c   : > { %v7340_v4 = vsel %vm22292_vm13, %v19906_v58, %v7339_v59  ;;  %vm22293_vm1 = vmmov %vm22292_vm13  ;;  %7577 = vst.msk [vmem:[#allocation2 + $0x70] sm:$0xff] %vm22294_vm0, %v7529_v40  ;;  %v15600_v24 = vadd.f32 %v19814_v32, %v15040_v25  ;;  %v15603_v54 = vadd.f32 %v19808_v34, %v7119_v41  ;;  %v7461_v33 = vsel %vm22289_vm3, %v7459_v16, %v7460_v7  ;;  %v7600_v34 = vld [vmem:[#allocation2 + $0x50] sm:$0xff]  ;;  %v16420_v59 = vld [vmem:[%s21623_s1 + $0x820] sm:$0xff]  }
 0x70d   : > { %v7348_v52 = vsel %vm22293_vm1, %v7336_v0, %v7347_v39  ;;  %vm22296_vm5 = vnez %v22295_v29  ;;  %vm22298_vm13 = vnez %v22297_v19  ;;  %v7358_v63 = vshrl.u32 %v19963_v35, 16  ;;  %7565 = vst.msk [vmem:[#allocation2 + $0xc8] sm:$0xff] %vm22294_vm0, %v19963_v35  ;;  %vm22299_vm1 = vmmov %vm22294_vm0  ;;  %7924 = vmatmul.mubr.bf16.gmra.mrb[84].mxu1 %v7596_v61  ;;  %v22300_v32 = vld [vmem:[#allocation19_spill] sm:$0xff]  ;;  %8398 = vmatmul.mubr.bf16.gmra.mrb[120].mxu0 %v7596_v61 }
 0x70e   : > { %v7514_v58 = vsel %vm22296_vm5, %v7340_v4, 0  ;;  %v7515_v30 = vsel %vm22298_vm13, %v7348_v52, 0  ;;  %7564 = vst.msk [vmem:[#allocation2 + $0xb0] sm:$0xff] %vm22299_vm1, %v7292_v46  ;;  %vm22301_vm9 = vnez %v22300_v32  ;;  %vm22302_vm12 = vmmov %vm22294_vm0  ;;  %v7361_v60 = vshll.u32 %v19963_v35, 16  ;;  %7931 = vmatprep.mubr.bf16.mxu1 %v7600_v34  ;;  %8405 = vmatprep.mubr.bf16.mxu0 %v7600_v34 }
 0x70f   : > { %v7530_v10 = vsel %vm22301_vm9, %v7461_v33, 0  ;;  %7546 = vst.msk [vmem:[#allocation2 + $0x78] sm:$0xff] %vm22302_vm12, %v7514_v58  ;;  %vm22303_vm3 = vmmov %vm22294_vm0  ;;  %v7350_v3 = vshrl.u32 %v7292_v46, 16  ;;  %v7353_v6 = vshll.u32 %v7292_v46, 16  ;;  %v19991_v0 = vrot.slane %v7358_v63, 7  ;;  %15059 = vmatpush3.bf16.msra.mxu1 %v16418_v45  ;;  %v15044_v40 = vpop.f32.mrb[36].mxu0 }
 0x710   : > { %7547 = vst.msk [vmem:[#allocation2 + $0x90] sm:$0xff] %vm22303_vm3, %v7515_v30  ;;  %vm22304_vm13 = vmmov %vm22294_vm0  ;;  %v7240_v28 = vadd.f32 %v15600_v24, %v19858_v50  ;;  %v7238_v22 = vadd.f32 %v15603_v54, %v19858_v50  ;;  %v15606_v36 = vadd.f32 %v19817_v21, %v15041_v9  ;;  %v7462_v47 = vor.u32 %v7460_v7, %v7342_v18  ;;  %v7135_v46 = vpop.f32.mrb[37].mxu0  ;;  %v22307_v9 = vld [vmem:[#allocation20_spill] sm:$0xff]  ;;  %v22311_v33 = vld [vmem:[#allocation6_spill] sm:$0xff] }
 0x711   : > { %7578 = vst.msk [vmem:[#allocation2 + $0x88] sm:$0xff] %vm22304_vm13, %v7530_v10  ;;  %v7352_v2 = vrot.slane %v7350_v3, 7  ;;  %v7463_v25 = vrot.slane %v7353_v6, 1  ;;  %v15609_v39 = vadd.f32 %v19811_v13, %v7122_v57  ;;  %15060 = vmatprep.subr.bf16.mxu1 %v16419_v44  ;;  %v7363_v12 = vor.u32 %v7361_v60, %v19991_v0  ;;  %v15045_v54 = vpop.f32.mrb[38].mxu0  ;;  %v20016_v10 = vld [vmem:[#allocation2 + $0x48] sm:$0xff] }
 0x712   : > { %v7466_v41 = vrot.slane %v7361_v60, 1  ;;  %v7272_v16 = vmax.f32 %v7240_v28, 0.0  ;;  %v7241_v21 = vadd.f32 %v15606_v36, %v19858_v50  ;;  %vm22305_vm12 = vsmask.f32 7424  ;;  %v7138_v34 = vpop.f32.mrb[39].mxu0  ;;  %v22314_v60 = vld [vmem:[#allocation5_spill] sm:$0xff] }
 0x713   : > { %v7355_v45 = vor.u32 %v7353_v6, %v7352_v2  ;;  %v7464_v37 = vsel %vm22305_vm12, %v7462_v47, %v7463_v25  ;;  %v7465_v18 = vor.u32 %v7463_v25, %v7350_v3  ;;  %v7270_v7 = vmax.f32 %v7238_v22, 0.0  ;;  %15061 = vmatpush3.bf16.msra.mxu1 %v16419_v44  ;;  %vm22310_vm3 = vmmov %vm22305_vm12  ;;  %v22316_v44 = vld [vmem:[#allocation21_spill] sm:$0xff]  ;;  %v20036_v25 = vld [vmem:[#allocation2 + $0x68] sm:$0xff] }
 0x714   : > { %vm22306_vm13 = vsmask.f32 256  ;;  %vm22308_vm0 = vnez %v22307_v9  ;;  %v7273_v52 = vmax.f32 %v7241_v21, 0.0  ;;  %v7239_v24 = vadd.f32 %v15609_v39, %v19858_v50  ;;  %15062 = vmatprep.subr.bf16.mxu1 %v16420_v59 }
 0x715   : > { %v7364_v13 = vsel %vm22306_vm13, %v7352_v2, %v7363_v12  ;;  %v7531_v4 = vsel %vm22308_vm0, %v7464_v37, 0  ;;  %vm22309_vm1 = vmmov %vm22306_vm13  ;;  %v7467_v61 = vsel %vm22310_vm3, %v7465_v18, %v7466_v41  ;;  %vm22312_vm12 = vnez %v22311_v33  ;;  %7932 = vmatmul.mubr.bf16.gmra.mrb[88].mxu1 %v20016_v10  ;;  %8406 = vmatmul.mubr.bf16.gmra.mrb[124].mxu0 %v20016_v10  ;;  %v16437_v33 = vld [vmem:[%s21623_s1 + $0x850] sm:$0xff]  }
 0x716   : > { %v7356_v57 = vsel %vm22309_vm1, %v19954_v5, %v7355_v45  ;;  %v7517_v58 = vsel %vm22312_vm12, %v7364_v13, 0  ;;  %vm22313_vm9 = vcmask 523264   ;;  %v15612_v30 = vadd.f32 %v19826_v42, %v15044_v40  ;;  %v16421_v42 = vld [vmem:[%s21623_s1 + $0x828] sm:$0xff]   ;;  %7939 = vmatprep.mubr.bf16.mxu1 %v20036_v25  ;;  %8413 = vmatprep.mubr.bf16.mxu0 %v20036_v25 }
 0x717   : > { %7579 = vst.msk [vmem:[#allocation2 + $0xa0] sm:$0xff] %vm22313_vm9, %v7531_v4  ;;  %vm22315_vm13 = vnez %v22314_v60  ;;  %vm22317_vm0 = vnez %v22316_v44  ;;  %vm22318_vm1 = vmmov %vm22313_vm9  ;;  %v20023_v5 = vpack.c.bf16 %v7273_v52, %v7272_v16  ;;  %v7271_v28 = vmax.f32 %v7239_v24, 0.0  ;;  %15063 = vmatpush3.bf16.msra.mxu1 %v16420_v59  ;;  %v16435_v44 = vld [vmem:[%s21623_s1 + $0x848] sm:$0xff]   ;;  %v16436_v60 = vld [vmem:[%s21623_s1 + $0x890] sm:$0xff]  }
 0x718   : > { %v7516_v3 = vsel %vm22315_vm13, %v7356_v57, 0  ;;  %v7532_v6 = vsel %vm22317_vm0, %v7467_v61, 0  ;;  %7549 = vst.msk [vmem:[#allocation2 + $0xc0] sm:$0xff] %vm22318_vm1, %v7517_v58  ;;  %vm22319_vm9 = vmmov %vm22318_vm1  ;;  %v7244_v22 = vadd.f32 %v15612_v30, %v19858_v50  ;;  %v15615_v36 = vadd.f32 %v19820_v53, %v7135_v46  ;;  %15064 = vmatprep.subr.bf16.mxu1 %v16421_v42  ;;  %v16422_v57 = vld [vmem:[%s21623_s1 + $0x830] sm:$0xff]  }
 0x719   : > { %7548 = vst.msk [vmem:[#allocation2 + $0xa8] sm:$0xff] %vm22319_vm9, %v7516_v3  ;;  %vm22320_vm3 = vmmov %vm22318_vm1  ;;  %v15618_v47 = vadd.f32 %v19829_v38, %v15045_v54  ;;  %v15621_v2 = vadd.f32 %v19823_v43, %v7138_v34  ;;  %v7374_v39 = vshrl.u32 %v20023_v5, 16  ;;  %v7377_v12 = vshll.u32 %v20023_v5, 16  ;;  %v20063_v3 = vld [vmem:[#allocation2 + $0x60] sm:$0xff] }
 0x71a   : > { %7580 = vst.msk [vmem:[#allocation2 + $0xb8] sm:$0xff] %vm22320_vm3, %v7532_v6  ;;  %v7294_v16 = vpack.c.bf16 %v7271_v28, %v7270_v7  ;;  %v7468_v53 = vor.u32 %v7466_v41, %v7358_v63  ;;  %v7242_v43 = vadd.f32 %v15615_v36, %v19858_v50  ;;  %vm22321_vm9 = vmmov %vm22318_vm1  ;;  %v7276_v18 = vmax.f32 %v7244_v22, 0.0  ;;  %v15048_v7 = vpop.f32.mrb[40].mxu0  ;;  %v20068_v36 = vld [vmem:[#allocation2 + $0x80] sm:$0xff] }
 0x71b   : > { %7567 = vst.msk [vmem:[#allocation2 + $0xf8] sm:$0xff] %vm22318_vm1, %v20023_v5  ;;  %v7245_v38 = vadd.f32 %v15618_v47, %v19858_v50  ;;  %v7243_v21 = vadd.f32 %v15621_v2, %v19858_v50  ;;  %v20049_v40 = vrot.slane %v7374_v39, 7  ;;  %v15624_v63 = vadd.f32 %v19838_v26, %v15048_v7  ;;  %v7151_v41 = vpop.f32.mrb[41].mxu0  ;;  %15065 = vmatpush3.bf16.msra.mxu1 %v16421_v42  ;;  %v16423_v47 = vld [vmem:[%s21623_s1 + $0x838] sm:$0xff]  }
 0x71c   : > { %v7366_v45 = vshrl.u32 %v7294_v16, 16  ;;  %v7369_v37 = vshll.u32 %v7294_v16, 16  ;;  %7566 = vst.msk [vmem:[#allocation2 + $0xe0] sm:$0xff] %vm22321_vm9, %v7294_v16  ;;  %v7274_v46 = vmax.f32 %v7242_v43, 0.0  ;;  %v7472_v52 = vrot.slane %v7377_v12, 1  ;;  %v15049_v54 = vpop.f32.mrb[42].mxu0  ;;  %15066 = vmatprep.subr.bf16.mxu1 %v16422_v57 }
 0x71d   : > { %v7277_v13 = vmax.f32 %v7245_v38, 0.0  ;;  %v7275_v35 = vmax.f32 %v7243_v21, 0.0  ;;  %v7379_v4 = vor.u32 %v7377_v12, %v20049_v40  ;;  %v20060_v30 = vadd.f32 %v15624_v63, %v19858_v50  ;;  %v7154_v26 = vpop.f32.mrb[43].mxu0  ;;  %7940 = vmatmul.mubr.bf16.gmra.mrb[92].mxu1 %v20063_v3  ;;  %v22324_v2 = vld [vmem:[#allocation8_spill] sm:$0xff]  ;;  %v22326_v12 = vld [vmem:[#allocation22_spill] sm:$0xff]  ;;  %8414 = vmatmul.mubr.bf16.gmra.mrb[128].mxu0 %v20063_v3 }
 0x71e   : > { %v7368_v24 = vrot.slane %v7366_v45, 7  ;;  %v7469_v59 = vrot.slane %v7369_v37, 1  ;;  %v15627_v34 = vadd.f32 %v19832_v62, %v7151_v41  ;;  %vm22322_vm3 = vsmask.f32 256  ;;  %7947 = vmatprep.mubr.bf16.mxu1 %v20068_v36  ;;  %8421 = vmatprep.mubr.bf16.mxu0 %v20068_v36 }
 0x71f   : > { %v20057_v61 = vpack.c.bf16 %v7277_v13, %v7276_v18  ;;  %v7296_v58 = vpack.c.bf16 %v7275_v35, %v7274_v46  ;;  %vm22323_vm1 = vsmask.f32 7424  ;;  %vm22325_vm9 = vnez %v22324_v2  ;;  %v22334_v18 = vld [vmem:[#allocation7_spill] sm:$0xff]  ;;  %15067 = vmatpush3.bf16.msra.mxu1 %v16422_v57  ;;  %v16434_v2 = vld [vmem:[%s21623_s1 + $0x888] sm:$0xff]  }
 0x720   : > { %v7371_v6 = vor.u32 %v7369_v37, %v7368_v24  ;;  %v7380_v5 = vsel %vm22322_vm3, %v7368_v24, %v7379_v4  ;;  %v7470_v28 = vsel %vm22323_vm1, %v7468_v53, %v7469_v59  ;;  %v7471_v22 = vor.u32 %v7469_v59, %v7366_v45  ;;  %v22336_v46 = vld [vmem:[#allocation23_spill] sm:$0xff]  ;;  %v15052_v4 = vpop.f32.mrb[44].mxu0  ;;  %15068 = vmatprep.subr.bf16.mxu1 %v16423_v47 }
 0x721   : > { %v7519_v62 = vsel %vm22325_vm9, %v7380_v5, 0  ;;  %vm22327_vm0 = vnez %v22326_v12  ;;  %v7390_v16 = vshrl.u32 %v20057_v61, 16  ;;  %v7393_v43 = vshll.u32 %v20057_v61, 16  ;;  %v16433_v12 = vld [vmem:[%s21623_s1 + $0x840] sm:$0xff]  }
 0x722   : > { %v7533_v42 = vsel %vm22327_vm0, %v7470_v28, 0  ;;  %vm22328_vm3 = vcmask 523264   ;;  %vm22330_vm13 = vsmask.f32 256  ;;  %vm22331_vm9 = vsmask.f32 7424 }
 0x723   : > { %7569 = vst.msk [vmem:[#allocation2 + $0x128] sm:$0xff] %vm22328_vm3, %v20057_v61  ;;  %vm22329_vm1 = vmmov %vm22328_vm3  ;;  %v7372_v53 = vsel %vm22330_vm13, %v19991_v0, %v7371_v6  ;;  %v7473_v38 = vsel %vm22331_vm9, %v7471_v22, %v7472_v52  ;;  %v7382_v21 = vshrl.u32 %v7296_v58, 16  ;;  %v7385_v45 = vshll.u32 %v7296_v58, 16  ;;  %v7167_v6 = vpop.f32.mrb[45].mxu0  ;;  %15069 = vmatpush3.bf16.msra.mxu1 %v16423_v47 }
 0x724   : > { %7568 = vst.msk [vmem:[#allocation2 + $0x110] sm:$0xff] %vm22329_vm1, %v7296_v58  ;;  %vm22332_vm12 = vmmov %vm22329_vm1  ;;  %v7474_v37 = vor.u32 %v7472_v52, %v7374_v39  ;;  %vm22335_vm3 = vnez %v22334_v18  ;;  %v20096_v0 = vrot.slane %v7390_v16, 7  ;;  %v7478_v35 = vrot.slane %v7393_v43, 1  ;;  %v20104_v52 = vld [vmem:[%s21623_s1 + $0x740] sm:$0xff]  }
 0x725   : > { %7551 = vst.msk [vmem:[#allocation2 + $0xf0] sm:$0xff] %vm22332_vm12, %v7519_v62  ;;  %vm22333_vm0 = vmmov %vm22329_vm1  ;;  %v7518_v7 = vsel %vm22335_vm3, %v7372_v53, 0  ;;  %vm22337_vm1 = vnez %v22336_v46  ;;  %v7384_v63 = vrot.slane %v7382_v21, 7  ;;  %v7475_v41 = vrot.slane %v7385_v45, 1  ;;  %v15053_v62 = vpop.f32.mrb[46].mxu0  ;;  %v22341_v53 = vld [vmem:[#allocation25_spill] sm:$0xff]  ;;  %15102 = vmatprep.subr.bf16.mxu1 %v20104_v52 }
 0x726   : > { %7581 = vst.msk [vmem:[#allocation2 + $0xd0] sm:$0xff] %vm22333_vm0, %v7533_v42  ;;  %v7534_v13 = vsel %vm22337_vm1, %v7473_v38, 0  ;;  %vm22338_vm12 = vmmov %vm22333_vm0  ;;  %v7246_v39 = vadd.f32 %v15627_v34, %v19858_v50  ;;  %v7395_v24 = vor.u32 %v7393_v43, %v20096_v0  ;;  %v7280_v59 = vmax.f32 %v20060_v30, 0.0  ;;  %v20346_v18 = vld [vmem:[#allocation2] sm:$0xff] }
 0x727   : > { %7550 = vst.msk [vmem:[#allocation2 + $0xd8] sm:$0xff] %vm22338_vm12, %v7518_v7  ;;  %v15630_v57 = vadd.f32 %v19841_v20, %v15049_v54  ;;  %v15633_v58 = vadd.f32 %v19835_v49, %v7154_v26  ;;  %v7387_v5 = vor.u32 %v7385_v45, %v7384_v63  ;;  %vm22339_vm13 = vmmov %vm22331_vm9  ;;  %v7477_v34 = vor.u32 %v7475_v41, %v7382_v21  ;;  %v7170_v7 = vpop.f32.mrb[47].mxu0  ;;  %v20116_v20 = vld [vmem:[#allocation2 + $0x78] sm:$0xff]  ;;  %v22344_v26 = vld [vmem:[#allocation10_spill] sm:$0xff] }
 0x728   : > { %7582 = vst.msk [vmem:[#allocation2 + $0xe8] sm:$0xff] %vm22333_vm0, %v7534_v13  ;;  %v7476_v28 = vsel %vm22339_vm13, %v7474_v37, %v7475_v41  ;;  %v7278_v22 = vmax.f32 %v7246_v39, 0.0  ;;  %vm22340_vm9 = vsmask.f32 256  ;;  %vm22342_vm12 = vnez %v22341_v53  ;;  %7948 = vmatmul.mubr.bf16.gmra.mrb[96].mxu1 %v20116_v20  ;;  %v20126_v37 = vld [vmem:[#allocation2 + $0x98] sm:$0xff]  ;;  %v22347_v13 = vld [vmem:[#allocation9_spill] sm:$0xff]  ;;  %8422 = vmatmul.mubr.bf16.gmra.mrb[132].mxu0 %v20116_v20 }
 0x729   : > { %v7396_v42 = vsel %vm22340_vm9, %v7384_v63, %v7395_v24  ;;  %v7535_v38 = vsel %vm22342_vm12, %v7476_v28, 0  ;;  %v7249_v43 = vadd.f32 %v15630_v57, %v19858_v50  ;;  %v7247_v30 = vadd.f32 %v15633_v58, %v19858_v50  ;;  %vm22343_vm0 = vmmov %vm22340_vm9  ;;  %v22349_v63 = vld [vmem:[#allocation27_spill] sm:$0xff]  ;;  %7955 = vmatprep.mubr.bf16.mxu1 %v20126_v37  ;;  %8429 = vmatprep.mubr.bf16.mxu0 %v20126_v37 }
 0x72a   : > { %v7388_v49 = vsel %vm22343_vm0, %v20049_v40, %v7387_v5  ;;  %v7479_v54 = vsel %vm22339_vm13, %v7477_v34, %v7478_v35  ;;  %vm22345_vm1 = vnez %v22344_v26  ;;  %vm22346_vm9 = vcmask 523264  }
 0x72b   : > { %v7521_v21 = vsel %vm22345_vm1, %v7396_v42, 0  ;;  %7583 = vst.msk [vmem:[#allocation2 + $0x100] sm:$0xff] %vm22346_vm9, %v7535_v38  ;;  %v15636_v45 = vadd.f32 %v19850_v27, %v15052_v4  ;;  %vm22348_vm12 = vnez %v22347_v13  ;;  %vm22350_vm0 = vnez %v22349_v63  ;;  %vm22351_vm13 = vmmov %vm22346_vm9 }
 0x72c   : > { %v7520_v47 = vsel %vm22348_vm12, %v7388_v49, 0  ;;  %v7536_v40 = vsel %vm22350_vm0, %v7479_v54, 0  ;;  %7553 = vst.msk [vmem:[#allocation2 + $0x120] sm:$0xff] %vm22351_vm13, %v7521_v21  ;;  %v7281_v41 = vmax.f32 %v7249_v43, 0.0  ;;  %v7279_v39 = vmax.f32 %v7247_v30, 0.0  ;;  %vm22352_vm1 = vmmov %vm22346_vm9 }
 0x72d   : > { %7552 = vst.msk [vmem:[#allocation2 + $0x108] sm:$0xff] %vm22346_vm9, %v7520_v47  ;;  %v7252_v27 = vadd.f32 %v15636_v45, %v19858_v50  ;;  %v15639_v4 = vadd.f32 %v19844_v1, %v7167_v6  ;;  %v15642_v24 = vadd.f32 %v19853_v55, %v15053_v62  ;;  %v15645_v57 = vadd.f32 %v19847_v17, %v7170_v7  ;;  %vm22353_vm13 = vmmov %vm22352_vm1  ;;  %v20150_v7 = vld [vmem:[#allocation2 + $0x90] sm:$0xff] }
 0x72e   : > { %7584 = vst.msk [vmem:[#allocation2 + $0x118] sm:$0xff] %vm22352_vm1, %v7536_v40  ;;  %v7299_v58 = vpack.c.bf16 %v7281_v41, %v7280_v59  ;;  %v7298_v5 = vpack.c.bf16 %v7279_v39, %v7278_v22  ;;  %v7480_v28 = vor.u32 %v7478_v35, %v7390_v16  ;;  %vm22354_vm9 = vsmask.f32 7424  ;;  %v20155_v40 = vld [vmem:[#allocation2 + $0xb0] sm:$0xff]  ;;  %v22355_v39 = vld [vmem:[#allocation28_spill] sm:$0xff]  ;;  %vm22357_vm0 = vmmov %vm22353_vm13 }
 0x72f   : > { %v7250_v34 = vadd.f32 %v15639_v4, %v19858_v50  ;;  %v7253_v42 = vadd.f32 %v15642_v24, %v19858_v50  ;;  %v7251_v38 = vadd.f32 %v15645_v57, %v19858_v50  ;;  %v7284_v17 = vmax.f32 %v7252_v27, 0.0  ;;  %vm22360_vm3 = vmmov %vm22357_vm0  ;;  %v20316_v63 = vld [vmem:[#allocation2 + $0xd0] sm:$0xff]  ;;  %v20319_v13 = vld [vmem:[#allocation2 + $0xe8] sm:$0xff] }
 0x730   : > { %v7406_v43 = vshrl.u32 %v7299_v58, 16  ;;  %v7409_v30 = vshll.u32 %v7299_v58, 16  ;;  %7571 = vst.msk [vmem:[#allocation2 + $0x158] sm:$0xff] %vm22352_vm1, %v7299_v58  ;;  %v7398_v1 = vshrl.u32 %v7298_v5, 16  ;;  %v7401_v55 = vshll.u32 %v7298_v5, 16  ;;  %7956 = vmatmul.mubr.bf16.gmra.mrb[100].mxu1 %v20150_v7  ;;  %8430 = vmatmul.mubr.bf16.gmra.mrb[136].mxu0 %v20150_v7 }
 0x731   : > { %7570 = vst.msk [vmem:[#allocation2 + $0x140] sm:$0xff] %vm22353_vm13, %v7298_v5  ;;  %v7282_v59 = vmax.f32 %v7250_v34, 0.0  ;;  %v7285_v6 = vmax.f32 %v7253_v42, 0.0  ;;  %v7283_v22 = vmax.f32 %v7251_v38, 0.0  ;;  %vm22356_vm1 = vnez %v22355_v39  ;;  %7963 = vmatprep.mubr.bf16.mxu1 %v20155_v40  ;;  %8437 = vmatprep.mubr.bf16.mxu0 %v20155_v40  ;;  %v20304_v42 = vld [vmem:[#allocation2 + $0xa0] sm:$0xff]  ;;  %v20307_v39 = vld [vmem:[#allocation2 + $0xb8] sm:$0xff] }
 0x732   : > { %v7408_v61 = vrot.slane %v7406_v43, 7  ;;  %v7484_v16 = vrot.slane %v7409_v30, 1  ;;  %v7400_v35 = vrot.slane %v7398_v1, 7  ;;  %v7481_v62 = vrot.slane %v7401_v55, 1 }
 0x733   : > { %v7301_v49 = vpack.c.bf16 %v7285_v6, %v7284_v17  ;;  %v7300_v50 = vpack.c.bf16 %v7283_v22, %v7282_v59 }
 0x734   : > { %v7411_v54 = vor.u32 %v7409_v30, %v7408_v61  ;;  %v7486_v21 = vor.u32 %v7484_v16, %v7406_v43  ;;  %v7403_v45 = vor.u32 %v7401_v55, %v7400_v35  ;;  %v7482_v47 = vsel %vm22354_vm9, %v7480_v28, %v7481_v62  ;;  %v20292_v55 = vld [vmem:[#allocation2 + $0x70] sm:$0xff]  ;;  %v20295_v43 = vld [vmem:[#allocation2 + $0x88] sm:$0xff] }
 0x735   : > { %v7483_v41 = vor.u32 %v7481_v62, %v7398_v1  ;;  %v7537_v27 = vsel %vm22356_vm1, %v7482_v47, 0  ;;  %v7422_v4 = vshrl.u32 %v7301_v49, 16  ;;  %v7425_v24 = vshll.u32 %v7301_v49, 16  ;;  %7573 = vst.msk [vmem:[#allocation2 + $0x188] sm:$0xff] %vm22353_vm13, %v7301_v49  ;;  %vm22365_vm13 = vmmov %vm22357_vm0  ;;  %v20328_v26 = vld [vmem:[#allocation2 + $0x118] sm:$0xff] }
 0x736   : > { %7572 = vst.msk [vmem:[#allocation2 + $0x170] sm:$0xff] %vm22357_vm0, %v7300_v50  ;;  %vm22358_vm9 = vsmask.f32 256  ;;  %v7414_v5 = vshrl.u32 %v7300_v50, 16  ;;  %v7417_v28 = vshll.u32 %v7300_v50, 16  ;;  %v20178_v50 = vld [vmem:[#allocation2 + $0xa8] sm:$0xff] }
 0x737   : > { %v7404_v57 = vsel %vm22358_vm9, %v20096_v0, %v7403_v45  ;;  %vm22359_vm12 = vmmov %vm22358_vm9  ;;  %7585 = vst.msk [vmem:[#allocation2 + $0x130] sm:$0xff] %vm22360_vm3, %v7537_v27  ;;  %vm22361_vm1 = vsmask.f32 7424  ;;  %v7424_v1 = vrot.slane %v7422_v4, 7  ;;  %v7490_v0 = vrot.slane %v7425_v24, 1  ;;  %v16426_v27 = vld [vmem:[%s21623_s1 + $0x750] sm:$0xff]  }
 0x738   : > { %v7412_v58 = vsel %vm22359_vm12, %v7400_v35, %v7411_v54  ;;  %v7485_v34 = vsel %vm22361_vm1, %v7483_v41, %v7484_v16  ;;  %v7522_v38 = vsel %vm22096_vm7, %v7404_v57, 0  ;;  %v7416_v59 = vrot.slane %v7414_v5, 7  ;;  %vm22366_vm3 = vmmov %vm22357_vm0  ;;  %7964 = vmatmul.mubr.bf16.gmra.mrb[104].mxu1 %v20178_v50  ;;  %v20184_v41 = vld [vmem:[#allocation2 + $0xc8] sm:$0xff]  ;;  %8438 = vmatmul.mubr.bf16.gmra.mrb[140].mxu0 %v20178_v50  ;;  %v16427_v45 = vld [vmem:[%s21623_s1 + $0x758] sm:$0xff]  }
 0x739   : > { %v7523_v30 = vsel %vm22211_vm15, %v7412_v58, 0  ;;  %v7538_v17 = vsel %vm22213_vm10, %v7485_v34, 0  ;;  %7554 = vst.msk [vmem:[#allocation2 + $0x138] sm:$0xff] %vm22357_vm0, %v7522_v38  ;;  %v7487_v6 = vrot.slane %v7417_v28, 1  ;;  %v7427_v22 = vor.u32 %v7425_v24, %v7424_v1  ;;  %vm22367_vm12 = vmmov %vm22361_vm1  ;;  %7971 = vmatprep.mubr.bf16.mxu1 %v20184_v41  ;;  %8445 = vmatprep.mubr.bf16.mxu0 %v20184_v41  ;;  %v20206_v1 = vld [vmem:[#allocation2 + $0xc0] sm:$0xff]  ;;  %v16425_v34 = vld [vmem:[%s21623_s1 + $0x748] sm:$0xff]  }
 0x73a   : > { %7555 = vst.msk [vmem:[#allocation2 + $0x150] sm:$0xff] %vm22365_vm13, %v7523_v30  ;;  %v7492_v16 = vor.u32 %v7490_v0, %v7422_v4  ;;  %v7419_v35 = vor.u32 %v7417_v28, %v7416_v59  ;;  %vm22368_vm1 = vmmov %vm22358_vm9  ;;  %v7595_v30 = vld [vmem:[#allocation2 + $0x28] sm:$0xff] }
 0x73b   : > { %7586 = vst.msk [vmem:[#allocation2 + $0x148] sm:$0xff] %vm22366_vm3, %v7538_v17  ;;  %v7488_v62 = vsel %vm22367_vm12, %v7486_v21, %v7487_v6  ;;  %v7489_v49 = vor.u32 %v7487_v6, %v7414_v5  ;;  %v7428_v54 = vsel %vm22368_vm1, %v7416_v59, %v7427_v22  ;;  %vm22371_vm9 = vmmov %vm22368_vm1  ;;  %v20209_v17 = vld [vmem:[#allocation2 + $0xe0] sm:$0xff]  ;;  %v20217_v59 = vld [vmem:[#allocation2 + $0xf8] sm:$0xff] }
 0x73c   : > { %v7539_v47 = vsel %vm22105_vm6, %v7488_v62, 0  ;;  %v7509_v57 = vsel %vm22221_vm8, %v7492_v16, 0  ;;  %v7420_v4 = vsel %vm22371_vm9, %v7408_v61, %v7419_v35  ;;  %vm22372_vm0 = vmmov %vm22367_vm12  ;;  %v7525_v58 = vsel %vm22110_vm2, %v7428_v54, 0  ;;  %v20222_v6 = vld [vmem:[#allocation2 + $0xf0] sm:$0xff]  ;;  %v20230_v16 = vld [vmem:[#allocation2 + $0x108] sm:$0xff]  ;;  %v13958_v62 = vpop.f32.mrb[112].mxu0 }
 0x73d   : > { %v7491_v24 = vsel %vm22372_vm0, %v7489_v49, %v7490_v0  ;;  %vm22374_vm13 = vmmov %vm22366_vm3  ;;  %v7541_v28 = vsel %vm17515_vm14, %v7509_v57, 0  ;;  %v7524_v38 = vsel %vm22114_vm11, %v7420_v4, 0  ;;  %7557 = vst.msk [vmem:[#allocation2 + $0x180] sm:$0xff] %vm22366_vm3, %v7525_v58  ;;  %v20214_v0 = vld [vmem:[#allocation2 + $0xd8] sm:$0xff]  ;;  %v20225_v22 = vld [vmem:[#allocation2 + $0x110] sm:$0xff]  ;;  %v13959_v49 = vpop.f32.mrb[113].mxu0 }
 0x73e   : > { %7587 = vst.msk [vmem:[#allocation2 + $0x160] sm:$0xff] %vm22374_vm13, %v7539_v47  ;;  %v7540_v61 = vsel %vm17497_vm4, %v7491_v24, 0  ;;  %vm22378_vm12 = vmmov %vm22366_vm3  ;;  %v20233_v35 = vld [vmem:[#allocation2 + $0x128] sm:$0xff]  ;;  %v20238_v54 = vadd.f32 %v13959_v49, %v13958_v62  ;;  %v13961_v47 = vpop.f32.mrb[114].mxu0  ;;  %v20242_v24 = vld [vmem:[#allocation2 + $0x120] sm:$0xff] }
 0x73f   : > { %7589 = vst.msk [vmem:[#allocation2 + $0x190] sm:$0xff] %vm22378_vm12, %v7541_v28  ;;  %vm22379_vm1 = vmmov %vm22366_vm3  ;;  %v13962_v57 = vpop.f32.mrb[115].mxu0  ;;  %v20245_v58 = vld [vmem:[#allocation2 + $0x140] sm:$0xff]  ;;  %v20261_v62 = vld [vmem:[#allocation2 + $0x170] sm:$0xff]  ;;  %vm22407_vm3 = vsmask.f32 256 }
 0x740   : > { %7556 = vst.msk [vmem:[#allocation2 + $0x168] sm:$0xff] %vm22379_vm1, %v7524_v38  ;;  %vm22380_vm9 = vmmov %vm22379_vm1  ;;  %7972 = vmatmul.mubr.bf16.gmra.mrb[108].mxu1 %v20206_v1  ;;  %8446 = vmatmul.mubr.bf16.gmra.mrb[144].mxu0 %v20206_v1  ;;  %v20240_v4 = vadd.f32 %v13962_v57, %v13961_v47  ;;  %v20250_v28 = vld [vmem:[#allocation2 + $0x138] sm:$0xff]  ;;  %v20269_v47 = vld [vmem:[#allocation2 + $0x188] sm:$0xff] }
 0x741   : > { %7588 = vst.msk [vmem:[#allocation2 + $0x178] sm:$0xff] %vm22380_vm9, %v7540_v61  ;;  %7979 = vmatprep.mubr.bf16.mxu1 %v20209_v17  ;;  %8453 = vmatprep.mubr.bf16.mxu0 %v20209_v17  ;;  %v20253_v38 = vld [vmem:[#allocation2 + $0x158] sm:$0xff]  ;;  %v20258_v61 = vld [vmem:[#allocation2 + $0x150] sm:$0xff]  ;;  %v20279_v5 = vld [vmem:[#allocation2 + $0x40] sm:$0xff] }
 0x742   : > { %v20282_v21 = vld [vmem:[#allocation2 + $0x58] sm:$0xff]  ;;  %v20331_v53 = vld [vmem:[#allocation2 + $0x130] sm:$0xff]  ;;  %vm22405_vm0 = vmmov %vm22379_vm1  ;;  %vm22410_vm1 = vsmask.f32 7424 }
 0x743   : > { %vm22406_vm13 = vmmov %vm22405_vm0 }
 0x744   : > { %v20273_v57 = vld [vmem:[#allocation2 + $0x180] sm:$0xff] }
 0x745   : > { %v20337_v46 = vld [vmem:[#allocation2 + $0x160] sm:$0xff] }
 0x746   : > { %22381 = vst [vmem:[#allocation37_spill] sm:$0xff] %v20337_v46 }
 0x747   : > { %v20266_v49 = vld [vmem:[#allocation2 + $0x168] sm:$0xff] }
 0x748   : > { %7980 = vmatmul.mubr.bf16.gmra.mrb[112].mxu1 %v20214_v0  ;;  %8454 = vmatmul.mubr.bf16.gmra.mrb[148].mxu0 %v20214_v0 }
 0x749   : > { %7987 = vmatprep.mubr.bf16.mxu1 %v20217_v59  ;;  %8461 = vmatprep.mubr.bf16.mxu0 %v20217_v59 }
 0x750   : > { %7988 = vmatmul.mubr.bf16.gmra.mrb[116].mxu1 %v20222_v6  ;;  %8462 = vmatmul.mubr.bf16.gmra.mrb[152].mxu0 %v20222_v6 }
 0x751   : > { %7995 = vmatprep.mubr.bf16.mxu1 %v20225_v22  ;;  %8469 = vmatprep.mubr.bf16.mxu0 %v20225_v22 }
 0x758   : > { %7996 = vmatmul.mubr.bf16.gmra.mrb[120].mxu1 %v20230_v16  ;;  %8470 = vmatmul.mubr.bf16.gmra.mrb[156].mxu0 %v20230_v16 }
 0x759   : > { %8003 = vmatprep.mubr.bf16.mxu1 %v20233_v35  ;;  %8477 = vmatprep.mubr.bf16.mxu0 %v20233_v35 }
 0x760   : > { %8004 = vmatmul.mubr.bf16.gmra.mrb[124].mxu1 %v20242_v24  ;;  %8478 = vmatmul.mubr.bf16.gmra.mrb[160].mxu0 %v20242_v24 }
 0x761   : > { %8011 = vmatprep.mubr.bf16.mxu1 %v20245_v58  ;;  %8485 = vmatprep.mubr.bf16.mxu0 %v20245_v58 }
 0x768   : > { %8012 = vmatmul.mubr.bf16.gmra.mrb[128].mxu1 %v20250_v28  ;;  %8486 = vmatmul.mubr.bf16.gmra.mrb[164].mxu0 %v20250_v28 }
 0x769   : > { %8019 = vmatprep.mubr.bf16.mxu1 %v20253_v38  ;;  %8493 = vmatprep.mubr.bf16.mxu0 %v20253_v38 }
 0x770   : > { %8020 = vmatmul.mubr.bf16.gmra.mrb[132].mxu1 %v20258_v61  ;;  %8494 = vmatmul.mubr.bf16.gmra.mrb[168].mxu0 %v20258_v61 }
 0x771   : > { %8027 = vmatprep.mubr.bf16.mxu1 %v20261_v62  ;;  %8501 = vmatprep.mubr.bf16.mxu0 %v20261_v62 }
 0x778   : > { %8028 = vmatmul.mubr.bf16.gmra.mrb[136].mxu1 %v20266_v49  ;;  %8502 = vmatmul.mubr.bf16.gmra.mrb[172].mxu0 %v20266_v49 }
 0x779   : > { %8035 = vmatprep.mubr.bf16.mxu1 %v20269_v47 }
 0x780   : > { %8036 = vmatmul.mubr.bf16.gmra.mrb[140].mxu1 %v20273_v57 }
 0x781   : > { %15070 = vmatprep.mubr.bf16.mxu1 %v7595_v30 }
 0x788   : > { %15071 = vmatmul.mubr.bf16.vlgmr.msra.gmra.mrb[48].mxu1 %v20279_v5 }
 0x789   : > { %15074 = vmatprep.mubr.bf16.mxu1 %v20282_v21  ;;  %15103 = vmatpush3.bf16.msra.mxu1 %v20104_v52  ;;  %v16428_v52 = vld [vmem:[%s21623_s1 + $0x760] sm:$0xff]  }
 0x78a   : > { %15104 = vmatprep.subr.bf16.mxu1 %v16425_v34 }
 0x78d   : > { %15105 = vmatpush3.bf16.msra.mxu1 %v16425_v34  ;;  %v16429_v34 = vld [vmem:[%s21623_s1 + $0x768] sm:$0xff]  }
 0x78e   : > { %15106 = vmatprep.subr.bf16.mxu1 %v16426_v27 }
 0x790   : > { %15075 = vmatmul.mubr.bf16.gmra.mrb[52].mxu1 %v20292_v55 }
 0x791   : > { %15078 = vmatprep.mubr.bf16.mxu1 %v20295_v43  ;;  %15107 = vmatpush3.bf16.msra.mxu1 %v16426_v27  ;;  %v16430_v27 = vld [vmem:[%s21623_s1 + $0x770] sm:$0xff]  }
 0x792   : > { %15108 = vmatprep.subr.bf16.mxu1 %v16427_v45 }
 0x795   : > { %15109 = vmatpush3.bf16.msra.mxu1 %v16427_v45  ;;  %v16431_v45 = vld [vmem:[%s21623_s1 + $0x778] sm:$0xff]  }
 0x796   : > { %15110 = vmatprep.subr.bf16.mxu1 %v16428_v52 }
 0x798   : > { %15079 = vmatmul.mubr.bf16.gmra.mrb[56].mxu1 %v20304_v42 }
 0x799   : > { %15082 = vmatprep.mubr.bf16.mxu1 %v20307_v39  ;;  %15111 = vmatpush3.bf16.msra.mxu1 %v16428_v52  ;;  %v16432_v52 = vld [vmem:[%s21623_s1 + $0x880] sm:$0xff]  }
 0x79a   : > { %15112 = vmatprep.subr.bf16.mxu1 %v16429_v34 }
 0x79d   : > { %15113 = vmatpush3.bf16.msra.mxu1 %v16429_v34  ;;  %v20325_v34 = vld [vmem:[#allocation2 + $0x100] sm:$0xff] }
 0x79e   : > { %15114 = vmatprep.subr.bf16.mxu1 %v16430_v27 }
 0x7a0   : > { %15083 = vmatmul.mubr.bf16.gmra.mrb[60].mxu1 %v20316_v63 }
 0x7a1   : > { %15086 = vmatprep.mubr.bf16.mxu1 %v20319_v13  ;;  %15115 = vmatpush3.bf16.msra.mxu1 %v16430_v27  ;;  %v20334_v27 = vld [vmem:[#allocation2 + $0x148] sm:$0xff] }
 0x7a2   : > { %15116 = vmatprep.subr.bf16.mxu1 %v16431_v45 }
 0x7a5   : > { %15117 = vmatpush3.bf16.msra.mxu1 %v16431_v45  ;;  %v20340_v45 = vld [vmem:[#allocation2 + $0x178] sm:$0xff] }
 0x7a6   : > { %14078 = vmatprep.subr.bf16.mxu1 %v16432_v52  ;;  %v20343_v52 = vld [vmem:[#allocation2 + $0x190] sm:$0xff] }
 0x7a7   : > { %22382 = vst [vmem:[#allocation38_spill] sm:$0xff] %v20343_v52 }
 0x7a8   : > { %15087 = vmatmul.mubr.bf16.gmra.mrb[64].mxu1 %v20325_v34 }
 0x7a9   : > { %15090 = vmatprep.mubr.bf16.mxu1 %v20328_v26 }
 0x7b0   : > { %15091 = vmatmul.mubr.bf16.gmra.mrb[68].mxu1 %v20331_v53 }
 0x7b1   : > { %15094 = vmatprep.mubr.bf16.mxu1 %v20334_v27 }
 0x7b8   : > { %15095 = vmatmul.mubr.bf16.gmra.mrb[72].mxu1 %v20337_v46 }
 0x7b9   : > { %15098 = vmatprep.mubr.bf16.mxu1 %v20340_v45 }
 0x7c0   : > { %15099 = vmatmul.mubr.bf16.gmra.mrb[76].mxu1 %v20343_v52 }
 0x7c1   : > { %15118 = vmatprep.mubr.bf16.mxu1 %v20346_v18 }
 0x7c8   : > { %15119 = vmatmul.mubr.bf16.vlgmr.msra.gmra.mrb[48].mxu1 %v7595_v30  ;;  %v16438_v30 = vld [vmem:[%s21623_s1 + $0x898] sm:$0xff]  }
 0x7c9   : > { %15122 = vmatprep.mubr.bf16.mxu1 %v20279_v5  ;;  %14079 = vmatpush3.bf16.msra.mxu1 %v16433_v12  ;;  %v16442_v12 = vld [vmem:[%s21623_s1 + $0x8a8] sm:$0xff]  }
 0x7ca   : > { %14080 = vmatprep.subr.bf16.mxu1 %v16434_v2  ;;  %v16439_v2 = vld [vmem:[%s21623_s1 + $0x858] sm:$0xff]  }
 0x7cd   : > { %14081 = vmatpush3.bf16.msra.mxu1 %v16435_v44  ;;  %v16440_v44 = vld [vmem:[%s21623_s1 + $0x8a0] sm:$0xff]  }
 0x7ce   : > { %14082 = vmatprep.subr.bf16.mxu1 %v16436_v60  ;;  %v16441_v60 = vld [vmem:[%s21623_s1 + $0x860] sm:$0xff]  }
 0x7d0   : > { %15123 = vmatmul.mubr.bf16.gmra.mrb[52].mxu1 %v20282_v21 }
 0x7d1   : > { %15126 = vmatprep.mubr.bf16.mxu1 %v20292_v55  ;;  %14083 = vmatpush3.bf16.msra.mxu1 %v16437_v33  ;;  %v16443_v33 = vld [vmem:[%s21623_s1 + $0x868] sm:$0xff]  }
 0x7d2   : > { %14084 = vmatprep.subr.bf16.mxu1 %v16438_v30  ;;  %v16444_v30 = vld [vmem:[%s21623_s1 + $0x8b0] sm:$0xff]  }
 0x7d5   : > { %14085 = vmatpush3.bf16.msra.mxu1 %v16439_v2 }
 0x7d6   : > { %14086 = vmatprep.subr.bf16.mxu1 %v16440_v44 }
 0x7d7   : > { %v13822_v2 = vpop.f32.mrb[80].mxu1 }
 0x7d8   : > { %15127 = vmatmul.mubr.bf16.gmra.mrb[56].mxu1 %v20295_v43  ;;  %v13964_v44 = vpop.f32.mrb[116].mxu0  ;;  %v13823_v9 = vpop.f32.mrb[81].mxu1 }
 0x7d9   : > { %15130 = vmatprep.mubr.bf16.mxu1 %v20304_v42  ;;  %14087 = vmatpush3.bf16.msra.mxu1 %v16441_v60  ;;  %v13824_v32 = vadd.f32 %v13823_v9, %v13822_v2  ;;  %v13965_v19 = vpop.f32.mrb[117].mxu0  ;;  %v13825_v29 = vpop.f32.mrb[82].mxu1  ;;  %v16445_v60 = vld [vmem:[%s21623_s1 + $0x870] sm:$0xff]  }
 0x7da   : > { %14088 = vmatprep.subr.bf16.mxu1 %v16442_v12  ;;  %v13966_v48 = vadd.f32 %v13965_v19, %v13964_v44  ;;  %v13967_v51 = vpop.f32.mrb[118].mxu0  ;;  %v13826_v31 = vpop.f32.mrb[83].mxu1  ;;  %v16446_v12 = vld [vmem:[%s21623_s1 + $0x8b8] sm:$0xff]  }
 0x7db   : > { %v20397_v15 = vadd.f32 %v20238_v54, %v13824_v32  ;;  %v13827_v11 = vadd.f32 %v13826_v31, %v13825_v29  ;;  %v13968_v9 = vpop.f32.mrb[119].mxu0  ;;  %v16447_v19 = vld [vmem:[%s21623_s1 + $0x878] sm:$0xff]   ;;  %v20410_v32 = vld [vmem:[%s21623_s1 + $0x8c0] sm:$0xff]  }
 0x7dc   : > { %v13969_v2 = vadd.f32 %v13968_v9, %v13967_v51 }
 0x7dd   : > { %14089 = vmatpush3.bf16.msra.mxu1 %v16443_v33  ;;  %22383 = vst [vmem:[#allocation39_spill] sm:$0xff] %v20397_v15  ;;  %v20401_v33 = vadd.f32 %v20240_v4, %v13827_v11 }
 0x7de   : > { %14090 = vmatprep.subr.bf16.mxu1 %v16444_v30 }
 0x7df   : > { %22384 = vst [vmem:[#allocation40_spill] sm:$0xff] %v20401_v33 }
 0x7e0   : > { %15131 = vmatmul.mubr.bf16.gmra.mrb[60].mxu1 %v20307_v39  ;;  %v13828_v31 = vpop.f32.mrb[84].mxu1  ;;  %v13970_v51 = vpop.f32.mrb[120].mxu0 }
 0x7e1   : > { %15134 = vmatprep.mubr.bf16.mxu1 %v20316_v63  ;;  %14091 = vmatpush3.bf16.msra.mxu1 %v16445_v60  ;;  %v13829_v29 = vpop.f32.mrb[85].mxu1  ;;  %v13971_v30 = vpop.f32.mrb[121].mxu0 }
 0x7e2   : > { %14092 = vmatprep.subr.bf16.mxu1 %v16446_v12  ;;  %v13830_v54 = vadd.f32 %v13829_v29, %v13828_v31  ;;  %v13831_v11 = vpop.f32.mrb[86].mxu1  ;;  %v13972_v4 = vadd.f32 %v13971_v30, %v13970_v51  ;;  %v13973_v44 = vpop.f32.mrb[122].mxu0 }
 0x7e3   : > { %v13832_v60 = vpop.f32.mrb[87].mxu1  ;;  %v13974_v56 = vpop.f32.mrb[123].mxu0 }
 0x7e4   : > { %v20413_v9 = vadd.f32 %v13966_v48, %v13830_v54  ;;  %v13833_v12 = vadd.f32 %v13832_v60, %v13831_v11  ;;  %v13975_v14 = vadd.f32 %v13974_v56, %v13973_v44 }
 0x7e5   : > { %14093 = vmatpush3.bf16.msra.mxu1 %v16447_v19 }
 0x7e6   : > { %15150 = vmatprep.subr.bf16.mxu1 %v20410_v32  ;;  %22385 = vst [vmem:[#allocation41_spill] sm:$0xff] %v20413_v9  ;;  %v20416_v8 = vadd.f32 %v13969_v2, %v13833_v12 }
 0x7e8   : > { %15135 = vmatmul.mubr.bf16.gmra.mrb[64].mxu1 %v20319_v13  ;;  %22386 = vst [vmem:[#allocation42_spill] sm:$0xff] %v20416_v8  ;;  %v13834_v31 = vpop.f32.mrb[88].mxu1  ;;  %v13976_v29 = vpop.f32.mrb[124].mxu0 }
 0x7e9   : > { %15138 = vmatprep.mubr.bf16.mxu1 %v20325_v34  ;;  %v13835_v23 = vpop.f32.mrb[89].mxu1  ;;  %v13977_v51 = vpop.f32.mrb[125].mxu0 }
 0x7ea   : > { %v13836_v19 = vadd.f32 %v13835_v23, %v13834_v31  ;;  %v13837_v30 = vpop.f32.mrb[90].mxu1  ;;  %v13978_v33 = vadd.f32 %v13977_v51, %v13976_v29  ;;  %v13979_v15 = vpop.f32.mrb[126].mxu0 }
 0x7eb   : > { %v13838_v52 = vpop.f32.mrb[91].mxu1  ;;  %v13980_v11 = vpop.f32.mrb[127].mxu0 }
 0x7ec   : > { %v20419_v48 = vadd.f32 %v13972_v4, %v13836_v19  ;;  %v13839_v54 = vadd.f32 %v13838_v52, %v13837_v30  ;;  %v13981_v56 = vadd.f32 %v13980_v11, %v13979_v15 }
 0x7ee   : > { %22387 = vst [vmem:[#allocation43_spill] sm:$0xff] %v20419_v48  ;;  %v20422_v2 = vadd.f32 %v13975_v14, %v13839_v54 }
 0x7f0   : > { %15139 = vmatmul.mubr.bf16.gmra.mrb[68].mxu1 %v20328_v26  ;;  %22388 = vst [vmem:[#allocation44_spill] sm:$0xff] %v20422_v2  ;;  %v13840_v44 = vpop.f32.mrb[92].mxu1  ;;  %v13982_v60 = vpop.f32.mrb[128].mxu0 }
 0x7f1   : > { %15142 = vmatprep.mubr.bf16.mxu1 %v20331_v53  ;;  %v13841_v12 = vpop.f32.mrb[93].mxu1  ;;  %v13983_v31 = vpop.f32.mrb[129].mxu0 }
 0x7f2   : > { %v13842_v23 = vadd.f32 %v13841_v12, %v13840_v44  ;;  %v13843_v8 = vpop.f32.mrb[94].mxu1  ;;  %v13984_v29 = vadd.f32 %v13983_v31, %v13982_v60  ;;  %v13985_v51 = vpop.f32.mrb[130].mxu0 }
 0x7f3   : > { %v13844_v9 = vpop.f32.mrb[95].mxu1  ;;  %v13986_v19 = vpop.f32.mrb[131].mxu0 }
 0x7f4   : > { %v20425_v4 = vadd.f32 %v13978_v33, %v13842_v23  ;;  %v13845_v52 = vadd.f32 %v13844_v9, %v13843_v8  ;;  %v13987_v15 = vadd.f32 %v13986_v19, %v13985_v51 }
 0x7f6   : > { %22389 = vst [vmem:[#allocation45_spill] sm:$0xff] %v20425_v4  ;;  %v20428_v14 = vadd.f32 %v13981_v56, %v13845_v52  ;;  %v8672_v56 = vld [vmem:[#allocation2 + $0x38] sm:$0xff] }
 0x7f8   : > { %15143 = vmatmul.mubr.bf16.gmra.mrb[72].mxu1 %v20334_v27  ;;  %22390 = vst [vmem:[#allocation46_spill] sm:$0xff] %v20428_v14 }
 0x7f9   : > { %15146 = vmatprep.mubr.bf16.mxu1 %v20337_v46 }
 0x7fb   : > { %v13846_v30 = vpop.f32.mrb[96].mxu1  ;;  %v13988_v54 = vpop.f32.mrb[132].mxu0 }
 0x7fc   : > { %v13847_v11 = vpop.f32.mrb[97].mxu1  ;;  %v13989_v12 = vpop.f32.mrb[133].mxu0 }
 0x7fd   : > { %v13848_v44 = vadd.f32 %v13847_v11, %v13846_v30  ;;  %v13849_v2 = vpop.f32.mrb[98].mxu1  ;;  %v13990_v60 = vadd.f32 %v13989_v12, %v13988_v54  ;;  %v13991_v31 = vpop.f32.mrb[134].mxu0 }
 0x7fe   : > { %v13850_v48 = vpop.f32.mrb[99].mxu1  ;;  %v13992_v9 = vpop.f32.mrb[135].mxu0 }
 0x7ff   : > { %v20431_v33 = vadd.f32 %v13984_v29, %v13848_v44  ;;  %v13851_v8 = vadd.f32 %v13850_v48, %v13849_v2  ;;  %v13993_v23 = vadd.f32 %v13992_v9, %v13991_v31  ;;  %v16449_v48 = vld [vmem:[%s21623_s1 + $0x8c8] sm:$0xff]  }
 0x800   : > { %15147 = vmatmul.mubr.bf16.gmra.mrb[76].mxu1 %v20340_v45 }
 0x801   : > { %v20434_v51 = vadd.f32 %v13987_v15, %v13851_v8  ;;  %8944 = vmatprep.mubr.bf16.mxu1 %v8672_v56  ;;  %v8671_v15 = vld [vmem:[#allocation2 + $0x30] sm:$0xff] }
 0x802   : > { %v8675_v8 = vld [vmem:[#allocation2 + $0x50] sm:$0xff] }
 0x803   : > { %v13852_v52 = vpop.f32.mrb[100].mxu1  ;;  %v13994_v19 = vpop.f32.mrb[136].mxu0 }
 0x804   : > { %v13853_v14 = vpop.f32.mrb[101].mxu1  ;;  %v13995_v11 = vpop.f32.mrb[137].mxu0 }
 0x805   : > { %v13854_v30 = vadd.f32 %v13853_v14, %v13852_v52  ;;  %v13855_v4 = vpop.f32.mrb[102].mxu1  ;;  %v13996_v54 = vadd.f32 %v13995_v11, %v13994_v19  ;;  %v13997_v12 = vpop.f32.mrb[138].mxu0  ;;  %v16450_v14 = vld [vmem:[%s21623_s1 + $0x8d0] sm:$0xff]  }
 0x806   : > { %v13856_v46 = vpop.f32.mrb[103].mxu1  ;;  %v13998_v44 = vpop.f32.mrb[139].mxu0 }
 0x807   : > { %v20439_v2 = vadd.f32 %v13990_v60, %v13854_v30  ;;  %v13857_v29 = vadd.f32 %v13856_v46, %v13855_v4  ;;  %v13999_v31 = vadd.f32 %v13998_v44, %v13997_v12 }
 0x808   : > { %8945 = vmatmul.mubr.bf16.vlgmr.msra.gmra.mrb[176].mxu1 %v8671_v15 }
 0x809   : > { %v20441_v9 = vadd.f32 %v13993_v23, %v13857_v29  ;;  %8952 = vmatprep.mubr.bf16.mxu1 %v8675_v8  ;;  %15151 = vmatpush3.bf16.msra.mxu1 %v20410_v32  ;;  %v16451_v32 = vld [vmem:[%s21623_s1 + $0x8d8] sm:$0xff]  }
 0x80a   : > { %15152 = vmatprep.subr.bf16.mxu1 %v16449_v48 }
 0x80b   : > { %v13858_v56 = vpop.f32.mrb[104].mxu1  ;;  %v14000_v52 = vpop.f32.mrb[140].mxu0 }
 0x80c   : > { %v13859_v60 = vpop.f32.mrb[105].mxu1  ;;  %v14001_v46 = vpop.f32.mrb[141].mxu0 }
 0x80d   : > { %v13860_v19 = vadd.f32 %v13859_v60, %v13858_v56  ;;  %v13861_v4 = vpop.f32.mrb[106].mxu1  ;;  %15153 = vmatpush3.bf16.msra.mxu1 %v16449_v48  ;;  %v14002_v30 = vadd.f32 %v14001_v46, %v14000_v52  ;;  %v14003_v11 = vpop.f32.mrb[142].mxu0  ;;  %v16452_v48 = vld [vmem:[%s21623_s1 + $0x8e0] sm:$0xff]  }
 0x80e   : > { %v13862_v12 = vpop.f32.mrb[107].mxu1  ;;  %15154 = vmatprep.subr.bf16.mxu1 %v16450_v14  ;;  %v14004_v44 = vpop.f32.mrb[143].mxu0 }
 0x80f   : > { %v20450_v23 = vadd.f32 %v13996_v54, %v13860_v19  ;;  %v13863_v29 = vadd.f32 %v13862_v12, %v13861_v4  ;;  %v14005_v15 = vadd.f32 %v14004_v44, %v14003_v11 }
 0x810   : > { %8953 = vmatmul.mubr.bf16.gmra.mrb[180].mxu1 %v20016_v10 }
 0x811   : > { %v20453_v8 = vadd.f32 %v13999_v31, %v13863_v29  ;;  %8960 = vmatprep.mubr.bf16.mxu1 %v20036_v25  ;;  %15155 = vmatpush3.bf16.msra.mxu1 %v16450_v14  ;;  %v16453_v25 = vld [vmem:[%s21623_s1 + $0x8e8] sm:$0xff]  }
 0x812   : > { %15156 = vmatprep.subr.bf16.mxu1 %v16451_v32 }
 0x813   : > { %v13864_v56 = vpop.f32.mrb[108].mxu1  ;;  %v14006_v52 = vpop.f32.mrb[144].mxu0 }
 0x814   : > { %v13865_v60 = vpop.f32.mrb[109].mxu1  ;;  %v14007_v19 = vpop.f32.mrb[145].mxu0 }
 0x815   : > { %v13866_v54 = vadd.f32 %v13865_v60, %v13864_v56  ;;  %v13867_v46 = vpop.f32.mrb[110].mxu1  ;;  %15157 = vmatpush3.bf16.msra.mxu1 %v16451_v32  ;;  %v14008_v4 = vadd.f32 %v14007_v19, %v14006_v52  ;;  %v14009_v11 = vpop.f32.mrb[146].mxu0  ;;  %v16454_v32 = vld [vmem:[%s21623_s1 + $0x8f0] sm:$0xff]  }
 0x816   : > { %v13868_v10 = vpop.f32.mrb[111].mxu1  ;;  %15158 = vmatprep.subr.bf16.mxu1 %v16452_v48  ;;  %v14010_v12 = vpop.f32.mrb[147].mxu0 }
 0x817   : > { %v20462_v31 = vadd.f32 %v14002_v30, %v13866_v54  ;;  %v13869_v14 = vadd.f32 %v13868_v10, %v13867_v46  ;;  %v14011_v29 = vadd.f32 %v14010_v12, %v14009_v11 }
 0x818   : > { %8961 = vmatmul.mubr.bf16.gmra.mrb[184].mxu1 %v20063_v3 }
 0x819   : > { %v20465_v44 = vadd.f32 %v14005_v15, %v13869_v14  ;;  %8968 = vmatprep.mubr.bf16.mxu1 %v20068_v36  ;;  %15159 = vmatpush3.bf16.msra.mxu1 %v16452_v48  ;;  %v16455_v36 = vld [vmem:[%s21623_s1 + $0x8f8] sm:$0xff]  }
 0x81a   : > { %15160 = vmatprep.subr.bf16.mxu1 %v16453_v25 }
 0x81b   : > { %22391 = vst [vmem:[#allocation47_spill] sm:$0xff] %v20465_v44  ;;  %v13870_v56 = vpop.f32.mrb[112].mxu1  ;;  %v14012_v52 = vpop.f32.mrb[148].mxu0 }
 0x81c   : > { %v13871_v60 = vpop.f32.mrb[113].mxu1  ;;  %v14013_v54 = vpop.f32.mrb[149].mxu0 }
 0x81d   : > { %v13872_v30 = vadd.f32 %v13871_v60, %v13870_v56  ;;  %v13873_v19 = vpop.f32.mrb[114].mxu1  ;;  %15161 = vmatpush3.bf16.msra.mxu1 %v16453_v25  ;;  %v14014_v46 = vadd.f32 %v14013_v54, %v14012_v52  ;;  %v14015_v11 = vpop.f32.mrb[150].mxu0 }
 0x81e   : > { %v13874_v3 = vpop.f32.mrb[115].mxu1  ;;  %15162 = vmatprep.subr.bf16.mxu1 %v16454_v32  ;;  %v14016_v10 = vpop.f32.mrb[151].mxu0 }
 0x81f   : > { %v20474_v15 = vadd.f32 %v14008_v4, %v13872_v30  ;;  %v13875_v48 = vadd.f32 %v13874_v3, %v13873_v19  ;;  %v14017_v14 = vadd.f32 %v14016_v10, %v14015_v11 }
 0x820   : > { %8969 = vmatmul.mubr.bf16.gmra.mrb[188].mxu1 %v20116_v20 }
 0x821   : > { %v20477_v12 = vadd.f32 %v14011_v29, %v13875_v48  ;;  %8976 = vmatprep.mubr.bf16.mxu1 %v20126_v37  ;;  %15163 = vmatpush3.bf16.msra.mxu1 %v16454_v32 }
 0x822   : > { %15164 = vmatprep.subr.bf16.mxu1 %v16455_v36 }
 0x823   : > { %22392 = vst [vmem:[#allocation48_spill] sm:$0xff] %v20477_v12  ;;  %v13876_v25 = vpop.f32.mrb[116].mxu1  ;;  %v14018_v56 = vpop.f32.mrb[152].mxu0 }
 0x824   : > { %v13877_v52 = vpop.f32.mrb[117].mxu1  ;;  %v14019_v54 = vpop.f32.mrb[153].mxu0 }
 0x825   : > { %v13878_v60 = vadd.f32 %v13877_v52, %v13876_v25  ;;  %v13879_v44 = vpop.f32.mrb[118].mxu1  ;;  %15165 = vmatpush3.bf16.msra.mxu1 %v16455_v36  ;;  %v14020_v4 = vadd.f32 %v14019_v54, %v14018_v56  ;;  %v14021_v30 = vpop.f32.mrb[154].mxu0 }
 0x826   : > { %v13880_v19 = vpop.f32.mrb[119].mxu1  ;;  %v14022_v20 = vpop.f32.mrb[155].mxu0 }
 0x827   : > { %v20480_v3 = vadd.f32 %v14014_v46, %v13878_v60  ;;  %v13881_v11 = vadd.f32 %v13880_v19, %v13879_v44  ;;  %v14023_v29 = vadd.f32 %v14022_v20, %v14021_v30 }
 0x828   : > { %8977 = vmatmul.mubr.bf16.gmra.mrb[192].mxu1 %v20150_v7 }
 0x829   : > { %v20483_v37 = vadd.f32 %v14017_v14, %v13881_v11  ;;  %8984 = vmatprep.mubr.bf16.mxu1 %v20155_v40 }
 0x82b   : > { %v13882_v32 = vpop.f32.mrb[120].mxu1  ;;  %v14024_v48 = vpop.f32.mrb[156].mxu0 }
 0x82c   : > { %v13883_v10 = vpop.f32.mrb[121].mxu1  ;;  %v14025_v52 = vpop.f32.mrb[157].mxu0 }
 0x82d   : > { %v13884_v25 = vadd.f32 %v13883_v10, %v13882_v32  ;;  %v13885_v36 = vpop.f32.mrb[122].mxu1  ;;  %v14026_v56 = vadd.f32 %v14025_v52, %v14024_v48  ;;  %v14027_v54 = vpop.f32.mrb[158].mxu0 }
 0x82e   : > { %v13886_v12 = vpop.f32.mrb[123].mxu1  ;;  %v14028_v60 = vpop.f32.mrb[159].mxu0 }
 0x82f   : > { %v20486_v46 = vadd.f32 %v14020_v4, %v13884_v25  ;;  %v13887_v44 = vadd.f32 %v13886_v12, %v13885_v36  ;;  %v14029_v30 = vadd.f32 %v14028_v60, %v14027_v54 }
 0x830   : > { %8985 = vmatmul.mubr.bf16.gmra.mrb[196].mxu1 %v20178_v50 }
 0x831   : > { %v20489_v7 = vadd.f32 %v14023_v29, %v13887_v44  ;;  %8992 = vmatprep.mubr.bf16.mxu1 %v20184_v41 }
 0x833   : > { %v13888_v40 = vpop.f32.mrb[124].mxu1  ;;  %v14030_v14 = vpop.f32.mrb[160].mxu0 }
 0x834   : > { %v13889_v19 = vpop.f32.mrb[125].mxu1  ;;  %v14031_v20 = vpop.f32.mrb[161].mxu0 }
 0x835   : > { %v13890_v11 = vadd.f32 %v13889_v19, %v13888_v40  ;;  %v13891_v32 = vpop.f32.mrb[126].mxu1  ;;  %v14032_v48 = vadd.f32 %v14031_v20, %v14030_v14  ;;  %v14033_v10 = vpop.f32.mrb[162].mxu0 }
 0x836   : > { %v13892_v52 = vpop.f32.mrb[127].mxu1  ;;  %v14034_v25 = vpop.f32.mrb[163].mxu0 }
 0x837   : > { %v20492_v4 = vadd.f32 %v14026_v56, %v13890_v11  ;;  %v13893_v12 = vadd.f32 %v13892_v52, %v13891_v32  ;;  %v14035_v36 = vadd.f32 %v14034_v25, %v14033_v10 }
 0x838   : > { %8993 = vmatmul.mubr.bf16.gmra.mrb[200].mxu1 %v20206_v1 }
 0x839   : > { %v20495_v50 = vadd.f32 %v14029_v30, %v13893_v12  ;;  %9000 = vmatprep.mubr.bf16.mxu1 %v20209_v17 }
 0x83b   : > { %v13894_v41 = vpop.f32.mrb[128].mxu1  ;;  %v14036_v29 = vpop.f32.mrb[164].mxu0 }
 0x83c   : > { %v13895_v54 = vpop.f32.mrb[129].mxu1  ;;  %v14037_v60 = vpop.f32.mrb[165].mxu0 }
 0x83d   : > { %v13896_v44 = vadd.f32 %v13895_v54, %v13894_v41  ;;  %v13897_v40 = vpop.f32.mrb[130].mxu1  ;;  %v14038_v14 = vadd.f32 %v14037_v60, %v14036_v29  ;;  %v14039_v19 = vpop.f32.mrb[166].mxu0 }
 0x83e   : > { %v13898_v20 = vpop.f32.mrb[131].mxu1  ;;  %v14040_v32 = vpop.f32.mrb[167].mxu0 }
 0x83f   : > { %v20498_v56 = vadd.f32 %v14032_v48, %v13896_v44  ;;  %v13899_v11 = vadd.f32 %v13898_v20, %v13897_v40  ;;  %v14041_v10 = vadd.f32 %v14040_v32, %v14039_v19 }
 0x840   : > { %9001 = vmatmul.mubr.bf16.gmra.mrb[204].mxu1 %v20214_v0 }
 0x841   : > { %v20501_v1 = vadd.f32 %v14035_v36, %v13899_v11  ;;  %9008 = vmatprep.mubr.bf16.mxu1 %v20217_v59 }
 0x843   : > { %v13900_v17 = vpop.f32.mrb[132].mxu1  ;;  %v14042_v30 = vpop.f32.mrb[168].mxu0 }
 0x844   : > { %v13901_v52 = vpop.f32.mrb[133].mxu1  ;;  %v14043_v25 = vpop.f32.mrb[169].mxu0 }
 0x845   : > { %v13902_v12 = vadd.f32 %v13901_v52, %v13900_v17  ;;  %v13903_v41 = vpop.f32.mrb[134].mxu1  ;;  %v14044_v29 = vadd.f32 %v14043_v25, %v14042_v30  ;;  %v14045_v54 = vpop.f32.mrb[170].mxu0 }
 0x846   : > { %v13904_v60 = vpop.f32.mrb[135].mxu1  ;;  %v14046_v40 = vpop.f32.mrb[171].mxu0 }
 0x847   : > { %v20504_v48 = vadd.f32 %v14038_v14, %v13902_v12  ;;  %v13905_v44 = vadd.f32 %v13904_v60, %v13903_v41  ;;  %v14047_v19 = vadd.f32 %v14046_v40, %v14045_v54 }
 0x848   : > { %9009 = vmatmul.mubr.bf16.gmra.mrb[208].mxu1 %v20222_v6 }
 0x849   : > { %v20507_v0 = vadd.f32 %v14041_v10, %v13905_v44  ;;  %9016 = vmatprep.mubr.bf16.mxu1 %v20225_v22 }
 0x84b   : > { %v13906_v59 = vpop.f32.mrb[136].mxu1  ;;  %v14048_v36 = vpop.f32.mrb[172].mxu0 }
 0x84c   : > { %v13907_v20 = vpop.f32.mrb[137].mxu1  ;;  %v14049_v32 = vpop.f32.mrb[173].mxu0 }
 0x84d   : > { %v13908_v11 = vadd.f32 %v13907_v20, %v13906_v59  ;;  %v13909_v17 = vpop.f32.mrb[138].mxu1  ;;  %v14050_v30 = vadd.f32 %v14049_v32, %v14048_v36  ;;  %v14051_v52 = vpop.f32.mrb[174].mxu0 }
 0x84e   : > { %v13910_v25 = vpop.f32.mrb[139].mxu1  ;;  %v14052_v41 = vpop.f32.mrb[175].mxu0 }
 0x84f   : > { %v20510_v14 = vadd.f32 %v14044_v29, %v13908_v11  ;;  %v13911_v12 = vadd.f32 %v13910_v25, %v13909_v17  ;;  %v14053_v54 = vadd.f32 %v14052_v41, %v14051_v52  ;;  %v22395_v52 = vld [vmem:[#allocation39_spill] sm:$0xff] }
 0x850   : > { %9017 = vmatmul.mubr.bf16.gmra.mrb[212].mxu1 %v20230_v16  ;;  %v16456_v16 = vld [vmem:[%s21623_s1 + $0xa00] sm:$0xff]  }
 0x851   : > { %v20513_v6 = vadd.f32 %v14047_v19, %v13911_v12  ;;  %9024 = vmatprep.mubr.bf16.mxu1 %v20233_v35  ;;  %v16457_v35 = vld [vmem:[%s21623_s1 + $0x9c0] sm:$0xff]   ;;  %14214 = vmatprep.subr.bf16.mxu0 %v16456_v16  ;;  %v22396_v12 = vld [vmem:[#allocation40_spill] sm:$0xff]  ;;  %v16480_v16 = vld [vmem:[%s21623_s1 + $0x968] sm:$0xff]  }
 0x852   : > { %14215 = vmatpush3.bf16.msra.mxu0 %v16457_v35 }
 0x853   : > { %v13912_v22 = vpop.f32.mrb[140].mxu1 }
 0x854   : > { %v13913_v10 = vpop.f32.mrb[141].mxu1 }
 0x855   : > { %v13914_v60 = vadd.f32 %v13913_v10, %v13912_v22  ;;  %v13915_v44 = vpop.f32.mrb[142].mxu1  ;;  %v16479_v10 = vld [vmem:[%s21623_s1 + $0x920] sm:$0xff]  }
 0x856   : > { %v13916_v40 = vpop.f32.mrb[143].mxu1 }
 0x857   : > { %v20516_v59 = vadd.f32 %v14050_v30, %v13914_v60  ;;  %v13917_v36 = vadd.f32 %v13916_v40, %v13915_v44  ;;  %v16477_v30 = vld [vmem:[%s21623_s1 + $0x918] sm:$0xff]  }
 0x858   : > { %9025 = vmatmul.mubr.bf16.gmra.mrb[216].mxu1 %v20242_v24  ;;  %v16458_v24 = vld [vmem:[%s21623_s1 + $0xa08] sm:$0xff]  }
 0x859   : > { %v20519_v29 = vadd.f32 %v14053_v54, %v13917_v36  ;;  %9032 = vmatprep.mubr.bf16.mxu1 %v20245_v58  ;;  %v16459_v58 = vld [vmem:[%s21623_s1 + $0x9c8] sm:$0xff]   ;;  %14216 = vmatprep.subr.bf16.mxu0 %v16458_v24  ;;  %v16478_v54 = vld [vmem:[%s21623_s1 + $0x960] sm:$0xff]  }
 0x85a   : > { %14217 = vmatpush3.bf16.msra.mxu0 %v16459_v58  ;;  %v22397_v24 = vld [vmem:[#allocation41_spill] sm:$0xff] }
 0x860   : > { %9033 = vmatmul.mubr.bf16.gmra.mrb[220].mxu1 %v20250_v28  ;;  %v16461_v28 = vld [vmem:[%s21623_s1 + $0x9d0] sm:$0xff]  }
 0x861   : > { %9040 = vmatprep.mubr.bf16.mxu1 %v20253_v38  ;;  %v16469_v38 = vld [vmem:[%s21623_s1 + $0x900] sm:$0xff]  }
 0x868   : > { %9041 = vmatmul.mubr.bf16.gmra.mrb[224].mxu1 %v20258_v61  ;;  %v16470_v61 = vld [vmem:[%s21623_s1 + $0x948] sm:$0xff]  }
 0x869   : > { %9048 = vmatprep.mubr.bf16.mxu1 %v20261_v62  ;;  %v16471_v62 = vld [vmem:[%s21623_s1 + $0x908] sm:$0xff]  }
 0x870   : > { %9049 = vmatmul.mubr.bf16.gmra.mrb[228].mxu1 %v20266_v49  ;;  %v16472_v49 = vld [vmem:[%s21623_s1 + $0x950] sm:$0xff]  }
 0x871   : > { %9056 = vmatprep.mubr.bf16.mxu1 %v20269_v47  ;;  %v16473_v47 = vld [vmem:[%s21623_s1 + $0xa30] sm:$0xff]  }
 0x878   : > { %9057 = vmatmul.mubr.bf16.gmra.mrb[232].mxu1 %v20273_v57  ;;  %v16474_v57 = vld [vmem:[%s21623_s1 + $0x910] sm:$0xff]  }
 0x879   : > { %9064 = vmatprep.mubr.bf16.mxu1 %v20346_v18 }
 0x880   : > { %9065 = vmatmul.mubr.bf16.gmra.mrb[236].mxu1 %v20346_v18 }
 0x881   : > { %15166 = vmatprep.mubr.bf16.mxu1 %v20279_v5  ;;  %v16460_v5 = vld [vmem:[%s21623_s1 + $0xa10] sm:$0xff]  }
 0x882   : > { %14218 = vmatprep.subr.bf16.mxu0 %v16460_v5  ;;  %v16481_v5 = vld [vmem:[%s21623_s1 + $0x928] sm:$0xff]  }
 0x883   : > { %14219 = vmatpush3.bf16.msra.mxu0 %v16461_v28  ;;  %v22398_v28 = vld [vmem:[#allocation42_spill] sm:$0xff] }
 0x888   : > { %15167 = vmatmul.mubr.bf16.vlgmr.msra.gmra.mrb[48].mxu1 %v20282_v21  ;;  %v16468_v21 = vld [vmem:[%s21623_s1 + $0x940] sm:$0xff]  }
 0x889   : > { %15170 = vmatprep.mubr.bf16.mxu1 %v20292_v55  ;;  %v22394_v55 = vld [vmem:[#allocation38_spill] sm:$0xff]  ;;  %14350 = vmatprep.subr.bf16.mxu1 %v16468_v21  ;;  %v16486_v21 = vld [vmem:[%s21623_s1 + $0x978] sm:$0xff]  }
 0x88a   : > { %14351 = vmatpush3.bf16.msra.mxu1 %v16469_v38 }
 0x88b   : > { %14352 = vmatprep.subr.bf16.mxu1 %v16470_v61  ;;  %v22399_v61 = vld [vmem:[#allocation43_spill] sm:$0xff] }
 0x88e   : > { %14353 = vmatpush3.bf16.msra.mxu1 %v16471_v62 }
 0x88f   : > { %14354 = vmatprep.subr.bf16.mxu1 %v16472_v49  ;;  %v16487_v49 = vld [vmem:[%s21623_s1 + $0x938] sm:$0xff]  }
 0x890   : > { %15171 = vmatmul.mubr.bf16.gmra.mrb[52].mxu1 %v20295_v43  ;;  %v16463_v43 = vld [vmem:[%s21623_s1 + $0x9d8] sm:$0xff]  }
 0x891   : > { %15174 = vmatprep.mubr.bf16.mxu1 %v20304_v42  ;;  %v16462_v42 = vld [vmem:[%s21623_s1 + $0xa18] sm:$0xff]  }
 0x892   : > { %14220 = vmatprep.subr.bf16.mxu0 %v16462_v42  ;;  %14355 = vmatpush3.bf16.msra.mxu1 %v16474_v57 }
 0x893   : > { %14221 = vmatpush3.bf16.msra.mxu0 %v16463_v43  ;;  %v16482_v43 = vld [vmem:[%s21623_s1 + $0x970] sm:$0xff]  }
 0x898   : > { %15175 = vmatmul.mubr.bf16.gmra.mrb[56].mxu1 %v20307_v39  ;;  %v16465_v39 = vld [vmem:[%s21623_s1 + $0x9e0] sm:$0xff]  }
 0x899   : > { %15178 = vmatprep.mubr.bf16.mxu1 %v20316_v63  ;;  %v22393_v63 = vld [vmem:[#allocation37_spill] sm:$0xff] }
 0x8a0   : > { %15179 = vmatmul.mubr.bf16.gmra.mrb[60].mxu1 %v20319_v13  ;;  %v16464_v13 = vld [vmem:[%s21623_s1 + $0xa20] sm:$0xff]  }
 0x8a1   : > { %15182 = vmatprep.mubr.bf16.mxu1 %v20325_v34  ;;  %14222 = vmatprep.subr.bf16.mxu0 %v16464_v13  ;;  %v16475_v34 = vld [vmem:[%s21623_s1 + $0x9f0] sm:$0xff]  }
 0x8a2   : > { %14223 = vmatpush3.bf16.msra.mxu0 %v16465_v39  ;;  %v16484_v13 = vld [vmem:[%s21623_s1 + $0x930] sm:$0xff]  }
 0x8a8   : > { %15183 = vmatmul.mubr.bf16.gmra.mrb[64].mxu1 %v20328_v26  ;;  %v16467_v26 = vld [vmem:[%s21623_s1 + $0x9e8] sm:$0xff]  }
 0x8a9   : > { %15186 = vmatprep.mubr.bf16.mxu1 %v20331_v53  ;;  %v16466_v53 = vld [vmem:[%s21623_s1 + $0xa28] sm:$0xff]  }
 0x8aa   : > { %14224 = vmatprep.subr.bf16.mxu0 %v16466_v53 }
 0x8ab   : > { %14225 = vmatpush3.bf16.msra.mxu0 %v16467_v26 }
 0x8ac   : > { %14226 = vmatprep.subr.bf16.mxu0 %v16473_v47  ;;  %v22400_v47 = vld [vmem:[#allocation44_spill] sm:$0xff] }
 0x8af   : > { %14227 = vmatpush3.bf16.msra.mxu0 %v16475_v34 }
 0x8b0   : > { %15187 = vmatmul.mubr.bf16.gmra.mrb[68].mxu1 %v20334_v27  ;;  %v16476_v27 = vld [vmem:[%s21623_s1 + $0x958] sm:$0xff]  }
 0x8b1   : > { %15190 = vmatprep.mubr.bf16.mxu1 %v22393_v63  ;;  %14356 = vmatprep.subr.bf16.mxu1 %v16476_v27 }
 0x8b2   : > { %14357 = vmatpush3.bf16.msra.mxu1 %v16477_v30  ;;  %v16483_v30 = vld [vmem:[%s21623_s1 + $0xa38] sm:$0xff]  }
 0x8b3   : > { %14358 = vmatprep.subr.bf16.mxu1 %v16478_v54  ;;  %14228 = vmatprep.subr.bf16.mxu0 %v16483_v30 }
 0x8b6   : > { %14359 = vmatpush3.bf16.msra.mxu1 %v16479_v10 }
 0x8b7   : > { %14360 = vmatprep.subr.bf16.mxu1 %v16480_v16 }
 0x8b8   : > { %15191 = vmatmul.mubr.bf16.gmra.mrb[72].mxu1 %v20340_v45 }
 0x8b9   : > { %15194 = vmatprep.mubr.bf16.mxu1 %v22394_v55 }
 0x8ba   : > { %14361 = vmatpush3.bf16.msra.mxu1 %v16481_v5 }
 0x8bb   : > { %14362 = vmatprep.subr.bf16.mxu1 %v16482_v43 }
 0x8be   : > { %14363 = vmatpush3.bf16.msra.mxu1 %v16484_v13 }
 0x8bf   : > { %14364 = vmatprep.subr.bf16.mxu1 %v16486_v21 }
 0x8c0   : > { %15195 = vmatmul.mubr.bf16.gmra.mrb[76].mxu1 %v20346_v18 }
 0x8c1   : > { %10433 = vmatprep.mubr.bf16.mxu1 %v20346_v18 }
 0x8c2   : > { %14365 = vmatpush3.bf16.msra.mxu1 %v16487_v49 }
 0x8c8   : > { %10434 = vmatmul.mubr.bf16.vlgmr.msra.gmra.mrb[144].mxu1 %v20346_v18 }
 0x8db   : > { %v14094_v45 = vpop.f32.mrb[176].mxu1 }
 0x8dc   : > { %v14095_v19 = vpop.f32.mrb[177].mxu1 }
 0x8dd   : > { %v14096_v20 = vadd.f32 %v14095_v19, %v14094_v45  ;;  %v14097_v11 = vpop.f32.mrb[178].mxu1 }
 0x8de   : > { %v14098_v32 = vpop.f32.mrb[179].mxu1 }
 0x8df   : > { %v14099_v17 = vadd.f32 %v14098_v32, %v14097_v11  ;;  %v20615_v25 = vadd.f32 %v22395_v52, %v14096_v20  ;;  %v22401_v32 = vld [vmem:[#allocation45_spill] sm:$0xff]  ;;  %v16485_v52 = vld [vmem:[%s21623_s1 + $0x9f8] sm:$0xff]  }
 0x8e0   : > { %14229 = vmatpush3.bf16.msra.mxu0 %v16485_v52 }
 0x8e1   : > { %v20618_v41 = vadd.f32 %v22396_v12, %v14099_v17  ;;  %v22402_v12 = vld [vmem:[#allocation46_spill] sm:$0xff] }
 0x8e3   : > { %v14100_v22 = vpop.f32.mrb[180].mxu1 }
 0x8e4   : > { %v14101_v60 = vpop.f32.mrb[181].mxu1 }
 0x8e5   : > { %v14102_v44 = vadd.f32 %v14101_v60, %v14100_v22  ;;  %v14103_v40 = vpop.f32.mrb[182].mxu1 }
 0x8e6   : > { %v14104_v36 = vpop.f32.mrb[183].mxu1 }
 0x8e7   : > { %v14105_v35 = vadd.f32 %v14104_v36, %v14103_v40  ;;  %v20630_v58 = vadd.f32 %v22397_v24, %v14102_v44 }
 0x8e9   : > { %v20636_v42 = vadd.f32 %v22398_v28, %v14105_v35 }
 0x8eb   : > { %v14106_v63 = vpop.f32.mrb[184].mxu1 }
 0x8ec   : > { %v14107_v39 = vpop.f32.mrb[185].mxu1 }
 0x8ed   : > { %v14108_v55 = vadd.f32 %v14107_v39, %v14106_v63  ;;  %v14109_v53 = vpop.f32.mrb[186].mxu1  ;;  %v20681_v39 = vld [vmem:[%s21623_s1 + $0xa40] sm:$0xff]  }
 0x8ee   : > { %v14110_v26 = vpop.f32.mrb[187].mxu1  ;;  %15198 = vmatprep.subr.bf16.mxu0 %v20681_v39 }
 0x8ef   : > { %v14111_v38 = vadd.f32 %v14110_v26, %v14109_v53  ;;  %v20648_v62 = vadd.f32 %v22399_v61, %v14108_v55 }
 0x8f1   : > { %v20654_v57 = vadd.f32 %v22400_v47, %v14111_v38 }
 0x8f3   : > { %v14112_v34 = vpop.f32.mrb[188].mxu1 }
 0x8f4   : > { %v14113_v27 = vpop.f32.mrb[189].mxu1 }
 0x8f5   : > { %v14114_v45 = vadd.f32 %v14113_v27, %v14112_v34  ;;  %v14115_v19 = vpop.f32.mrb[190].mxu1 }
 0x8f6   : > { %v14116_v20 = vpop.f32.mrb[191].mxu1 }
 0x8f7   : > { %v14117_v11 = vadd.f32 %v14116_v20, %v14115_v19  ;;  %v20658_v17 = vadd.f32 %v22401_v32, %v14114_v45  ;;  %v22403_v20 = vld [vmem:[#allocation47_spill] sm:$0xff] }
 0x8f9   : > { %v20667_v54 = vadd.f32 %v22402_v12, %v14117_v11 }
 0x8fb   : > { %v14118_v18 = vpop.f32.mrb[192].mxu1 }
 0x8fc   : > { %v14119_v22 = vpop.f32.mrb[193].mxu1 }
 0x8fd   : > { %v14120_v10 = vadd.f32 %v14119_v22, %v14118_v18  ;;  %v14121_v60 = vpop.f32.mrb[194].mxu1  ;;  %v22404_v22 = vld [vmem:[#allocation48_spill] sm:$0xff] }
 0x8fe   : > { %v14122_v44 = vpop.f32.mrb[195].mxu1 }
 0x8ff   : > { %v14123_v40 = vadd.f32 %v14122_v44, %v14121_v60  ;;  %v20670_v36 = vadd.f32 %v20431_v33, %v14120_v10 }
 0x901   : > { %v20673_v16 = vadd.f32 %v20434_v51, %v14123_v40 }
 0x903   : > { %v14124_v35 = vpop.f32.mrb[196].mxu1 }
 0x904   : > { %v14125_v24 = vpop.f32.mrb[197].mxu1 }
 0x905   : > { %v14126_v5 = vadd.f32 %v14125_v24, %v14124_v35  ;;  %v14127_v28 = vpop.f32.mrb[198].mxu1 }
 0x906   : > { %v14128_v43 = vpop.f32.mrb[199].mxu1 }
 0x907   : > { %v14129_v63 = vadd.f32 %v14128_v43, %v14127_v28  ;;  %v20676_v13 = vadd.f32 %v20439_v2, %v14126_v5 }
 0x909   : > { %v20684_v33 = vadd.f32 %v20441_v9, %v14129_v63 }
 0x90b   : > { %v14130_v51 = vpop.f32.mrb[200].mxu1 }
 0x90c   : > { %v14131_v55 = vpop.f32.mrb[201].mxu1 }
 0x90d   : > { %v14132_v53 = vadd.f32 %v14131_v55, %v14130_v51  ;;  %v14133_v26 = vpop.f32.mrb[202].mxu1 }
 0x90e   : > { %v14134_v21 = vpop.f32.mrb[203].mxu1 }
 0x90f   : > { %v14135_v38 = vadd.f32 %v14134_v21, %v14133_v26  ;;  %v20688_v61 = vadd.f32 %v20450_v23, %v14132_v53 }
 0x911   : > { %v20691_v2 = vadd.f32 %v20453_v8, %v14135_v38 }
 0x913   : > { %v14136_v49 = vpop.f32.mrb[204].mxu1 }
 0x914   : > { %v14137_v47 = vpop.f32.mrb[205].mxu1 }
 0x915   : > { %v14138_v34 = vadd.f32 %v14137_v47, %v14136_v49  ;;  %v14139_v27 = vpop.f32.mrb[206].mxu1 }
 0x916   : > { %v14140_v9 = vpop.f32.mrb[207].mxu1 }
 0x917   : > { %v14141_v45 = vadd.f32 %v14140_v9, %v14139_v27  ;;  %v20694_v19 = vadd.f32 %v20462_v31, %v14138_v34 }
 0x919   : > { %v20697_v11 = vadd.f32 %v22403_v20, %v14141_v45 }
 0x91b   : > { %v14142_v32 = vpop.f32.mrb[208].mxu1 }
 0x91c   : > { %v14143_v30 = vpop.f32.mrb[209].mxu1 }
 0x91d   : > { %v14144_v52 = vadd.f32 %v14143_v30, %v14142_v32  ;;  %v14145_v23 = vpop.f32.mrb[210].mxu1 }
 0x91e   : > { %v14146_v12 = vpop.f32.mrb[211].mxu1 }
 0x91f   : > { %v14147_v18 = vadd.f32 %v14146_v12, %v14145_v23  ;;  %v20700_v8 = vadd.f32 %v20474_v15, %v14144_v52 }
 0x921   : > { %v20703_v10 = vadd.f32 %v22404_v22, %v14147_v18 }
 0x923   : > { %v14148_v60 = vpop.f32.mrb[212].mxu1 }
 0x924   : > { %v14149_v44 = vpop.f32.mrb[213].mxu1 }
 0x925   : > { %v14150_v40 = vadd.f32 %v14149_v44, %v14148_v60  ;;  %v14151_v31 = vpop.f32.mrb[214].mxu1 }
 0x926   : > { %v14152_v35 = vpop.f32.mrb[215].mxu1 }
 0x927   : > { %v14153_v24 = vadd.f32 %v14152_v35, %v14151_v31  ;;  %v20706_v5 = vadd.f32 %v20480_v3, %v14150_v40 }
 0x929   : > { %v20709_v28 = vadd.f32 %v20483_v37, %v14153_v24 }
 0x92b   : > { %v14154_v43 = vpop.f32.mrb[216].mxu1 }
 0x92c   : > { %v14155_v63 = vpop.f32.mrb[217].mxu1 }
 0x92d   : > { %v14156_v51 = vadd.f32 %v14155_v63, %v14154_v43  ;;  %v14157_v15 = vpop.f32.mrb[218].mxu1 }
 0x92e   : > { %v14158_v55 = vpop.f32.mrb[219].mxu1 }
 0x92f   : > { %v14159_v53 = vadd.f32 %v14158_v55, %v14157_v15  ;;  %v20712_v26 = vadd.f32 %v20486_v46, %v14156_v51 }
 0x931   : > { %v20715_v21 = vadd.f32 %v20489_v7, %v14159_v53 }
 0x933   : > { %v14160_v38 = vpop.f32.mrb[220].mxu1 }
 0x934   : > { %v14161_v49 = vpop.f32.mrb[221].mxu1 }
 0x935   : > { %v14162_v47 = vadd.f32 %v14161_v49, %v14160_v38  ;;  %v14163_v3 = vpop.f32.mrb[222].mxu1 }
 0x936   : > { %v14164_v34 = vpop.f32.mrb[223].mxu1 }
 0x937   : > { %v14165_v27 = vadd.f32 %v14164_v34, %v14163_v3  ;;  %v20718_v37 = vadd.f32 %v20492_v4, %v14162_v47 }
 0x939   : > { %v20721_v9 = vadd.f32 %v20495_v50, %v14165_v27 }
 0x93b   : > { %v14166_v45 = vpop.f32.mrb[224].mxu1 }
 0x93c   : > { %v14167_v20 = vpop.f32.mrb[225].mxu1 }
 0x93d   : > { %v14168_v32 = vadd.f32 %v14167_v20, %v14166_v45  ;;  %v14169_v46 = vpop.f32.mrb[226].mxu1 }
 0x93e   : > { %v14170_v30 = vpop.f32.mrb[227].mxu1 }
 0x93f   : > { %v14171_v52 = vadd.f32 %v14170_v30, %v14169_v46  ;;  %v20724_v7 = vadd.f32 %v20498_v56, %v14168_v32 }
 0x941   : > { %v20727_v23 = vadd.f32 %v20501_v1, %v14171_v52 }
 0x943   : > { %v14172_v12 = vpop.f32.mrb[228].mxu1 }
 0x944   : > { %v14173_v18 = vpop.f32.mrb[229].mxu1 }
 0x945   : > { %v14174_v22 = vadd.f32 %v14173_v18, %v14172_v12  ;;  %v14175_v4 = vpop.f32.mrb[230].mxu1 }
 0x946   : > { %v14176_v60 = vpop.f32.mrb[231].mxu1 }
 0x947   : > { %v14177_v44 = vadd.f32 %v14176_v60, %v14175_v4  ;;  %v20730_v50 = vadd.f32 %v20504_v48, %v14174_v22 }
 0x949   : > { %v20733_v40 = vadd.f32 %v20507_v0, %v14177_v44 }
 0x94b   : > { %v14178_v31 = vpop.f32.mrb[232].mxu1 }
 0x94c   : > { %v14179_v35 = vpop.f32.mrb[233].mxu1 }
 0x94d   : > { %v14180_v24 = vadd.f32 %v14179_v35, %v14178_v31  ;;  %v14181_v56 = vpop.f32.mrb[234].mxu1 }
 0x94e   : > { %v14182_v43 = vpop.f32.mrb[235].mxu1 }
 0x94f   : > { %v14183_v63 = vadd.f32 %v14182_v43, %v14181_v56  ;;  %v20736_v1 = vadd.f32 %v20510_v14, %v14180_v24  ;;  %v20750_v14 = vld [vmem:[%s21624_s2 + $0x3] ss:$0 sm:$0xff] }
 0x951   : > { %v20739_v51 = vadd.f32 %v20513_v6, %v14183_v63 }
 0x953   : > { %v14184_v15 = vpop.f32.mrb[236].mxu1 }
 0x954   : > { %v14185_v55 = vpop.f32.mrb[237].mxu1 }
 0x955   : > { %v14186_v53 = vadd.f32 %v14185_v55, %v14184_v15  ;;  %v14187_v48 = vpop.f32.mrb[238].mxu1 }
 0x956   : > { %v14188_v38 = vpop.f32.mrb[239].mxu1 }
 0x957   : > { %v14189_v49 = vadd.f32 %v14188_v38, %v14187_v48  ;;  %v20742_v0 = vadd.f32 %v20516_v59, %v14186_v53 }
 0x959   : > { %v20745_v47 = vadd.f32 %v20519_v29, %v14189_v49 }
 0x95b   : > { %v15168_v3 = vpop.f32.mrb[48].mxu1 }
 0x95c   : > { %v15648_v6 = vadd.f32 %v20630_v58, %v15168_v3  ;;  %v9107_v34 = vpop.f32.mrb[49].mxu1 }
 0x95d   : > { %v15651_v27 = vadd.f32 %v20615_v25, %v9107_v34  ;;  %v15169_v45 = vpop.f32.mrb[50].mxu1 }
 0x95e   : > { %v9276_v20 = vadd.f32 %v15648_v6, %v20750_v14  ;;  %v15654_v59 = vadd.f32 %v20636_v42, %v15169_v45  ;;  %v9110_v32 = vpop.f32.mrb[51].mxu1 }
 0x95f   : > { %v9274_v29 = vadd.f32 %v15651_v27, %v20750_v14  ;;  %v15657_v46 = vadd.f32 %v20618_v41, %v9110_v32 }
 0x960   : > { %v9277_v30 = vadd.f32 %v15654_v59, %v20750_v14  ;;  %v9308_v12 = vmax.f32 %v9276_v20, 0.0 }
 0x961   : > { %v9275_v52 = vadd.f32 %v15657_v46, %v20750_v14  ;;  %v9306_v58 = vmax.f32 %v9274_v29, 0.0 }
 0x962   : > { %v9309_v18 = vmax.f32 %v9277_v30, 0.0 }
 0x963   : > { %v9307_v22 = vmax.f32 %v9275_v52, 0.0  ;;  %v15172_v4 = vpop.f32.mrb[52].mxu1 }
 0x964   : > { %v9339_v25 = vpack.c.bf16 %v9309_v18, %v9308_v12  ;;  %v15660_v60 = vadd.f32 %v20658_v17, %v15172_v4  ;;  %v9123_v44 = vpop.f32.mrb[53].mxu1  ;;  %v22408_v12 = vld [vmem:[#allocation24_spill] sm:$0xff] }
 0x965   : > { %v9338_v31 = vpack.c.bf16 %v9307_v22, %v9306_v58  ;;  %v15663_v42 = vadd.f32 %v20648_v62, %v9123_v44  ;;  %v15173_v35 = vpop.f32.mrb[54].mxu1  ;;  %vm22409_vm12 = vnez %v22408_v12  ;;  %v22411_v22 = vld [vmem:[#allocation29_spill] sm:$0xff]  ;;  %v22413_v44 = vld [vmem:[#allocation26_spill] sm:$0xff] }
 0x966   : > { %v9362_v24 = vshrl.u32 %v9339_v25, 16  ;;  %v9365_v56 = vshll.u32 %v9339_v25, 16  ;;  %9611 = vst.msk [vmem:[#allocation2 + $0x38] sm:$0xff] %vm22405_vm0, %v9339_v25  ;;  %v9280_v41 = vadd.f32 %v15660_v60, %v20750_v14  ;;  %v15666_v43 = vadd.f32 %v20667_v54, %v15173_v35  ;;  %v9126_v63 = vpop.f32.mrb[55].mxu1 }
 0x967   : > { %v9355_v15 = vshrl.u32 %v9338_v31, 16  ;;  %v9358_v55 = vshll.u32 %v9338_v31, 16  ;;  %9610 = vst.msk [vmem:[#allocation2 + $0x20] sm:$0xff] %vm22406_vm13, %v9338_v31  ;;  %v9278_v17 = vadd.f32 %v15663_v42, %v20750_v14  ;;  %v15669_v53 = vadd.f32 %v20654_v57, %v9126_v63  ;;  %v22415_v42 = vld [vmem:[#allocation15_spill] sm:$0xff] }
 0x968   : > { %v20768_v48 = vrot.slane %v9362_v24, 7  ;;  %v9281_v62 = vadd.f32 %v15666_v43, %v20750_v14  ;;  %v9500_v54 = vrot.slane %v9365_v56, 1  ;;  %v9312_v34 = vmax.f32 %v9280_v41, 0.0 }
 0x969   : > { %v9357_v38 = vrot.slane %v9355_v15, 7  ;;  %v9498_v49 = vrot.slane %v9358_v55, 1  ;;  %v9279_v3 = vadd.f32 %v15669_v53, %v20750_v14  ;;  %v9310_v59 = vmax.f32 %v9278_v17, 0.0 }
 0x96a   : > { %v9367_v6 = vor.u32 %v9365_v56, %v20768_v48  ;;  %v9313_v27 = vmax.f32 %v9281_v62, 0.0  ;;  %vm22412_vm9 = vnez %v22411_v22  ;;  %vm22414_vm0 = vnez %v22413_v44 }
 0x96b   : > { %v9360_v45 = vor.u32 %v9358_v55, %v9357_v38  ;;  %v9499_v20 = vor.u32 %v9498_v49, %v9355_v15  ;;  %v9311_v32 = vmax.f32 %v9279_v3, 0.0  ;;  %v15176_v29 = vpop.f32.mrb[56].mxu1  ;;  %vm22416_vm13 = vnez %v22415_v42 }
 0x96c   : > { %v9368_v57 = vsel %vm22407_vm3, %v9357_v38, %v9367_v6  ;;  %v20774_v46 = vpack.c.bf16 %v9313_v27, %v9312_v34  ;;  %v15672_v30 = vadd.f32 %v20676_v13, %v15176_v29  ;;  %v9139_v52 = vpop.f32.mrb[57].mxu1  ;;  %vm22417_vm3 = vcmask 523264  }
 0x96d   : > { %v9497_v18 = vsel %vm22409_vm12, 0, %v9360_v45  ;;  %v9501_v58 = vsel %vm22410_vm1, %v9499_v20, %v9500_v54  ;;  %v9563_v4 = vsel %vm22412_vm9, %v9368_v57, 0  ;;  %v9340_v25 = vpack.c.bf16 %v9311_v32, %v9310_v59  ;;  %v15177_v60 = vpop.f32.mrb[58].mxu1  ;;  %vm22418_vm12 = vmmov %vm22417_vm3  ;;  %v22424_v57 = vld [vmem:[#allocation16_spill] sm:$0xff] }
 0x96e   : > { %v9562_v31 = vsel %vm22414_vm0, %v9497_v18, 0  ;;  %v9578_v35 = vsel %vm22416_vm13, %v9501_v58, 0  ;;  %9595 = vst.msk [vmem:[#allocation2 + $0x30] sm:$0xff] %vm22417_vm3, %v9563_v4  ;;  %v9378_v13 = vshrl.u32 %v20774_v46, 16  ;;  %v9381_v56 = vshll.u32 %v20774_v46, 16  ;;  %v9142_v41 = vpop.f32.mrb[59].mxu1  ;;  %vm22419_vm1 = vmmov %vm22417_vm3 }
 0x96f   : > { %9613 = vst.msk [vmem:[#allocation2 + $0x68] sm:$0xff] %vm22418_vm12, %v20774_v46  ;;  %v9646_v43 = vld [vmem:[#allocation2 + $0x20] sm:$0xff]  ;;  %vm22420_vm9 = vmmov %vm22419_vm1  ;;  %v9370_v63 = vshrl.u32 %v9340_v25, 16  ;;  %v9373_v15 = vshll.u32 %v9340_v25, 16  ;;  %v9284_v55 = vadd.f32 %v15672_v30, %v20750_v14  ;;  %v15675_v17 = vadd.f32 %v20670_v36, %v9139_v52  ;;  %v22428_v4 = vld [vmem:[#allocation36_spill] sm:$0xff] }
 0x970   : > { %9594 = vst.msk [vmem:[#allocation2 + $0x18] sm:$0xff] %vm22419_vm1, %v9562_v31  ;;  %vm22421_vm0 = vmmov %vm22419_vm1  ;;  %9967 = vmatprep.mubr.bf16.mxu0 %v9646_v43  ;;  %10441 = vmatprep.mubr.bf16.mxu1 %v9646_v43  ;;  %v9502_v53 = vor.u32 %v9500_v54, %v9362_v24  ;;  %v20798_v62 = vrot.slane %v9378_v13, 7  ;;  %v15678_v38 = vadd.f32 %v20684_v33, %v15177_v60  ;;  %v9506_v3 = vrot.slane %v9381_v56, 1  ;;  %v22431_v31 = vld [vmem:[#allocation32_spill] sm:$0xff] }
 0x971   : > { %9626 = vst.msk [vmem:[#allocation2 + $0x28] sm:$0xff] %vm22420_vm9, %v9578_v35  ;;  %v15681_v49 = vadd.f32 %v20673_v16, %v9142_v41  ;;  %v9372_v6 = vrot.slane %v9370_v63, 7  ;;  %v9503_v34 = vrot.slane %v9373_v15, 1  ;;  %v9282_v27 = vadd.f32 %v15675_v17, %v20750_v14  ;;  %v22433_v35 = vld [vmem:[#allocation17_spill] sm:$0xff] }
 0x972   : > { %9612 = vst.msk [vmem:[#allocation2 + $0x50] sm:$0xff] %vm22421_vm0, %v9340_v25  ;;  %v9383_v45 = vor.u32 %v9381_v56, %v20798_v62  ;;  %v9316_v20 = vmax.f32 %v9284_v55, 0.0  ;;  %v9285_v36 = vadd.f32 %v15678_v38, %v20750_v14  ;;  %vm22422_vm13 = vsmask.f32 7424  ;;  %v9649_v38 = vld [vmem:[#allocation2 + $0x38] sm:$0xff] }
 0x973   : > { %v9283_v24 = vadd.f32 %v15681_v49, %v20750_v14  ;;  %v9375_v54 = vor.u32 %v9373_v15, %v9372_v6  ;;  %v9504_v59 = vsel %vm22422_vm13, %v9502_v53, %v9503_v34  ;;  %v9505_v32 = vor.u32 %v9503_v34, %v9370_v63  ;;  %v15180_v33 = vpop.f32.mrb[60].mxu1  ;;  %vm22427_vm9 = vmmov %vm22422_vm13  ;;  %v16489_v15 = vld [vmem:[%s21623_s1 + $0xa48] sm:$0xff]  }
 0x974   : > { %v9314_v29 = vmax.f32 %v9282_v27, 0.0  ;;  %vm22423_vm3 = vsmask.f32 256  ;;  %vm22425_vm12 = vnez %v22424_v57  ;;  %v9317_v52 = vmax.f32 %v9285_v36, 0.0  ;;  %v9155_v18 = vpop.f32.mrb[61].mxu1 }
 0x975   : > { %v9384_v16 = vsel %vm22423_vm3, %v9372_v6, %v9383_v45  ;;  %v9579_v30 = vsel %vm22425_vm12, %v9504_v59, 0  ;;  %v9315_v12 = vmax.f32 %v9283_v24, 0.0  ;;  %vm22426_vm1 = vmmov %vm22423_vm3  ;;  %v9507_v22 = vsel %vm22427_vm9, %v9505_v32, %v9506_v3  ;;  %v15181_v44 = vpop.f32.mrb[62].mxu1 }
 0x976   : > { %v9376_v58 = vsel %vm22426_vm1, %v20768_v48, %v9375_v54  ;;  %vm22429_vm0 = vnez %v22428_v4  ;;  %vm22430_vm13 = vcmask 523264   ;;  %v15684_v60 = vadd.f32 %v20694_v19, %v15180_v33  ;;  %v9158_v43 = vpop.f32.mrb[63].mxu1  ;;  %v16490_v54 = vld [vmem:[%s21623_s1 + $0xa50] sm:$0xff]  }
 0x977   : > { %v9565_v25 = vsel %vm22429_vm0, %v9384_v16, 0  ;;  %9627 = vst.msk [vmem:[#allocation2 + $0x40] sm:$0xff] %vm22430_vm13, %v9579_v30  ;;  %vm22432_vm3 = vnez %v22431_v31  ;;  %vm22434_vm12 = vnez %v22433_v35  ;;  %vm22435_vm4 = vmmov %vm22430_vm13  ;;  %v20822_v41 = vpack.c.bf16 %v9317_v52, %v9316_v20  ;;  %v9645_v63 = vld [vmem:[#allocation2 + $0x18] sm:$0xff]  ;;  %v22441_v52 = vld [vmem:[#allocation18_spill] sm:$0xff] }
 0x978   : > { %v9564_v42 = vsel %vm22432_vm3, %v9376_v58, 0  ;;  %v9580_v56 = vsel %vm22434_vm12, %v9507_v22, 0  ;;  %9597 = vst.msk [vmem:[#allocation2 + $0x60] sm:$0xff] %vm22435_vm4, %v9565_v25  ;;  %v9342_v48 = vpack.c.bf16 %v9315_v12, %v9314_v29  ;;  %vm22436_vm1 = vmmov %vm22435_vm4  ;;  %v9288_v19 = vadd.f32 %v15684_v60, %v20750_v14  ;;  %9968 = vmatmul.mubr.bf16.vlgmr.msra.gmra.mrb[176].mxu0 %v9645_v63  ;;  %10442 = vmatmul.mubr.bf16.gmra.mrb[148].mxu1 %v9645_v63  ;;  %v16491_v35 = vld [vmem:[%s21623_s1 + $0xa58] sm:$0xff]  }
 0x979   : > { %9596 = vst.msk [vmem:[#allocation2 + $0x48] sm:$0xff] %vm22436_vm1, %v9564_v42  ;;  %vm22437_vm9 = vmmov %vm22436_vm1  ;;  %v15687_v55 = vadd.f32 %v20688_v61, %v9155_v18  ;;  %v15690_v17 = vadd.f32 %v20697_v11, %v15181_v44  ;;  %v15693_v53 = vadd.f32 %v20691_v2, %v9158_v43  ;;  %v9394_v49 = vshrl.u32 %v20822_v41, 16  ;;  %9975 = vmatprep.mubr.bf16.mxu0 %v9649_v38  ;;  %v20863_v42 = vld [vmem:[#allocation2 + $0x30] sm:$0xff]  ;;  %v22448_v43 = vld [vmem:[#allocation4_spill] sm:$0xff] }
 0x97a   : > { %9628 = vst.msk [vmem:[#allocation2 + $0x58] sm:$0xff] %vm22437_vm9, %v9580_v56  ;;  %v9397_v6 = vshll.u32 %v20822_v41, 16  ;;  %vm22438_vm4 = vmmov %vm22436_vm1  ;;  %v9386_v34 = vshrl.u32 %v9342_v48, 16  ;;  %v9389_v27 = vshll.u32 %v9342_v48, 16  ;;  %15199 = vmatpush3.bf16.msra.mxu0 %v20681_v39  ;;  %10449 = vmatprep.mubr.bf16.mxu1 %v9649_v38  ;;  %v9508_v45 = vor.u32 %v9506_v3, %v9378_v13 }
 0x97b   : > { %9615 = vst.msk [vmem:[#allocation2 + $0x98] sm:$0xff] %vm22438_vm4, %v20822_v41  ;;  %vm22439_vm0 = vmmov %vm22436_vm1  ;;  %v9286_v61 = vadd.f32 %v15687_v55, %v20750_v14  ;;  %v9289_v11 = vadd.f32 %v15690_v17, %v20750_v14  ;;  %v9287_v2 = vadd.f32 %v15693_v53, %v20750_v14  ;;  %v20846_v20 = vrot.slane %v9394_v49, 7  ;;  %15200 = vmatprep.subr.bf16.mxu0 %v16489_v15  ;;  %v15184_v39 = vpop.f32.mrb[64].mxu1 }
 0x97c   : > { %9614 = vst.msk [vmem:[#allocation2 + $0x80] sm:$0xff] %vm22439_vm0, %v9342_v48  ;;  %v9388_v36 = vrot.slane %v9386_v34, 7  ;;  %v9509_v24 = vrot.slane %v9389_v27, 1  ;;  %v9320_v59 = vmax.f32 %v9288_v19, 0.0  ;;  %v9512_v46 = vrot.slane %v9397_v6, 1  ;;  %v9171_v57 = vpop.f32.mrb[65].mxu1  ;;  %vm22445_vm9 = vmmov %vm22439_vm0 }
 0x97d   : > { %v9318_v32 = vmax.f32 %v9286_v61, 0.0  ;;  %v9321_v29 = vmax.f32 %v9289_v11, 0.0  ;;  %v9319_v33 = vmax.f32 %v9287_v2, 0.0  ;;  %v9399_v16 = vor.u32 %v9397_v6, %v20846_v20  ;;  %v15185_v22 = vpop.f32.mrb[66].mxu1 }
 0x97e   : > { %v9391_v13 = vor.u32 %v9389_v27, %v9388_v36  ;;  %vm22440_vm13 = vsmask.f32 7424  ;;  %v9511_v30 = vor.u32 %v9509_v24, %v9386_v34  ;;  %vm22442_vm3 = vnez %v22441_v52  ;;  %15201 = vmatpush3.bf16.msra.mxu0 %v16489_v15  ;;  %v9174_v31 = vpop.f32.mrb[67].mxu1  ;;  %v22452_v15 = vld [vmem:[#allocation19_spill] sm:$0xff] }
 0x97f   : > { %v9510_v3 = vsel %vm22440_vm13, %v9508_v45, %v9509_v24  ;;  %v20855_v18 = vpack.c.bf16 %v9321_v29, %v9320_v59  ;;  %v9344_v58 = vpack.c.bf16 %v9319_v33, %v9318_v32  ;;  %vm22443_vm12 = vsmask.f32 256  ;;  %15202 = vmatprep.subr.bf16.mxu0 %v16490_v54  ;;  %vm22446_vm4 = vmmov %vm22440_vm13 }
 0x980   : > { %v9581_v12 = vsel %vm22442_vm3, %v9510_v3, 0  ;;  %v9392_v4 = vsel %vm22443_vm12, %v20798_v62, %v9391_v13  ;;  %vm22444_vm1 = vmmov %vm22443_vm12  ;;  %v15696_v60 = vadd.f32 %v20706_v5, %v15184_v39  ;;  %v15699_v44 = vadd.f32 %v20700_v8, %v9171_v57  ;;  %9976 = vmatmul.mubr.bf16.gmra.mrb[180].mxu0 %v20863_v42  ;;  %v9652_v8 = vld [vmem:[#allocation2 + $0x50] sm:$0xff]  ;;  %10450 = vmatmul.mubr.bf16.gmra.mrb[152].mxu1 %v20863_v42 }
 0x981   : > { %v9400_v25 = vsel %vm22444_vm1, %v9388_v36, %v9399_v16  ;;  %9629 = vst.msk [vmem:[#allocation2 + $0x70] sm:$0xff] %vm22445_vm9, %v9581_v12  ;;  %v9513_v56 = vsel %vm22446_vm4, %v9511_v30, %v9512_v46  ;;  %v9566_v62 = vsel %vm22296_vm5, %v9392_v4, 0  ;;  %vm22449_vm0 = vnez %v22448_v43  ;;  %vm22450_vm13 = vmmov %vm22445_vm9  ;;  %9983 = vmatprep.mubr.bf16.mxu0 %v9652_v8  ;;  %10457 = vmatprep.mubr.bf16.mxu1 %v9652_v8  ;;  %v16492_v36 = vld [vmem:[%s21623_s1 + $0xa60] sm:$0xff]   ;;  %v22458_v16 = vld [vmem:[#allocation20_spill] sm:$0xff] }
 0x982   : > { %v9567_v63 = vsel %vm22449_vm0, %v9400_v25, 0  ;;  %v9410_v5 = vshrl.u32 %v20855_v18, 16  ;;  %9617 = vst.msk [vmem:[#allocation2 + $0xc8] sm:$0xff] %vm22450_vm13, %v20855_v18  ;;  %vm22451_vm3 = vmmov %vm22445_vm9  ;;  %vm22453_vm12 = vnez %v22452_v15  ;;  %v9413_v55 = vshll.u32 %v20855_v18, 16  ;;  %15203 = vmatpush3.bf16.msra.mxu0 %v16490_v54  ;;  %v22462_v12 = vld [vmem:[#allocation6_spill] sm:$0xff] }
 0x983   : > { %9616 = vst.msk [vmem:[#allocation2 + $0xb0] sm:$0xff] %vm22451_vm3, %v9344_v58  ;;  %v9582_v19 = vsel %vm22453_vm12, %v9513_v56, 0  ;;  %vm22454_vm1 = vmmov %vm22451_vm3  ;;  %v9402_v17 = vshrl.u32 %v9344_v58, 16  ;;  %v9405_v53 = vshll.u32 %v9344_v58, 16  ;;  %v9292_v6 = vadd.f32 %v15696_v60, %v20750_v14  ;;  %15204 = vmatprep.subr.bf16.mxu0 %v16491_v35  ;;  %v15188_v29 = vpop.f32.mrb[68].mxu1  ;;  %v20912_v25 = vld [vmem:[#allocation2 + $0x48] sm:$0xff] }
 0x984   : > { %9598 = vst.msk [vmem:[#allocation2 + $0x78] sm:$0xff] %vm22454_vm1, %v9566_v62  ;;  %vm22455_vm9 = vmmov %vm22454_vm1  ;;  %v20887_v38 = vrot.slane %v9410_v5, 7  ;;  %v9290_v34 = vadd.f32 %v15699_v44, %v20750_v14  ;;  %v15702_v27 = vadd.f32 %v20709_v28, %v15185_v22  ;;  %v9514_v61 = vor.u32 %v9512_v46, %v9394_v49  ;;  %v9187_v39 = vpop.f32.mrb[69].mxu1  ;;  %v22465_v60 = vld [vmem:[#allocation5_spill] sm:$0xff]  ;;  %v20932_v8 = vld [vmem:[#allocation2 + $0x68] sm:$0xff] }
 0x985   : > { %9599 = vst.msk [vmem:[#allocation2 + $0x90] sm:$0xff] %vm22455_vm9, %v9567_v63  ;;  %vm22456_vm5 = vmmov %vm22454_vm1  ;;  %v9404_v11 = vrot.slane %v9402_v17, 7  ;;  %v9515_v2 = vrot.slane %v9405_v53, 1  ;;  %v15705_v45 = vadd.f32 %v20703_v10, %v9174_v31  ;;  %v9518_v59 = vrot.slane %v9413_v55, 1  ;;  %v15189_v57 = vpop.f32.mrb[70].mxu1  ;;  %v22467_v31 = vld [vmem:[#allocation21_spill] sm:$0xff] }
 0x986   : > { %9630 = vst.msk [vmem:[#allocation2 + $0x88] sm:$0xff] %vm22456_vm5, %v9582_v19  ;;  %v9415_v24 = vor.u32 %v9413_v55, %v20887_v38  ;;  %v9324_v32 = vmax.f32 %v9292_v6, 0.0  ;;  %v9293_v28 = vadd.f32 %v15702_v27, %v20750_v14  ;;  %v9322_v33 = vmax.f32 %v9290_v34, 0.0  ;;  %15205 = vmatpush3.bf16.msra.mxu0 %v16491_v35  ;;  %vm22461_vm12 = vmmov %vm22446_vm4  ;;  %v9190_v4 = vpop.f32.mrb[71].mxu1 }
 0x987   : > { %v9407_v54 = vor.u32 %v9405_v53, %v9404_v11  ;;  %v9516_v41 = vsel %vm22446_vm4, %v9514_v61, %v9515_v2  ;;  %v9517_v49 = vor.u32 %v9515_v2, %v9402_v17  ;;  %vm22457_vm0 = vsmask.f32 256  ;;  %vm22464_vm9 = vmmov %vm22456_vm5  ;;  %15206 = vmatprep.subr.bf16.mxu0 %v16492_v36 }
 0x988   : > { %v9416_v10 = vsel %vm22457_vm0, %v9404_v11, %v9415_v24  ;;  %vm22459_vm13 = vnez %v22458_v16  ;;  %v9325_v13 = vmax.f32 %v9293_v28, 0.0  ;;  %v9291_v3 = vadd.f32 %v15705_v45, %v20750_v14  ;;  %vm22460_vm3 = vmmov %vm22457_vm0  ;;  %9984 = vmatmul.mubr.bf16.gmra.mrb[184].mxu0 %v20912_v25  ;;  %10458 = vmatmul.mubr.bf16.gmra.mrb[156].mxu1 %v20912_v25 }
 0x989   : > { %v9583_v46 = vsel %vm22459_vm13, %v9516_v41, 0  ;;  %v9408_v30 = vsel %vm22460_vm3, %v20846_v20, %v9407_v54  ;;  %v9519_v52 = vsel %vm22461_vm12, %v9517_v49, %v9518_v59  ;;  %vm22463_vm1 = vnez %v22462_v12  ;;  %vm22469_vm0 = vmmov %vm22464_vm9  ;;  %9991 = vmatprep.mubr.bf16.mxu0 %v20932_v8  ;;  %10465 = vmatprep.mubr.bf16.mxu1 %v20932_v8 }
 0x98a   : > { %v9569_v58 = vsel %vm22463_vm1, %v9416_v10, 0  ;;  %9631 = vst.msk [vmem:[#allocation2 + $0xa0] sm:$0xff] %vm22464_vm9, %v9583_v46  ;;  %v15708_v22 = vadd.f32 %v20718_v37, %v15188_v29  ;;  %vm22466_vm5 = vnez %v22465_v60  ;;  %vm22468_vm4 = vnez %v22467_v31  ;;  %v16493_v37 = vld [vmem:[%s21623_s1 + $0xa68] sm:$0xff]   ;;  %vm22470_vm13 = vmmov %vm22469_vm0  ;;  %15207 = vmatpush3.bf16.msra.mxu0 %v16492_v36  ;;  %v16494_v29 = vld [vmem:[%s21623_s1 + $0xa70] sm:$0xff]  }
 0x98b   : > { %v9568_v44 = vsel %vm22466_vm5, %v9408_v30, 0  ;;  %v9584_v35 = vsel %vm22468_vm4, %v9519_v52, 0  ;;  %9601 = vst.msk [vmem:[#allocation2 + $0xc0] sm:$0xff] %vm22469_vm0, %v9569_v58  ;;  %v20919_v20 = vpack.c.bf16 %v9325_v13, %v9324_v32  ;;  %v9323_v56 = vmax.f32 %v9291_v3, 0.0  ;;  %vm22471_vm3 = vmmov %vm22469_vm0  ;;  %v15192_v61 = vpop.f32.mrb[72].mxu1  ;;  %15208 = vmatprep.subr.bf16.mxu0 %v16493_v37  ;;  %v20964_v3 = vld [vmem:[#allocation2 + $0x80] sm:$0xff] }
 0x98c   : > { %9600 = vst.msk [vmem:[#allocation2 + $0xa8] sm:$0xff] %vm22470_vm13, %v9568_v44  ;;  %v9296_v48 = vadd.f32 %v15708_v22, %v20750_v14  ;;  %v15711_v62 = vadd.f32 %v20712_v26, %v9187_v39  ;;  %v15714_v43 = vadd.f32 %v20721_v9, %v15189_v57  ;;  %v15717_v63 = vadd.f32 %v20715_v21, %v9190_v4  ;;  %vm22472_vm12 = vmmov %vm22469_vm0  ;;  %v9203_v45 = vpop.f32.mrb[73].mxu1  ;;  %v20959_v39 = vld [vmem:[#allocation2 + $0x60] sm:$0xff]  ;;  %v16495_v57 = vld [vmem:[%s21623_s1 + $0xa78] sm:$0xff]  }
 0x98d   : > { %9632 = vst.msk [vmem:[#allocation2 + $0xb8] sm:$0xff] %vm22471_vm3, %v9584_v35  ;;  %v9426_v15 = vshrl.u32 %v20919_v20, 16  ;;  %v9429_v19 = vshll.u32 %v20919_v20, 16  ;;  %v9346_v55 = vpack.c.bf16 %v9323_v56, %v9322_v33  ;;  %v9520_v26 = vor.u32 %v9518_v59, %v9410_v5  ;;  %vm22473_vm1 = vmmov %vm22469_vm0  ;;  %v15193_v28 = vpop.f32.mrb[74].mxu1  ;;  %v22476_v30 = vld [vmem:[#allocation8_spill] sm:$0xff]  ;;  %v22478_v52 = vld [vmem:[#allocation22_spill] sm:$0xff] }
 0x98e   : > { %9619 = vst.msk [vmem:[#allocation2 + $0xf8] sm:$0xff] %vm22472_vm12, %v20919_v20  ;;  %v9294_v21 = vadd.f32 %v15711_v62, %v20750_v14  ;;  %v9297_v9 = vadd.f32 %v15714_v43, %v20750_v14  ;;  %v9295_v17 = vadd.f32 %v15717_v63, %v20750_v14  ;;  %v9328_v27 = vmax.f32 %v9296_v48, 0.0  ;;  %15209 = vmatpush3.bf16.msra.mxu0 %v16493_v37  ;;  %vm22480_vm13 = vmmov %vm22473_vm1  ;;  %v22486_v20 = vld [vmem:[#allocation7_spill] sm:$0xff] }
 0x98f   : > { %v20945_v53 = vrot.slane %v9426_v15, 7  ;;  %v9418_v6 = vshrl.u32 %v9346_v55, 16  ;;  %v9421_v34 = vshll.u32 %v9346_v55, 16  ;;  %9618 = vst.msk [vmem:[#allocation2 + $0xe0] sm:$0xff] %vm22473_vm1, %v9346_v55  ;;  %v15720_v5 = vadd.f32 %v20730_v50, %v15192_v61  ;;  %v9206_v50 = vpop.f32.mrb[75].mxu1  ;;  %vm22481_vm3 = vmmov %vm22473_vm1  ;;  %15210 = vmatprep.subr.bf16.mxu0 %v16494_v29  ;;  %v22488_v37 = vld [vmem:[#allocation23_spill] sm:$0xff] }
 0x990   : > { %v9326_v11 = vmax.f32 %v9294_v21, 0.0  ;;  %v9329_v2 = vmax.f32 %v9297_v9, 0.0  ;;  %v9327_v18 = vmax.f32 %v9295_v17, 0.0  ;;  %v9524_v59 = vrot.slane %v9429_v19, 1  ;;  %9992 = vmatmul.mubr.bf16.gmra.mrb[188].mxu0 %v20959_v39  ;;  %10466 = vmatmul.mubr.bf16.gmra.mrb[160].mxu1 %v20959_v39  ;;  %v21000_v55 = vld [vmem:[%s21623_s1 + $0x980] sm:$0xff]  }
 0x991   : > { %v9431_v24 = vor.u32 %v9429_v19, %v20945_v53  ;;  %v9420_v32 = vrot.slane %v9418_v6, 7  ;;  %v9521_v36 = vrot.slane %v9421_v34, 1  ;;  %v20956_v49 = vadd.f32 %v15720_v5, %v20750_v14  ;;  %9999 = vmatprep.mubr.bf16.mxu0 %v20964_v3  ;;  %10473 = vmatprep.mubr.bf16.mxu1 %v20964_v3  ;;  %v22493_v5 = vld [vmem:[#allocation25_spill] sm:$0xff] }
 0x992   : > { %v20953_v54 = vpack.c.bf16 %v9329_v2, %v9328_v27  ;;  %v9348_v41 = vpack.c.bf16 %v9327_v18, %v9326_v11  ;;  %v15723_v33 = vadd.f32 %v20724_v7, %v9203_v45  ;;  %vm22474_vm9 = vsmask.f32 256  ;;  %15211 = vmatpush3.bf16.msra.mxu0 %v16494_v29 }
 0x993   : > { %v9423_v10 = vor.u32 %v9421_v34, %v9420_v32  ;;  %v9432_v16 = vsel %vm22474_vm9, %v9420_v32, %v9431_v24  ;;  %vm22475_vm5 = vsmask.f32 7424  ;;  %v9523_v13 = vor.u32 %v9521_v36, %v9418_v6  ;;  %vm22482_vm12 = vmmov %vm22474_vm9  ;;  %v15196_v19 = vpop.f32.mrb[76].mxu1  ;;  %15212 = vmatprep.subr.bf16.mxu0 %v16495_v57 }
 0x994   : > { %v9522_v46 = vsel %vm22475_vm5, %v9520_v26, %v9521_v36  ;;  %vm22477_vm4 = vnez %v22476_v30  ;;  %vm22479_vm0 = vnez %v22478_v52  ;;  %v9442_v58 = vshrl.u32 %v20953_v54, 16  ;;  %9621 = vst.msk [vmem:[#allocation2 + $0x128] sm:$0xff] %vm22480_vm13, %v20953_v54  ;;  %vm22483_vm1 = vmmov %vm22475_vm5  ;;  %v9219_v6 = vpop.f32.mrb[77].mxu1 }
 0x995   : > { %v9571_v7 = vsel %vm22477_vm4, %v9432_v16, 0  ;;  %v9585_v12 = vsel %vm22479_vm0, %v9522_v46, 0  ;;  %v9445_v22 = vshll.u32 %v20953_v54, 16  ;;  %9620 = vst.msk [vmem:[#allocation2 + $0x110] sm:$0xff] %vm22481_vm3, %v9348_v41  ;;  %v9424_v4 = vsel %vm22482_vm12, %v20887_v38, %v9423_v10  ;;  %vm22484_vm9 = vmmov %vm22481_vm3  ;;  %v15197_v2 = vpop.f32.mrb[78].mxu1  ;;  %v22502_v10 = vld [vmem:[#allocation27_spill] sm:$0xff] }
 0x996   : > { %v9525_v60 = vsel %vm22483_vm1, %v9523_v13, %v9524_v59  ;;  %9603 = vst.msk [vmem:[#allocation2 + $0xf0] sm:$0xff] %vm22484_vm9, %v9571_v7  ;;  %vm22485_vm5 = vmmov %vm22481_vm3  ;;  %v9434_v44 = vshrl.u32 %v9348_v41, 16  ;;  %v9437_v31 = vshll.u32 %v9348_v41, 16  ;;  %v9526_v35 = vor.u32 %v9524_v59, %v9426_v15  ;;  %v9222_v32 = vpop.f32.mrb[79].mxu1  ;;  %15213 = vmatpush3.bf16.msra.mxu0 %v16495_v57 }
 0x997   : > { %9633 = vst.msk [vmem:[#allocation2 + $0xd0] sm:$0xff] %vm22485_vm5, %v9585_v12  ;;  %vm22487_vm4 = vnez %v22486_v20  ;;  %vm22489_vm0 = vnez %v22488_v37  ;;  %v20992_v38 = vrot.slane %v9442_v58, 7  ;;  %vm22490_vm13 = vmmov %vm22481_vm3  ;;  %v9530_v62 = vrot.slane %v9445_v22, 1  ;;  %15246 = vmatprep.subr.bf16.mxu0 %v21000_v55 }
 0x998   : > { %v9570_v56 = vsel %vm22487_vm4, %v9424_v4, 0  ;;  %v9586_v48 = vsel %vm22489_vm0, %v9525_v60, 0  ;;  %v9436_v43 = vrot.slane %v9434_v44, 7  ;;  %v9527_v63 = vrot.slane %v9437_v31, 1  ;;  %vm22491_vm12 = vmmov %vm22483_vm1 }
 0x999   : > { %9602 = vst.msk [vmem:[#allocation2 + $0xd8] sm:$0xff] %vm22490_vm13, %v9570_v56  ;;  %v9298_v15 = vadd.f32 %v15723_v33, %v20750_v14  ;;  %v9447_v26 = vor.u32 %v9445_v22, %v20992_v38  ;;  %v9332_v21 = vmax.f32 %v20956_v49, 0.0  ;;  %v15726_v9 = vadd.f32 %v20733_v40, %v15193_v28  ;;  %v21012_v40 = vld [vmem:[#allocation2 + $0x78] sm:$0xff]  ;;  %vm22496_vm4 = vmmov %vm22491_vm12  ;;  %v22497_v28 = vld [vmem:[#allocation10_spill] sm:$0xff] }
 0x99a   : > { %9634 = vst.msk [vmem:[#allocation2 + $0xe8] sm:$0xff] %vm22481_vm3, %v9586_v48  ;;  %v15729_v17 = vadd.f32 %v20727_v23, %v9206_v50  ;;  %v9439_v34 = vor.u32 %v9437_v31, %v9436_v43  ;;  %v9528_v27 = vsel %vm22491_vm12, %v9526_v35, %v9527_v63  ;;  %v9529_v61 = vor.u32 %v9527_v63, %v9434_v44  ;;  %vm22499_vm13 = vmmov %vm22481_vm3  ;;  %v21022_v49 = vld [vmem:[#allocation2 + $0x98] sm:$0xff]  ;;  %v22500_v33 = vld [vmem:[#allocation9_spill] sm:$0xff] }
 0x99b   : > { %v9330_v11 = vmax.f32 %v9298_v15, 0.0  ;;  %vm22492_vm1 = vsmask.f32 256  ;;  %vm22494_vm9 = vnez %v22493_v5  ;;  %v9301_v24 = vadd.f32 %v15726_v9, %v20750_v14  ;;  %10000 = vmatmul.mubr.bf16.gmra.mrb[192].mxu0 %v21012_v40  ;;  %10474 = vmatmul.mubr.bf16.gmra.mrb[164].mxu1 %v21012_v40 }
 0x99c   : > { %v9448_v18 = vsel %vm22492_vm1, %v9436_v43, %v9447_v26  ;;  %v9587_v45 = vsel %vm22494_vm9, %v9528_v27, 0  ;;  %v9299_v59 = vadd.f32 %v15729_v17, %v20750_v14  ;;  %vm22495_vm5 = vmmov %vm22492_vm1  ;;  %v9531_v36 = vsel %vm22496_vm4, %v9529_v61, %v9530_v62  ;;  %10007 = vmatprep.mubr.bf16.mxu0 %v21022_v49  ;;  %10481 = vmatprep.mubr.bf16.mxu1 %v21022_v49  ;;  %v22510_v17 = vld [vmem:[#allocation28_spill] sm:$0xff] }
 0x99d   : > { %v9440_v23 = vsel %vm22495_vm5, %v20945_v53, %v9439_v34  ;;  %vm22498_vm0 = vnez %v22497_v28  ;;  %9635 = vst.msk [vmem:[#allocation2 + $0x100] sm:$0xff] %vm22499_vm13, %v9587_v45  ;;  %v15732_v41 = vadd.f32 %v20742_v0, %v15196_v19  ;;  %vm22501_vm3 = vnez %v22500_v33  ;;  %vm22504_vm1 = vmmov %vm22499_vm13 }
 0x99e   : > { %v9573_v29 = vsel %vm22498_vm0, %v9448_v18, 0  ;;  %v9572_v50 = vsel %vm22501_vm3, %v9440_v23, 0  ;;  %vm22503_vm12 = vnez %v22502_v10  ;;  %v9333_v16 = vmax.f32 %v9301_v24, 0.0  ;;  %vm22505_vm9 = vmmov %vm22504_vm1 }
 0x99f   : > { %v9588_v53 = vsel %vm22503_vm12, %v9531_v36, 0  ;;  %9605 = vst.msk [vmem:[#allocation2 + $0x120] sm:$0xff] %vm22504_vm1, %v9573_v29  ;;  %v9331_v46 = vmax.f32 %v9299_v59, 0.0  ;;  %vm22506_vm5 = vmmov %vm22504_vm1  ;;  %v9304_v0 = vadd.f32 %v15732_v41, %v20750_v14  ;;  %v15735_v13 = vadd.f32 %v20736_v1, %v9219_v6  ;;  %v16497_v59 = vld [vmem:[%s21623_s1 + $0x988] sm:$0xff]   ;;  %v16498_v36 = vld [vmem:[%s21623_s1 + $0x990] sm:$0xff]  }
 0x9a0   : > { %9604 = vst.msk [vmem:[#allocation2 + $0x108] sm:$0xff] %vm22505_vm9, %v9572_v50  ;;  %v15738_v57 = vadd.f32 %v20745_v47, %v15197_v2  ;;  %v15741_v30 = vadd.f32 %v20739_v51, %v9222_v32  ;;  %v9351_v7 = vpack.c.bf16 %v9333_v16, %v9332_v21  ;;  %v9532_v12 = vor.u32 %v9530_v62, %v9442_v58  ;;  %vm22507_vm4 = vmmov %vm22504_vm1  ;;  %v21046_v62 = vld [vmem:[#allocation2 + $0x90] sm:$0xff] }
 0x9a1   : > { %9636 = vst.msk [vmem:[#allocation2 + $0x118] sm:$0xff] %vm22506_vm5, %v9588_v53  ;;  %v9350_v52 = vpack.c.bf16 %v9331_v46, %v9330_v11  ;;  %v9302_v22 = vadd.f32 %v15735_v13, %v20750_v14  ;;  %vm22508_vm0 = vmmov %vm22504_vm1  ;;  %v9336_v51 = vmax.f32 %v9304_v0, 0.0  ;;  %vm22509_vm13 = vsmask.f32 7424  ;;  %v21051_v21 = vld [vmem:[#allocation2 + $0xb0] sm:$0xff]  ;;  %v21074_v46 = vld [vmem:[#allocation2 + $0xa8] sm:$0xff] }
 0x9a2   : > { %v9305_v4 = vadd.f32 %v15738_v57, %v20750_v14  ;;  %v9303_v60 = vadd.f32 %v15741_v30, %v20750_v14  ;;  %v9458_v44 = vshrl.u32 %v9351_v7, 16  ;;  %v9461_v31 = vshll.u32 %v9351_v7, 16  ;;  %9623 = vst.msk [vmem:[#allocation2 + $0x158] sm:$0xff] %vm22507_vm4, %v9351_v7  ;;  %vm22512_vm12 = vmmov %vm22508_vm0  ;;  %v21080_v30 = vld [vmem:[#allocation2 + $0xc8] sm:$0xff]  ;;  %v16504_v13 = vld [vmem:[%s21623_s1 + $0xac0] sm:$0xff]  }
 0x9a3   : > { %v9450_v1 = vshrl.u32 %v9350_v52, 16  ;;  %v9453_v47 = vshll.u32 %v9350_v52, 16  ;;  %9622 = vst.msk [vmem:[#allocation2 + $0x140] sm:$0xff] %vm22508_vm0, %v9350_v52  ;;  %v9334_v35 = vmax.f32 %v9302_v22, 0.0  ;;  %10008 = vmatmul.mubr.bf16.gmra.mrb[196].mxu0 %v21046_v62  ;;  %10482 = vmatmul.mubr.bf16.gmra.mrb[168].mxu1 %v21046_v62  ;;  %vm22511_vm3 = vnez %v22510_v17  ;;  %vm22513_vm1 = vmmov %vm22508_vm0 }
 0x9a4   : > { %v9337_v20 = vmax.f32 %v9305_v4, 0.0  ;;  %v9335_v56 = vmax.f32 %v9303_v60, 0.0  ;;  %v9460_v54 = vrot.slane %v9458_v44, 7  ;;  %v9536_v58 = vrot.slane %v9461_v31, 1  ;;  %10015 = vmatprep.mubr.bf16.mxu0 %v21051_v21  ;;  %10489 = vmatprep.mubr.bf16.mxu1 %v21051_v21  ;;  %vm22516_vm4 = vmmov %vm22508_vm0 }
 0x9a5   : > { %v9452_v37 = vrot.slane %v9450_v1, 7  ;;  %v9533_v48 = vrot.slane %v9453_v47, 1  ;;  %vm22514_vm9 = vsmask.f32 256  ;;  %vm22517_vm0 = vmmov %vm22509_vm13 }
 0x9a6   : > { %v9353_v43 = vpack.c.bf16 %v9337_v20, %v9336_v51  ;;  %v9352_v14 = vpack.c.bf16 %v9335_v56, %v9334_v35  ;;  %v9463_v63 = vor.u32 %v9461_v31, %v9460_v54  ;;  %v9538_v15 = vor.u32 %v9536_v58, %v9458_v44  ;;  %vm22515_vm5 = vmmov %vm22514_vm9  ;;  %v22534_v51 = vld [vmem:[#allocation34_spill] sm:$0xff]  ;;  %v21102_v20 = vld [vmem:[#allocation2 + $0xc0] sm:$0xff] }
 0x9a7   : > { %v9455_v19 = vor.u32 %v9453_v47, %v9452_v37  ;;  %v9534_v26 = vsel %vm22509_vm13, %v9532_v12, %v9533_v48  ;;  %v9535_v9 = vor.u32 %v9533_v48, %v9450_v1  ;;  %vm22521_vm13 = vmmov %vm22513_vm1  ;;  %v21105_v56 = vld [vmem:[#allocation2 + $0xe0] sm:$0xff]  ;;  %v21121_v48 = vld [vmem:[#allocation2 + $0x110] sm:$0xff] }
 0x9a8   : > { %v9589_v6 = vsel %vm22511_vm3, %v9534_v26, 0  ;;  %v9474_v34 = vshrl.u32 %v9353_v43, 16  ;;  %v9477_v27 = vshll.u32 %v9353_v43, 16  ;;  %9625 = vst.msk [vmem:[#allocation2 + $0x188] sm:$0xff] %vm22512_vm12, %v9353_v43  ;;  %v9464_v11 = vsel %vm22515_vm5, %v9452_v37, %v9463_v63  ;;  %vm22522_vm3 = vmmov %vm22513_vm1  ;;  %v21118_v37 = vld [vmem:[#allocation2 + $0xf0] sm:$0xff]  ;;  %v21126_v43 = vld [vmem:[#allocation2 + $0x108] sm:$0xff] }
 0x9a9   : > { %9624 = vst.msk [vmem:[#allocation2 + $0x170] sm:$0xff] %vm22513_vm1, %v9352_v14  ;;  %v9456_v61 = vsel %vm22514_vm9, %v20992_v38, %v9455_v19  ;;  %v9466_v2 = vshrl.u32 %v9352_v14, 16  ;;  %v9469_v18 = vshll.u32 %v9352_v14, 16  ;;  %v9537_v5 = vsel %vm22517_vm0, %v9535_v9, %v9536_v58  ;;  %vm22523_vm12 = vmmov %vm22513_vm1  ;;  %v21113_v58 = vld [vmem:[#allocation2 + $0xf8] sm:$0xff]  ;;  %v21129_v14 = vld [vmem:[#allocation2 + $0x128] sm:$0xff]  ;;  %v14366_v63 = vpop.f32.mrb[144].mxu1 }
 0x9aa   : > { %9637 = vst.msk [vmem:[#allocation2 + $0x130] sm:$0xff] %vm22516_vm4, %v9589_v6  ;;  %v9574_v24 = vsel %vm22096_vm7, %v9456_v61, 0  ;;  %v9575_v32 = vsel %vm22211_vm15, %v9464_v11, 0  ;;  %v9476_v23 = vrot.slane %v9474_v34, 7  ;;  %v9590_v28 = vsel %vm22213_vm10, %v9537_v5, 0  ;;  %vm22524_vm7 = vmmov %vm22517_vm0  ;;  %v21138_v6 = vld [vmem:[#allocation2 + $0x120] sm:$0xff] }
 0x9ab   : > { %9606 = vst.msk [vmem:[#allocation2 + $0x138] sm:$0xff] %vm22521_vm13, %v9574_v24  ;;  %v9542_v38 = vrot.slane %v9477_v27, 1  ;;  %v9468_v29 = vrot.slane %v9466_v2, 7  ;;  %v9539_v41 = vrot.slane %v9469_v18, 1  ;;  %vm22525_vm15 = vmmov %vm22515_vm5  ;;  %10016 = vmatmul.mubr.bf16.gmra.mrb[200].mxu0 %v21074_v46  ;;  %10490 = vmatmul.mubr.bf16.gmra.mrb[172].mxu1 %v21074_v46  ;;  %v21149_v61 = vld [vmem:[#allocation2 + $0x158] sm:$0xff]  ;;  %v9647_v24 = vld [vmem:[#allocation2 + $0x28] sm:$0xff] }
 0x9ac   : > { %9607 = vst.msk [vmem:[#allocation2 + $0x150] sm:$0xff] %vm22522_vm3, %v9575_v32  ;;  %v9479_v33 = vor.u32 %v9477_v27, %v9476_v23  ;;  %vm22528_vm10 = vmmov %vm22515_vm5  ;;  %10023 = vmatprep.mubr.bf16.mxu0 %v21080_v30  ;;  %10497 = vmatprep.mubr.bf16.mxu1 %v21080_v30  ;;  %v21175_v32 = vld [vmem:[#allocation2 + $0x40] sm:$0xff]  ;;  %v21178_v23 = vld [vmem:[#allocation2 + $0x58] sm:$0xff] }
 0x9ad   : > { %9638 = vst.msk [vmem:[#allocation2 + $0x148] sm:$0xff] %vm22523_vm12, %v9590_v28  ;;  %v9544_v50 = vor.u32 %v9542_v38, %v9474_v34  ;;  %v9471_v10 = vor.u32 %v9469_v18, %v9468_v29  ;;  %v9540_v53 = vsel %vm22524_vm7, %v9538_v15, %v9539_v41  ;;  %v9541_v16 = vor.u32 %v9539_v41, %v9466_v2  ;;  %vm22529_vm1 = vmmov %vm22517_vm0  ;;  %v14367_v15 = vpop.f32.mrb[145].mxu1  ;;  %v21141_v34 = vld [vmem:[#allocation2 + $0x140] sm:$0xff]  ;;  %v16499_v28 = vld [vmem:[%s21623_s1 + $0x998] sm:$0xff]  }
 0x9ae   : > { %v9480_v0 = vsel %vm22525_vm15, %v9468_v29, %v9479_v33  ;;  %v9591_v57 = vsel %vm22105_vm6, %v9540_v53, 0  ;;  %vm22531_vm9 = vmmov %vm22522_vm3  ;;  %vm22535_vm6 = vnez %v22534_v51  ;;  %v21134_v19 = vadd.f32 %v14367_v15, %v14366_v63  ;;  %v14369_v26 = vpop.f32.mrb[146].mxu1  ;;  %v21191_v29 = vld [vmem:[#allocation2 + $0x88] sm:$0xff]  ;;  %v21200_v33 = vld [vmem:[#allocation2 + $0xa0] sm:$0xff] }
 0x9af   : > { %v9561_v52 = vsel %vm22221_vm8, %v9544_v50, 0  ;;  %v9472_v12 = vsel %vm22528_vm10, %v9460_v54, %v9471_v10  ;;  %v9543_v22 = vsel %vm22529_vm1, %v9541_v16, %v9542_v38  ;;  %v9577_v60 = vsel %vm22110_vm2, %v9480_v0, 0  ;;  %9639 = vst.msk [vmem:[#allocation2 + $0x160] sm:$0xff] %vm22531_vm9, %v9591_v57  ;;  %vm22536_vm8 = vmmov %vm22522_vm3  ;;  %v21110_v54 = vld [vmem:[#allocation2 + $0xd8] sm:$0xff]  ;;  %v14370_v9 = vpop.f32.mrb[147].mxu1  ;;  %v21165_v5 = vld [vmem:[#allocation2 + $0x188] sm:$0xff] }
 0x9b0   : > { %v9593_v31 = vsel %vm17515_vm14, %v9561_v52, 0  ;;  %v9576_v47 = vsel %vm22114_vm11, %v9472_v12, 0  ;;  %v9592_v35 = vsel %vm22535_vm6, %v9543_v22, 0  ;;  %9609 = vst.msk [vmem:[#allocation2 + $0x180] sm:$0xff] %vm22536_vm8, %v9577_v60  ;;  %vm22537_vm2 = vmmov %vm22522_vm3  ;;  %v21136_v17 = vadd.f32 %v14370_v9, %v14369_v26  ;;  %v21157_v2 = vld [vmem:[#allocation2 + $0x170] sm:$0xff]  ;;  %v16501_v41 = vld [vmem:[%s21623_s1 + $0x9a8] sm:$0xff]  }
 0x9b1   : > { %9641 = vst.msk [vmem:[#allocation2 + $0x190] sm:$0xff] %vm22537_vm2, %v9593_v31  ;;  %vm22538_vm5 = vmmov %vm22537_vm2  ;;  %v21188_v38 = vld [vmem:[#allocation2 + $0x70] sm:$0xff]  ;;  %v21203_v50 = vld [vmem:[#allocation2 + $0xb8] sm:$0xff] }
 0x9b2   : > { %9608 = vst.msk [vmem:[#allocation2 + $0x168] sm:$0xff] %vm22538_vm5, %v9576_v47  ;;  %vm22539_vm4 = vmmov %vm22537_vm2  ;;  %v21146_v27 = vld [vmem:[#allocation2 + $0x138] sm:$0xff]  ;;  %v16502_v10 = vld [vmem:[%s21623_s1 + $0x9b0] sm:$0xff]  }
 0x9b3   : > { %9640 = vst.msk [vmem:[#allocation2 + $0x178] sm:$0xff] %vm22539_vm4, %v9592_v35  ;;  %10024 = vmatmul.mubr.bf16.gmra.mrb[204].mxu0 %v21102_v20  ;;  %10498 = vmatmul.mubr.bf16.gmra.mrb[240].mxu1 %v21102_v20  ;;  %v21154_v11 = vld [vmem:[#allocation2 + $0x150] sm:$0xff]  ;;  %v16503_v53 = vld [vmem:[%s21623_s1 + $0x9b8] sm:$0xff]   ;;  %v21215_v0 = vld [vmem:[#allocation2 + $0xe8] sm:$0xff] }
 0x9b4   : > { %10031 = vmatprep.mubr.bf16.mxu0 %v21105_v56  ;;  %10505 = vmatprep.mubr.bf16.mxu1 %v21105_v56  ;;  %v21212_v16 = vld [vmem:[#allocation2 + $0xd0] sm:$0xff]  ;;  %v21221_v57 = vld [vmem:[#allocation2 + $0x100] sm:$0xff]  ;;  %v21224_v7 = vld [vmem:[#allocation2 + $0x118] sm:$0xff] }
 0x9b5   : > { %22540 = vst [vmem:[#allocation49_spill] sm:$0xff] %v21212_v16  ;;  %v21227_v52 = vld [vmem:[#allocation2 + $0x130] sm:$0xff]  ;;  %v21230_v12 = vld [vmem:[#allocation2 + $0x148] sm:$0xff]  ;;  %v21242_v44 = vld [vmem:[#allocation2] sm:$0xff] }
 0x9b6   : > { %v21233_v22 = vld [vmem:[#allocation2 + $0x160] sm:$0xff]  ;;  %v16506_v1 = vld [vmem:[%s21623_s1 + $0xac8] sm:$0xff]   ;;  %v16508_v51 = vld [vmem:[%s21623_s1 + $0xad0] sm:$0xff]  }
 0x9b7   : > { %v21169_v45 = vld [vmem:[#allocation2 + $0x180] sm:$0xff]  ;;  %22541 = vst [vmem:[#allocation37_spill] sm:$0xff] %v21233_v22  ;;  %v16507_v47 = vld [vmem:[%s21623_s1 + $0xa88] sm:$0xff]   ;;  %v16509_v35 = vld [vmem:[%s21623_s1 + $0xa90] sm:$0xff]  }
 0x9b8   : > { %v21239_v60 = vld [vmem:[#allocation2 + $0x190] sm:$0xff]  ;;  %v16505_v31 = vld [vmem:[%s21623_s1 + $0xa80] sm:$0xff]   ;;  %v16510_v63 = vld [vmem:[%s21623_s1 + $0xad8] sm:$0xff]  }
 0x9b9   : > { %v21162_v18 = vld [vmem:[#allocation2 + $0x168] sm:$0xff]  ;;  %22542 = vst [vmem:[#allocation38_spill] sm:$0xff] %v21239_v60  ;;  %v16511_v15 = vld [vmem:[%s21623_s1 + $0xa98] sm:$0xff]   ;;  %v16512_v26 = vld [vmem:[%s21623_s1 + $0xae0] sm:$0xff]  }
 0x9ba   : > { %v21236_v4 = vld [vmem:[#allocation2 + $0x178] sm:$0xff]  ;;  %v16513_v9 = vld [vmem:[%s21623_s1 + $0xaa0] sm:$0xff]  }
 0x9bb   : > { %10032 = vmatmul.mubr.bf16.gmra.mrb[208].mxu0 %v21110_v54  ;;  %10506 = vmatmul.mubr.bf16.gmra.mrb[244].mxu1 %v21110_v54 }
 0x9bc   : > { %10039 = vmatprep.mubr.bf16.mxu0 %v21113_v58  ;;  %10513 = vmatprep.mubr.bf16.mxu1 %v21113_v58 }
 0x9c3   : > { %10040 = vmatmul.mubr.bf16.gmra.mrb[212].mxu0 %v21118_v37  ;;  %10514 = vmatmul.mubr.bf16.gmra.mrb[248].mxu1 %v21118_v37 }
 0x9c4   : > { %10047 = vmatprep.mubr.bf16.mxu0 %v21121_v48  ;;  %10521 = vmatprep.mubr.bf16.mxu1 %v21121_v48 }
 0x9cb   : > { %10048 = vmatmul.mubr.bf16.gmra.mrb[216].mxu0 %v21126_v43  ;;  %10522 = vmatmul.mubr.bf16.gmra.mrb[252].mxu1 %v21126_v43 }
 0x9cc   : > { %10055 = vmatprep.mubr.bf16.mxu0 %v21129_v14  ;;  %10529 = vmatprep.mubr.bf16.mxu1 %v21129_v14 }
 0x9d3   : > { %10056 = vmatmul.mubr.bf16.gmra.mrb[220].mxu0 %v21138_v6  ;;  %10530 = vmatmul.mubr.bf16.gmra.mrb[0].mxu1 %v21138_v6 }
 0x9d4   : > { %10063 = vmatprep.mubr.bf16.mxu0 %v21141_v34  ;;  %10537 = vmatprep.mubr.bf16.mxu1 %v21141_v34 }
 0x9db   : > { %10064 = vmatmul.mubr.bf16.gmra.mrb[224].mxu0 %v21146_v27  ;;  %10538 = vmatmul.mubr.bf16.gmra.mrb[4].mxu1 %v21146_v27 }
 0x9dc   : > { %10071 = vmatprep.mubr.bf16.mxu0 %v21149_v61  ;;  %10545 = vmatprep.mubr.bf16.mxu1 %v21149_v61 }
 0x9e3   : > { %10072 = vmatmul.mubr.bf16.gmra.mrb[228].mxu0 %v21154_v11  ;;  %10546 = vmatmul.mubr.bf16.gmra.mrb[8].mxu1 %v21154_v11 }
 0x9e4   : > { %10079 = vmatprep.mubr.bf16.mxu0 %v21157_v2  ;;  %10553 = vmatprep.mubr.bf16.mxu1 %v21157_v2 }
 0x9eb   : > { %10080 = vmatmul.mubr.bf16.gmra.mrb[232].mxu0 %v21162_v18  ;;  %10554 = vmatmul.mubr.bf16.gmra.mrb[12].mxu1 %v21162_v18 }
 0x9ec   : > { %10087 = vmatprep.mubr.bf16.mxu0 %v21165_v5 }
 0x9f3   : > { %10088 = vmatmul.mubr.bf16.gmra.mrb[236].mxu0 %v21169_v45 }
 0x9f4   : > { %15214 = vmatprep.mubr.bf16.mxu0 %v9647_v24 }
 0x9fb   : > { %15215 = vmatmul.mubr.bf16.vlgmr.msra.gmra.mrb[240].mxu0 %v21175_v32 }
 0x9fc   : > { %15218 = vmatprep.mubr.bf16.mxu0 %v21178_v23  ;;  %15247 = vmatpush3.bf16.msra.mxu0 %v21000_v55  ;;  %v16500_v55 = vld [vmem:[%s21623_s1 + $0x9a0] sm:$0xff]  }
 0x9fd   : > { %15248 = vmatprep.subr.bf16.mxu0 %v16497_v59 }
 0xa00   : > { %15249 = vmatpush3.bf16.msra.mxu0 %v16497_v59  ;;  %v16515_v59 = vld [vmem:[%s21623_s1 + $0xaa8] sm:$0xff]  }
 0xa01   : > { %15250 = vmatprep.subr.bf16.mxu0 %v16498_v36 }
 0xa03   : > { %15219 = vmatmul.mubr.bf16.gmra.mrb[244].mxu0 %v21188_v38 }
 0xa04   : > { %15222 = vmatprep.mubr.bf16.mxu0 %v21191_v29  ;;  %15251 = vmatpush3.bf16.msra.mxu0 %v16498_v36  ;;  %v16516_v36 = vld [vmem:[%s21623_s1 + $0xaf0] sm:$0xff]  }
 0xa05   : > { %15252 = vmatprep.subr.bf16.mxu0 %v16499_v28 }
 0xa08   : > { %15253 = vmatpush3.bf16.msra.mxu0 %v16499_v28 }
 0xa09   : > { %15254 = vmatprep.subr.bf16.mxu0 %v16500_v55 }
 0xa0b   : > { %15223 = vmatmul.mubr.bf16.gmra.mrb[248].mxu0 %v21200_v33 }
 0xa0c   : > { %15226 = vmatprep.mubr.bf16.mxu0 %v21203_v50  ;;  %15255 = vmatpush3.bf16.msra.mxu0 %v16500_v55 }
 0xa0d   : > { %15256 = vmatprep.subr.bf16.mxu0 %v16501_v41 }
 0xa10   : > { %15257 = vmatpush3.bf16.msra.mxu0 %v16501_v41 }
 0xa11   : > { %15258 = vmatprep.subr.bf16.mxu0 %v16502_v10 }
 0xa13   : > { %15227 = vmatmul.mubr.bf16.gmra.mrb[252].mxu0 %v21212_v16 }
 0xa14   : > { %15230 = vmatprep.mubr.bf16.mxu0 %v21215_v0  ;;  %15259 = vmatpush3.bf16.msra.mxu0 %v16502_v10 }
 0xa15   : > { %15260 = vmatprep.subr.bf16.mxu0 %v16503_v53 }
 0xa18   : > { %15261 = vmatpush3.bf16.msra.mxu0 %v16503_v53 }
 0xa19   : > { %14486 = vmatprep.subr.bf16.mxu0 %v16504_v13 }
 0xa1b   : > { %15231 = vmatmul.mubr.bf16.gmra.mrb[0].mxu0 %v21221_v57 }
 0xa1c   : > { %15234 = vmatprep.mubr.bf16.mxu0 %v21224_v7 }
 0xa23   : > { %15235 = vmatmul.mubr.bf16.gmra.mrb[4].mxu0 %v21227_v52 }
 0xa24   : > { %15238 = vmatprep.mubr.bf16.mxu0 %v21230_v12 }
 0xa2b   : > { %15239 = vmatmul.mubr.bf16.gmra.mrb[8].mxu0 %v21233_v22 }
 0xa2c   : > { %15242 = vmatprep.mubr.bf16.mxu0 %v21236_v4 }
 0xa33   : > { %15243 = vmatmul.mubr.bf16.gmra.mrb[12].mxu0 %v21239_v60 }
 0xa34   : > { %15262 = vmatprep.mubr.bf16.mxu0 %v21242_v44 }
 0xa3b   : > { %15263 = vmatmul.mubr.bf16.vlgmr.msra.gmra.mrb[240].mxu0 %v9647_v24  ;;  %v16514_v24 = vld [vmem:[%s21623_s1 + $0xae8] sm:$0xff]  }
 0xa3c   : > { %15266 = vmatprep.mubr.bf16.mxu0 %v21175_v32  ;;  %14487 = vmatpush3.bf16.msra.mxu0 %v16505_v31  ;;  %v16517_v31 = vld [vmem:[%s21623_s1 + $0xab0] sm:$0xff]  }
 0xa3d   : > { %14488 = vmatprep.subr.bf16.mxu0 %v16506_v1 }
 0xa40   : > { %14489 = vmatpush3.bf16.msra.mxu0 %v16507_v47 }
 0xa41   : > { %14490 = vmatprep.subr.bf16.mxu0 %v16508_v51 }
 0xa43   : > { %15267 = vmatmul.mubr.bf16.gmra.mrb[244].mxu0 %v21178_v23 }
 0xa44   : > { %15270 = vmatprep.mubr.bf16.mxu0 %v21188_v38  ;;  %14491 = vmatpush3.bf16.msra.mxu0 %v16509_v35  ;;  %v16518_v35 = vld [vmem:[%s21623_s1 + $0xaf8] sm:$0xff]  }
 0xa45   : > { %14492 = vmatprep.subr.bf16.mxu0 %v16510_v63 }
 0xa48   : > { %14493 = vmatpush3.bf16.msra.mxu0 %v16511_v15 }
 0xa49   : > { %14494 = vmatprep.subr.bf16.mxu0 %v16512_v26 }
 0xa4b   : > { %15271 = vmatmul.mubr.bf16.gmra.mrb[248].mxu0 %v21191_v29  ;;  %v14230_v28 = vpop.f32.mrb[176].mxu0  ;;  %v14372_v55 = vpop.f32.mrb[148].mxu1 }
 0xa4c   : > { %15274 = vmatprep.mubr.bf16.mxu0 %v21200_v33  ;;  %14495 = vmatpush3.bf16.msra.mxu0 %v16513_v9  ;;  %v14231_v41 = vpop.f32.mrb[177].mxu0  ;;  %v14373_v53 = vpop.f32.mrb[149].mxu1 }
 0xa4d   : > { %14496 = vmatprep.subr.bf16.mxu0 %v16514_v24  ;;  %v14232_v10 = vadd.f32 %v14231_v41, %v14230_v28  ;;  %v14233_v13 = vpop.f32.mrb[178].mxu0  ;;  %v14374_v1 = vadd.f32 %v14373_v53, %v14372_v55  ;;  %v14375_v47 = vpop.f32.mrb[150].mxu1 }
 0xa4e   : > { %v14234_v51 = vpop.f32.mrb[179].mxu0  ;;  %v14376_v26 = vpop.f32.mrb[151].mxu1 }
 0xa4f   : > { %v21293_v63 = vadd.f32 %v21134_v19, %v14232_v10  ;;  %v14235_v15 = vadd.f32 %v14234_v51, %v14233_v13  ;;  %v14377_v9 = vadd.f32 %v14376_v26, %v14375_v47  ;;  %v21306_v19 = vld [vmem:[%s21623_s1 + $0xb00] sm:$0xff]  }
 0xa50   : > { %14497 = vmatpush3.bf16.msra.mxu0 %v16515_v59  ;;  %v16519_v59 = vld [vmem:[%s21623_s1 + $0xab8] sm:$0xff]  }
 0xa51   : > { %14498 = vmatprep.subr.bf16.mxu0 %v16516_v36  ;;  %22543 = vst [vmem:[#allocation39_spill] sm:$0xff] %v21293_v63  ;;  %v21297_v24 = vadd.f32 %v21136_v17, %v14235_v15 }
 0xa53   : > { %15275 = vmatmul.mubr.bf16.gmra.mrb[252].mxu0 %v21203_v50  ;;  %22544 = vst [vmem:[#allocation40_spill] sm:$0xff] %v21297_v24  ;;  %v14236_v36 = vpop.f32.mrb[180].mxu0  ;;  %v14378_v28 = vpop.f32.mrb[152].mxu1 }
 0xa54   : > { %15278 = vmatprep.mubr.bf16.mxu0 %v21212_v16  ;;  %14499 = vmatpush3.bf16.msra.mxu0 %v16517_v31  ;;  %v14237_v55 = vpop.f32.mrb[181].mxu0  ;;  %v14379_v10 = vpop.f32.mrb[153].mxu1 }
 0xa55   : > { %14500 = vmatprep.subr.bf16.mxu0 %v16518_v35  ;;  %v14238_v41 = vadd.f32 %v14237_v55, %v14236_v36  ;;  %v14239_v17 = vpop.f32.mrb[182].mxu0  ;;  %v14380_v53 = vadd.f32 %v14379_v10, %v14378_v28  ;;  %v14381_v13 = vpop.f32.mrb[154].mxu1 }
 0xa56   : > { %v14240_v31 = vpop.f32.mrb[183].mxu0  ;;  %v14382_v35 = vpop.f32.mrb[155].mxu1 }
 0xa57   : > { %v21309_v47 = vadd.f32 %v14374_v1, %v14238_v41  ;;  %v14241_v51 = vadd.f32 %v14240_v31, %v14239_v17  ;;  %v14383_v15 = vadd.f32 %v14382_v35, %v14381_v13 }
 0xa58   : > { %14501 = vmatpush3.bf16.msra.mxu0 %v16519_v59 }
 0xa59   : > { %15294 = vmatprep.subr.bf16.mxu0 %v21306_v19  ;;  %22545 = vst [vmem:[#allocation41_spill] sm:$0xff] %v21309_v47  ;;  %v21312_v26 = vadd.f32 %v14377_v9, %v14241_v51 }
 0xa5b   : > { %15279 = vmatmul.mubr.bf16.gmra.mrb[0].mxu0 %v21215_v0  ;;  %22546 = vst [vmem:[#allocation42_spill] sm:$0xff] %v21312_v26  ;;  %v14242_v36 = vpop.f32.mrb[184].mxu0  ;;  %v14384_v55 = vpop.f32.mrb[156].mxu1 }
 0xa5c   : > { %15282 = vmatprep.mubr.bf16.mxu0 %v21221_v57  ;;  %v14243_v24 = vpop.f32.mrb[185].mxu0  ;;  %v14385_v28 = vpop.f32.mrb[157].mxu1 }
 0xa5d   : > { %v14244_v59 = vadd.f32 %v14243_v24, %v14242_v36  ;;  %v14245_v10 = vpop.f32.mrb[186].mxu0  ;;  %v14386_v63 = vadd.f32 %v14385_v28, %v14384_v55  ;;  %v14387_v60 = vpop.f32.mrb[158].mxu1 }
 0xa5e   : > { %v14246_v16 = vpop.f32.mrb[187].mxu0  ;;  %v14388_v17 = vpop.f32.mrb[159].mxu1 }
 0xa5f   : > { %v21315_v1 = vadd.f32 %v14380_v53, %v14244_v59  ;;  %v14247_v41 = vadd.f32 %v14246_v16, %v14245_v10  ;;  %v14389_v13 = vadd.f32 %v14388_v17, %v14387_v60 }
 0xa61   : > { %22547 = vst [vmem:[#allocation43_spill] sm:$0xff] %v21315_v1  ;;  %v21318_v9 = vadd.f32 %v14383_v15, %v14247_v41 }
 0xa63   : > { %15283 = vmatmul.mubr.bf16.gmra.mrb[4].mxu0 %v21224_v7  ;;  %22548 = vst [vmem:[#allocation44_spill] sm:$0xff] %v21318_v9  ;;  %v14248_v31 = vpop.f32.mrb[188].mxu0  ;;  %v14390_v51 = vpop.f32.mrb[160].mxu1 }
 0xa64   : > { %15286 = vmatprep.mubr.bf16.mxu0 %v21227_v52  ;;  %v14249_v35 = vpop.f32.mrb[189].mxu0  ;;  %v14391_v36 = vpop.f32.mrb[161].mxu1 }
 0xa65   : > { %v14250_v24 = vadd.f32 %v14249_v35, %v14248_v31  ;;  %v14251_v26 = vpop.f32.mrb[190].mxu0  ;;  %v14392_v55 = vadd.f32 %v14391_v36, %v14390_v51  ;;  %v14393_v28 = vpop.f32.mrb[162].mxu1 }
 0xa66   : > { %v14252_v47 = vpop.f32.mrb[191].mxu0  ;;  %v14394_v59 = vpop.f32.mrb[163].mxu1 }
 0xa67   : > { %v21321_v53 = vadd.f32 %v14386_v63, %v14250_v24  ;;  %v14253_v16 = vadd.f32 %v14252_v47, %v14251_v26  ;;  %v14395_v60 = vadd.f32 %v14394_v59, %v14393_v28 }
 0xa69   : > { %22549 = vst [vmem:[#allocation45_spill] sm:$0xff] %v21321_v53  ;;  %v21324_v15 = vadd.f32 %v14389_v13, %v14253_v16  ;;  %v10724_v13 = vld [vmem:[#allocation2 + $0x38] sm:$0xff] }
 0xa6b   : > { %15287 = vmatmul.mubr.bf16.gmra.mrb[8].mxu0 %v21230_v12  ;;  %22550 = vst [vmem:[#allocation46_spill] sm:$0xff] %v21324_v15 }
 0xa6c   : > { %15290 = vmatprep.mubr.bf16.mxu0 %v21233_v22 }
 0xa6e   : > { %v14254_v10 = vpop.f32.mrb[192].mxu0  ;;  %v14396_v41 = vpop.f32.mrb[164].mxu1 }
 0xa6f   : > { %v14255_v17 = vpop.f32.mrb[193].mxu0  ;;  %v14397_v35 = vpop.f32.mrb[165].mxu1 }
 0xa70   : > { %v14256_v31 = vadd.f32 %v14255_v17, %v14254_v10  ;;  %v14257_v9 = vpop.f32.mrb[194].mxu0  ;;  %v14398_v51 = vadd.f32 %v14397_v35, %v14396_v41  ;;  %v14399_v36 = vpop.f32.mrb[166].mxu1 }
 0xa71   : > { %v14258_v1 = vpop.f32.mrb[195].mxu0  ;;  %v14400_v26 = vpop.f32.mrb[167].mxu1 }
 0xa72   : > { %v21327_v63 = vadd.f32 %v14392_v55, %v14256_v31  ;;  %v14259_v47 = vadd.f32 %v14258_v1, %v14257_v9  ;;  %v14401_v24 = vadd.f32 %v14400_v26, %v14399_v36  ;;  %v16521_v1 = vld [vmem:[%s21623_s1 + $0xb08] sm:$0xff]   ;;  %v10727_v36 = vld [vmem:[#allocation2 + $0x50] sm:$0xff] }
 0xa73   : > { %15291 = vmatmul.mubr.bf16.gmra.mrb[12].mxu0 %v21236_v4 }
 0xa74   : > { %v21330_v28 = vadd.f32 %v14395_v60, %v14259_v47  ;;  %10996 = vmatprep.mubr.bf16.mxu0 %v10724_v13 }
 0xa76   : > { %v14260_v16 = vpop.f32.mrb[196].mxu0  ;;  %v14402_v59 = vpop.f32.mrb[168].mxu1 }
 0xa77   : > { %v14261_v15 = vpop.f32.mrb[197].mxu0  ;;  %v14403_v17 = vpop.f32.mrb[169].mxu1 }
 0xa78   : > { %v14262_v10 = vadd.f32 %v14261_v15, %v14260_v16  ;;  %v14263_v53 = vpop.f32.mrb[198].mxu0  ;;  %v14404_v41 = vadd.f32 %v14403_v17, %v14402_v59  ;;  %v14405_v35 = vpop.f32.mrb[170].mxu1  ;;  %v16522_v15 = vld [vmem:[%s21623_s1 + $0xb10] sm:$0xff]  }
 0xa79   : > { %v14264_v22 = vpop.f32.mrb[199].mxu0  ;;  %v14406_v31 = vpop.f32.mrb[171].mxu1 }
 0xa7a   : > { %v21335_v9 = vadd.f32 %v14398_v51, %v14262_v10  ;;  %v14265_v55 = vadd.f32 %v14264_v22, %v14263_v53  ;;  %v14407_v60 = vadd.f32 %v14406_v31, %v14405_v35 }
 0xa7b   : > { %10997 = vmatmul.mubr.bf16.vlgmr.msra.gmra.mrb[48].mxu0 %v20863_v42 }
 0xa7c   : > { %v21338_v47 = vadd.f32 %v14401_v24, %v14265_v55  ;;  %11004 = vmatprep.mubr.bf16.mxu0 %v10727_v36  ;;  %15295 = vmatpush3.bf16.msra.mxu0 %v21306_v19  ;;  %v16523_v19 = vld [vmem:[%s21623_s1 + $0xb18] sm:$0xff]  }
 0xa7d   : > { %15296 = vmatprep.subr.bf16.mxu0 %v16521_v1 }
 0xa7e   : > { %v14266_v26 = vpop.f32.mrb[200].mxu0  ;;  %v14408_v13 = vpop.f32.mrb[172].mxu1 }
 0xa7f   : > { %v14267_v51 = vpop.f32.mrb[201].mxu0  ;;  %v14409_v22 = vpop.f32.mrb[173].mxu1 }
 0xa80   : > { %v14268_v16 = vadd.f32 %v14267_v51, %v14266_v26  ;;  %v14269_v53 = vpop.f32.mrb[202].mxu0  ;;  %15297 = vmatpush3.bf16.msra.mxu0 %v16521_v1  ;;  %v14410_v59 = vadd.f32 %v14409_v22, %v14408_v13  ;;  %v14411_v42 = vpop.f32.mrb[174].mxu1  ;;  %v16524_v1 = vld [vmem:[%s21623_s1 + $0xb20] sm:$0xff]  }
 0xa81   : > { %v14270_v10 = vpop.f32.mrb[203].mxu0  ;;  %15298 = vmatprep.subr.bf16.mxu0 %v16522_v15  ;;  %v14412_v35 = vpop.f32.mrb[175].mxu1 }
 0xa82   : > { %v21347_v24 = vadd.f32 %v14404_v41, %v14268_v16  ;;  %v14271_v17 = vadd.f32 %v14270_v10, %v14269_v53  ;;  %v14413_v55 = vadd.f32 %v14412_v35, %v14411_v42 }
 0xa83   : > { %11005 = vmatmul.mubr.bf16.gmra.mrb[52].mxu0 %v20912_v25 }
 0xa84   : > { %v21350_v31 = vadd.f32 %v14407_v60, %v14271_v17  ;;  %11012 = vmatprep.mubr.bf16.mxu0 %v20932_v8  ;;  %15299 = vmatpush3.bf16.msra.mxu0 %v16522_v15  ;;  %v16525_v8 = vld [vmem:[%s21623_s1 + $0xb28] sm:$0xff]  }
 0xa85   : > { %15300 = vmatprep.subr.bf16.mxu0 %v16523_v19 }
 0xa86   : > { %v14272_v36 = vpop.f32.mrb[204].mxu0  ;;  %v14414_v26 = vpop.f32.mrb[240].mxu1 }
 0xa87   : > { %v14273_v13 = vpop.f32.mrb[205].mxu0  ;;  %v14415_v51 = vpop.f32.mrb[241].mxu1 }
 0xa88   : > { %v14274_v41 = vadd.f32 %v14273_v13, %v14272_v36  ;;  %v14275_v16 = vpop.f32.mrb[206].mxu0  ;;  %15301 = vmatpush3.bf16.msra.mxu0 %v16523_v19  ;;  %v14416_v22 = vadd.f32 %v14415_v51, %v14414_v26  ;;  %v14417_v53 = vpop.f32.mrb[242].mxu1  ;;  %v16526_v19 = vld [vmem:[%s21623_s1 + $0xb30] sm:$0xff]  }
 0xa89   : > { %v14276_v25 = vpop.f32.mrb[207].mxu0  ;;  %15302 = vmatprep.subr.bf16.mxu0 %v16524_v1  ;;  %v14418_v42 = vpop.f32.mrb[243].mxu1 }
 0xa8a   : > { %v21359_v60 = vadd.f32 %v14410_v59, %v14274_v41  ;;  %v14277_v15 = vadd.f32 %v14276_v25, %v14275_v16  ;;  %v14419_v10 = vadd.f32 %v14418_v42, %v14417_v53 }
 0xa8b   : > { %11013 = vmatmul.mubr.bf16.gmra.mrb[56].mxu0 %v20959_v39 }
 0xa8c   : > { %v21362_v17 = vadd.f32 %v14413_v55, %v14277_v15  ;;  %11020 = vmatprep.mubr.bf16.mxu0 %v20964_v3  ;;  %15303 = vmatpush3.bf16.msra.mxu0 %v16524_v1  ;;  %v16527_v3 = vld [vmem:[%s21623_s1 + $0xb38] sm:$0xff]  }
 0xa8d   : > { %15304 = vmatprep.subr.bf16.mxu0 %v16525_v8 }
 0xa8e   : > { %v14278_v35 = vpop.f32.mrb[208].mxu0  ;;  %v14420_v36 = vpop.f32.mrb[244].mxu1 }
 0xa8f   : > { %v14279_v26 = vpop.f32.mrb[209].mxu0  ;;  %v14421_v13 = vpop.f32.mrb[245].mxu1 }
 0xa90   : > { %v14280_v59 = vadd.f32 %v14279_v26, %v14278_v35  ;;  %v14281_v41 = vpop.f32.mrb[210].mxu0  ;;  %15305 = vmatpush3.bf16.msra.mxu0 %v16525_v8  ;;  %v14422_v51 = vadd.f32 %v14421_v13, %v14420_v36  ;;  %v14423_v16 = vpop.f32.mrb[246].mxu1 }
 0xa91   : > { %v14282_v39 = vpop.f32.mrb[211].mxu0  ;;  %15306 = vmatprep.subr.bf16.mxu0 %v16526_v19  ;;  %v14424_v53 = vpop.f32.mrb[247].mxu1 }
 0xa92   : > { %v21371_v55 = vadd.f32 %v14416_v22, %v14280_v59  ;;  %v14283_v1 = vadd.f32 %v14282_v39, %v14281_v41  ;;  %v14425_v25 = vadd.f32 %v14424_v53, %v14423_v16 }
 0xa93   : > { %11021 = vmatmul.mubr.bf16.gmra.mrb[60].mxu0 %v21012_v40 }
 0xa94   : > { %v21374_v15 = vadd.f32 %v14419_v10, %v14283_v1  ;;  %11028 = vmatprep.mubr.bf16.mxu0 %v21022_v49  ;;  %15307 = vmatpush3.bf16.msra.mxu0 %v16526_v19 }
 0xa95   : > { %15308 = vmatprep.subr.bf16.mxu0 %v16527_v3 }
 0xa96   : > { %22551 = vst [vmem:[#allocation47_spill] sm:$0xff] %v21374_v15  ;;  %v14284_v8 = vpop.f32.mrb[212].mxu0  ;;  %v14426_v42 = vpop.f32.mrb[248].mxu1 }
 0xa97   : > { %v14285_v35 = vpop.f32.mrb[213].mxu0  ;;  %v14427_v26 = vpop.f32.mrb[249].mxu1 }
 0xa98   : > { %v14286_v36 = vadd.f32 %v14285_v35, %v14284_v8  ;;  %v14287_v13 = vpop.f32.mrb[214].mxu0  ;;  %15309 = vmatpush3.bf16.msra.mxu0 %v16527_v3  ;;  %v14428_v22 = vadd.f32 %v14427_v26, %v14426_v42  ;;  %v14429_v59 = vpop.f32.mrb[250].mxu1 }
 0xa99   : > { %v14288_v41 = vpop.f32.mrb[215].mxu0  ;;  %v14430_v40 = vpop.f32.mrb[251].mxu1 }
 0xa9a   : > { %v21377_v39 = vadd.f32 %v14422_v51, %v14286_v36  ;;  %v14289_v16 = vadd.f32 %v14288_v41, %v14287_v13  ;;  %v14431_v10 = vadd.f32 %v14430_v40, %v14429_v59 }
 0xa9b   : > { %11029 = vmatmul.mubr.bf16.gmra.mrb[64].mxu0 %v21046_v62 }
 0xa9c   : > { %v21380_v49 = vadd.f32 %v14425_v25, %v14289_v16  ;;  %11036 = vmatprep.mubr.bf16.mxu0 %v21051_v21 }
 0xa9e   : > { %v14290_v19 = vpop.f32.mrb[216].mxu0  ;;  %v14432_v1 = vpop.f32.mrb[252].mxu1 }
 0xa9f   : > { %v14291_v53 = vpop.f32.mrb[217].mxu0  ;;  %v14433_v35 = vpop.f32.mrb[253].mxu1 }
 0xaa0   : > { %v14292_v8 = vadd.f32 %v14291_v53, %v14290_v19  ;;  %v14293_v3 = vpop.f32.mrb[218].mxu0  ;;  %v14434_v42 = vadd.f32 %v14433_v35, %v14432_v1  ;;  %v14435_v26 = vpop.f32.mrb[254].mxu1 }
 0xaa1   : > { %v14294_v15 = vpop.f32.mrb[219].mxu0  ;;  %v14436_v13 = vpop.f32.mrb[255].mxu1 }
 0xaa2   : > { %v21383_v51 = vadd.f32 %v14428_v22, %v14292_v8  ;;  %v14295_v36 = vadd.f32 %v14294_v15, %v14293_v3  ;;  %v14437_v59 = vadd.f32 %v14436_v13, %v14435_v26 }
 0xaa3   : > { %11037 = vmatmul.mubr.bf16.gmra.mrb[68].mxu0 %v21074_v46 }
 0xaa4   : > { %v21386_v62 = vadd.f32 %v14431_v10, %v14295_v36  ;;  %11044 = vmatprep.mubr.bf16.mxu0 %v21080_v30 }
 0xaa6   : > { %v14296_v21 = vpop.f32.mrb[220].mxu0  ;;  %v14438_v25 = vpop.f32.mrb[0].mxu1 }
 0xaa7   : > { %v14297_v41 = vpop.f32.mrb[221].mxu0  ;;  %v14439_v40 = vpop.f32.mrb[1].mxu1 }
 0xaa8   : > { %v14298_v16 = vadd.f32 %v14297_v41, %v14296_v21  ;;  %v14299_v19 = vpop.f32.mrb[222].mxu0  ;;  %v14440_v1 = vadd.f32 %v14439_v40, %v14438_v25  ;;  %v14441_v53 = vpop.f32.mrb[2].mxu1 }
 0xaa9   : > { %v14300_v35 = vpop.f32.mrb[223].mxu0  ;;  %v14442_v8 = vpop.f32.mrb[3].mxu1 }
 0xaaa   : > { %v21389_v22 = vadd.f32 %v14434_v42, %v14298_v16  ;;  %v14301_v15 = vadd.f32 %v14300_v35, %v14299_v19  ;;  %v14443_v3 = vadd.f32 %v14442_v8, %v14441_v53 }
 0xaab   : > { %11045 = vmatmul.mubr.bf16.gmra.mrb[72].mxu0 %v21102_v20 }
 0xaac   : > { %v21392_v46 = vadd.f32 %v14437_v59, %v14301_v15  ;;  %11052 = vmatprep.mubr.bf16.mxu0 %v21105_v56 }
 0xaae   : > { %v14302_v30 = vpop.f32.mrb[224].mxu0  ;;  %v14444_v10 = vpop.f32.mrb[4].mxu1 }
 0xaaf   : > { %v14303_v26 = vpop.f32.mrb[225].mxu0  ;;  %v14445_v13 = vpop.f32.mrb[5].mxu1 }
 0xab0   : > { %v14304_v36 = vadd.f32 %v14303_v26, %v14302_v30  ;;  %v14305_v21 = vpop.f32.mrb[226].mxu0  ;;  %v14446_v25 = vadd.f32 %v14445_v13, %v14444_v10  ;;  %v14447_v41 = vpop.f32.mrb[6].mxu1 }
 0xab1   : > { %v14306_v40 = vpop.f32.mrb[227].mxu0  ;;  %v14448_v19 = vpop.f32.mrb[7].mxu1 }
 0xab2   : > { %v21395_v42 = vadd.f32 %v14440_v1, %v14304_v36  ;;  %v14307_v16 = vadd.f32 %v14306_v40, %v14305_v21  ;;  %v14449_v53 = vadd.f32 %v14448_v19, %v14447_v41 }
 0xab3   : > { %11053 = vmatmul.mubr.bf16.gmra.mrb[76].mxu0 %v21110_v54 }
 0xab4   : > { %v21398_v20 = vadd.f32 %v14443_v3, %v14307_v16  ;;  %11060 = vmatprep.mubr.bf16.mxu0 %v21113_v58 }
 0xab6   : > { %v14308_v56 = vpop.f32.mrb[228].mxu0  ;;  %v14450_v59 = vpop.f32.mrb[8].mxu1 }
 0xab7   : > { %v14309_v35 = vpop.f32.mrb[229].mxu0  ;;  %v14451_v8 = vpop.f32.mrb[9].mxu1 }
 0xab8   : > { %v14310_v15 = vadd.f32 %v14309_v35, %v14308_v56  ;;  %v14311_v30 = vpop.f32.mrb[230].mxu0  ;;  %v14452_v10 = vadd.f32 %v14451_v8, %v14450_v59  ;;  %v14453_v26 = vpop.f32.mrb[10].mxu1 }
 0xab9   : > { %v14312_v13 = vpop.f32.mrb[231].mxu0  ;;  %v14454_v21 = vpop.f32.mrb[11].mxu1 }
 0xaba   : > { %v21401_v1 = vadd.f32 %v14446_v25, %v14310_v15  ;;  %v14313_v36 = vadd.f32 %v14312_v13, %v14311_v30  ;;  %v14455_v41 = vadd.f32 %v14454_v21, %v14453_v26 }
 0xabb   : > { %11061 = vmatmul.mubr.bf16.gmra.mrb[80].mxu0 %v21118_v37 }
 0xabc   : > { %v21404_v54 = vadd.f32 %v14449_v53, %v14313_v36  ;;  %11068 = vmatprep.mubr.bf16.mxu0 %v21121_v48 }
 0xabe   : > { %v14314_v58 = vpop.f32.mrb[232].mxu0  ;;  %v14456_v3 = vpop.f32.mrb[12].mxu1 }
 0xabf   : > { %v14315_v40 = vpop.f32.mrb[233].mxu0  ;;  %v14457_v19 = vpop.f32.mrb[13].mxu1 }
 0xac0   : > { %v14316_v16 = vadd.f32 %v14315_v40, %v14314_v58  ;;  %v14317_v56 = vpop.f32.mrb[234].mxu0  ;;  %v14458_v59 = vadd.f32 %v14457_v19, %v14456_v3  ;;  %v14459_v35 = vpop.f32.mrb[14].mxu1 }
 0xac1   : > { %v14318_v8 = vpop.f32.mrb[235].mxu0  ;;  %v14460_v30 = vpop.f32.mrb[15].mxu1 }
 0xac2   : > { %v21407_v25 = vadd.f32 %v14452_v10, %v14316_v16  ;;  %v14319_v15 = vadd.f32 %v14318_v8, %v14317_v56  ;;  %v14461_v26 = vadd.f32 %v14460_v30, %v14459_v35  ;;  %v22560_v8 = vld [vmem:[#allocation44_spill] sm:$0xff] }
 0xac3   : > { %11069 = vmatmul.mubr.bf16.gmra.mrb[84].mxu0 %v21126_v43  ;;  %v22552_v43 = vld [vmem:[#allocation49_spill] sm:$0xff] }
 0xac4   : > { %v21410_v37 = vadd.f32 %v14455_v41, %v14319_v15  ;;  %11076 = vmatprep.mubr.bf16.mxu0 %v21129_v14  ;;  %v22553_v14 = vld [vmem:[#allocation37_spill] sm:$0xff] }
 0xac6   : > { %v14320_v48 = vpop.f32.mrb[236].mxu0 }
 0xac7   : > { %v14321_v53 = vpop.f32.mrb[237].mxu0 }
 0xac8   : > { %v14322_v13 = vadd.f32 %v14321_v53, %v14320_v48  ;;  %v14323_v36 = vpop.f32.mrb[238].mxu0 }
 0xac9   : > { %v14324_v21 = vpop.f32.mrb[239].mxu0 }
 0xaca   : > { %v21413_v58 = vadd.f32 %v14458_v59, %v14322_v13  ;;  %v14325_v3 = vadd.f32 %v14324_v21, %v14323_v36  ;;  %v22559_v59 = vld [vmem:[#allocation43_spill] sm:$0xff]  ;;  %v22561_v21 = vld [vmem:[#allocation45_spill] sm:$0xff] }
 0xacb   : > { %11077 = vmatmul.mubr.bf16.gmra.mrb[88].mxu0 %v21138_v6  ;;  %v22554_v6 = vld [vmem:[#allocation38_spill] sm:$0xff] }
 0xacc   : > { %v21416_v10 = vadd.f32 %v14461_v26, %v14325_v3  ;;  %11084 = vmatprep.mubr.bf16.mxu0 %v21141_v34 }
 0xad3   : > { %11085 = vmatmul.mubr.bf16.gmra.mrb[92].mxu0 %v21146_v27 }
 0xad4   : > { %11092 = vmatprep.mubr.bf16.mxu0 %v21149_v61 }
 0xadb   : > { %11093 = vmatmul.mubr.bf16.gmra.mrb[96].mxu0 %v21154_v11 }
 0xadc   : > { %11100 = vmatprep.mubr.bf16.mxu0 %v21157_v2 }
 0xae3   : > { %11101 = vmatmul.mubr.bf16.gmra.mrb[100].mxu0 %v21162_v18 }
 0xae4   : > { %11108 = vmatprep.mubr.bf16.mxu0 %v21165_v5  ;;  %v22555_v5 = vld [vmem:[#allocation39_spill] sm:$0xff] }
 0xaeb   : > { %11109 = vmatmul.mubr.bf16.gmra.mrb[104].mxu0 %v21169_v45 }
 0xaec   : > { %11116 = vmatprep.mubr.bf16.mxu0 %v21242_v44 }
 0xaf3   : > { %11117 = vmatmul.mubr.bf16.gmra.mrb[108].mxu0 %v21242_v44 }
 0xaf4   : > { %15310 = vmatprep.mubr.bf16.mxu0 %v21175_v32  ;;  %v22556_v32 = vld [vmem:[#allocation40_spill] sm:$0xff] }
 0xafb   : > { %15311 = vmatmul.mubr.bf16.vlgmr.msra.gmra.mrb[240].mxu0 %v21178_v23 }
 0xafc   : > { %15314 = vmatprep.mubr.bf16.mxu0 %v21188_v38 }
 0xb03   : > { %15315 = vmatmul.mubr.bf16.gmra.mrb[244].mxu0 %v21191_v29 }
 0xb04   : > { %15318 = vmatprep.mubr.bf16.mxu0 %v21200_v33 }
 0xb0b   : > { %15319 = vmatmul.mubr.bf16.gmra.mrb[248].mxu0 %v21203_v50 }
 0xb0c   : > { %15322 = vmatprep.mubr.bf16.mxu0 %v22552_v43  ;;  %v22562_v43 = vld [vmem:[#allocation46_spill] sm:$0xff] }
 0xb13   : > { %15323 = vmatmul.mubr.bf16.gmra.mrb[252].mxu0 %v21215_v0 }
 0xb14   : > { %15326 = vmatprep.mubr.bf16.mxu0 %v21221_v57 }
 0xb1b   : > { %15327 = vmatmul.mubr.bf16.gmra.mrb[0].mxu0 %v21224_v7  ;;  %v22557_v7 = vld [vmem:[#allocation41_spill] sm:$0xff] }
 0xb1c   : > { %15330 = vmatprep.mubr.bf16.mxu0 %v21227_v52 }
 0xb23   : > { %15331 = vmatmul.mubr.bf16.gmra.mrb[4].mxu0 %v21230_v12  ;;  %v22558_v12 = vld [vmem:[#allocation42_spill] sm:$0xff] }
 0xb24   : > { %15334 = vmatprep.mubr.bf16.mxu0 %v22553_v14 }
 0xb2b   : > { %15335 = vmatmul.mubr.bf16.gmra.mrb[8].mxu0 %v21236_v4 }
 0xb2c   : > { %15338 = vmatprep.mubr.bf16.mxu0 %v22554_v6 }
 0xb33   : > { %15339 = vmatmul.mubr.bf16.gmra.mrb[12].mxu0 %v21242_v44 }
 0xb4e   : > { %v14502_v34 = vpop.f32.mrb[48].mxu0 }
 0xb4f   : > { %v14503_v27 = vpop.f32.mrb[49].mxu0 }
 0xb50   : > { %v14504_v61 = vadd.f32 %v14503_v27, %v14502_v34  ;;  %v14505_v11 = vpop.f32.mrb[50].mxu0 }
 0xb51   : > { %v14506_v2 = vpop.f32.mrb[51].mxu0 }
 0xb52   : > { %v14507_v18 = vadd.f32 %v14506_v2, %v14505_v11  ;;  %v21445_v45 = vadd.f32 %v22555_v5, %v14504_v61 }
 0xb54   : > { %v21448_v23 = vadd.f32 %v22556_v32, %v14507_v18 }
 0xb56   : > { %v14508_v38 = vpop.f32.mrb[52].mxu0 }
 0xb57   : > { %v14509_v29 = vpop.f32.mrb[53].mxu0 }
 0xb58   : > { %v14510_v33 = vadd.f32 %v14509_v29, %v14508_v38  ;;  %v14511_v50 = vpop.f32.mrb[54].mxu0 }
 0xb59   : > { %v14512_v0 = vpop.f32.mrb[55].mxu0 }
 0xb5a   : > { %v14513_v57 = vadd.f32 %v14512_v0, %v14511_v50  ;;  %v21451_v52 = vadd.f32 %v22557_v7, %v14510_v33 }
 0xb5c   : > { %v21454_v4 = vadd.f32 %v22558_v12, %v14513_v57 }
 0xb5e   : > { %v14514_v44 = vpop.f32.mrb[56].mxu0 }
 0xb5f   : > { %v14515_v41 = vpop.f32.mrb[57].mxu0 }
 0xb60   : > { %v14516_v40 = vadd.f32 %v14515_v41, %v14514_v44  ;;  %v14517_v16 = vpop.f32.mrb[58].mxu0 }
 0xb61   : > { %v14518_v19 = vpop.f32.mrb[59].mxu0 }
 0xb62   : > { %v14519_v56 = vadd.f32 %v14518_v19, %v14517_v16  ;;  %v21457_v35 = vadd.f32 %v22559_v59, %v14516_v40 }
 0xb64   : > { %v21460_v15 = vadd.f32 %v22560_v8, %v14519_v56 }
 0xb66   : > { %v14520_v30 = vpop.f32.mrb[60].mxu0 }
 0xb67   : > { %v14521_v26 = vpop.f32.mrb[61].mxu0 }
 0xb68   : > { %v14522_v48 = vadd.f32 %v14521_v26, %v14520_v30  ;;  %v14523_v53 = vpop.f32.mrb[62].mxu0 }
 0xb69   : > { %v14524_v13 = vpop.f32.mrb[63].mxu0 }
 0xb6a   : > { %v14525_v36 = vadd.f32 %v14524_v13, %v14523_v53  ;;  %v21463_v3 = vadd.f32 %v22561_v21, %v14522_v48 }
 0xb6c   : > { %v21466_v14 = vadd.f32 %v22562_v43, %v14525_v36 }
 0xb6e   : > { %v14526_v6 = vpop.f32.mrb[64].mxu0 }
 0xb6f   : > { %v14527_v34 = vpop.f32.mrb[65].mxu0 }
 0xb70   : > { %v14528_v27 = vadd.f32 %v14527_v34, %v14526_v6  ;;  %v14529_v61 = vpop.f32.mrb[66].mxu0  ;;  %v22563_v6 = vld [vmem:[#allocation47_spill] sm:$0xff] }
 0xb71   : > { %v14530_v11 = vpop.f32.mrb[67].mxu0 }
 0xb72   : > { %v14531_v2 = vadd.f32 %v14530_v11, %v14529_v61  ;;  %v21469_v18 = vadd.f32 %v21327_v63, %v14528_v27 }
 0xb74   : > { %v21472_v5 = vadd.f32 %v21330_v28, %v14531_v2 }
 0xb76   : > { %v14532_v32 = vpop.f32.mrb[68].mxu0 }
 0xb77   : > { %v14533_v38 = vpop.f32.mrb[69].mxu0 }
 0xb78   : > { %v14534_v29 = vadd.f32 %v14533_v38, %v14532_v32  ;;  %v14535_v33 = vpop.f32.mrb[70].mxu0 }
 0xb79   : > { %v14536_v50 = vpop.f32.mrb[71].mxu0 }
 0xb7a   : > { %v14537_v0 = vadd.f32 %v14536_v50, %v14535_v33  ;;  %v21475_v57 = vadd.f32 %v21335_v9, %v14534_v29 }
 0xb7c   : > { %v21478_v7 = vadd.f32 %v21338_v47, %v14537_v0 }
 0xb7e   : > { %v14538_v12 = vpop.f32.mrb[72].mxu0 }
 0xb7f   : > { %v14539_v44 = vpop.f32.mrb[73].mxu0 }
 0xb80   : > { %v14540_v41 = vadd.f32 %v14539_v44, %v14538_v12  ;;  %v14541_v63 = vpop.f32.mrb[74].mxu0 }
 0xb81   : > { %v14542_v40 = vpop.f32.mrb[75].mxu0 }
 0xb82   : > { %v14543_v16 = vadd.f32 %v14542_v40, %v14541_v63  ;;  %v21481_v28 = vadd.f32 %v21347_v24, %v14540_v41 }
 0xb84   : > { %v21484_v19 = vadd.f32 %v21350_v31, %v14543_v16 }
 0xb86   : > { %v14544_v56 = vpop.f32.mrb[76].mxu0 }
 0xb87   : > { %v14545_v59 = vpop.f32.mrb[77].mxu0 }
 0xb88   : > { %v14546_v8 = vadd.f32 %v14545_v59, %v14544_v56  ;;  %v14547_v9 = vpop.f32.mrb[78].mxu0 }
 0xb89   : > { %v14548_v30 = vpop.f32.mrb[79].mxu0 }
 0xb8a   : > { %v14549_v26 = vadd.f32 %v14548_v30, %v14547_v9  ;;  %v21487_v47 = vadd.f32 %v21359_v60, %v14546_v8 }
 0xb8c   : > { %v21490_v48 = vadd.f32 %v21362_v17, %v14549_v26 }
 0xb8e   : > { %v14550_v53 = vpop.f32.mrb[80].mxu0 }
 0xb8f   : > { %v14551_v13 = vpop.f32.mrb[81].mxu0 }
 0xb90   : > { %v14552_v36 = vadd.f32 %v14551_v13, %v14550_v53  ;;  %v14553_v24 = vpop.f32.mrb[82].mxu0 }
 0xb91   : > { %v14554_v21 = vpop.f32.mrb[83].mxu0 }
 0xb92   : > { %v14555_v43 = vadd.f32 %v14554_v21, %v14553_v24  ;;  %v21493_v31 = vadd.f32 %v21371_v55, %v14552_v36 }
 0xb94   : > { %v21496_v34 = vadd.f32 %v22563_v6, %v14555_v43 }
 0xb96   : > { %v14556_v27 = vpop.f32.mrb[84].mxu0 }
 0xb97   : > { %v14557_v61 = vpop.f32.mrb[85].mxu0 }
 0xb98   : > { %v14558_v11 = vadd.f32 %v14557_v61, %v14556_v27  ;;  %v14559_v60 = vpop.f32.mrb[86].mxu0 }
 0xb99   : > { %v14560_v2 = vpop.f32.mrb[87].mxu0 }
 0xb9a   : > { %v14561_v32 = vadd.f32 %v14560_v2, %v14559_v60  ;;  %v21499_v17 = vadd.f32 %v21377_v39, %v14558_v11 }
 0xb9c   : > { %v21502_v38 = vadd.f32 %v21380_v49, %v14561_v32 }
 0xb9e   : > { %v14562_v29 = vpop.f32.mrb[88].mxu0 }
 0xb9f   : > { %v14563_v33 = vpop.f32.mrb[89].mxu0 }
 0xba0   : > { %v14564_v50 = vadd.f32 %v14563_v33, %v14562_v29  ;;  %v14565_v55 = vpop.f32.mrb[90].mxu0 }
 0xba1   : > { %v14566_v0 = vpop.f32.mrb[91].mxu0 }
 0xba2   : > { %v14567_v12 = vadd.f32 %v14566_v0, %v14565_v55  ;;  %v21505_v44 = vadd.f32 %v21383_v51, %v14564_v50 }
 0xba4   : > { %v21508_v41 = vadd.f32 %v21386_v62, %v14567_v12 }
 0xba6   : > { %v14568_v63 = vpop.f32.mrb[92].mxu0 }
 0xba7   : > { %v14569_v40 = vpop.f32.mrb[93].mxu0 }
 0xba8   : > { %v14570_v16 = vadd.f32 %v14569_v40, %v14568_v63  ;;  %v14571_v39 = vpop.f32.mrb[94].mxu0 }
 0xba9   : > { %v14572_v56 = vpop.f32.mrb[95].mxu0 }
 0xbaa   : > { %v14573_v59 = vadd.f32 %v14572_v56, %v14571_v39  ;;  %v21511_v49 = vadd.f32 %v21389_v22, %v14570_v16 }
 0xbac   : > { %v21514_v8 = vadd.f32 %v21392_v46, %v14573_v59 }
 0xbae   : > { %v14574_v9 = vpop.f32.mrb[96].mxu0 }
 0xbaf   : > { %v14575_v30 = vpop.f32.mrb[97].mxu0 }
 0xbb0   : > { %v14576_v26 = vadd.f32 %v14575_v30, %v14574_v9  ;;  %v14577_v51 = vpop.f32.mrb[98].mxu0 }
 0xbb1   : > { %v14578_v53 = vpop.f32.mrb[99].mxu0 }
 0xbb2   : > { %v14579_v13 = vadd.f32 %v14578_v53, %v14577_v51  ;;  %v21517_v62 = vadd.f32 %v21395_v42, %v14576_v26 }
 0xbb4   : > { %v21520_v36 = vadd.f32 %v21398_v20, %v14579_v13 }
 0xbb6   : > { %v14580_v24 = vpop.f32.mrb[100].mxu0 }
 0xbb7   : > { %v14581_v21 = vpop.f32.mrb[101].mxu0 }
 0xbb8   : > { %v14582_v43 = vadd.f32 %v14581_v21, %v14580_v24  ;;  %v14583_v22 = vpop.f32.mrb[102].mxu0 }
 0xbb9   : > { %v14584_v6 = vpop.f32.mrb[103].mxu0 }
 0xbba   : > { %v14585_v27 = vadd.f32 %v14584_v6, %v14583_v22  ;;  %v21523_v46 = vadd.f32 %v21401_v1, %v14582_v43 }
 0xbbc   : > { %v21526_v61 = vadd.f32 %v21404_v54, %v14585_v27 }
 0xbbe   : > { %v14586_v11 = vpop.f32.mrb[104].mxu0 }
 0xbbf   : > { %v14587_v60 = vpop.f32.mrb[105].mxu0 }
 0xbc0   : > { %v14588_v2 = vadd.f32 %v14587_v60, %v14586_v11  ;;  %v14589_v42 = vpop.f32.mrb[106].mxu0 }
 0xbc1   : > { %v14590_v32 = vpop.f32.mrb[107].mxu0 }
 0xbc2   : > { %v14591_v29 = vadd.f32 %v14590_v32, %v14589_v42  ;;  %v21529_v20 = vadd.f32 %v21407_v25, %v14588_v2 }
 0xbc4   : > { %v21532_v33 = vadd.f32 %v21410_v37, %v14591_v29  ;;  %v21544_v37 = vld [vmem:[%s21624_s2 + $0x4] ss:$0 sm:$0xff] }
 0xbc6   : > { %v14592_v50 = vpop.f32.mrb[108].mxu0 }
 0xbc7   : > { %v14593_v55 = vpop.f32.mrb[109].mxu0 }
 0xbc8   : > { %v14594_v0 = vadd.f32 %v14593_v55, %v14592_v50  ;;  %v14595_v1 = vpop.f32.mrb[110].mxu0 }
 0xbc9   : > { %v14596_v12 = vpop.f32.mrb[111].mxu0 }
 0xbca   : > { %v14597_v63 = vadd.f32 %v14596_v12, %v14595_v1  ;;  %v21535_v54 = vadd.f32 %v21413_v58, %v14594_v0 }
 0xbcc   : > { %v21538_v40 = vadd.f32 %v21416_v10, %v14597_v63 }
 0xbce   : > { %v15312_v16 = vpop.f32.mrb[240].mxu0 }
 0xbcf   : > { %v15744_v39 = vadd.f32 %v21451_v52, %v15312_v16  ;;  %v11159_v25 = vpop.f32.mrb[241].mxu0 }
 0xbd0   : > { %v15747_v56 = vadd.f32 %v21445_v45, %v11159_v25  ;;  %v15313_v59 = vpop.f32.mrb[242].mxu0 }
 0xbd1   : > { %v15750_v9 = vadd.f32 %v21454_v4, %v15313_v59  ;;  %v11162_v30 = vpop.f32.mrb[243].mxu0 }
 0xbd2   : > { %v15753_v58 = vadd.f32 %v21448_v23, %v11162_v30  ;;  %v11326_v10 = vadd.f32 %v15747_v56, %v21544_v37  ;;  %v11328_v23 = vadd.f32 %v15744_v39, %v21544_v37 }
 0xbd3   : > { %v11329_v22 = vadd.f32 %v15750_v9, %v21544_v37 }
 0xbd4   : > { %11358 = vxpose.xlu0.b32.start [1/16] (narrow) %v11326_v10, 8  ;;  %v11327_v52 = vadd.f32 %v15753_v58, %v21544_v37 }
 0xbd6   : > { %v15316_v26 = vpop.f32.mrb[244].mxu0 }
 0xbd7   : > { %v15756_v51 = vadd.f32 %v21463_v3, %v15316_v26  ;;  %v11175_v53 = vpop.f32.mrb[245].mxu0 }
 0xbd8   : > { %v15759_v13 = vadd.f32 %v21457_v35, %v11175_v53  ;;  %v15317_v24 = vpop.f32.mrb[246].mxu0  ;;  %11359 = vxpose.xlu0.b32.cont [2/16] (narrow) %v11327_v52, 8 }
 0xbd9   : > { %v15762_v45 = vadd.f32 %v21466_v14, %v15317_v24  ;;  %v11178_v21 = vpop.f32.mrb[247].mxu0  ;;  %v11332_v55 = vadd.f32 %v15756_v51, %v21544_v37 }
 0xbda   : > { %v15765_v4 = vadd.f32 %v21460_v15, %v11178_v21  ;;  %v11330_v15 = vadd.f32 %v15759_v13, %v21544_v37 }
 0xbdb   : > { %v11333_v1 = vadd.f32 %v15762_v45, %v21544_v37 }
 0xbdc   : > { %11360 = vxpose.xlu0.b32.cont [3/16] (narrow) %v11328_v23, 8  ;;  %v11331_v42 = vadd.f32 %v15765_v4, %v21544_v37 }
 0xbde   : > { %v15320_v43 = vpop.f32.mrb[248].mxu0 }
 0xbdf   : > { %v15768_v6 = vadd.f32 %v21475_v57, %v15320_v43  ;;  %v11191_v27 = vpop.f32.mrb[249].mxu0 }
 0xbe0   : > { %v15771_v3 = vadd.f32 %v21469_v18, %v11191_v27  ;;  %v15321_v11 = vpop.f32.mrb[250].mxu0  ;;  %11361 = vxpose.xlu0.b32.cont [4/16] (narrow) %v11329_v22, 8 }
 0xbe1   : > { %v15774_v35 = vadd.f32 %v21478_v7, %v15321_v11  ;;  %v11194_v60 = vpop.f32.mrb[251].mxu0  ;;  %v11336_v52 = vadd.f32 %v15768_v6, %v21544_v37 }
 0xbe2   : > { %v15777_v14 = vadd.f32 %v21472_v5, %v11194_v60  ;;  %v11334_v25 = vadd.f32 %v15771_v3, %v21544_v37 }
 0xbe3   : > { %v11337_v53 = vadd.f32 %v15774_v35, %v21544_v37 }
 0xbe4   : > { %11362 = vxpose.xlu0.b32.cont [5/16] (narrow) %v11330_v15, 8 }
 0xbe6   : > { %v15324_v2 = vpop.f32.mrb[252].mxu0 }
 0xbe7   : > { %v21564_v32 = vadd.f32 %v21487_v47, %v15324_v2  ;;  %v11207_v57 = vpop.f32.mrb[253].mxu0 }
 0xbe8   : > { %v15783_v29 = vadd.f32 %v21481_v28, %v11207_v57  ;;  %v15325_v18 = vpop.f32.mrb[254].mxu0  ;;  %11363 = vxpose.xlu0.b32.cont [6/16] (narrow) %v11331_v42, 8 }
 0xbe9   : > { %v21568_v50 = vadd.f32 %v21490_v48, %v15325_v18  ;;  %v11210_v7 = vpop.f32.mrb[255].mxu0  ;;  %v11340_v57 = vadd.f32 %v21564_v32, %v21544_v37 }
 0xbea   : > { %v15789_v5 = vadd.f32 %v21484_v19, %v11210_v7  ;;  %v11338_v43 = vadd.f32 %v15783_v29, %v21544_v37 }
 0xbeb   : > { %v11341_v18 = vadd.f32 %v21568_v50, %v21544_v37 }
 0xbec   : > { %11364 = vxpose.xlu0.b32.cont [7/16] (narrow) %v11332_v55, 8  ;;  %v11339_v27 = vadd.f32 %v15789_v5, %v21544_v37 }
 0xbee   : > { %v15328_v0 = vpop.f32.mrb[0].mxu0 }
 0xbef   : > { %v15792_v47 = vadd.f32 %v21499_v17, %v15328_v0  ;;  %v11223_v12 = vpop.f32.mrb[1].mxu0  ;;  %v11335_v17 = vadd.f32 %v15777_v14, %v21544_v37 }
 0xbf0   : > { %v15795_v63 = vadd.f32 %v21493_v31, %v11223_v12  ;;  %v15329_v28 = vpop.f32.mrb[2].mxu0  ;;  %11365 = vxpose.xlu0.b32.cont [8/16] (narrow) %v11333_v1, 8 }
 0xbf1   : > { %v15798_v16 = vadd.f32 %v21502_v38, %v15329_v28  ;;  %v11226_v48 = vpop.f32.mrb[3].mxu0  ;;  %v11344_v26 = vadd.f32 %v15792_v47, %v21544_v37 }
 0xbf2   : > { %v15801_v39 = vadd.f32 %v21496_v34, %v11226_v48  ;;  %v11342_v19 = vadd.f32 %v15795_v63, %v21544_v37 }
 0xbf4   : > { %11390 = vxpose.xlu1.b32.start [1/16] (narrow) %v11342_v19, 8  ;;  %11366 = vxpose.xlu0.b32.cont [9/16] (narrow) %v11334_v25, 8  ;;  %v11343_v59 = vadd.f32 %v15801_v39, %v21544_v37 }
 0xbf6   : > { %v15332_v56 = vpop.f32.mrb[4].mxu0 }
 0xbf7   : > { %v15804_v31 = vadd.f32 %v21511_v49, %v15332_v56  ;;  %v11239_v9 = vpop.f32.mrb[5].mxu0  ;;  %v11345_v49 = vadd.f32 %v15798_v16, %v21544_v37 }
 0xbf8   : > { %v15807_v30 = vadd.f32 %v21505_v44, %v11239_v9  ;;  %v15333_v38 = vpop.f32.mrb[6].mxu0  ;;  %11391 = vxpose.xlu1.b32.cont [2/16] (narrow) %v11343_v59, 8  ;;  %11367 = vxpose.xlu0.b32.cont [10/16] (narrow) %v11335_v17, 8 }
 0xbf9   : > { %v15810_v34 = vadd.f32 %v21514_v8, %v15333_v38  ;;  %v11242_v58 = vpop.f32.mrb[7].mxu0  ;;  %v11348_v42 = vadd.f32 %v15804_v31, %v21544_v37 }
 0xbfa   : > { %v15813_v10 = vadd.f32 %v21508_v41, %v11242_v58  ;;  %v11346_v23 = vadd.f32 %v15807_v30, %v21544_v37 }
 0xbfc   : > { %11392 = vxpose.xlu1.b32.cont [3/16] (narrow) %v11344_v26, 8  ;;  %11368 = vxpose.xlu0.b32.cont [11/16] (narrow) %v11336_v52, 8 }
 0xbfe   : > { %v15336_v51 = vpop.f32.mrb[8].mxu0 }
 0xbff   : > { %v15816_v44 = vadd.f32 %v21523_v46, %v15336_v51  ;;  %v11255_v13 = vpop.f32.mrb[9].mxu0 }
 0xc00   : > { %v15819_v24 = vadd.f32 %v21517_v62, %v11255_v13  ;;  %v15337_v8 = vpop.f32.mrb[10].mxu0  ;;  %11393 = vxpose.xlu1.b32.cont [4/16] (narrow) %v11345_v49, 8  ;;  %11369 = vxpose.xlu0.b32.cont [12/16] (narrow) %v11337_v53, 8 }
 0xc01   : > { %v15822_v41 = vadd.f32 %v21526_v61, %v15337_v8  ;;  %v11258_v45 = vpop.f32.mrb[11].mxu0  ;;  %v11352_v21 = vadd.f32 %v15816_v44, %v21544_v37  ;;  %v11347_v61 = vadd.f32 %v15813_v10, %v21544_v37 }
 0xc02   : > { %v15825_v4 = vadd.f32 %v21520_v36, %v11258_v45  ;;  %v11350_v22 = vadd.f32 %v15819_v24, %v21544_v37 }
 0xc03   : > { %v11353_v46 = vadd.f32 %v15822_v41, %v21544_v37 }
 0xc04   : > { %11394 = vxpose.xlu1.b32.cont [5/16] (narrow) %v11346_v23, 8  ;;  %11370 = vxpose.xlu0.b32.cont [13/16] (narrow) %v11338_v43, 8  ;;  %v11351_v62 = vadd.f32 %v15825_v4, %v21544_v37 }
 0xc06   : > { %v15340_v6 = vpop.f32.mrb[12].mxu0 }
 0xc07   : > { %v15828_v3 = vadd.f32 %v21535_v54, %v15340_v6  ;;  %v11271_v36 = vpop.f32.mrb[13].mxu0 }
 0xc08   : > { %v15831_v11 = vadd.f32 %v21529_v20, %v11271_v36  ;;  %v15341_v35 = vpop.f32.mrb[14].mxu0  ;;  %11395 = vxpose.xlu1.b32.cont [6/16] (narrow) %v11347_v61, 8  ;;  %11371 = vxpose.xlu0.b32.cont [14/16] (narrow) %v11339_v27, 8 }
 0xc09   : > { %v15834_v60 = vadd.f32 %v21538_v40, %v15341_v35  ;;  %v11274_v14 = vpop.f32.mrb[15].mxu0  ;;  %v11356_v15 = vadd.f32 %v15828_v3, %v21544_v37  ;;  %v11349_v40 = vadd.f32 %v15810_v34, %v21544_v37 }
 0xc0a   : > { %v15837_v2 = vadd.f32 %v21532_v33, %v11274_v14  ;;  %v11354_v54 = vadd.f32 %v15831_v11, %v21544_v37 }
 0xc0b   : > { %v11357_v29 = vadd.f32 %v15834_v60, %v21544_v37 }
 0xc0c   : > { %11396 = vxpose.xlu1.b32.cont [7/16] (narrow) %v11348_v42, 8  ;;  %11372 = vxpose.xlu0.b32.cont [15/16] (narrow) %v11340_v57, 8  ;;  %v11355_v20 = vadd.f32 %v15837_v2, %v21544_v37 }
 0xc10   : > { %11397 = vxpose.xlu1.b32.cont [8/16] (narrow) %v11349_v40, 8  ;;  %11373 = vxpose.xlu0.b32.end [16/16] (narrow) %v11341_v18, 8 }
 0xc14   : > { %11398 = vxpose.xlu1.b32.cont [9/16] (narrow) %v11350_v22, 8 }
 0xc18   : > { %11399 = vxpose.xlu1.b32.cont [10/16] (narrow) %v11351_v62, 8 }
 0xc1c   : > { %11400 = vxpose.xlu1.b32.cont [11/16] (narrow) %v11352_v21, 8 }
 0xc20   : > { %11401 = vxpose.xlu1.b32.cont [12/16] (narrow) %v11353_v46, 8 }
 0xc24   : > { %11402 = vxpose.xlu1.b32.cont [13/16] (narrow) %v11354_v54, 8 }
 0xc28   : > { %11403 = vxpose.xlu1.b32.cont [14/16] (narrow) %v11355_v20, 8 }
 0xc2c   : > { %11404 = vxpose.xlu1.b32.cont [15/16] (narrow) %v11356_v15, 8 }
 0xc30   : > { %11405 = vxpose.xlu1.b32.end [16/16] (narrow) %v11357_v29, 8 }
 0xc54   : > { %v11374_v33 = vpop.trf.xlu0 }
 0xc55   : > { %v12576_v32 = vmul.f32 -1.442695, %v11374_v33 }
 0xc57   : > { %16528 = vpow2.f32 %v12576_v32 }
 0xc61   : > { %v16529_v55 = vpop.eup %16528 }
 0xc62   : > { %v11428_v0 = vadd.f32 1.0, %v16529_v55 }
 0xc74   : > { %v11406_v7 = vpop.trf.xlu1 }
 0xc75   : > { %v12577_v5 = vmul.f32 -1.442695, %v11406_v7 }
 0xc77   : > { %16530 = vpow2.f32 %v12577_v5 }
 0xc78   : > { %16532 = vrcp.f32 %v11428_v0 }
 0xc81   : > { %v16531_v37 = vpop.eup %16530 }
 0xc82   : > { %v11429_v50 = vadd.f32 1.0, %v16531_v37  ;;  %v16533_v1 = vpop.eup %16532 }
 0xc84   : > { %16534 = vrcp.f32 %v11429_v50 }
 0xc8e   : > { %v16535_v47 = vpop.eup %16534 }
 0xc8f   : > { %v11436_v12 = vcombine.low %v16533_v1, %v16535_v47 }
 0xc91   : > { %11438 = vst [vmem:[%s170_s27] sm:$0x77] %v11436_v12 }
 0xc92 PF: > { %s13_s12 = sadd.s32 1, %s16588_s12  }
 0xc93   : > { %p10_p4 = scmp.ge.s32.totalorder %s13_s12, 4  }
 0xc95   :  { %12 = sbr.rel (!%p10_p4) target bundleno = 1 (0x1), region = 80 }

</bundles_post_ra>
